<compile_context>
chip_gen: v5e
topology: v5e:2x2
jax: 0.10.0
libtpu: 0.0.40
codegen_flags: <defaults>
</compile_context>

<pallas_src>
import functools

import jax
import jax.numpy as jnp
from jax.experimental import pallas as pl
from jax.experimental.pallas import tpu as pltpu


# ----------------------------- Pallas kernels -----------------------------

def _conv_kernel(*refs, relu, has_res, has_ds, center):
    """Tap-accumulation conv GEMM.

    grid = (m_tiles, n_tiles, taps); the tap axis is the reduction ("arbitrary").
    Per tap: acc += x_tap @ w_tap (bf16 operands, f32 MXU accumulation).
    Epilogue (folded-BN bias, optional residual add, optional ReLU) on the last tap.
    If has_ds, the ResNet downsample 1x1 conv is fused: it is exactly the centre
    tap of the 3x3 pad-1 im2col, so on t == center a second dot with wd is taken
    and written to the second output (bias only, no ReLU).
    """
    if has_ds:
        x_ref, w_ref, wd_ref, b_ref, bd_ref, o_ref, od_ref, acc_ref = refs
    elif has_res:
        x_ref, w_ref, b_ref, r_ref, o_ref, acc_ref = refs
    else:
        x_ref, w_ref, b_ref, o_ref, acc_ref = refs

    t = pl.program_id(2)

    @pl.when(t == 0)
    def _():
        acc_ref[...] = jnp.zeros_like(acc_ref)

    acc_ref[...] += jnp.dot(x_ref[...], w_ref[...],
                            preferred_element_type=jnp.float32)

    if has_ds:
        @pl.when(t == center)
        def _():
            d = jnp.dot(x_ref[...], wd_ref[...],
                        preferred_element_type=jnp.float32)
            od_ref[...] = (d + bd_ref[...]).astype(od_ref.dtype)

    @pl.when(t == pl.num_programs(2) - 1)
    def _():
        r = acc_ref[...] + b_ref[...]
        if has_res:
            r = r + r_ref[...].astype(jnp.float32)
        if relu:
            r = jnp.maximum(r, 0.0)
        o_ref[...] = r.astype(o_ref.dtype)


def _pool_fc_kernel(x_ref, w_ref, b_ref, o_ref, *, inv_s):
    # AdaptiveAvgPool2d(1) over the spatial axis + (B,512)@(512,64) FC, fused.
    feat = jnp.sum(x_ref[...].astype(jnp.float32), axis=1) * inv_s       # (B, C)
    acc = jnp.dot(feat.astype(jnp.bfloat16), w_ref[...],
                  preferred_element_type=jnp.float32)
    o_ref[...] = acc + b_ref[...]


# --------------------------- pallas_call wrappers ---------------------------

def _pick_tile_m(m):
    for cand in (256, 128, 64, 32, 16, 8):
        if m % cand == 0:
            return cand
    return m


def tap_conv(x_taps, w_taps, b, *, residual=None, w_ds=None, b_ds=None,
             relu=False, center=0, out_dtype=jnp.bfloat16):
    """(T,M,K) taps x (T,K,N) per-tap weights -> (M,N), accumulated over T.

    grid = (M//tile_m, N//tile_n, T) with ("parallel","parallel","arbitrary").
    Weight chunks stream per tap (double-buffered DMA); epilogue fused.
    """
    T, M, K = x_taps.shape
    N = w_taps.shape[2]
    has_ds = w_ds is not None
    has_res = residual is not None
    assert not (has_ds and has_res)

    tile_m = _pick_tile_m(M)
    tile_n = N if N <= 128 else N // 2   # >=2 N-tiles on wide layers -> v7x megacore
    grid = (M // tile_m, N // tile_n, T)

    in_specs = [
        pl.BlockSpec((None, tile_m, K), lambda m, n, t: (t, m, 0)),    # LHS tap
        pl.BlockSpec((None, K, tile_n), lambda m, n, t: (t, 0, n)),    # weight tap (streamed)
    ]
    args = [x_taps.astype(jnp.bfloat16), w_taps.astype(jnp.bfloat16)]
    if has_ds:
        in_specs.append(pl.BlockSpec((K, tile_n), lambda m, n, t: (0, n)))
        args.append(w_ds.astype(jnp.bfloat16))
    in_specs.append(pl.BlockSpec((1, tile_n), lambda m, n, t: (0, n)))
    args.append(b.reshape(1, N).astype(jnp.float32))
    if has_ds:
        in_specs.append(pl.BlockSpec((1, tile_n), lambda m, n, t: (0, n)))
        args.append(b_ds.reshape(1, N).astype(jnp.float32))
    if has_res:
        in_specs.append(pl.BlockSpec((tile_m, tile_n), lambda m, n, t: (m, n)))
        args.append(residual.astype(jnp.bfloat16))

    out_spec = pl.BlockSpec((tile_m, tile_n), lambda m, n, t: (m, n))
    if has_ds:
        out_shape = (jax.ShapeDtypeStruct((M, N), out_dtype),
                     jax.ShapeDtypeStruct((M, N), out_dtype))
        out_specs = (out_spec, out_spec)
    else:
        out_shape = jax.ShapeDtypeStruct((M, N), out_dtype)
        out_specs = out_spec

    kernel = functools.partial(_conv_kernel, relu=relu, has_res=has_res,
                               has_ds=has_ds, center=center)
    return pl.pallas_call(
        kernel,
        grid=grid,
        in_specs=in_specs,
        out_specs=out_specs,
        out_shape=out_shape,
        scratch_shapes=[pltpu.VMEM((tile_m, tile_n), jnp.float32)],
        compiler_params=pltpu.CompilerParams(
            dimension_semantics=("parallel", "parallel", "arbitrary")),
    )(*args)


def pool_fc(x_feat, w, b):
    """Fused avgpool + 4x Linear(512,11) heads (lane-padded to 64 outputs)."""
    B, S, C = x_feat.shape
    N = w.shape[1]
    vmem = pl.BlockSpec(memory_space=pltpu.MemorySpace.VMEM)
    return pl.pallas_call(
        functools.partial(_pool_fc_kernel, inv_s=1.0 / S),
        out_shape=jax.ShapeDtypeStruct((B, N), jnp.float32),
        in_specs=[vmem, vmem, vmem],
        out_specs=vmem,
    )(x_feat.astype(jnp.bfloat16), w.astype(jnp.bfloat16),
      b.reshape(1, N).astype(jnp.float32))


# ------------------------------ JAX glue ops -------------------------------

def conv3x3_bn(x, w, b, *, stride, relu, residual=None, w_ds=None, b_ds=None):
    """3x3 pad-1 conv (NHWC) + folded eval-BN via the 9-tap accumulation kernel.
    Optionally fuses the block's 1x1 stride-s downsample conv (centre tap) or the
    residual-add + ReLU epilogue."""
    B, H, W, Cin = x.shape
    Cout = w.shape[0]
    pad = 1
    Ho = (H + 2 * pad - 3) // stride + 1
    Wo = (W + 2 * pad - 3) // stride + 1
    xp = jnp.pad(x, ((0, 0), (pad, pad), (pad, pad), (0, 0)))
    views = [xp[:, i:i + stride * Ho:stride, j:j + stride * Wo:stride, :]
             for i in range(3) for j in range(3)]
    x_taps = jnp.stack(views, axis=0).reshape(9, B * Ho * Wo, Cin)
    w_taps = w.transpose(2, 3, 1, 0).reshape(9, Cin, Cout)   # (tap, cin, cout)
    if w_ds is not None:
        wd = w_ds.transpose(2, 3, 1, 0).reshape(Cin, Cout)
        y, idn = tap_conv(x_taps, w_taps, b, w_ds=wd, b_ds=b_ds,
                          relu=relu, center=4)
        return y.reshape(B, Ho, Wo, Cout), idn               # idn flat (M, Cout)
    y = tap_conv(x_taps, w_taps, b, residual=residual, relu=relu)
    return y.reshape(B, Ho, Wo, Cout)


def conv7x7_bn_stem(x, w, b, *, stride=2, pad=3, relu=True, k_pad_to=256):
    """ResNet stem conv1: Cin=3 is lane-sparse, so flatten all 49 taps into one
    K=147 GEMM and zero-pad K to 256 for aligned lanes/sublanes."""
    B, H, W, Cin = x.shape
    Cout, _, kh, kw = w.shape
    xp = jnp.pad(x, ((0, 0), (pad, pad), (pad, pad), (0, 0)))
    Ho = (H + 2 * pad - kh) // stride + 1
    Wo = (W + 2 * pad - kw) // stride + 1
    views = [xp[:, i:i + stride * Ho:stride, j:j + stride * Wo:stride, :]
             for i in range(kh) for j in range(kw)]
    cols = jnp.stack(views, axis=3).reshape(B * Ho * Wo, kh * kw * Cin)
    wmat = w.transpose(2, 3, 1, 0).reshape(kh * kw * Cin, Cout)
    K = kh * kw * Cin
    if k_pad_to and k_pad_to > K:
        cols = jnp.pad(cols, ((0, 0), (0, k_pad_to - K)))
        wmat = jnp.pad(wmat, ((0, k_pad_to - K), (0, 0)))
    y = tap_conv(cols[None], wmat[None], b, relu=relu)       # single tap
    return y.reshape(B, Ho, Wo, Cout)


def maxpool2d_3x3_s2_p1(x):
    """Stem maxpool in plain XLA: the 9-tap max fuses with the strided views;
    a dedicated pallas_call (+ HBM stack round-trip) would only add overhead."""
    B, H, W, C = x.shape
    k, stride, pad = 3, 2, 1
    neg = float(jnp.finfo(x.dtype).min)
    xp = jnp.pad(x, ((0, 0), (pad, pad), (pad, pad), (0, 0)), constant_values=neg)
    Ho = (H + 2 * pad - k) // stride + 1
    Wo = (W + 2 * pad - k) // stride + 1
    views = [xp[:, i:i + stride * Ho:stride, j:j + stride * Wo:stride, :]
             for i in range(k) for j in range(k)]
    return functools.reduce(jnp.maximum, views)


def basic_block(x, p):
    B, H, W, C = x.shape
    if "wd" in p:
        # conv1 + fused downsample (identity branch) in one kernel.
        out, idn = conv3x3_bn(x, p["w1"], p["b1"], stride=p["stride"], relu=True,
                              w_ds=p["wd"], b_ds=p["bd"])
    else:
        out = conv3x3_bn(x, p["w1"], p["b1"], stride=p["stride"], relu=True)
        idn = x.reshape(B * H * W, C)
    # conv2 with residual add + final ReLU fused into the GEMM epilogue.
    return conv3x3_bn(out, p["w2"], p["b2"], stride=1, relu=True, residual=idn)


def svhn_model1_forward(img, params):
    # --- self.cnn = resnet18 minus final fc (conv1/bn1/relu/maxpool/layer1..4/avgpool)
    x = img.transpose(0, 2, 3, 1).astype(jnp.bfloat16)       # NCHW -> NHWC once
    x = conv7x7_bn_stem(x, params["conv1_w"], params["conv1_b"])
    x = maxpool2d_3x3_s2_p1(x)
    for layer in params["layers"]:
        for blk in layer:
            x = basic_block(x, blk)
    B, H, W, C = x.shape
    # dp1: Dropout(0.5) in eval mode is identity.  avgpool + 4 FC heads fused.
    logits = pool_fc(x.reshape(B, H * W, C), params["fc_w"], params["fc_b"])  # (B,64)
    logits = logits[:, :44]                                   # drop the zero padding
    c1, c2, c3, c4 = jnp.split(logits, 4, axis=1)
    return c1, c2, c3, c4


# ---------------------------- deterministic init ----------------------------

def init_params(key):
    keys = iter(jax.random.split(key, 64))

    def conv_w(cout, cin, k):
        std = (2.0 / (cin * k * k)) ** 0.5             # kaiming-normal-ish
        return jax.random.normal(next(keys), (cout, cin, k, k), jnp.float32) * std

    def fold_bn(w, eps=1e-5):
        # eval-mode BN with default init: gamma=1, beta=0, mean=0, var=1
        cout = w.shape[0]
        gamma = jnp.ones((cout,), jnp.float32)
        beta = jnp.zeros((cout,), jnp.float32)
        mean = jnp.zeros((cout,), jnp.float32)
        var = jnp.ones((cout,), jnp.float32)
        scale = gamma / jnp.sqrt(var + eps)
        return w * scale[:, None, None, None], beta - mean * scale

    params = {}
    params["conv1_w"], params["conv1_b"] = fold_bn(conv_w(64, 3, 7))

    cfg = [(64, 64, 1), (64, 128, 2), (128, 256, 2), (256, 512, 2)]
    layers = []
    for cin, cout, stride in cfg:
        blocks = []
        for bidx in range(2):
            s = stride if bidx == 0 else 1
            ci = cin if bidx == 0 else cout
            blk = {"stride": s}
            blk["w1"], blk["b1"] = fold_bn(conv_w(cout, ci, 3))
            blk["w2"], blk["b2"] = fold_bn(conv_w(cout, cout, 3))
            if s != 1 or ci != cout:
                blk["wd"], blk["bd"] = fold_bn(conv_w(cout, ci, 1))
            blocks.append(blk)
        layers.append(blocks)
    params["layers"] = layers

    # fc1_0..fc4_0: Linear(512, 11), PyTorch default uniform(-1/sqrt(512), 1/sqrt(512)).
    # (fc5_0 and fc*_1 are defined in __init__ but unused in forward.)
    bound = 1.0 / (512.0 ** 0.5)
    ws, bs = [], []
    for _ in range(4):
        w = jax.random.uniform(next(keys), (11, 512), jnp.float32, -bound, bound)
        bb = jax.random.uniform(next(keys), (11,), jnp.float32, -bound, bound)
        ws.append(w.T)
        bs.append(bb)
    fc_w = jnp.concatenate(ws, axis=1)                 # (512, 44)
    fc_b = jnp.concatenate(bs, axis=0)                 # (44,)
    params["fc_w"] = jnp.pad(fc_w, ((0, 0), (0, 20)))  # lane-pad 44 -> 64
    params["fc_b"] = jnp.pad(fc_b, (0, 20))
    return params


# ---------------------------------- main ------------------------------------

if __name__ == "__main__":
    key = jax.random.PRNGKey(0)
    pkey, xkey = jax.random.split(key)
    params = init_params(pkey)

    # NCHW input like PyTorch; 32x32 RGB (SVHN-sized).
    img = jax.random.normal(xkey, (2, 3, 32, 32), jnp.float32)

    fwd = jax.jit(lambda im: svhn_model1_forward(im, params))
    c1, c2, c3, c4 = fwd(img)
    jax.block_until_ready((c1, c2, c3, c4))

    assert c1.shape == (2, 11) and c2.shape == (2, 11)
    assert c3.shape == (2, 11) and c4.shape == (2, 11)
    print("KERNEL_OK")
</pallas_src>

<mosaic_0001>
module attributes {stable_mosaic.version = 11 : i64} {
  func.func @_conv_kernel(%arg0: i32, %arg1: i32, %arg2: i32, %arg3: memref<1x256x256xbf16, #tpu.memory_space<vmem>>, %arg4: memref<1x256x64xbf16, #tpu.memory_space<vmem>>, %arg5: memref<1x64xf32, #tpu.memory_space<vmem>>, %arg6: memref<256x64xbf16, #tpu.memory_space<vmem>>, %arg7: memref<256x64xf32, #tpu.memory_space<vmem>>) attributes {dimension_semantics = [#tpu.dimension_semantics<parallel>, #tpu.dimension_semantics<parallel>, #tpu.dimension_semantics<arbitrary>], iteration_bounds = array<i64: 2, 1, 1>, scalar_prefetch = 0 : i64, scratch_operands = 1 : i64, tpu.core_type = #tpu.core_type<tc>, window_params = [{transform_indices = @transform_0, window_bounds = array<i64: 1, 256, 256>}, {transform_indices = @transform_1, window_bounds = array<i64: 1, 256, 64>}, {transform_indices = @transform_2, window_bounds = array<i64: 1, 64>}, {transform_indices = @transform_3, window_bounds = array<i64: 256, 64>}]} {
    %c0_i32 = arith.constant 0 : i32
    %0 = arith.cmpi eq, %arg2, %c0_i32 : i32
    %1 = arith.extui %0 : i1 to i32
    %c0_i32_0 = arith.constant 0 : i32
    %2 = arith.cmpi ne, %1, %c0_i32_0 : i32
    scf.if %2 {
      %cst_12 = arith.constant 0.000000e+00 : f32
      %14 = vector.broadcast %cst_12 : f32 to vector<256x64xf32>
      %c0_13 = arith.constant 0 : index
      %c0_14 = arith.constant 0 : index
      %15 = vector.load %arg7[%c0_13, %c0_14] : memref<256x64xf32, #tpu.memory_space<vmem>>, vector<256x64xf32>
      tpu.vector_store %arg7[%c0_13, %c0_14], %14 {strides = array<i32>} : memref<256x64xf32, #tpu.memory_space<vmem>>, vector<256x64xf32>,
    } else {
    }
    %c0 = arith.constant 0 : index
    %c0_1 = arith.constant 0 : index
    %3 = vector.load %arg7[%c0, %c0_1] : memref<256x64xf32, #tpu.memory_space<vmem>>, vector<256x64xf32>
    %c0_2 = arith.constant 0 : index
    %c0_3 = arith.constant 0 : index
    %c0_4 = arith.constant 0 : index
    %4 = vector.load %arg3[%c0_2, %c0_3, %c0_4] : memref<1x256x256xbf16, #tpu.memory_space<vmem>>, vector<1x256x256xbf16>
    %5 = vector.shape_cast %4 : vector<1x256x256xbf16> to vector<256x256xbf16>
    %c0_5 = arith.constant 0 : index
    %c0_6 = arith.constant 0 : index
    %c0_7 = arith.constant 0 : index
    %6 = vector.load %arg4[%c0_5, %c0_6, %c0_7] : memref<1x256x64xbf16, #tpu.memory_space<vmem>>, vector<1x256x64xbf16>
    %7 = vector.shape_cast %6 : vector<1x256x64xbf16> to vector<256x64xbf16>
    %cst = arith.constant dense<0.000000e+00> : vector<256x64xf32>
    %8 = tpu.matmul %5, %7, %cst {dimension_numbers = #tpu.dot_dimension_numbers<[1], [0], [0], [1], [0, 0, 1, 1], [], []>} : vector<256x256xbf16>, vector<256x64xbf16>, vector<256x64xf32> -> vector<256x64xf32>
    %9 = arith.addf %3, %8 : vector<256x64xf32>
    %c0_8 = arith.constant 0 : index
    %c0_9 = arith.constant 0 : index
    %10 = vector.load %arg7[%c0_8, %c0_9] : memref<256x64xf32, #tpu.memory_space<vmem>>, vector<256x64xf32>
    tpu.vector_store %arg7[%c0_8, %c0_9], %9 {strides = array<i32>} : memref<256x64xf32, #tpu.memory_space<vmem>>, vector<256x64xf32>,
    %c0_i32_10 = arith.constant 0 : i32
    %11 = arith.cmpi eq, %arg2, %c0_i32_10 : i32
    %12 = arith.extui %11 : i1 to i32
    %c0_i32_11 = arith.constant 0 : i32
    %13 = arith.cmpi ne, %12, %c0_i32_11 : i32
    scf.if %13 {
      %c0_12 = arith.constant 0 : index
      %c0_13 = arith.constant 0 : index
      %14 = vector.load %arg7[%c0_12, %c0_13] : memref<256x64xf32, #tpu.memory_space<vmem>>, vector<256x64xf32>
      %c0_14 = arith.constant 0 : index
      %c0_15 = arith.constant 0 : index
      %15 = vector.load %arg5[%c0_14, %c0_15] : memref<1x64xf32, #tpu.memory_space<vmem>>, vector<1x64xf32>
      %16 = vector.broadcast %15 : vector<1x64xf32> to vector<256x64xf32>
      %17 = arith.addf %14, %16 : vector<256x64xf32>
      %cst_16 = arith.constant 0.000000e+00 : f32
      %18 = vector.broadcast %cst_16 : f32 to vector<256x64xf32>
      %19 = arith.maximumf %17, %18 : vector<256x64xf32>
      %20 = arith.truncf %19 : vector<256x64xf32> to vector<256x64xbf16>
      %c0_17 = arith.constant 0 : index
      %c0_18 = arith.constant 0 : index
      %21 = vector.load %arg6[%c0_17, %c0_18] : memref<256x64xbf16, #tpu.memory_space<vmem>>, vector<256x64xbf16>
      tpu.vector_store %arg6[%c0_17, %c0_18], %20 {strides = array<i32>} : memref<256x64xbf16, #tpu.memory_space<vmem>>, vector<256x64xbf16>,
    } else {
    }
    return
  }
  func.func @transform_0(%arg0: i32, %arg1: i32, %arg2: i32) -> (i32, i32, i32) {
    %c0_i32 = arith.constant 0 : i32
    %c0_i32_0 = arith.constant 0 : i32
    return %arg2, %arg0, %c0_i32 : i32, i32, i32
  }
  func.func @transform_1(%arg0: i32, %arg1: i32, %arg2: i32) -> (i32, i32, i32) {
    %c0_i32 = arith.constant 0 : i32
    %c0_i32_0 = arith.constant 0 : i32
    return %arg2, %c0_i32, %arg1 : i32, i32, i32
  }
  func.func @transform_2(%arg0: i32, %arg1: i32, %arg2: i32) -> (i32, i32) {
    %c0_i32 = arith.constant 0 : i32
    %c0_i32_0 = arith.constant 0 : i32
    return %c0_i32, %arg1 : i32, i32
  }
  func.func @transform_3(%arg0: i32, %arg1: i32, %arg2: i32) -> (i32, i32) {
    %c0_i32 = arith.constant 0 : i32
    return %arg0, %arg1 : i32, i32
  }
}

module attributes {stable_mosaic.version = 11 : i64} {
  func.func @_conv_kernel(%arg0: i32, %arg1: i32, %arg2: i32, %arg3: memref<1x128x64xbf16, #tpu.memory_space<vmem>>, %arg4: memref<1x64x64xbf16, #tpu.memory_space<vmem>>, %arg5: memref<1x64xf32, #tpu.memory_space<vmem>>, %arg6: memref<128x64xbf16, #tpu.memory_space<vmem>>, %arg7: memref<128x64xf32, #tpu.memory_space<vmem>>) attributes {dimension_semantics = [#tpu.dimension_semantics<parallel>, #tpu.dimension_semantics<parallel>, #tpu.dimension_semantics<arbitrary>], iteration_bounds = array<i64: 1, 1, 9>, scalar_prefetch = 0 : i64, scratch_operands = 1 : i64, tpu.core_type = #tpu.core_type<tc>, window_params = [{transform_indices = @transform_0, window_bounds = array<i64: 1, 128, 64>}, {transform_indices = @transform_1, window_bounds = array<i64: 1, 64, 64>}, {transform_indices = @transform_2, window_bounds = array<i64: 1, 64>}, {transform_indices = @transform_3, window_bounds = array<i64: 128, 64>}]} {
    %c0_i32 = arith.constant 0 : i32
    %0 = arith.cmpi eq, %arg2, %c0_i32 : i32
    %1 = arith.extui %0 : i1 to i32
    %c0_i32_0 = arith.constant 0 : i32
    %2 = arith.cmpi ne, %1, %c0_i32_0 : i32
    scf.if %2 {
      %cst_11 = arith.constant 0.000000e+00 : f32
      %14 = vector.broadcast %cst_11 : f32 to vector<128x64xf32>
      %c0_12 = arith.constant 0 : index
      %c0_13 = arith.constant 0 : index
      %15 = vector.load %arg7[%c0_12, %c0_13] : memref<128x64xf32, #tpu.memory_space<vmem>>, vector<128x64xf32>
      tpu.vector_store %arg7[%c0_12, %c0_13], %14 {strides = array<i32>} : memref<128x64xf32, #tpu.memory_space<vmem>>, vector<128x64xf32>,
    } else {
    }
    %c0 = arith.constant 0 : index
    %c0_1 = arith.constant 0 : index
    %3 = vector.load %arg7[%c0, %c0_1] : memref<128x64xf32, #tpu.memory_space<vmem>>, vector<128x64xf32>
    %c0_2 = arith.constant 0 : index
    %c0_3 = arith.constant 0 : index
    %c0_4 = arith.constant 0 : index
    %4 = vector.load %arg3[%c0_2, %c0_3, %c0_4] : memref<1x128x64xbf16, #tpu.memory_space<vmem>>, vector<1x128x64xbf16>
    %5 = vector.shape_cast %4 : vector<1x128x64xbf16> to vector<128x64xbf16>
    %c0_5 = arith.constant 0 : index
    %c0_6 = arith.constant 0 : index
    %c0_7 = arith.constant 0 : index
    %6 = vector.load %arg4[%c0_5, %c0_6, %c0_7] : memref<1x64x64xbf16, #tpu.memory_space<vmem>>, vector<1x64x64xbf16>
    %7 = vector.shape_cast %6 : vector<1x64x64xbf16> to vector<64x64xbf16>
    %cst = arith.constant dense<0.000000e+00> : vector<128x64xf32>
    %8 = tpu.matmul %5, %7, %cst {dimension_numbers = #tpu.dot_dimension_numbers<[1], [0], [0], [1], [0, 0, 1, 1], [], []>} : vector<128x64xbf16>, vector<64x64xbf16>, vector<128x64xf32> -> vector<128x64xf32>
    %9 = arith.addf %3, %8 : vector<128x64xf32>
    %c0_8 = arith.constant 0 : index
    %c0_9 = arith.constant 0 : index
    %10 = vector.load %arg7[%c0_8, %c0_9] : memref<128x64xf32, #tpu.memory_space<vmem>>, vector<128x64xf32>
    tpu.vector_store %arg7[%c0_8, %c0_9], %9 {strides = array<i32>} : memref<128x64xf32, #tpu.memory_space<vmem>>, vector<128x64xf32>,
    %c8_i32 = arith.constant 8 : i32
    %11 = arith.cmpi eq, %arg2, %c8_i32 : i32
    %12 = arith.extui %11 : i1 to i32
    %c0_i32_10 = arith.constant 0 : i32
    %13 = arith.cmpi ne, %12, %c0_i32_10 : i32
    scf.if %13 {
      %c0_11 = arith.constant 0 : index
      %c0_12 = arith.constant 0 : index
      %14 = vector.load %arg7[%c0_11, %c0_12] : memref<128x64xf32, #tpu.memory_space<vmem>>, vector<128x64xf32>
      %c0_13 = arith.constant 0 : index
      %c0_14 = arith.constant 0 : index
      %15 = vector.load %arg5[%c0_13, %c0_14] : memref<1x64xf32, #tpu.memory_space<vmem>>, vector<1x64xf32>
      %16 = vector.broadcast %15 : vector<1x64xf32> to vector<128x64xf32>
      %17 = arith.addf %14, %16 : vector<128x64xf32>
      %cst_15 = arith.constant 0.000000e+00 : f32
      %18 = vector.broadcast %cst_15 : f32 to vector<128x64xf32>
      %19 = arith.maximumf %17, %18 : vector<128x64xf32>
      %20 = arith.truncf %19 : vector<128x64xf32> to vector<128x64xbf16>
      %c0_16 = arith.constant 0 : index
      %c0_17 = arith.constant 0 : index
      %21 = vector.load %arg6[%c0_16, %c0_17] : memref<128x64xbf16, #tpu.memory_space<vmem>>, vector<128x64xbf16>
      tpu.vector_store %arg6[%c0_16, %c0_17], %20 {strides = array<i32>} : memref<128x64xbf16, #tpu.memory_space<vmem>>, vector<128x64xbf16>,
    } else {
    }
    return
  }
  func.func @transform_0(%arg0: i32, %arg1: i32, %arg2: i32) -> (i32, i32, i32) {
    %c0_i32 = arith.constant 0 : i32
    %c0_i32_0 = arith.constant 0 : i32
    return %arg2, %arg0, %c0_i32 : i32, i32, i32
  }
  func.func @transform_1(%arg0: i32, %arg1: i32, %arg2: i32) -> (i32, i32, i32) {
    %c0_i32 = arith.constant 0 : i32
    %c0_i32_0 = arith.constant 0 : i32
    return %arg2, %c0_i32, %arg1 : i32, i32, i32
  }
  func.func @transform_2(%arg0: i32, %arg1: i32, %arg2: i32) -> (i32, i32) {
    %c0_i32 = arith.constant 0 : i32
    %c0_i32_0 = arith.constant 0 : i32
    return %c0_i32, %arg1 : i32, i32
  }
  func.func @transform_3(%arg0: i32, %arg1: i32, %arg2: i32) -> (i32, i32) {
    %c0_i32 = arith.constant 0 : i32
    return %arg0, %arg1 : i32, i32
  }
}

module attributes {stable_mosaic.version = 11 : i64} {
  func.func @_conv_kernel(%arg0: i32, %arg1: i32, %arg2: i32, %arg3: memref<1x128x64xbf16, #tpu.memory_space<vmem>>, %arg4: memref<1x64x64xbf16, #tpu.memory_space<vmem>>, %arg5: memref<1x64xf32, #tpu.memory_space<vmem>>, %arg6: memref<128x64xbf16, #tpu.memory_space<vmem>>, %arg7: memref<128x64xbf16, #tpu.memory_space<vmem>>, %arg8: memref<128x64xf32, #tpu.memory_space<vmem>>) attributes {dimension_semantics = [#tpu.dimension_semantics<parallel>, #tpu.dimension_semantics<parallel>, #tpu.dimension_semantics<arbitrary>], iteration_bounds = array<i64: 1, 1, 9>, scalar_prefetch = 0 : i64, scratch_operands = 1 : i64, tpu.core_type = #tpu.core_type<tc>, window_params = [{transform_indices = @transform_0, window_bounds = array<i64: 1, 128, 64>}, {transform_indices = @transform_1, window_bounds = array<i64: 1, 64, 64>}, {transform_indices = @transform_2, window_bounds = array<i64: 1, 64>}, {transform_indices = @transform_3, window_bounds = array<i64: 128, 64>}, {transform_indices = @transform_4, window_bounds = array<i64: 128, 64>}]} {
    %c0_i32 = arith.constant 0 : i32
    %0 = arith.cmpi eq, %arg2, %c0_i32 : i32
    %1 = arith.extui %0 : i1 to i32
    %c0_i32_0 = arith.constant 0 : i32
    %2 = arith.cmpi ne, %1, %c0_i32_0 : i32
    scf.if %2 {
      %cst_11 = arith.constant 0.000000e+00 : f32
      %14 = vector.broadcast %cst_11 : f32 to vector<128x64xf32>
      %c0_12 = arith.constant 0 : index
      %c0_13 = arith.constant 0 : index
      %15 = vector.load %arg8[%c0_12, %c0_13] : memref<128x64xf32, #tpu.memory_space<vmem>>, vector<128x64xf32>
      tpu.vector_store %arg8[%c0_12, %c0_13], %14 {strides = array<i32>} : memref<128x64xf32, #tpu.memory_space<vmem>>, vector<128x64xf32>,
    } else {
    }
    %c0 = arith.constant 0 : index
    %c0_1 = arith.constant 0 : index
    %3 = vector.load %arg8[%c0, %c0_1] : memref<128x64xf32, #tpu.memory_space<vmem>>, vector<128x64xf32>
    %c0_2 = arith.constant 0 : index
    %c0_3 = arith.constant 0 : index
    %c0_4 = arith.constant 0 : index
    %4 = vector.load %arg3[%c0_2, %c0_3, %c0_4] : memref<1x128x64xbf16, #tpu.memory_space<vmem>>, vector<1x128x64xbf16>
    %5 = vector.shape_cast %4 : vector<1x128x64xbf16> to vector<128x64xbf16>
    %c0_5 = arith.constant 0 : index
    %c0_6 = arith.constant 0 : index
    %c0_7 = arith.constant 0 : index
    %6 = vector.load %arg4[%c0_5, %c0_6, %c0_7] : memref<1x64x64xbf16, #tpu.memory_space<vmem>>, vector<1x64x64xbf16>
    %7 = vector.shape_cast %6 : vector<1x64x64xbf16> to vector<64x64xbf16>
    %cst = arith.constant dense<0.000000e+00> : vector<128x64xf32>
    %8 = tpu.matmul %5, %7, %cst {dimension_numbers = #tpu.dot_dimension_numbers<[1], [0], [0], [1], [0, 0, 1, 1], [], []>} : vector<128x64xbf16>, vector<64x64xbf16>, vector<128x64xf32> -> vector<128x64xf32>
    %9 = arith.addf %3, %8 : vector<128x64xf32>
    %c0_8 = arith.constant 0 : index
    %c0_9 = arith.constant 0 : index
    %10 = vector.load %arg8[%c0_8, %c0_9] : memref<128x64xf32, #tpu.memory_space<vmem>>, vector<128x64xf32>
    tpu.vector_store %arg8[%c0_8, %c0_9], %9 {strides = array<i32>} : memref<128x64xf32, #tpu.memory_space<vmem>>, vector<128x64xf32>,
    %c8_i32 = arith.constant 8 : i32
    %11 = arith.cmpi eq, %arg2, %c8_i32 : i32
    %12 = arith.extui %11 : i1 to i32
    %c0_i32_10 = arith.constant 0 : i32
    %13 = arith.cmpi ne, %12, %c0_i32_10 : i32
    scf.if %13 {
      %c0_11 = arith.constant 0 : index
      %c0_12 = arith.constant 0 : index
      %14 = vector.load %arg8[%c0_11, %c0_12] : memref<128x64xf32, #tpu.memory_space<vmem>>, vector<128x64xf32>
      %c0_13 = arith.constant 0 : index
      %c0_14 = arith.constant 0 : index
      %15 = vector.load %arg5[%c0_13, %c0_14] : memref<1x64xf32, #tpu.memory_space<vmem>>, vector<1x64xf32>
      %16 = vector.broadcast %15 : vector<1x64xf32> to vector<128x64xf32>
      %17 = arith.addf %14, %16 : vector<128x64xf32>
      %c0_15 = arith.constant 0 : index
      %c0_16 = arith.constant 0 : index
      %18 = vector.load %arg6[%c0_15, %c0_16] : memref<128x64xbf16, #tpu.memory_space<vmem>>, vector<128x64xbf16>
      %19 = arith.extf %18 : vector<128x64xbf16> to vector<128x64xf32>
      %20 = arith.addf %17, %19 : vector<128x64xf32>
      %cst_17 = arith.constant 0.000000e+00 : f32
      %21 = vector.broadcast %cst_17 : f32 to vector<128x64xf32>
      %22 = arith.maximumf %20, %21 : vector<128x64xf32>
      %23 = arith.truncf %22 : vector<128x64xf32> to vector<128x64xbf16>
      %c0_18 = arith.constant 0 : index
      %c0_19 = arith.constant 0 : index
      %24 = vector.load %arg7[%c0_18, %c0_19] : memref<128x64xbf16, #tpu.memory_space<vmem>>, vector<128x64xbf16>
      tpu.vector_store %arg7[%c0_18, %c0_19], %23 {strides = array<i32>} : memref<128x64xbf16, #tpu.memory_space<vmem>>, vector<128x64xbf16>,
    } else {
    }
    return
  }
  func.func @transform_0(%arg0: i32, %arg1: i32, %arg2: i32) -> (i32, i32, i32) {
    %c0_i32 = arith.constant 0 : i32
    %c0_i32_0 = arith.constant 0 : i32
    return %arg2, %arg0, %c0_i32 : i32, i32, i32
  }
  func.func @transform_1(%arg0: i32, %arg1: i32, %arg2: i32) -> (i32, i32, i32) {
    %c0_i32 = arith.constant 0 : i32
    %c0_i32_0 = arith.constant 0 : i32
    return %arg2, %c0_i32, %arg1 : i32, i32, i32
  }
  func.func @transform_2(%arg0: i32, %arg1: i32, %arg2: i32) -> (i32, i32) {
    %c0_i32 = arith.constant 0 : i32
    %c0_i32_0 = arith.constant 0 : i32
    return %c0_i32, %arg1 : i32, i32
  }
  func.func @transform_3(%arg0: i32, %arg1: i32, %arg2: i32) -> (i32, i32) {
    %c0_i32 = arith.constant 0 : i32
    return %arg0, %arg1 : i32, i32
  }
  func.func @transform_4(%arg0: i32, %arg1: i32, %arg2: i32) -> (i32, i32) {
    %c0_i32 = arith.constant 0 : i32
    return %arg0, %arg1 : i32, i32
  }
}

module attributes {stable_mosaic.version = 11 : i64} {
  func.func @_conv_kernel(%arg0: i32, %arg1: i32, %arg2: i32, %arg3: memref<1x32x64xbf16, #tpu.memory_space<vmem>>, %arg4: memref<1x64x128xbf16, #tpu.memory_space<vmem>>, %arg5: memref<64x128xbf16, #tpu.memory_space<vmem>>, %arg6: memref<1x128xf32, #tpu.memory_space<vmem>>, %arg7: memref<1x128xf32, #tpu.memory_space<vmem>>, %arg8: memref<32x128xbf16, #tpu.memory_space<vmem>>, %arg9: memref<32x128xbf16, #tpu.memory_space<vmem>>, %arg10: memref<32x128xf32, #tpu.memory_space<vmem>>) attributes {dimension_semantics = [#tpu.dimension_semantics<parallel>, #tpu.dimension_semantics<parallel>, #tpu.dimension_semantics<arbitrary>], iteration_bounds = array<i64: 1, 1, 9>, scalar_prefetch = 0 : i64, scratch_operands = 1 : i64, tpu.core_type = #tpu.core_type<tc>, window_params = [{transform_indices = @transform_0, window_bounds = array<i64: 1, 32, 64>}, {transform_indices = @transform_1, window_bounds = array<i64: 1, 64, 128>}, {transform_indices = @transform_2, window_bounds = array<i64: 64, 128>}, {transform_indices = @transform_3, window_bounds = array<i64: 1, 128>}, {transform_indices = @transform_4, window_bounds = array<i64: 1, 128>}, {transform_indices = @transform_5, window_bounds = array<i64: 32, 128>}, {transform_indices = @transform_6, window_bounds = array<i64: 32, 128>}]} {
    %c0_i32 = arith.constant 0 : i32
    %0 = arith.cmpi eq, %arg2, %c0_i32 : i32
    %1 = arith.extui %0 : i1 to i32
    %c0_i32_0 = arith.constant 0 : i32
    %2 = arith.cmpi ne, %1, %c0_i32_0 : i32
    scf.if %2 {
      %cst_12 = arith.constant 0.000000e+00 : f32
      %17 = vector.broadcast %cst_12 : f32 to vector<32x128xf32>
      %c0_13 = arith.constant 0 : index
      %c0_14 = arith.constant 0 : index
      %18 = vector.load %arg10[%c0_13, %c0_14] : memref<32x128xf32, #tpu.memory_space<vmem>>, vector<32x128xf32>
      tpu.vector_store %arg10[%c0_13, %c0_14], %17 {strides = array<i32>} : memref<32x128xf32, #tpu.memory_space<vmem>>, vector<32x128xf32>,
    } else {
    }
    %c0 = arith.constant 0 : index
    %c0_1 = arith.constant 0 : index
    %3 = vector.load %arg10[%c0, %c0_1] : memref<32x128xf32, #tpu.memory_space<vmem>>, vector<32x128xf32>
    %c0_2 = arith.constant 0 : index
    %c0_3 = arith.constant 0 : index
    %c0_4 = arith.constant 0 : index
    %4 = vector.load %arg3[%c0_2, %c0_3, %c0_4] : memref<1x32x64xbf16, #tpu.memory_space<vmem>>, vector<1x32x64xbf16>
    %5 = vector.shape_cast %4 : vector<1x32x64xbf16> to vector<32x64xbf16>
    %c0_5 = arith.constant 0 : index
    %c0_6 = arith.constant 0 : index
    %c0_7 = arith.constant 0 : index
    %6 = vector.load %arg4[%c0_5, %c0_6, %c0_7] : memref<1x64x128xbf16, #tpu.memory_space<vmem>>, vector<1x64x128xbf16>
    %7 = vector.shape_cast %6 : vector<1x64x128xbf16> to vector<64x128xbf16>
    %cst = arith.constant dense<0.000000e+00> : vector<32x128xf32>
    %8 = tpu.matmul %5, %7, %cst {dimension_numbers = #tpu.dot_dimension_numbers<[1], [0], [0], [1], [0, 0, 1, 1], [], []>} : vector<32x64xbf16>, vector<64x128xbf16>, vector<32x128xf32> -> vector<32x128xf32>
    %9 = arith.addf %3, %8 : vector<32x128xf32>
    %c0_8 = arith.constant 0 : index
    %c0_9 = arith.constant 0 : index
    %10 = vector.load %arg10[%c0_8, %c0_9] : memref<32x128xf32, #tpu.memory_space<vmem>>, vector<32x128xf32>
    tpu.vector_store %arg10[%c0_8, %c0_9], %9 {strides = array<i32>} : memref<32x128xf32, #tpu.memory_space<vmem>>, vector<32x128xf32>,
    %c4_i32 = arith.constant 4 : i32
    %11 = arith.cmpi eq, %arg2, %c4_i32 : i32
    %12 = arith.extui %11 : i1 to i32
    %c0_i32_10 = arith.constant 0 : i32
    %13 = arith.cmpi ne, %12, %c0_i32_10 : i32
    scf.if %13 {
      %c0_12 = arith.constant 0 : index
      %c0_13 = arith.constant 0 : index
      %c0_14 = arith.constant 0 : index
      %17 = vector.load %arg3[%c0_12, %c0_13, %c0_14] : memref<1x32x64xbf16, #tpu.memory_space<vmem>>, vector<1x32x64xbf16>
      %18 = vector.shape_cast %17 : vector<1x32x64xbf16> to vector<32x64xbf16>
      %c0_15 = arith.constant 0 : index
      %c0_16 = arith.constant 0 : index
      %19 = vector.load %arg5[%c0_15, %c0_16] : memref<64x128xbf16, #tpu.memory_space<vmem>>, vector<64x128xbf16>
      %cst_17 = arith.constant dense<0.000000e+00> : vector<32x128xf32>
      %20 = tpu.matmul %18, %19, %cst_17 {dimension_numbers = #tpu.dot_dimension_numbers<[1], [0], [0], [1], [0, 0, 1, 1], [], []>} : vector<32x64xbf16>, vector<64x128xbf16>, vector<32x128xf32> -> vector<32x128xf32>
      %c0_18 = arith.constant 0 : index
      %c0_19 = arith.constant 0 : index
      %21 = vector.load %arg7[%c0_18, %c0_19] : memref<1x128xf32, #tpu.memory_space<vmem>>, vector<1x128xf32>
      %22 = vector.broadcast %21 : vector<1x128xf32> to vector<32x128xf32>
      %23 = arith.addf %20, %22 : vector<32x128xf32>
      %24 = arith.truncf %23 : vector<32x128xf32> to vector<32x128xbf16>
      %c0_20 = arith.constant 0 : index
      %c0_21 = arith.constant 0 : index
      %25 = vector.load %arg9[%c0_20, %c0_21] : memref<32x128xbf16, #tpu.memory_space<vmem>>, vector<32x128xbf16>
      tpu.vector_store %arg9[%c0_20, %c0_21], %24 {strides = array<i32>} : memref<32x128xbf16, #tpu.memory_space<vmem>>, vector<32x128xbf16>,
    } else {
    }
    %c8_i32 = arith.constant 8 : i32
    %14 = arith.cmpi eq, %arg2, %c8_i32 : i32
    %15 = arith.extui %14 : i1 to i32
    %c0_i32_11 = arith.constant 0 : i32
    %16 = arith.cmpi ne, %15, %c0_i32_11 : i32
    scf.if %16 {
      %c0_12 = arith.constant 0 : index
      %c0_13 = arith.constant 0 : index
      %17 = vector.load %arg10[%c0_12, %c0_13] : memref<32x128xf32, #tpu.memory_space<vmem>>, vector<32x128xf32>
      %c0_14 = arith.constant 0 : index
      %c0_15 = arith.constant 0 : index
      %18 = vector.load %arg6[%c0_14, %c0_15] : memref<1x128xf32, #tpu.memory_space<vmem>>, vector<1x128xf32>
      %19 = vector.broadcast %18 : vector<1x128xf32> to vector<32x128xf32>
      %20 = arith.addf %17, %19 : vector<32x128xf32>
      %cst_16 = arith.constant 0.000000e+00 : f32
      %21 = vector.broadcast %cst_16 : f32 to vector<32x128xf32>
      %22 = arith.maximumf %20, %21 : vector<32x128xf32>
      %23 = arith.truncf %22 : vector<32x128xf32> to vector<32x128xbf16>
      %c0_17 = arith.constant 0 : index
      %c0_18 = arith.constant 0 : index
      %24 = vector.load %arg8[%c0_17, %c0_18] : memref<32x128xbf16, #tpu.memory_space<vmem>>, vector<32x128xbf16>
      tpu.vector_store %arg8[%c0_17, %c0_18], %23 {strides = array<i32>} : memref<32x128xbf16, #tpu.memory_space<vmem>>, vector<32x128xbf16>,
    } else {
    }
    return
  }
  func.func @transform_0(%arg0: i32, %arg1: i32, %arg2: i32) -> (i32, i32, i32) {
    %c0_i32 = arith.constant 0 : i32
    %c0_i32_0 = arith.constant 0 : i32
    return %arg2, %arg0, %c0_i32 : i32, i32, i32
  }
  func.func @transform_1(%arg0: i32, %arg1: i32, %arg2: i32) -> (i32, i32, i32) {
    %c0_i32 = arith.constant 0 : i32
    %c0_i32_0 = arith.constant 0 : i32
    return %arg2, %c0_i32, %arg1 : i32, i32, i32
  }
  func.func @transform_2(%arg0: i32, %arg1: i32, %arg2: i32) -> (i32, i32) {
    %c0_i32 = arith.constant 0 : i32
    %c0_i32_0 = arith.constant 0 : i32
    return %c0_i32, %arg1 : i32, i32
  }
  func.func @transform_3(%arg0: i32, %arg1: i32, %arg2: i32) -> (i32, i32) {
    %c0_i32 = arith.constant 0 : i32
    %c0_i32_0 = arith.constant 0 : i32
    return %c0_i32, %arg1 : i32, i32
  }
  func.func @transform_4(%arg0: i32, %arg1: i32, %arg2: i32) -> (i32, i32) {
    %c0_i32 = arith.constant 0 : i32
    %c0_i32_0 = arith.constant 0 : i32
    return %c0_i32, %arg1 : i32, i32
  }
  func.func @transform_5(%arg0: i32, %arg1: i32, %arg2: i32) -> (i32, i32) {
    %c0_i32 = arith.constant 0 : i32
    return %arg0, %arg1 : i32, i32
  }
  func.func @transform_6(%arg0: i32, %arg1: i32, %arg2: i32) -> (i32, i32) {
    %c0_i32 = arith.constant 0 : i32
    return %arg0, %arg1 : i32, i32
  }
}

module attributes {stable_mosaic.version = 11 : i64} {
  func.func @_conv_kernel(%arg0: i32, %arg1: i32, %arg2: i32, %arg3: memref<1x32x128xbf16, #tpu.memory_space<vmem>>, %arg4: memref<1x128x128xbf16, #tpu.memory_space<vmem>>, %arg5: memref<1x128xf32, #tpu.memory_space<vmem>>, %arg6: memref<32x128xbf16, #tpu.memory_space<vmem>>, %arg7: memref<32x128xf32, #tpu.memory_space<vmem>>) attributes {dimension_semantics = [#tpu.dimension_semantics<parallel>, #tpu.dimension_semantics<parallel>, #tpu.dimension_semantics<arbitrary>], iteration_bounds = array<i64: 1, 1, 9>, scalar_prefetch = 0 : i64, scratch_operands = 1 : i64, tpu.core_type = #tpu.core_type<tc>, window_params = [{transform_indices = @transform_0, window_bounds = array<i64: 1, 32, 128>}, {transform_indices = @transform_1, window_bounds = array<i64: 1, 128, 128>}, {transform_indices = @transform_2, window_bounds = array<i64: 1, 128>}, {transform_indices = @transform_3, window_bounds = array<i64: 32, 128>}]} {
    %c0_i32 = arith.constant 0 : i32
    %0 = arith.cmpi eq, %arg2, %c0_i32 : i32
    %1 = arith.extui %0 : i1 to i32
    %c0_i32_0 = arith.constant 0 : i32
    %2 = arith.cmpi ne, %1, %c0_i32_0 : i32
    scf.if %2 {
      %cst_11 = arith.constant 0.000000e+00 : f32
      %14 = vector.broadcast %cst_11 : f32 to vector<32x128xf32>
      %c0_12 = arith.constant 0 : index
      %c0_13 = arith.constant 0 : index
      %15 = vector.load %arg7[%c0_12, %c0_13] : memref<32x128xf32, #tpu.memory_space<vmem>>, vector<32x128xf32>
      tpu.vector_store %arg7[%c0_12, %c0_13], %14 {strides = array<i32>} : memref<32x128xf32, #tpu.memory_space<vmem>>, vector<32x128xf32>,
    } else {
    }
    %c0 = arith.constant 0 : index
    %c0_1 = arith.constant 0 : index
    %3 = vector.load %arg7[%c0, %c0_1] : memref<32x128xf32, #tpu.memory_space<vmem>>, vector<32x128xf32>
    %c0_2 = arith.constant 0 : index
    %c0_3 = arith.constant 0 : index
    %c0_4 = arith.constant 0 : index
    %4 = vector.load %arg3[%c0_2, %c0_3, %c0_4] : memref<1x32x128xbf16, #tpu.memory_space<vmem>>, vector<1x32x128xbf16>
    %5 = vector.shape_cast %4 : vector<1x32x128xbf16> to vector<32x128xbf16>
    %c0_5 = arith.constant 0 : index
    %c0_6 = arith.constant 0 : index
    %c0_7 = arith.constant 0 : index
    %6 = vector.load %arg4[%c0_5, %c0_6, %c0_7] : memref<1x128x128xbf16, #tpu.memory_space<vmem>>, vector<1x128x128xbf16>
    %7 = vector.shape_cast %6 : vector<1x128x128xbf16> to vector<128x128xbf16>
    %cst = arith.constant dense<0.000000e+00> : vector<32x128xf32>
    %8 = tpu.matmul %5, %7, %cst {dimension_numbers = #tpu.dot_dimension_numbers<[1], [0], [0], [1], [0, 0, 1, 1], [], []>} : vector<32x128xbf16>, vector<128x128xbf16>, vector<32x128xf32> -> vector<32x128xf32>
    %9 = arith.addf %3, %8 : vector<32x128xf32>
    %c0_8 = arith.constant 0 : index
    %c0_9 = arith.constant 0 : index
    %10 = vector.load %arg7[%c0_8, %c0_9] : memref<32x128xf32, #tpu.memory_space<vmem>>, vector<32x128xf32>
    tpu.vector_store %arg7[%c0_8, %c0_9], %9 {strides = array<i32>} : memref<32x128xf32, #tpu.memory_space<vmem>>, vector<32x128xf32>,
    %c8_i32 = arith.constant 8 : i32
    %11 = arith.cmpi eq, %arg2, %c8_i32 : i32
    %12 = arith.extui %11 : i1 to i32
    %c0_i32_10 = arith.constant 0 : i32
    %13 = arith.cmpi ne, %12, %c0_i32_10 : i32
    scf.if %13 {
      %c0_11 = arith.constant 0 : index
      %c0_12 = arith.constant 0 : index
      %14 = vector.load %arg7[%c0_11, %c0_12] : memref<32x128xf32, #tpu.memory_space<vmem>>, vector<32x128xf32>
      %c0_13 = arith.constant 0 : index
      %c0_14 = arith.constant 0 : index
      %15 = vector.load %arg5[%c0_13, %c0_14] : memref<1x128xf32, #tpu.memory_space<vmem>>, vector<1x128xf32>
      %16 = vector.broadcast %15 : vector<1x128xf32> to vector<32x128xf32>
      %17 = arith.addf %14, %16 : vector<32x128xf32>
      %cst_15 = arith.constant 0.000000e+00 : f32
      %18 = vector.broadcast %cst_15 : f32 to vector<32x128xf32>
      %19 = arith.maximumf %17, %18 : vector<32x128xf32>
      %20 = arith.truncf %19 : vector<32x128xf32> to vector<32x128xbf16>
      %c0_16 = arith.constant 0 : index
      %c0_17 = arith.constant 0 : index
      %21 = vector.load %arg6[%c0_16, %c0_17] : memref<32x128xbf16, #tpu.memory_space<vmem>>, vector<32x128xbf16>
      tpu.vector_store %arg6[%c0_16, %c0_17], %20 {strides = array<i32>} : memref<32x128xbf16, #tpu.memory_space<vmem>>, vector<32x128xbf16>,
    } else {
    }
    return
  }
  func.func @transform_0(%arg0: i32, %arg1: i32, %arg2: i32) -> (i32, i32, i32) {
    %c0_i32 = arith.constant 0 : i32
    %c0_i32_0 = arith.constant 0 : i32
    return %arg2, %arg0, %c0_i32 : i32, i32, i32
  }
  func.func @transform_1(%arg0: i32, %arg1: i32, %arg2: i32) -> (i32, i32, i32) {
    %c0_i32 = arith.constant 0 : i32
    %c0_i32_0 = arith.constant 0 : i32
    return %arg2, %c0_i32, %arg1 : i32, i32, i32
  }
  func.func @transform_2(%arg0: i32, %arg1: i32, %arg2: i32) -> (i32, i32) {
    %c0_i32 = arith.constant 0 : i32
    %c0_i32_0 = arith.constant 0 : i32
    return %c0_i32, %arg1 : i32, i32
  }
  func.func @transform_3(%arg0: i32, %arg1: i32, %arg2: i32) -> (i32, i32) {
    %c0_i32 = arith.constant 0 : i32
    return %arg0, %arg1 : i32, i32
  }
}

module attributes {stable_mosaic.version = 11 : i64} {
  func.func @_conv_kernel(%arg0: i32, %arg1: i32, %arg2: i32, %arg3: memref<1x32x128xbf16, #tpu.memory_space<vmem>>, %arg4: memref<1x128x128xbf16, #tpu.memory_space<vmem>>, %arg5: memref<1x128xf32, #tpu.memory_space<vmem>>, %arg6: memref<32x128xbf16, #tpu.memory_space<vmem>>, %arg7: memref<32x128xbf16, #tpu.memory_space<vmem>>, %arg8: memref<32x128xf32, #tpu.memory_space<vmem>>) attributes {dimension_semantics = [#tpu.dimension_semantics<parallel>, #tpu.dimension_semantics<parallel>, #tpu.dimension_semantics<arbitrary>], iteration_bounds = array<i64: 1, 1, 9>, scalar_prefetch = 0 : i64, scratch_operands = 1 : i64, tpu.core_type = #tpu.core_type<tc>, window_params = [{transform_indices = @transform_0, window_bounds = array<i64: 1, 32, 128>}, {transform_indices = @transform_1, window_bounds = array<i64: 1, 128, 128>}, {transform_indices = @transform_2, window_bounds = array<i64: 1, 128>}, {transform_indices = @transform_3, window_bounds = array<i64: 32, 128>}, {transform_indices = @transform_4, window_bounds = array<i64: 32, 128>}]} {
    %c0_i32 = arith.constant 0 : i32
    %0 = arith.cmpi eq, %arg2, %c0_i32 : i32
    %1 = arith.extui %0 : i1 to i32
    %c0_i32_0 = arith.constant 0 : i32
    %2 = arith.cmpi ne, %1, %c0_i32_0 : i32
    scf.if %2 {
      %cst_11 = arith.constant 0.000000e+00 : f32
      %14 = vector.broadcast %cst_11 : f32 to vector<32x128xf32>
      %c0_12 = arith.constant 0 : index
      %c0_13 = arith.constant 0 : index
      %15 = vector.load %arg8[%c0_12, %c0_13] : memref<32x128xf32, #tpu.memory_space<vmem>>, vector<32x128xf32>
      tpu.vector_store %arg8[%c0_12, %c0_13], %14 {strides = array<i32>} : memref<32x128xf32, #tpu.memory_space<vmem>>, vector<32x128xf32>,
    } else {
    }
    %c0 = arith.constant 0 : index
    %c0_1 = arith.constant 0 : index
    %3 = vector.load %arg8[%c0, %c0_1] : memref<32x128xf32, #tpu.memory_space<vmem>>, vector<32x128xf32>
    %c0_2 = arith.constant 0 : index
    %c0_3 = arith.constant 0 : index
    %c0_4 = arith.constant 0 : index
    %4 = vector.load %arg3[%c0_2, %c0_3, %c0_4] : memref<1x32x128xbf16, #tpu.memory_space<vmem>>, vector<1x32x128xbf16>
    %5 = vector.shape_cast %4 : vector<1x32x128xbf16> to vector<32x128xbf16>
    %c0_5 = arith.constant 0 : index
    %c0_6 = arith.constant 0 : index
    %c0_7 = arith.constant 0 : index
    %6 = vector.load %arg4[%c0_5, %c0_6, %c0_7] : memref<1x128x128xbf16, #tpu.memory_space<vmem>>, vector<1x128x128xbf16>
    %7 = vector.shape_cast %6 : vector<1x128x128xbf16> to vector<128x128xbf16>
    %cst = arith.constant dense<0.000000e+00> : vector<32x128xf32>
    %8 = tpu.matmul %5, %7, %cst {dimension_numbers = #tpu.dot_dimension_numbers<[1], [0], [0], [1], [0, 0, 1, 1], [], []>} : vector<32x128xbf16>, vector<128x128xbf16>, vector<32x128xf32> -> vector<32x128xf32>
    %9 = arith.addf %3, %8 : vector<32x128xf32>
    %c0_8 = arith.constant 0 : index
    %c0_9 = arith.constant 0 : index
    %10 = vector.load %arg8[%c0_8, %c0_9] : memref<32x128xf32, #tpu.memory_space<vmem>>, vector<32x128xf32>
    tpu.vector_store %arg8[%c0_8, %c0_9], %9 {strides = array<i32>} : memref<32x128xf32, #tpu.memory_space<vmem>>, vector<32x128xf32>,
    %c8_i32 = arith.constant 8 : i32
    %11 = arith.cmpi eq, %arg2, %c8_i32 : i32
    %12 = arith.extui %11 : i1 to i32
    %c0_i32_10 = arith.constant 0 : i32
    %13 = arith.cmpi ne, %12, %c0_i32_10 : i32
    scf.if %13 {
      %c0_11 = arith.constant 0 : index
      %c0_12 = arith.constant 0 : index
      %14 = vector.load %arg8[%c0_11, %c0_12] : memref<32x128xf32, #tpu.memory_space<vmem>>, vector<32x128xf32>
      %c0_13 = arith.constant 0 : index
      %c0_14 = arith.constant 0 : index
      %15 = vector.load %arg5[%c0_13, %c0_14] : memref<1x128xf32, #tpu.memory_space<vmem>>, vector<1x128xf32>
      %16 = vector.broadcast %15 : vector<1x128xf32> to vector<32x128xf32>
      %17 = arith.addf %14, %16 : vector<32x128xf32>
      %c0_15 = arith.constant 0 : index
      %c0_16 = arith.constant 0 : index
      %18 = vector.load %arg6[%c0_15, %c0_16] : memref<32x128xbf16, #tpu.memory_space<vmem>>, vector<32x128xbf16>
      %19 = arith.extf %18 : vector<32x128xbf16> to vector<32x128xf32>
      %20 = arith.addf %17, %19 : vector<32x128xf32>
      %cst_17 = arith.constant 0.000000e+00 : f32
      %21 = vector.broadcast %cst_17 : f32 to vector<32x128xf32>
      %22 = arith.maximumf %20, %21 : vector<32x128xf32>
      %23 = arith.truncf %22 : vector<32x128xf32> to vector<32x128xbf16>
      %c0_18 = arith.constant 0 : index
      %c0_19 = arith.constant 0 : index
      %24 = vector.load %arg7[%c0_18, %c0_19] : memref<32x128xbf16, #tpu.memory_space<vmem>>, vector<32x128xbf16>
      tpu.vector_store %arg7[%c0_18, %c0_19], %23 {strides = array<i32>} : memref<32x128xbf16, #tpu.memory_space<vmem>>, vector<32x128xbf16>,
    } else {
    }
    return
  }
  func.func @transform_0(%arg0: i32, %arg1: i32, %arg2: i32) -> (i32, i32, i32) {
    %c0_i32 = arith.constant 0 : i32
    %c0_i32_0 = arith.constant 0 : i32
    return %arg2, %arg0, %c0_i32 : i32, i32, i32
  }
  func.func @transform_1(%arg0: i32, %arg1: i32, %arg2: i32) -> (i32, i32, i32) {
    %c0_i32 = arith.constant 0 : i32
    %c0_i32_0 = arith.constant 0 : i32
    return %arg2, %c0_i32, %arg1 : i32, i32, i32
  }
  func.func @transform_2(%arg0: i32, %arg1: i32, %arg2: i32) -> (i32, i32) {
    %c0_i32 = arith.constant 0 : i32
    %c0_i32_0 = arith.constant 0 : i32
    return %c0_i32, %arg1 : i32, i32
  }
  func.func @transform_3(%arg0: i32, %arg1: i32, %arg2: i32) -> (i32, i32) {
    %c0_i32 = arith.constant 0 : i32
    return %arg0, %arg1 : i32, i32
  }
  func.func @transform_4(%arg0: i32, %arg1: i32, %arg2: i32) -> (i32, i32) {
    %c0_i32 = arith.constant 0 : i32
    return %arg0, %arg1 : i32, i32
  }
}

module attributes {stable_mosaic.version = 11 : i64} {
  func.func @_conv_kernel(%arg0: i32, %arg1: i32, %arg2: i32, %arg3: memref<1x32x128xbf16, #tpu.memory_space<vmem>>, %arg4: memref<1x128x128xbf16, #tpu.memory_space<vmem>>, %arg5: memref<1x128xf32, #tpu.memory_space<vmem>>, %arg6: memref<32x128xbf16, #tpu.memory_space<vmem>>, %arg7: memref<32x128xbf16, #tpu.memory_space<vmem>>, %arg8: memref<32x128xf32, #tpu.memory_space<vmem>>) attributes {dimension_semantics = [#tpu.dimension_semantics<parallel>, #tpu.dimension_semantics<parallel>, #tpu.dimension_semantics<arbitrary>], iteration_bounds = array<i64: 1, 1, 9>, scalar_prefetch = 0 : i64, scratch_operands = 1 : i64, tpu.core_type = #tpu.core_type<tc>, window_params = [{transform_indices = @transform_0, window_bounds = array<i64: 1, 32, 128>}, {transform_indices = @transform_1, window_bounds = array<i64: 1, 128, 128>}, {transform_indices = @transform_2, window_bounds = array<i64: 1, 128>}, {transform_indices = @transform_3, window_bounds = array<i64: 32, 128>}, {transform_indices = @transform_4, window_bounds = array<i64: 32, 128>}]} {
    %c0_i32 = arith.constant 0 : i32
    %0 = arith.cmpi eq, %arg2, %c0_i32 : i32
    %1 = arith.extui %0 : i1 to i32
    %c0_i32_0 = arith.constant 0 : i32
    %2 = arith.cmpi ne, %1, %c0_i32_0 : i32
    scf.if %2 {
      %cst_11 = arith.constant 0.000000e+00 : f32
      %14 = vector.broadcast %cst_11 : f32 to vector<32x128xf32>
      %c0_12 = arith.constant 0 : index
      %c0_13 = arith.constant 0 : index
      %15 = vector.load %arg8[%c0_12, %c0_13] : memref<32x128xf32, #tpu.memory_space<vmem>>, vector<32x128xf32>
      tpu.vector_store %arg8[%c0_12, %c0_13], %14 {strides = array<i32>} : memref<32x128xf32, #tpu.memory_space<vmem>>, vector<32x128xf32>,
    } else {
    }
    %c0 = arith.constant 0 : index
    %c0_1 = arith.constant 0 : index
    %3 = vector.load %arg8[%c0, %c0_1] : memref<32x128xf32, #tpu.memory_space<vmem>>, vector<32x128xf32>
    %c0_2 = arith.constant 0 : index
    %c0_3 = arith.constant 0 : index
    %c0_4 = arith.constant 0 : index
    %4 = vector.load %arg3[%c0_2, %c0_3, %c0_4] : memref<1x32x128xbf16, #tpu.memory_space<vmem>>, vector<1x32x128xbf16>
    %5 = vector.shape_cast %4 : vector<1x32x128xbf16> to vector<32x128xbf16>
    %c0_5 = arith.constant 0 : index
    %c0_6 = arith.constant 0 : index
    %c0_7 = arith.constant 0 : index
    %6 = vector.load %arg4[%c0_5, %c0_6, %c0_7] : memref<1x128x128xbf16, #tpu.memory_space<vmem>>, vector<1x128x128xbf16>
    %7 = vector.shape_cast %6 : vector<1x128x128xbf16> to vector<128x128xbf16>
    %cst = arith.constant dense<0.000000e+00> : vector<32x128xf32>
    %8 = tpu.matmul %5, %7, %cst {dimension_numbers = #tpu.dot_dimension_numbers<[1], [0], [0], [1], [0, 0, 1, 1], [], []>} : vector<32x128xbf16>, vector<128x128xbf16>, vector<32x128xf32> -> vector<32x128xf32>
    %9 = arith.addf %3, %8 : vector<32x128xf32>
    %c0_8 = arith.constant 0 : index
    %c0_9 = arith.constant 0 : index
    %10 = vector.load %arg8[%c0_8, %c0_9] : memref<32x128xf32, #tpu.memory_space<vmem>>, vector<32x128xf32>
    tpu.vector_store %arg8[%c0_8, %c0_9], %9 {strides = array<i32>} : memref<32x128xf32, #tpu.memory_space<vmem>>, vector<32x128xf32>,
    %c8_i32 = arith.constant 8 : i32
    %11 = arith.cmpi eq, %arg2, %c8_i32 : i32
    %12 = arith.extui %11 : i1 to i32
    %c0_i32_10 = arith.constant 0 : i32
    %13 = arith.cmpi ne, %12, %c0_i32_10 : i32
    scf.if %13 {
      %c0_11 = arith.constant 0 : index
      %c0_12 = arith.constant 0 : index
      %14 = vector.load %arg8[%c0_11, %c0_12] : memref<32x128xf32, #tpu.memory_space<vmem>>, vector<32x128xf32>
      %c0_13 = arith.constant 0 : index
      %c0_14 = arith.constant 0 : index
      %15 = vector.load %arg5[%c0_13, %c0_14] : memref<1x128xf32, #tpu.memory_space<vmem>>, vector<1x128xf32>
      %16 = vector.broadcast %15 : vector<1x128xf32> to vector<32x128xf32>
      %17 = arith.addf %14, %16 : vector<32x128xf32>
      %c0_15 = arith.constant 0 : index
      %c0_16 = arith.constant 0 : index
      %18 = vector.load %arg6[%c0_15, %c0_16] : memref<32x128xbf16, #tpu.memory_space<vmem>>, vector<32x128xbf16>
      %19 = arith.extf %18 : vector<32x128xbf16> to vector<32x128xf32>
      %20 = arith.addf %17, %19 : vector<32x128xf32>
      %cst_17 = arith.constant 0.000000e+00 : f32
      %21 = vector.broadcast %cst_17 : f32 to vector<32x128xf32>
      %22 = arith.maximumf %20, %21 : vector<32x128xf32>
      %23 = arith.truncf %22 : vector<32x128xf32> to vector<32x128xbf16>
      %c0_18 = arith.constant 0 : index
      %c0_19 = arith.constant 0 : index
      %24 = vector.load %arg7[%c0_18, %c0_19] : memref<32x128xbf16, #tpu.memory_space<vmem>>, vector<32x128xbf16>
      tpu.vector_store %arg7[%c0_18, %c0_19], %23 {strides = array<i32>} : memref<32x128xbf16, #tpu.memory_space<vmem>>, vector<32x128xbf16>,
    } else {
    }
    return
  }
  func.func @transform_0(%arg0: i32, %arg1: i32, %arg2: i32) -> (i32, i32, i32) {
    %c0_i32 = arith.constant 0 : i32
    %c0_i32_0 = arith.constant 0 : i32
    return %arg2, %arg0, %c0_i32 : i32, i32, i32
  }
  func.func @transform_1(%arg0: i32, %arg1: i32, %arg2: i32) -> (i32, i32, i32) {
    %c0_i32 = arith.constant 0 : i32
    %c0_i32_0 = arith.constant 0 : i32
    return %arg2, %c0_i32, %arg1 : i32, i32, i32
  }
  func.func @transform_2(%arg0: i32, %arg1: i32, %arg2: i32) -> (i32, i32) {
    %c0_i32 = arith.constant 0 : i32
    %c0_i32_0 = arith.constant 0 : i32
    return %c0_i32, %arg1 : i32, i32
  }
  func.func @transform_3(%arg0: i32, %arg1: i32, %arg2: i32) -> (i32, i32) {
    %c0_i32 = arith.constant 0 : i32
    return %arg0, %arg1 : i32, i32
  }
  func.func @transform_4(%arg0: i32, %arg1: i32, %arg2: i32) -> (i32, i32) {
    %c0_i32 = arith.constant 0 : i32
    return %arg0, %arg1 : i32, i32
  }
}

module attributes {stable_mosaic.version = 11 : i64} {
  func.func @_conv_kernel(%arg0: i32, %arg1: i32, %arg2: i32, %arg3: memref<1x8x128xbf16, #tpu.memory_space<vmem>>, %arg4: memref<1x128x128xbf16, #tpu.memory_space<vmem>>, %arg5: memref<128x128xbf16, #tpu.memory_space<vmem>>, %arg6: memref<1x128xf32, #tpu.memory_space<vmem>>, %arg7: memref<1x128xf32, #tpu.memory_space<vmem>>, %arg8: memref<8x128xbf16, #tpu.memory_space<vmem>>, %arg9: memref<8x128xbf16, #tpu.memory_space<vmem>>, %arg10: memref<8x128xf32, #tpu.memory_space<vmem>>) attributes {dimension_semantics = [#tpu.dimension_semantics<parallel>, #tpu.dimension_semantics<parallel>, #tpu.dimension_semantics<arbitrary>], iteration_bounds = array<i64: 1, 2, 9>, scalar_prefetch = 0 : i64, scratch_operands = 1 : i64, tpu.core_type = #tpu.core_type<tc>, window_params = [{transform_indices = @transform_0, window_bounds = array<i64: 1, 8, 128>}, {transform_indices = @transform_1, window_bounds = array<i64: 1, 128, 128>}, {transform_indices = @transform_2, window_bounds = array<i64: 128, 128>}, {transform_indices = @transform_3, window_bounds = array<i64: 1, 128>}, {transform_indices = @transform_4, window_bounds = array<i64: 1, 128>}, {transform_indices = @transform_5, window_bounds = array<i64: 8, 128>}, {transform_indices = @transform_6, window_bounds = array<i64: 8, 128>}]} {
    %c0_i32 = arith.constant 0 : i32
    %0 = arith.cmpi eq, %arg2, %c0_i32 : i32
    %1 = arith.extui %0 : i1 to i32
    %c0_i32_0 = arith.constant 0 : i32
    %2 = arith.cmpi ne, %1, %c0_i32_0 : i32
    scf.if %2 {
      %cst_12 = arith.constant 0.000000e+00 : f32
      %17 = vector.broadcast %cst_12 : f32 to vector<8x128xf32>
      %c0_13 = arith.constant 0 : index
      %c0_14 = arith.constant 0 : index
      %18 = vector.load %arg10[%c0_13, %c0_14] : memref<8x128xf32, #tpu.memory_space<vmem>>, vector<8x128xf32>
      tpu.vector_store %arg10[%c0_13, %c0_14], %17 {strides = array<i32>} : memref<8x128xf32, #tpu.memory_space<vmem>>, vector<8x128xf32>,
    } else {
    }
    %c0 = arith.constant 0 : index
    %c0_1 = arith.constant 0 : index
    %3 = vector.load %arg10[%c0, %c0_1] : memref<8x128xf32, #tpu.memory_space<vmem>>, vector<8x128xf32>
    %c0_2 = arith.constant 0 : index
    %c0_3 = arith.constant 0 : index
    %c0_4 = arith.constant 0 : index
    %4 = vector.load %arg3[%c0_2, %c0_3, %c0_4] : memref<1x8x128xbf16, #tpu.memory_space<vmem>>, vector<1x8x128xbf16>
    %5 = vector.shape_cast %4 : vector<1x8x128xbf16> to vector<8x128xbf16>
    %c0_5 = arith.constant 0 : index
    %c0_6 = arith.constant 0 : index
    %c0_7 = arith.constant 0 : index
    %6 = vector.load %arg4[%c0_5, %c0_6, %c0_7] : memref<1x128x128xbf16, #tpu.memory_space<vmem>>, vector<1x128x128xbf16>
    %7 = vector.shape_cast %6 : vector<1x128x128xbf16> to vector<128x128xbf16>
    %cst = arith.constant dense<0.000000e+00> : vector<8x128xf32>
    %8 = tpu.matmul %5, %7, %cst {dimension_numbers = #tpu.dot_dimension_numbers<[1], [0], [0], [1], [0, 0, 1, 1], [], []>} : vector<8x128xbf16>, vector<128x128xbf16>, vector<8x128xf32> -> vector<8x128xf32>
    %9 = arith.addf %3, %8 : vector<8x128xf32>
    %c0_8 = arith.constant 0 : index
    %c0_9 = arith.constant 0 : index
    %10 = vector.load %arg10[%c0_8, %c0_9] : memref<8x128xf32, #tpu.memory_space<vmem>>, vector<8x128xf32>
    tpu.vector_store %arg10[%c0_8, %c0_9], %9 {strides = array<i32>} : memref<8x128xf32, #tpu.memory_space<vmem>>, vector<8x128xf32>,
    %c4_i32 = arith.constant 4 : i32
    %11 = arith.cmpi eq, %arg2, %c4_i32 : i32
    %12 = arith.extui %11 : i1 to i32
    %c0_i32_10 = arith.constant 0 : i32
    %13 = arith.cmpi ne, %12, %c0_i32_10 : i32
    scf.if %13 {
      %c0_12 = arith.constant 0 : index
      %c0_13 = arith.constant 0 : index
      %c0_14 = arith.constant 0 : index
      %17 = vector.load %arg3[%c0_12, %c0_13, %c0_14] : memref<1x8x128xbf16, #tpu.memory_space<vmem>>, vector<1x8x128xbf16>
      %18 = vector.shape_cast %17 : vector<1x8x128xbf16> to vector<8x128xbf16>
      %c0_15 = arith.constant 0 : index
      %c0_16 = arith.constant 0 : index
      %19 = vector.load %arg5[%c0_15, %c0_16] : memref<128x128xbf16, #tpu.memory_space<vmem>>, vector<128x128xbf16>
      %cst_17 = arith.constant dense<0.000000e+00> : vector<8x128xf32>
      %20 = tpu.matmul %18, %19, %cst_17 {dimension_numbers = #tpu.dot_dimension_numbers<[1], [0], [0], [1], [0, 0, 1, 1], [], []>} : vector<8x128xbf16>, vector<128x128xbf16>, vector<8x128xf32> -> vector<8x128xf32>
      %c0_18 = arith.constant 0 : index
      %c0_19 = arith.constant 0 : index
      %21 = vector.load %arg7[%c0_18, %c0_19] : memref<1x128xf32, #tpu.memory_space<vmem>>, vector<1x128xf32>
      %22 = vector.broadcast %21 : vector<1x128xf32> to vector<8x128xf32>
      %23 = arith.addf %20, %22 : vector<8x128xf32>
      %24 = arith.truncf %23 : vector<8x128xf32> to vector<8x128xbf16>
      %c0_20 = arith.constant 0 : index
      %c0_21 = arith.constant 0 : index
      %25 = vector.load %arg9[%c0_20, %c0_21] : memref<8x128xbf16, #tpu.memory_space<vmem>>, vector<8x128xbf16>
      tpu.vector_store %arg9[%c0_20, %c0_21], %24 {strides = array<i32>} : memref<8x128xbf16, #tpu.memory_space<vmem>>, vector<8x128xbf16>,
    } else {
    }
    %c8_i32 = arith.constant 8 : i32
    %14 = arith.cmpi eq, %arg2, %c8_i32 : i32
    %15 = arith.extui %14 : i1 to i32
    %c0_i32_11 = arith.constant 0 : i32
    %16 = arith.cmpi ne, %15, %c0_i32_11 : i32
    scf.if %16 {
      %c0_12 = arith.constant 0 : index
      %c0_13 = arith.constant 0 : index
      %17 = vector.load %arg10[%c0_12, %c0_13] : memref<8x128xf32, #tpu.memory_space<vmem>>, vector<8x128xf32>
      %c0_14 = arith.constant 0 : index
      %c0_15 = arith.constant 0 : index
      %18 = vector.load %arg6[%c0_14, %c0_15] : memref<1x128xf32, #tpu.memory_space<vmem>>, vector<1x128xf32>
      %19 = vector.broadcast %18 : vector<1x128xf32> to vector<8x128xf32>
      %20 = arith.addf %17, %19 : vector<8x128xf32>
      %cst_16 = arith.constant 0.000000e+00 : f32
      %21 = vector.broadcast %cst_16 : f32 to vector<8x128xf32>
      %22 = arith.maximumf %20, %21 : vector<8x128xf32>
      %23 = arith.truncf %22 : vector<8x128xf32> to vector<8x128xbf16>
      %c0_17 = arith.constant 0 : index
      %c0_18 = arith.constant 0 : index
      %24 = vector.load %arg8[%c0_17, %c0_18] : memref<8x128xbf16, #tpu.memory_space<vmem>>, vector<8x128xbf16>
      tpu.vector_store %arg8[%c0_17, %c0_18], %23 {strides = array<i32>} : memref<8x128xbf16, #tpu.memory_space<vmem>>, vector<8x128xbf16>,
    } else {
    }
    return
  }
  func.func @transform_0(%arg0: i32, %arg1: i32, %arg2: i32) -> (i32, i32, i32) {
    %c0_i32 = arith.constant 0 : i32
    %c0_i32_0 = arith.constant 0 : i32
    return %arg2, %arg0, %c0_i32 : i32, i32, i32
  }
  func.func @transform_1(%arg0: i32, %arg1: i32, %arg2: i32) -> (i32, i32, i32) {
    %c0_i32 = arith.constant 0 : i32
    %c0_i32_0 = arith.constant 0 : i32
    return %arg2, %c0_i32, %arg1 : i32, i32, i32
  }
  func.func @transform_2(%arg0: i32, %arg1: i32, %arg2: i32) -> (i32, i32) {
    %c0_i32 = arith.constant 0 : i32
    %c0_i32_0 = arith.constant 0 : i32
    return %c0_i32, %arg1 : i32, i32
  }
  func.func @transform_3(%arg0: i32, %arg1: i32, %arg2: i32) -> (i32, i32) {
    %c0_i32 = arith.constant 0 : i32
    %c0_i32_0 = arith.constant 0 : i32
    return %c0_i32, %arg1 : i32, i32
  }
  func.func @transform_4(%arg0: i32, %arg1: i32, %arg2: i32) -> (i32, i32) {
    %c0_i32 = arith.constant 0 : i32
    %c0_i32_0 = arith.constant 0 : i32
    return %c0_i32, %arg1 : i32, i32
  }
  func.func @transform_5(%arg0: i32, %arg1: i32, %arg2: i32) -> (i32, i32) {
    %c0_i32 = arith.constant 0 : i32
    return %arg0, %arg1 : i32, i32
  }
  func.func @transform_6(%arg0: i32, %arg1: i32, %arg2: i32) -> (i32, i32) {
    %c0_i32 = arith.constant 0 : i32
    return %arg0, %arg1 : i32, i32
  }
}

module attributes {stable_mosaic.version = 11 : i64} {
  func.func @_conv_kernel(%arg0: i32, %arg1: i32, %arg2: i32, %arg3: memref<1x8x256xbf16, #tpu.memory_space<vmem>>, %arg4: memref<1x256x128xbf16, #tpu.memory_space<vmem>>, %arg5: memref<1x128xf32, #tpu.memory_space<vmem>>, %arg6: memref<8x128xbf16, #tpu.memory_space<vmem>>, %arg7: memref<8x128xf32, #tpu.memory_space<vmem>>) attributes {dimension_semantics = [#tpu.dimension_semantics<parallel>, #tpu.dimension_semantics<parallel>, #tpu.dimension_semantics<arbitrary>], iteration_bounds = array<i64: 1, 2, 9>, scalar_prefetch = 0 : i64, scratch_operands = 1 : i64, tpu.core_type = #tpu.core_type<tc>, window_params = [{transform_indices = @transform_0, window_bounds = array<i64: 1, 8, 256>}, {transform_indices = @transform_1, window_bounds = array<i64: 1, 256, 128>}, {transform_indices = @transform_2, window_bounds = array<i64: 1, 128>}, {transform_indices = @transform_3, window_bounds = array<i64: 8, 128>}]} {
    %c0_i32 = arith.constant 0 : i32
    %0 = arith.cmpi eq, %arg2, %c0_i32 : i32
    %1 = arith.extui %0 : i1 to i32
    %c0_i32_0 = arith.constant 0 : i32
    %2 = arith.cmpi ne, %1, %c0_i32_0 : i32
    scf.if %2 {
      %cst_11 = arith.constant 0.000000e+00 : f32
      %14 = vector.broadcast %cst_11 : f32 to vector<8x128xf32>
      %c0_12 = arith.constant 0 : index
      %c0_13 = arith.constant 0 : index
      %15 = vector.load %arg7[%c0_12, %c0_13] : memref<8x128xf32, #tpu.memory_space<vmem>>, vector<8x128xf32>
      tpu.vector_store %arg7[%c0_12, %c0_13], %14 {strides = array<i32>} : memref<8x128xf32, #tpu.memory_space<vmem>>, vector<8x128xf32>,
    } else {
    }
    %c0 = arith.constant 0 : index
    %c0_1 = arith.constant 0 : index
    %3 = vector.load %arg7[%c0, %c0_1] : memref<8x128xf32, #tpu.memory_space<vmem>>, vector<8x128xf32>
    %c0_2 = arith.constant 0 : index
    %c0_3 = arith.constant 0 : index
    %c0_4 = arith.constant 0 : index
    %4 = vector.load %arg3[%c0_2, %c0_3, %c0_4] : memref<1x8x256xbf16, #tpu.memory_space<vmem>>, vector<1x8x256xbf16>
    %5 = vector.shape_cast %4 : vector<1x8x256xbf16> to vector<8x256xbf16>
    %c0_5 = arith.constant 0 : index
    %c0_6 = arith.constant 0 : index
    %c0_7 = arith.constant 0 : index
    %6 = vector.load %arg4[%c0_5, %c0_6, %c0_7] : memref<1x256x128xbf16, #tpu.memory_space<vmem>>, vector<1x256x128xbf16>
    %7 = vector.shape_cast %6 : vector<1x256x128xbf16> to vector<256x128xbf16>
    %cst = arith.constant dense<0.000000e+00> : vector<8x128xf32>
    %8 = tpu.matmul %5, %7, %cst {dimension_numbers = #tpu.dot_dimension_numbers<[1], [0], [0], [1], [0, 0, 1, 1], [], []>} : vector<8x256xbf16>, vector<256x128xbf16>, vector<8x128xf32> -> vector<8x128xf32>
    %9 = arith.addf %3, %8 : vector<8x128xf32>
    %c0_8 = arith.constant 0 : index
    %c0_9 = arith.constant 0 : index
    %10 = vector.load %arg7[%c0_8, %c0_9] : memref<8x128xf32, #tpu.memory_space<vmem>>, vector<8x128xf32>
    tpu.vector_store %arg7[%c0_8, %c0_9], %9 {strides = array<i32>} : memref<8x128xf32, #tpu.memory_space<vmem>>, vector<8x128xf32>,
    %c8_i32 = arith.constant 8 : i32
    %11 = arith.cmpi eq, %arg2, %c8_i32 : i32
    %12 = arith.extui %11 : i1 to i32
    %c0_i32_10 = arith.constant 0 : i32
    %13 = arith.cmpi ne, %12, %c0_i32_10 : i32
    scf.if %13 {
      %c0_11 = arith.constant 0 : index
      %c0_12 = arith.constant 0 : index
      %14 = vector.load %arg7[%c0_11, %c0_12] : memref<8x128xf32, #tpu.memory_space<vmem>>, vector<8x128xf32>
      %c0_13 = arith.constant 0 : index
      %c0_14 = arith.constant 0 : index
      %15 = vector.load %arg5[%c0_13, %c0_14] : memref<1x128xf32, #tpu.memory_space<vmem>>, vector<1x128xf32>
      %16 = vector.broadcast %15 : vector<1x128xf32> to vector<8x128xf32>
      %17 = arith.addf %14, %16 : vector<8x128xf32>
      %cst_15 = arith.constant 0.000000e+00 : f32
      %18 = vector.broadcast %cst_15 : f32 to vector<8x128xf32>
      %19 = arith.maximumf %17, %18 : vector<8x128xf32>
      %20 = arith.truncf %19 : vector<8x128xf32> to vector<8x128xbf16>
      %c0_16 = arith.constant 0 : index
      %c0_17 = arith.constant 0 : index
      %21 = vector.load %arg6[%c0_16, %c0_17] : memref<8x128xbf16, #tpu.memory_space<vmem>>, vector<8x128xbf16>
      tpu.vector_store %arg6[%c0_16, %c0_17], %20 {strides = array<i32>} : memref<8x128xbf16, #tpu.memory_space<vmem>>, vector<8x128xbf16>,
    } else {
    }
    return
  }
  func.func @transform_0(%arg0: i32, %arg1: i32, %arg2: i32) -> (i32, i32, i32) {
    %c0_i32 = arith.constant 0 : i32
    %c0_i32_0 = arith.constant 0 : i32
    return %arg2, %arg0, %c0_i32 : i32, i32, i32
  }
  func.func @transform_1(%arg0: i32, %arg1: i32, %arg2: i32) -> (i32, i32, i32) {
    %c0_i32 = arith.constant 0 : i32
    %c0_i32_0 = arith.constant 0 : i32
    return %arg2, %c0_i32, %arg1 : i32, i32, i32
  }
  func.func @transform_2(%arg0: i32, %arg1: i32, %arg2: i32) -> (i32, i32) {
    %c0_i32 = arith.constant 0 : i32
    %c0_i32_0 = arith.constant 0 : i32
    return %c0_i32, %arg1 : i32, i32
  }
  func.func @transform_3(%arg0: i32, %arg1: i32, %arg2: i32) -> (i32, i32) {
    %c0_i32 = arith.constant 0 : i32
    return %arg0, %arg1 : i32, i32
  }
}

module attributes {stable_mosaic.version = 11 : i64} {
  func.func @_conv_kernel(%arg0: i32, %arg1: i32, %arg2: i32, %arg3: memref<1x8x256xbf16, #tpu.memory_space<vmem>>, %arg4: memref<1x256x128xbf16, #tpu.memory_space<vmem>>, %arg5: memref<1x128xf32, #tpu.memory_space<vmem>>, %arg6: memref<8x128xbf16, #tpu.memory_space<vmem>>, %arg7: memref<8x128xbf16, #tpu.memory_space<vmem>>, %arg8: memref<8x128xf32, #tpu.memory_space<vmem>>) attributes {dimension_semantics = [#tpu.dimension_semantics<parallel>, #tpu.dimension_semantics<parallel>, #tpu.dimension_semantics<arbitrary>], iteration_bounds = array<i64: 1, 2, 9>, scalar_prefetch = 0 : i64, scratch_operands = 1 : i64, tpu.core_type = #tpu.core_type<tc>, window_params = [{transform_indices = @transform_0, window_bounds = array<i64: 1, 8, 256>}, {transform_indices = @transform_1, window_bounds = array<i64: 1, 256, 128>}, {transform_indices = @transform_2, window_bounds = array<i64: 1, 128>}, {transform_indices = @transform_3, window_bounds = array<i64: 8, 128>}, {transform_indices = @transform_4, window_bounds = array<i64: 8, 128>}]} {
    %c0_i32 = arith.constant 0 : i32
    %0 = arith.cmpi eq, %arg2, %c0_i32 : i32
    %1 = arith.extui %0 : i1 to i32
    %c0_i32_0 = arith.constant 0 : i32
    %2 = arith.cmpi ne, %1, %c0_i32_0 : i32
    scf.if %2 {
      %cst_11 = arith.constant 0.000000e+00 : f32
      %14 = vector.broadcast %cst_11 : f32 to vector<8x128xf32>
      %c0_12 = arith.constant 0 : index
      %c0_13 = arith.constant 0 : index
      %15 = vector.load %arg8[%c0_12, %c0_13] : memref<8x128xf32, #tpu.memory_space<vmem>>, vector<8x128xf32>
      tpu.vector_store %arg8[%c0_12, %c0_13], %14 {strides = array<i32>} : memref<8x128xf32, #tpu.memory_space<vmem>>, vector<8x128xf32>,
    } else {
    }
    %c0 = arith.constant 0 : index
    %c0_1 = arith.constant 0 : index
    %3 = vector.load %arg8[%c0, %c0_1] : memref<8x128xf32, #tpu.memory_space<vmem>>, vector<8x128xf32>
    %c0_2 = arith.constant 0 : index
    %c0_3 = arith.constant 0 : index
    %c0_4 = arith.constant 0 : index
    %4 = vector.load %arg3[%c0_2, %c0_3, %c0_4] : memref<1x8x256xbf16, #tpu.memory_space<vmem>>, vector<1x8x256xbf16>
    %5 = vector.shape_cast %4 : vector<1x8x256xbf16> to vector<8x256xbf16>
    %c0_5 = arith.constant 0 : index
    %c0_6 = arith.constant 0 : index
    %c0_7 = arith.constant 0 : index
    %6 = vector.load %arg4[%c0_5, %c0_6, %c0_7] : memref<1x256x128xbf16, #tpu.memory_space<vmem>>, vector<1x256x128xbf16>
    %7 = vector.shape_cast %6 : vector<1x256x128xbf16> to vector<256x128xbf16>
    %cst = arith.constant dense<0.000000e+00> : vector<8x128xf32>
    %8 = tpu.matmul %5, %7, %cst {dimension_numbers = #tpu.dot_dimension_numbers<[1], [0], [0], [1], [0, 0, 1, 1], [], []>} : vector<8x256xbf16>, vector<256x128xbf16>, vector<8x128xf32> -> vector<8x128xf32>
    %9 = arith.addf %3, %8 : vector<8x128xf32>
    %c0_8 = arith.constant 0 : index
    %c0_9 = arith.constant 0 : index
    %10 = vector.load %arg8[%c0_8, %c0_9] : memref<8x128xf32, #tpu.memory_space<vmem>>, vector<8x128xf32>
    tpu.vector_store %arg8[%c0_8, %c0_9], %9 {strides = array<i32>} : memref<8x128xf32, #tpu.memory_space<vmem>>, vector<8x128xf32>,
    %c8_i32 = arith.constant 8 : i32
    %11 = arith.cmpi eq, %arg2, %c8_i32 : i32
    %12 = arith.extui %11 : i1 to i32
    %c0_i32_10 = arith.constant 0 : i32
    %13 = arith.cmpi ne, %12, %c0_i32_10 : i32
    scf.if %13 {
      %c0_11 = arith.constant 0 : index
      %c0_12 = arith.constant 0 : index
      %14 = vector.load %arg8[%c0_11, %c0_12] : memref<8x128xf32, #tpu.memory_space<vmem>>, vector<8x128xf32>
      %c0_13 = arith.constant 0 : index
      %c0_14 = arith.constant 0 : index
      %15 = vector.load %arg5[%c0_13, %c0_14] : memref<1x128xf32, #tpu.memory_space<vmem>>, vector<1x128xf32>
      %16 = vector.broadcast %15 : vector<1x128xf32> to vector<8x128xf32>
      %17 = arith.addf %14, %16 : vector<8x128xf32>
      %c0_15 = arith.constant 0 : index
      %c0_16 = arith.constant 0 : index
      %18 = vector.load %arg6[%c0_15, %c0_16] : memref<8x128xbf16, #tpu.memory_space<vmem>>, vector<8x128xbf16>
      %19 = arith.extf %18 : vector<8x128xbf16> to vector<8x128xf32>
      %20 = arith.addf %17, %19 : vector<8x128xf32>
      %cst_17 = arith.constant 0.000000e+00 : f32
      %21 = vector.broadcast %cst_17 : f32 to vector<8x128xf32>
      %22 = arith.maximumf %20, %21 : vector<8x128xf32>
      %23 = arith.truncf %22 : vector<8x128xf32> to vector<8x128xbf16>
      %c0_18 = arith.constant 0 : index
      %c0_19 = arith.constant 0 : index
      %24 = vector.load %arg7[%c0_18, %c0_19] : memref<8x128xbf16, #tpu.memory_space<vmem>>, vector<8x128xbf16>
      tpu.vector_store %arg7[%c0_18, %c0_19], %23 {strides = array<i32>} : memref<8x128xbf16, #tpu.memory_space<vmem>>, vector<8x128xbf16>,
    } else {
    }
    return
  }
  func.func @transform_0(%arg0: i32, %arg1: i32, %arg2: i32) -> (i32, i32, i32) {
    %c0_i32 = arith.constant 0 : i32
    %c0_i32_0 = arith.constant 0 : i32
    return %arg2, %arg0, %c0_i32 : i32, i32, i32
  }
  func.func @transform_1(%arg0: i32, %arg1: i32, %arg2: i32) -> (i32, i32, i32) {
    %c0_i32 = arith.constant 0 : i32
    %c0_i32_0 = arith.constant 0 : i32
    return %arg2, %c0_i32, %arg1 : i32, i32, i32
  }
  func.func @transform_2(%arg0: i32, %arg1: i32, %arg2: i32) -> (i32, i32) {
    %c0_i32 = arith.constant 0 : i32
    %c0_i32_0 = arith.constant 0 : i32
    return %c0_i32, %arg1 : i32, i32
  }
  func.func @transform_3(%arg0: i32, %arg1: i32, %arg2: i32) -> (i32, i32) {
    %c0_i32 = arith.constant 0 : i32
    return %arg0, %arg1 : i32, i32
  }
  func.func @transform_4(%arg0: i32, %arg1: i32, %arg2: i32) -> (i32, i32) {
    %c0_i32 = arith.constant 0 : i32
    return %arg0, %arg1 : i32, i32
  }
}

module attributes {stable_mosaic.version = 11 : i64} {
  func.func @_conv_kernel(%arg0: i32, %arg1: i32, %arg2: i32, %arg3: memref<1x8x256xbf16, #tpu.memory_space<vmem>>, %arg4: memref<1x256x128xbf16, #tpu.memory_space<vmem>>, %arg5: memref<1x128xf32, #tpu.memory_space<vmem>>, %arg6: memref<8x128xbf16, #tpu.memory_space<vmem>>, %arg7: memref<8x128xbf16, #tpu.memory_space<vmem>>, %arg8: memref<8x128xf32, #tpu.memory_space<vmem>>) attributes {dimension_semantics = [#tpu.dimension_semantics<parallel>, #tpu.dimension_semantics<parallel>, #tpu.dimension_semantics<arbitrary>], iteration_bounds = array<i64: 1, 2, 9>, scalar_prefetch = 0 : i64, scratch_operands = 1 : i64, tpu.core_type = #tpu.core_type<tc>, window_params = [{transform_indices = @transform_0, window_bounds = array<i64: 1, 8, 256>}, {transform_indices = @transform_1, window_bounds = array<i64: 1, 256, 128>}, {transform_indices = @transform_2, window_bounds = array<i64: 1, 128>}, {transform_indices = @transform_3, window_bounds = array<i64: 8, 128>}, {transform_indices = @transform_4, window_bounds = array<i64: 8, 128>}]} {
    %c0_i32 = arith.constant 0 : i32
    %0 = arith.cmpi eq, %arg2, %c0_i32 : i32
    %1 = arith.extui %0 : i1 to i32
    %c0_i32_0 = arith.constant 0 : i32
    %2 = arith.cmpi ne, %1, %c0_i32_0 : i32
    scf.if %2 {
      %cst_11 = arith.constant 0.000000e+00 : f32
      %14 = vector.broadcast %cst_11 : f32 to vector<8x128xf32>
      %c0_12 = arith.constant 0 : index
      %c0_13 = arith.constant 0 : index
      %15 = vector.load %arg8[%c0_12, %c0_13] : memref<8x128xf32, #tpu.memory_space<vmem>>, vector<8x128xf32>
      tpu.vector_store %arg8[%c0_12, %c0_13], %14 {strides = array<i32>} : memref<8x128xf32, #tpu.memory_space<vmem>>, vector<8x128xf32>,
    } else {
    }
    %c0 = arith.constant 0 : index
    %c0_1 = arith.constant 0 : index
    %3 = vector.load %arg8[%c0, %c0_1] : memref<8x128xf32, #tpu.memory_space<vmem>>, vector<8x128xf32>
    %c0_2 = arith.constant 0 : index
    %c0_3 = arith.constant 0 : index
    %c0_4 = arith.constant 0 : index
    %4 = vector.load %arg3[%c0_2, %c0_3, %c0_4] : memref<1x8x256xbf16, #tpu.memory_space<vmem>>, vector<1x8x256xbf16>
    %5 = vector.shape_cast %4 : vector<1x8x256xbf16> to vector<8x256xbf16>
    %c0_5 = arith.constant 0 : index
    %c0_6 = arith.constant 0 : index
    %c0_7 = arith.constant 0 : index
    %6 = vector.load %arg4[%c0_5, %c0_6, %c0_7] : memref<1x256x128xbf16, #tpu.memory_space<vmem>>, vector<1x256x128xbf16>
    %7 = vector.shape_cast %6 : vector<1x256x128xbf16> to vector<256x128xbf16>
    %cst = arith.constant dense<0.000000e+00> : vector<8x128xf32>
    %8 = tpu.matmul %5, %7, %cst {dimension_numbers = #tpu.dot_dimension_numbers<[1], [0], [0], [1], [0, 0, 1, 1], [], []>} : vector<8x256xbf16>, vector<256x128xbf16>, vector<8x128xf32> -> vector<8x128xf32>
    %9 = arith.addf %3, %8 : vector<8x128xf32>
    %c0_8 = arith.constant 0 : index
    %c0_9 = arith.constant 0 : index
    %10 = vector.load %arg8[%c0_8, %c0_9] : memref<8x128xf32, #tpu.memory_space<vmem>>, vector<8x128xf32>
    tpu.vector_store %arg8[%c0_8, %c0_9], %9 {strides = array<i32>} : memref<8x128xf32, #tpu.memory_space<vmem>>, vector<8x128xf32>,
    %c8_i32 = arith.constant 8 : i32
    %11 = arith.cmpi eq, %arg2, %c8_i32 : i32
    %12 = arith.extui %11 : i1 to i32
    %c0_i32_10 = arith.constant 0 : i32
    %13 = arith.cmpi ne, %12, %c0_i32_10 : i32
    scf.if %13 {
      %c0_11 = arith.constant 0 : index
      %c0_12 = arith.constant 0 : index
      %14 = vector.load %arg8[%c0_11, %c0_12] : memref<8x128xf32, #tpu.memory_space<vmem>>, vector<8x128xf32>
      %c0_13 = arith.constant 0 : index
      %c0_14 = arith.constant 0 : index
      %15 = vector.load %arg5[%c0_13, %c0_14] : memref<1x128xf32, #tpu.memory_space<vmem>>, vector<1x128xf32>
      %16 = vector.broadcast %15 : vector<1x128xf32> to vector<8x128xf32>
      %17 = arith.addf %14, %16 : vector<8x128xf32>
      %c0_15 = arith.constant 0 : index
      %c0_16 = arith.constant 0 : index
      %18 = vector.load %arg6[%c0_15, %c0_16] : memref<8x128xbf16, #tpu.memory_space<vmem>>, vector<8x128xbf16>
      %19 = arith.extf %18 : vector<8x128xbf16> to vector<8x128xf32>
      %20 = arith.addf %17, %19 : vector<8x128xf32>
      %cst_17 = arith.constant 0.000000e+00 : f32
      %21 = vector.broadcast %cst_17 : f32 to vector<8x128xf32>
      %22 = arith.maximumf %20, %21 : vector<8x128xf32>
      %23 = arith.truncf %22 : vector<8x128xf32> to vector<8x128xbf16>
      %c0_18 = arith.constant 0 : index
      %c0_19 = arith.constant 0 : index
      %24 = vector.load %arg7[%c0_18, %c0_19] : memref<8x128xbf16, #tpu.memory_space<vmem>>, vector<8x128xbf16>
      tpu.vector_store %arg7[%c0_18, %c0_19], %23 {strides = array<i32>} : memref<8x128xbf16, #tpu.memory_space<vmem>>, vector<8x128xbf16>,
    } else {
    }
    return
  }
  func.func @transform_0(%arg0: i32, %arg1: i32, %arg2: i32) -> (i32, i32, i32) {
    %c0_i32 = arith.constant 0 : i32
    %c0_i32_0 = arith.constant 0 : i32
    return %arg2, %arg0, %c0_i32 : i32, i32, i32
  }
  func.func @transform_1(%arg0: i32, %arg1: i32, %arg2: i32) -> (i32, i32, i32) {
    %c0_i32 = arith.constant 0 : i32
    %c0_i32_0 = arith.constant 0 : i32
    return %arg2, %c0_i32, %arg1 : i32, i32, i32
  }
  func.func @transform_2(%arg0: i32, %arg1: i32, %arg2: i32) -> (i32, i32) {
    %c0_i32 = arith.constant 0 : i32
    %c0_i32_0 = arith.constant 0 : i32
    return %c0_i32, %arg1 : i32, i32
  }
  func.func @transform_3(%arg0: i32, %arg1: i32, %arg2: i32) -> (i32, i32) {
    %c0_i32 = arith.constant 0 : i32
    return %arg0, %arg1 : i32, i32
  }
  func.func @transform_4(%arg0: i32, %arg1: i32, %arg2: i32) -> (i32, i32) {
    %c0_i32 = arith.constant 0 : i32
    return %arg0, %arg1 : i32, i32
  }
}

module attributes {stable_mosaic.version = 11 : i64} {
  func.func @_conv_kernel(%arg0: i32, %arg1: i32, %arg2: i32, %arg3: memref<1x2x256xbf16, #tpu.memory_space<vmem>>, %arg4: memref<1x256x256xbf16, #tpu.memory_space<vmem>>, %arg5: memref<256x256xbf16, #tpu.memory_space<vmem>>, %arg6: memref<1x256xf32, #tpu.memory_space<vmem>>, %arg7: memref<1x256xf32, #tpu.memory_space<vmem>>, %arg8: memref<2x256xbf16, #tpu.memory_space<vmem>>, %arg9: memref<2x256xbf16, #tpu.memory_space<vmem>>, %arg10: memref<2x256xf32, #tpu.memory_space<vmem>>) attributes {dimension_semantics = [#tpu.dimension_semantics<parallel>, #tpu.dimension_semantics<parallel>, #tpu.dimension_semantics<arbitrary>], iteration_bounds = array<i64: 1, 2, 9>, scalar_prefetch = 0 : i64, scratch_operands = 1 : i64, tpu.core_type = #tpu.core_type<tc>, window_params = [{transform_indices = @transform_0, window_bounds = array<i64: 1, 2, 256>}, {transform_indices = @transform_1, window_bounds = array<i64: 1, 256, 256>}, {transform_indices = @transform_2, window_bounds = array<i64: 256, 256>}, {transform_indices = @transform_3, window_bounds = array<i64: 1, 256>}, {transform_indices = @transform_4, window_bounds = array<i64: 1, 256>}, {transform_indices = @transform_5, window_bounds = array<i64: 2, 256>}, {transform_indices = @transform_6, window_bounds = array<i64: 2, 256>}]} {
    %c0_i32 = arith.constant 0 : i32
    %0 = arith.cmpi eq, %arg2, %c0_i32 : i32
    %1 = arith.extui %0 : i1 to i32
    %c0_i32_0 = arith.constant 0 : i32
    %2 = arith.cmpi ne, %1, %c0_i32_0 : i32
    scf.if %2 {
      %cst_12 = arith.constant 0.000000e+00 : f32
      %17 = vector.broadcast %cst_12 : f32 to vector<2x256xf32>
      %c0_13 = arith.constant 0 : index
      %c0_14 = arith.constant 0 : index
      %18 = vector.load %arg10[%c0_13, %c0_14] : memref<2x256xf32, #tpu.memory_space<vmem>>, vector<2x256xf32>
      tpu.vector_store %arg10[%c0_13, %c0_14], %17 {strides = array<i32>} : memref<2x256xf32, #tpu.memory_space<vmem>>, vector<2x256xf32>,
    } else {
    }
    %c0 = arith.constant 0 : index
    %c0_1 = arith.constant 0 : index
    %3 = vector.load %arg10[%c0, %c0_1] : memref<2x256xf32, #tpu.memory_space<vmem>>, vector<2x256xf32>
    %c0_2 = arith.constant 0 : index
    %c0_3 = arith.constant 0 : index
    %c0_4 = arith.constant 0 : index
    %4 = vector.load %arg3[%c0_2, %c0_3, %c0_4] : memref<1x2x256xbf16, #tpu.memory_space<vmem>>, vector<1x2x256xbf16>
    %5 = vector.shape_cast %4 : vector<1x2x256xbf16> to vector<2x256xbf16>
    %c0_5 = arith.constant 0 : index
    %c0_6 = arith.constant 0 : index
    %c0_7 = arith.constant 0 : index
    %6 = vector.load %arg4[%c0_5, %c0_6, %c0_7] : memref<1x256x256xbf16, #tpu.memory_space<vmem>>, vector<1x256x256xbf16>
    %7 = vector.shape_cast %6 : vector<1x256x256xbf16> to vector<256x256xbf16>
    %cst = arith.constant dense<0.000000e+00> : vector<2x256xf32>
    %8 = tpu.matmul %5, %7, %cst {dimension_numbers = #tpu.dot_dimension_numbers<[1], [0], [0], [1], [0, 0, 1, 1], [], []>} : vector<2x256xbf16>, vector<256x256xbf16>, vector<2x256xf32> -> vector<2x256xf32>
    %9 = arith.addf %3, %8 : vector<2x256xf32>
    %c0_8 = arith.constant 0 : index
    %c0_9 = arith.constant 0 : index
    %10 = vector.load %arg10[%c0_8, %c0_9] : memref<2x256xf32, #tpu.memory_space<vmem>>, vector<2x256xf32>
    tpu.vector_store %arg10[%c0_8, %c0_9], %9 {strides = array<i32>} : memref<2x256xf32, #tpu.memory_space<vmem>>, vector<2x256xf32>,
    %c4_i32 = arith.constant 4 : i32
    %11 = arith.cmpi eq, %arg2, %c4_i32 : i32
    %12 = arith.extui %11 : i1 to i32
    %c0_i32_10 = arith.constant 0 : i32
    %13 = arith.cmpi ne, %12, %c0_i32_10 : i32
    scf.if %13 {
      %c0_12 = arith.constant 0 : index
      %c0_13 = arith.constant 0 : index
      %c0_14 = arith.constant 0 : index
      %17 = vector.load %arg3[%c0_12, %c0_13, %c0_14] : memref<1x2x256xbf16, #tpu.memory_space<vmem>>, vector<1x2x256xbf16>
      %18 = vector.shape_cast %17 : vector<1x2x256xbf16> to vector<2x256xbf16>
      %c0_15 = arith.constant 0 : index
      %c0_16 = arith.constant 0 : index
      %19 = vector.load %arg5[%c0_15, %c0_16] : memref<256x256xbf16, #tpu.memory_space<vmem>>, vector<256x256xbf16>
      %cst_17 = arith.constant dense<0.000000e+00> : vector<2x256xf32>
      %20 = tpu.matmul %18, %19, %cst_17 {dimension_numbers = #tpu.dot_dimension_numbers<[1], [0], [0], [1], [0, 0, 1, 1], [], []>} : vector<2x256xbf16>, vector<256x256xbf16>, vector<2x256xf32> -> vector<2x256xf32>
      %c0_18 = arith.constant 0 : index
      %c0_19 = arith.constant 0 : index
      %21 = vector.load %arg7[%c0_18, %c0_19] : memref<1x256xf32, #tpu.memory_space<vmem>>, vector<1x256xf32>
      %22 = vector.broadcast %21 : vector<1x256xf32> to vector<2x256xf32>
      %23 = arith.addf %20, %22 : vector<2x256xf32>
      %24 = arith.truncf %23 : vector<2x256xf32> to vector<2x256xbf16>
      %c0_20 = arith.constant 0 : index
      %c0_21 = arith.constant 0 : index
      %25 = vector.load %arg9[%c0_20, %c0_21] : memref<2x256xbf16, #tpu.memory_space<vmem>>, vector<2x256xbf16>
      tpu.vector_store %arg9[%c0_20, %c0_21], %24 {strides = array<i32>} : memref<2x256xbf16, #tpu.memory_space<vmem>>, vector<2x256xbf16>,
    } else {
    }
    %c8_i32 = arith.constant 8 : i32
    %14 = arith.cmpi eq, %arg2, %c8_i32 : i32
    %15 = arith.extui %14 : i1 to i32
    %c0_i32_11 = arith.constant 0 : i32
    %16 = arith.cmpi ne, %15, %c0_i32_11 : i32
    scf.if %16 {
      %c0_12 = arith.constant 0 : index
      %c0_13 = arith.constant 0 : index
      %17 = vector.load %arg10[%c0_12, %c0_13] : memref<2x256xf32, #tpu.memory_space<vmem>>, vector<2x256xf32>
      %c0_14 = arith.constant 0 : index
      %c0_15 = arith.constant 0 : index
      %18 = vector.load %arg6[%c0_14, %c0_15] : memref<1x256xf32, #tpu.memory_space<vmem>>, vector<1x256xf32>
      %19 = vector.broadcast %18 : vector<1x256xf32> to vector<2x256xf32>
      %20 = arith.addf %17, %19 : vector<2x256xf32>
      %cst_16 = arith.constant 0.000000e+00 : f32
      %21 = vector.broadcast %cst_16 : f32 to vector<2x256xf32>
      %22 = arith.maximumf %20, %21 : vector<2x256xf32>
      %23 = arith.truncf %22 : vector<2x256xf32> to vector<2x256xbf16>
      %c0_17 = arith.constant 0 : index
      %c0_18 = arith.constant 0 : index
      %24 = vector.load %arg8[%c0_17, %c0_18] : memref<2x256xbf16, #tpu.memory_space<vmem>>, vector<2x256xbf16>
      tpu.vector_store %arg8[%c0_17, %c0_18], %23 {strides = array<i32>} : memref<2x256xbf16, #tpu.memory_space<vmem>>, vector<2x256xbf16>,
    } else {
    }
    return
  }
  func.func @transform_0(%arg0: i32, %arg1: i32, %arg2: i32) -> (i32, i32, i32) {
    %c0_i32 = arith.constant 0 : i32
    %c0_i32_0 = arith.constant 0 : i32
    return %arg2, %arg0, %c0_i32 : i32, i32, i32
  }
  func.func @transform_1(%arg0: i32, %arg1: i32, %arg2: i32) -> (i32, i32, i32) {
    %c0_i32 = arith.constant 0 : i32
    %c0_i32_0 = arith.constant 0 : i32
    return %arg2, %c0_i32, %arg1 : i32, i32, i32
  }
  func.func @transform_2(%arg0: i32, %arg1: i32, %arg2: i32) -> (i32, i32) {
    %c0_i32 = arith.constant 0 : i32
    %c0_i32_0 = arith.constant 0 : i32
    return %c0_i32, %arg1 : i32, i32
  }
  func.func @transform_3(%arg0: i32, %arg1: i32, %arg2: i32) -> (i32, i32) {
    %c0_i32 = arith.constant 0 : i32
    %c0_i32_0 = arith.constant 0 : i32
    return %c0_i32, %arg1 : i32, i32
  }
  func.func @transform_4(%arg0: i32, %arg1: i32, %arg2: i32) -> (i32, i32) {
    %c0_i32 = arith.constant 0 : i32
    %c0_i32_0 = arith.constant 0 : i32
    return %c0_i32, %arg1 : i32, i32
  }
  func.func @transform_5(%arg0: i32, %arg1: i32, %arg2: i32) -> (i32, i32) {
    %c0_i32 = arith.constant 0 : i32
    return %arg0, %arg1 : i32, i32
  }
  func.func @transform_6(%arg0: i32, %arg1: i32, %arg2: i32) -> (i32, i32) {
    %c0_i32 = arith.constant 0 : i32
    return %arg0, %arg1 : i32, i32
  }
}

module attributes {stable_mosaic.version = 11 : i64} {
  func.func @_conv_kernel(%arg0: i32, %arg1: i32, %arg2: i32, %arg3: memref<1x2x512xbf16, #tpu.memory_space<vmem>>, %arg4: memref<1x512x256xbf16, #tpu.memory_space<vmem>>, %arg5: memref<1x256xf32, #tpu.memory_space<vmem>>, %arg6: memref<2x256xbf16, #tpu.memory_space<vmem>>, %arg7: memref<2x256xbf16, #tpu.memory_space<vmem>>, %arg8: memref<2x256xf32, #tpu.memory_space<vmem>>) attributes {dimension_semantics = [#tpu.dimension_semantics<parallel>, #tpu.dimension_semantics<parallel>, #tpu.dimension_semantics<arbitrary>], iteration_bounds = array<i64: 1, 2, 9>, scalar_prefetch = 0 : i64, scratch_operands = 1 : i64, tpu.core_type = #tpu.core_type<tc>, window_params = [{transform_indices = @transform_0, window_bounds = array<i64: 1, 2, 512>}, {transform_indices = @transform_1, window_bounds = array<i64: 1, 512, 256>}, {transform_indices = @transform_2, window_bounds = array<i64: 1, 256>}, {transform_indices = @transform_3, window_bounds = array<i64: 2, 256>}, {transform_indices = @transform_4, window_bounds = array<i64: 2, 256>}]} {
    %c0_i32 = arith.constant 0 : i32
    %0 = arith.cmpi eq, %arg2, %c0_i32 : i32
    %1 = arith.extui %0 : i1 to i32
    %c0_i32_0 = arith.constant 0 : i32
    %2 = arith.cmpi ne, %1, %c0_i32_0 : i32
    scf.if %2 {
      %cst_11 = arith.constant 0.000000e+00 : f32
      %14 = vector.broadcast %cst_11 : f32 to vector<2x256xf32>
      %c0_12 = arith.constant 0 : index
      %c0_13 = arith.constant 0 : index
      %15 = vector.load %arg8[%c0_12, %c0_13] : memref<2x256xf32, #tpu.memory_space<vmem>>, vector<2x256xf32>
      tpu.vector_store %arg8[%c0_12, %c0_13], %14 {strides = array<i32>} : memref<2x256xf32, #tpu.memory_space<vmem>>, vector<2x256xf32>,
    } else {
    }
    %c0 = arith.constant 0 : index
    %c0_1 = arith.constant 0 : index
    %3 = vector.load %arg8[%c0, %c0_1] : memref<2x256xf32, #tpu.memory_space<vmem>>, vector<2x256xf32>
    %c0_2 = arith.constant 0 : index
    %c0_3 = arith.constant 0 : index
    %c0_4 = arith.constant 0 : index
    %4 = vector.load %arg3[%c0_2, %c0_3, %c0_4] : memref<1x2x512xbf16, #tpu.memory_space<vmem>>, vector<1x2x512xbf16>
    %5 = vector.shape_cast %4 : vector<1x2x512xbf16> to vector<2x512xbf16>
    %c0_5 = arith.constant 0 : index
    %c0_6 = arith.constant 0 : index
    %c0_7 = arith.constant 0 : index
    %6 = vector.load %arg4[%c0_5, %c0_6, %c0_7] : memref<1x512x256xbf16, #tpu.memory_space<vmem>>, vector<1x512x256xbf16>
    %7 = vector.shape_cast %6 : vector<1x512x256xbf16> to vector<512x256xbf16>
    %cst = arith.constant dense<0.000000e+00> : vector<2x256xf32>
    %8 = tpu.matmul %5, %7, %cst {dimension_numbers = #tpu.dot_dimension_numbers<[1], [0], [0], [1], [0, 0, 1, 1], [], []>} : vector<2x512xbf16>, vector<512x256xbf16>, vector<2x256xf32> -> vector<2x256xf32>
    %9 = arith.addf %3, %8 : vector<2x256xf32>
    %c0_8 = arith.constant 0 : index
    %c0_9 = arith.constant 0 : index
    %10 = vector.load %arg8[%c0_8, %c0_9] : memref<2x256xf32, #tpu.memory_space<vmem>>, vector<2x256xf32>
    tpu.vector_store %arg8[%c0_8, %c0_9], %9 {strides = array<i32>} : memref<2x256xf32, #tpu.memory_space<vmem>>, vector<2x256xf32>,
    %c8_i32 = arith.constant 8 : i32
    %11 = arith.cmpi eq, %arg2, %c8_i32 : i32
    %12 = arith.extui %11 : i1 to i32
    %c0_i32_10 = arith.constant 0 : i32
    %13 = arith.cmpi ne, %12, %c0_i32_10 : i32
    scf.if %13 {
      %c0_11 = arith.constant 0 : index
      %c0_12 = arith.constant 0 : index
      %14 = vector.load %arg8[%c0_11, %c0_12] : memref<2x256xf32, #tpu.memory_space<vmem>>, vector<2x256xf32>
      %c0_13 = arith.constant 0 : index
      %c0_14 = arith.constant 0 : index
      %15 = vector.load %arg5[%c0_13, %c0_14] : memref<1x256xf32, #tpu.memory_space<vmem>>, vector<1x256xf32>
      %16 = vector.broadcast %15 : vector<1x256xf32> to vector<2x256xf32>
      %17 = arith.addf %14, %16 : vector<2x256xf32>
      %c0_15 = arith.constant 0 : index
      %c0_16 = arith.constant 0 : index
      %18 = vector.load %arg6[%c0_15, %c0_16] : memref<2x256xbf16, #tpu.memory_space<vmem>>, vector<2x256xbf16>
      %19 = arith.extf %18 : vector<2x256xbf16> to vector<2x256xf32>
      %20 = arith.addf %17, %19 : vector<2x256xf32>
      %cst_17 = arith.constant 0.000000e+00 : f32
      %21 = vector.broadcast %cst_17 : f32 to vector<2x256xf32>
      %22 = arith.maximumf %20, %21 : vector<2x256xf32>
      %23 = arith.truncf %22 : vector<2x256xf32> to vector<2x256xbf16>
      %c0_18 = arith.constant 0 : index
      %c0_19 = arith.constant 0 : index
      %24 = vector.load %arg7[%c0_18, %c0_19] : memref<2x256xbf16, #tpu.memory_space<vmem>>, vector<2x256xbf16>
      tpu.vector_store %arg7[%c0_18, %c0_19], %23 {strides = array<i32>} : memref<2x256xbf16, #tpu.memory_space<vmem>>, vector<2x256xbf16>,
    } else {
    }
    return
  }
  func.func @transform_0(%arg0: i32, %arg1: i32, %arg2: i32) -> (i32, i32, i32) {
    %c0_i32 = arith.constant 0 : i32
    %c0_i32_0 = arith.constant 0 : i32
    return %arg2, %arg0, %c0_i32 : i32, i32, i32
  }
  func.func @transform_1(%arg0: i32, %arg1: i32, %arg2: i32) -> (i32, i32, i32) {
    %c0_i32 = arith.constant 0 : i32
    %c0_i32_0 = arith.constant 0 : i32
    return %arg2, %c0_i32, %arg1 : i32, i32, i32
  }
  func.func @transform_2(%arg0: i32, %arg1: i32, %arg2: i32) -> (i32, i32) {
    %c0_i32 = arith.constant 0 : i32
    %c0_i32_0 = arith.constant 0 : i32
    return %c0_i32, %arg1 : i32, i32
  }
  func.func @transform_3(%arg0: i32, %arg1: i32, %arg2: i32) -> (i32, i32) {
    %c0_i32 = arith.constant 0 : i32
    return %arg0, %arg1 : i32, i32
  }
  func.func @transform_4(%arg0: i32, %arg1: i32, %arg2: i32) -> (i32, i32) {
    %c0_i32 = arith.constant 0 : i32
    return %arg0, %arg1 : i32, i32
  }
}

module attributes {stable_mosaic.version = 11 : i64} {
  func.func @_conv_kernel(%arg0: i32, %arg1: i32, %arg2: i32, %arg3: memref<1x2x512xbf16, #tpu.memory_space<vmem>>, %arg4: memref<1x512x256xbf16, #tpu.memory_space<vmem>>, %arg5: memref<1x256xf32, #tpu.memory_space<vmem>>, %arg6: memref<2x256xbf16, #tpu.memory_space<vmem>>, %arg7: memref<2x256xf32, #tpu.memory_space<vmem>>) attributes {dimension_semantics = [#tpu.dimension_semantics<parallel>, #tpu.dimension_semantics<parallel>, #tpu.dimension_semantics<arbitrary>], iteration_bounds = array<i64: 1, 2, 9>, scalar_prefetch = 0 : i64, scratch_operands = 1 : i64, tpu.core_type = #tpu.core_type<tc>, window_params = [{transform_indices = @transform_0, window_bounds = array<i64: 1, 2, 512>}, {transform_indices = @transform_1, window_bounds = array<i64: 1, 512, 256>}, {transform_indices = @transform_2, window_bounds = array<i64: 1, 256>}, {transform_indices = @transform_3, window_bounds = array<i64: 2, 256>}]} {
    %c0_i32 = arith.constant 0 : i32
    %0 = arith.cmpi eq, %arg2, %c0_i32 : i32
    %1 = arith.extui %0 : i1 to i32
    %c0_i32_0 = arith.constant 0 : i32
    %2 = arith.cmpi ne, %1, %c0_i32_0 : i32
    scf.if %2 {
      %cst_11 = arith.constant 0.000000e+00 : f32
      %14 = vector.broadcast %cst_11 : f32 to vector<2x256xf32>
      %c0_12 = arith.constant 0 : index
      %c0_13 = arith.constant 0 : index
      %15 = vector.load %arg7[%c0_12, %c0_13] : memref<2x256xf32, #tpu.memory_space<vmem>>, vector<2x256xf32>
      tpu.vector_store %arg7[%c0_12, %c0_13], %14 {strides = array<i32>} : memref<2x256xf32, #tpu.memory_space<vmem>>, vector<2x256xf32>,
    } else {
    }
    %c0 = arith.constant 0 : index
    %c0_1 = arith.constant 0 : index
    %3 = vector.load %arg7[%c0, %c0_1] : memref<2x256xf32, #tpu.memory_space<vmem>>, vector<2x256xf32>
    %c0_2 = arith.constant 0 : index
    %c0_3 = arith.constant 0 : index
    %c0_4 = arith.constant 0 : index
    %4 = vector.load %arg3[%c0_2, %c0_3, %c0_4] : memref<1x2x512xbf16, #tpu.memory_space<vmem>>, vector<1x2x512xbf16>
    %5 = vector.shape_cast %4 : vector<1x2x512xbf16> to vector<2x512xbf16>
    %c0_5 = arith.constant 0 : index
    %c0_6 = arith.constant 0 : index
    %c0_7 = arith.constant 0 : index
    %6 = vector.load %arg4[%c0_5, %c0_6, %c0_7] : memref<1x512x256xbf16, #tpu.memory_space<vmem>>, vector<1x512x256xbf16>
    %7 = vector.shape_cast %6 : vector<1x512x256xbf16> to vector<512x256xbf16>
    %cst = arith.constant dense<0.000000e+00> : vector<2x256xf32>
    %8 = tpu.matmul %5, %7, %cst {dimension_numbers = #tpu.dot_dimension_numbers<[1], [0], [0], [1], [0, 0, 1, 1], [], []>} : vector<2x512xbf16>, vector<512x256xbf16>, vector<2x256xf32> -> vector<2x256xf32>
    %9 = arith.addf %3, %8 : vector<2x256xf32>
    %c0_8 = arith.constant 0 : index
    %c0_9 = arith.constant 0 : index
    %10 = vector.load %arg7[%c0_8, %c0_9] : memref<2x256xf32, #tpu.memory_space<vmem>>, vector<2x256xf32>
    tpu.vector_store %arg7[%c0_8, %c0_9], %9 {strides = array<i32>} : memref<2x256xf32, #tpu.memory_space<vmem>>, vector<2x256xf32>,
    %c8_i32 = arith.constant 8 : i32
    %11 = arith.cmpi eq, %arg2, %c8_i32 : i32
    %12 = arith.extui %11 : i1 to i32
    %c0_i32_10 = arith.constant 0 : i32
    %13 = arith.cmpi ne, %12, %c0_i32_10 : i32
    scf.if %13 {
      %c0_11 = arith.constant 0 : index
      %c0_12 = arith.constant 0 : index
      %14 = vector.load %arg7[%c0_11, %c0_12] : memref<2x256xf32, #tpu.memory_space<vmem>>, vector<2x256xf32>
      %c0_13 = arith.constant 0 : index
      %c0_14 = arith.constant 0 : index
      %15 = vector.load %arg5[%c0_13, %c0_14] : memref<1x256xf32, #tpu.memory_space<vmem>>, vector<1x256xf32>
      %16 = vector.broadcast %15 : vector<1x256xf32> to vector<2x256xf32>
      %17 = arith.addf %14, %16 : vector<2x256xf32>
      %cst_15 = arith.constant 0.000000e+00 : f32
      %18 = vector.broadcast %cst_15 : f32 to vector<2x256xf32>
      %19 = arith.maximumf %17, %18 : vector<2x256xf32>
      %20 = arith.truncf %19 : vector<2x256xf32> to vector<2x256xbf16>
      %c0_16 = arith.constant 0 : index
      %c0_17 = arith.constant 0 : index
      %21 = vector.load %arg6[%c0_16, %c0_17] : memref<2x256xbf16, #tpu.memory_space<vmem>>, vector<2x256xbf16>
      tpu.vector_store %arg6[%c0_16, %c0_17], %20 {strides = array<i32>} : memref<2x256xbf16, #tpu.memory_space<vmem>>, vector<2x256xbf16>,
    } else {
    }
    return
  }
  func.func @transform_0(%arg0: i32, %arg1: i32, %arg2: i32) -> (i32, i32, i32) {
    %c0_i32 = arith.constant 0 : i32
    %c0_i32_0 = arith.constant 0 : i32
    return %arg2, %arg0, %c0_i32 : i32, i32, i32
  }
  func.func @transform_1(%arg0: i32, %arg1: i32, %arg2: i32) -> (i32, i32, i32) {
    %c0_i32 = arith.constant 0 : i32
    %c0_i32_0 = arith.constant 0 : i32
    return %arg2, %c0_i32, %arg1 : i32, i32, i32
  }
  func.func @transform_2(%arg0: i32, %arg1: i32, %arg2: i32) -> (i32, i32) {
    %c0_i32 = arith.constant 0 : i32
    %c0_i32_0 = arith.constant 0 : i32
    return %c0_i32, %arg1 : i32, i32
  }
  func.func @transform_3(%arg0: i32, %arg1: i32, %arg2: i32) -> (i32, i32) {
    %c0_i32 = arith.constant 0 : i32
    return %arg0, %arg1 : i32, i32
  }
}

module attributes {stable_mosaic.version = 11 : i64} {
  func.func @_pool_fc_kernel(%arg0: memref<2x1x512xbf16, #tpu.memory_space<vmem>>, %arg1: memref<512x64xbf16, #tpu.memory_space<vmem>>, %arg2: memref<1x64xf32, #tpu.memory_space<vmem>>, %arg3: memref<2x64xf32, #tpu.memory_space<vmem>>) attributes {dimension_semantics = [], scalar_prefetch = 0 : i64, scratch_operands = 0 : i64, tpu.core_type = #tpu.core_type<tc>} {
    %c0 = arith.constant 0 : index
    %c0_0 = arith.constant 0 : index
    %c0_1 = arith.constant 0 : index
    %0 = vector.load %arg0[%c0, %c0_0, %c0_1] : memref<2x1x512xbf16, #tpu.memory_space<vmem>>, vector<2x1x512xbf16>
    %1 = arith.extf %0 : vector<2x1x512xbf16> to vector<2x1x512xf32>
    %cst = arith.constant dense<0.000000e+00> : vector<2x512xf32>
    %2 = vector.multi_reduction <add>, %1, %cst [1] : vector<2x1x512xf32> to vector<2x512xf32>
    %cst_2 = arith.constant 1.000000e+00 : f32
    %3 = vector.broadcast %cst_2 : f32 to vector<2x512xf32>
    %4 = arith.mulf %2, %3 : vector<2x512xf32>
    %5 = arith.truncf %4 : vector<2x512xf32> to vector<2x512xbf16>
    %c0_3 = arith.constant 0 : index
    %c0_4 = arith.constant 0 : index
    %6 = vector.load %arg1[%c0_3, %c0_4] : memref<512x64xbf16, #tpu.memory_space<vmem>>, vector<512x64xbf16>
    %cst_5 = arith.constant dense<0.000000e+00> : vector<2x64xf32>
    %7 = tpu.matmul %5, %6, %cst_5 {dimension_numbers = #tpu.dot_dimension_numbers<[1], [0], [0], [1], [0, 0, 1, 1], [], []>} : vector<2x512xbf16>, vector<512x64xbf16>, vector<2x64xf32> -> vector<2x64xf32>
    %c0_6 = arith.constant 0 : index
    %c0_7 = arith.constant 0 : index
    %8 = vector.load %arg2[%c0_6, %c0_7] : memref<1x64xf32, #tpu.memory_space<vmem>>, vector<1x64xf32>
    %9 = vector.broadcast %8 : vector<1x64xf32> to vector<2x64xf32>
    %10 = arith.addf %7, %9 : vector<2x64xf32>
    %c0_8 = arith.constant 0 : index
    %c0_9 = arith.constant 0 : index
    %11 = vector.load %arg3[%c0_8, %c0_9] : memref<2x64xf32, #tpu.memory_space<vmem>>, vector<2x64xf32>
    tpu.vector_store %arg3[%c0_8, %c0_9], %10 {strides = array<i32>} : memref<2x64xf32, #tpu.memory_space<vmem>>, vector<2x64xf32>,
    return
  }
}

</mosaic_0001>

<bundles_post_ra>
// kernel: _lambda_.20
= control target key start
LH: loop header
LB: loop body
LE: loop exit
PB: predicated region body
PF: predicated region fallthrough
CT: control target
= control target key end

     0   :  { %8 = vsyncpa [#allocation4], 0  ;;  %s1568_s12 = smov 0   ;;  %s1570_s13 = smov 0   ;;  %s1845_s0 = inlined_call_operand.vmem [shape: bf16[1,512,256], index: 0, kind: input, shape index: {}]   ;;  %s1846_s1 = inlined_call_operand.hbm [shape: bf16[1,256,64], index: 1, kind: input, shape index: {}]   ;;  %s1847_s2 = inlined_call_operand.vmem [shape: f32[1,64], index: 2, kind: input, shape index: {}]   ;;  %s1848_s3 = inlined_call_operand.vmem [shape: bf16[512,64], index: 3, kind: output, shape index: {}]  }
   0x1   :  { %s1572_s14 = smov 0  }
   0x2 LB: > { %s1175_s15 = sadd.s32 4294967295, %s1542_s14   ;;  %s33_s16 = sadd.s32 1, %s1538_s13  ;;  %s1542_s14 = sphi %s1572_s14, %s14_s14   ;;  %s1538_s13 = sphi %s1570_s13, %s1850_s13   ;;  %s1534_s12 = sphi %s1568_s12, %s1849_s12  }
   0x3   : > { %p35_p0 = scmp.ge.s32.totalorder %s33_s16, 2  ;;  %p1177_p1 = scmp.ge.s32.totalorder %s1542_s14, 1 }
   0x4   : > { %p148_p2 = scmp.lt.s32.totalorder %s1542_s14, 3  ;;  %p1455_p4 = scmp.eq.s32.totalorder %s1175_s15, 0 }
   0x5   : > { %s1852_s16 = smov (%p35_p0, %s33_s16), 0  ;;  %s163_s19 = sshll.u32 %s1846_s1, 4  ;;  %s164_s19 = int_to_ptr.hbm [resolvable:$true] %s163_s19 }
   0x6   : > { %p149_p3 = pnand %p1177_p1, %p148_p2  ;;  %s1544_s20 = smov [#allocation3]  }
   0x7   : > { %s165_s21 = sshll.u32 %s1544_s20, 4  ;;  %s1545_s22 = smov 64   ;;  %s166_s21 = int_to_ptr.vmem [resolvable:$true] %s165_s21 }
   0x8   : > { %p1451_p5 = pneg %p149_p3  ;;  %s1546_s23 = smov 4  }
   0x9   : > { %201 = sbr.rel (%p149_p3) target bundleno = 320 (0x140), region = 32 }
   0xa   : > { %p1452_p6 = pnand %p1455_p4, %p1451_p5 }
   0xc   : > { %1454 = dma.hbm_to_vmem [thread:$0]  (!%p1452_p6), %s164_s19, 2048, %s166_s21, [#allocation4], %s1545_s22, %s1545_s22, %s1546_s23  }
   0xe   : > { %1529 = dma.done.wait (%p1455_p4), [#allocation4], 2048  }
   0xf   : > { %1531 = vsyncadd (%p1455_p4), [#allocation4], 4294965248  ;;  %v1422_v0 = vld [vmem:[#allocation3 + $0x38] sm:$0xff]  ;;  %v1421_v2 = vld [vmem:[#allocation3 + $0x30] sm:$0xff]  ;;  %s1183_s24 = sshll.u32 %s1534_s12, 5  ;;  %vm264_vm0 = vcmask 523264  }
  0x10   : > { %v1430_v1 = vld [vmem:[#allocation3 + $0x78] sm:$0xff]  ;;  %649 = vmatpush.bf16.msra.mxu0 %v1422_v0  ;;  %1431 = vmatpush.bf16.msra.mxu2 %v1422_v0  ;;  %v1429_v3 = vld [vmem:[#allocation3 + $0x70] sm:$0xff]  ;;  %v1420_v4 = vld [vmem:[#allocation3 + $0x28] sm:$0xff]  ;;  %p240_p7 = scmp.lt.s32.totalorder %s1183_s24, 63  ;;  %vm1027_vm1 = vcmask 519168  }
  0x11   : > { %738 = vmatpush.bf16.msra.mxu1 %v1430_v1  ;;  %1439 = vmatpush.bf16.msra.mxu3 %v1430_v1  ;;  %v1428_v5 = vld [vmem:[#allocation3 + $0x68] sm:$0xff]  ;;  %v1419_v6 = vld [vmem:[#allocation3 + $0x20] sm:$0xff]  ;;  %v1418_v8 = vld [vmem:[#allocation3 + $0x18] sm:$0xff] }
  0x12   : > { %v1427_v7 = vld [vmem:[#allocation3 + $0x60] sm:$0xff]  ;;  %v1426_v9 = vld [vmem:[#allocation3 + $0x58] sm:$0xff]  ;;  %s1854_s24 = smov (!%p240_p7, %s1183_s24), 63  ;;  %v1417_v10 = vld [vmem:[#allocation3 + $0x10] sm:$0xff] }
  0x13   : > { %v1425_v11 = vld [vmem:[#allocation3 + $0x50] sm:$0xff]  ;;  %s1382_s25 = sshll.u32 %s1854_s24, 3  ;;  %v1416_v12 = vld [vmem:[#allocation3 + $0x8] sm:$0xff]  ;;  %v1415_v14 = vld [vmem:[#allocation3] sm:$0xff]  ;;  %s1187_s4 = sshll.u32 %s1854_s24, 2 }
  0x14   : > { %650 = vmatpush.bf16.msra.mxu0 %v1421_v2  ;;  %1432 = vmatpush.bf16.msra.mxu2 %v1421_v2  ;;  %s1599_s28 = scalar_lea.vmem %s1845_s0, %s1382_s25  ;;  %v1424_v13 = vld [vmem:[#allocation3 + $0x48] sm:$0xff]  ;;  %v1423_v15 = vld [vmem:[#allocation3 + $0x40] sm:$0xff]  ;;  %s1710_s7 = scalar_lea.vmem %s1848_s3, %s1187_s4 }
  0x15   : > { %739 = vmatpush.bf16.msra.mxu1 %v1429_v3  ;;  %1440 = vmatpush.bf16.msra.mxu3 %v1429_v3  ;;  %v1190_v16 = vld [vmem:[%s1599_s28] sm:$0xf]  ;;  %v1384_v17 = vld [vmem:[%s1599_s28 + $0x4] sm:$0xf0]  ;;  %v1383_v20 = vld [vmem:[%s1599_s28 + $0x4] sm:$0xf] }
  0x16   : > { %v1254_v18 = vld [vmem:[%s1599_s28 + $0x80] sm:$0xf]  ;;  %v1400_v19 = vld [vmem:[%s1599_s28 + $0x84] sm:$0xf0]  ;;  %v1192_v21 = vld [vmem:[%s1599_s28 + $0x8] sm:$0xf0]  ;;  %v1191_v24 = vor.u32 %v1384_v17, %v1190_v16 }
  0x17   : > { %v1399_v22 = vld [vmem:[%s1599_s28 + $0x84] sm:$0xf]  ;;  %v1256_v23 = vld [vmem:[%s1599_s28 + $0x88] sm:$0xf0]  ;;  %v1255_v25 = vor.u32 %v1400_v19, %v1254_v18  ;;  %v1195_v26 = vor.u32 %v1383_v20, %v1192_v21  ;;  %v1198_v28 = vld [vmem:[%s1599_s28 + $0x10] sm:$0xf] }
  0x18   : > { %651 = vmatpush.bf16.msra.mxu0 %v1420_v4  ;;  %1433 = vmatpush.bf16.msra.mxu2 %v1420_v4  ;;  %v1259_v27 = vor.u32 %v1399_v22, %v1256_v23  ;;  %v1386_v29 = vld [vmem:[%s1599_s28 + $0x14] sm:$0xf0]  ;;  %v1262_v30 = vld [vmem:[%s1599_s28 + $0x90] sm:$0xf]  ;;  %v1385_v32 = vld [vmem:[%s1599_s28 + $0x14] sm:$0xf] }
  0x19   : > { %740 = vmatpush.bf16.msra.mxu1 %v1428_v5  ;;  %1441 = vmatpush.bf16.msra.mxu3 %v1428_v5  ;;  %v1402_v31 = vld [vmem:[%s1599_s28 + $0x94] sm:$0xf0]  ;;  %v1200_v33 = vld [vmem:[%s1599_s28 + $0x18] sm:$0xf0]  ;;  %v1401_v34 = vld [vmem:[%s1599_s28 + $0x94] sm:$0xf]  ;;  %v1199_v36 = vor.u32 %v1386_v29, %v1198_v28 }
  0x1a   : > { %v1264_v35 = vld [vmem:[%s1599_s28 + $0x98] sm:$0xf0]  ;;  %v1263_v37 = vor.u32 %v1402_v31, %v1262_v30  ;;  %v1203_v38 = vor.u32 %v1385_v32, %v1200_v33  ;;  %v1206_v40 = vld [vmem:[%s1599_s28 + $0x20] sm:$0xf]  ;;  %v1388_v41 = vld [vmem:[%s1599_s28 + $0x24] sm:$0xf0] }
  0x1b   : > { %v1267_v39 = vor.u32 %v1401_v34, %v1264_v35  ;;  %v1270_v42 = vld [vmem:[%s1599_s28 + $0xa0] sm:$0xf]  ;;  %v1404_v43 = vld [vmem:[%s1599_s28 + $0xa4] sm:$0xf0]  ;;  %v1387_v44 = vld [vmem:[%s1599_s28 + $0x24] sm:$0xf]  ;;  %v1207_v48 = vor.u32 %v1388_v41, %v1206_v40 }
  0x1c   : > { %652 = vmatpush.bf16.msra.mxu0 %v1419_v6  ;;  %1434 = vmatpush.bf16.msra.mxu2 %v1419_v6  ;;  %v1208_v45 = vld [vmem:[%s1599_s28 + $0x28] sm:$0xf0]  ;;  %v1403_v46 = vld [vmem:[%s1599_s28 + $0xa4] sm:$0xf]  ;;  %v1271_v49 = vor.u32 %v1404_v43, %v1270_v42  ;;  %v1214_v52 = vld [vmem:[%s1599_s28 + $0x30] sm:$0xf] }
  0x1d   : > { %741 = vmatpush.bf16.msra.mxu1 %v1427_v7  ;;  %1442 = vmatpush.bf16.msra.mxu3 %v1427_v7  ;;  %v1272_v47 = vld [vmem:[%s1599_s28 + $0xa8] sm:$0xf0]  ;;  %v1211_v50 = vor.u32 %v1387_v44, %v1208_v45  ;;  %v1390_v53 = vld [vmem:[%s1599_s28 + $0x34] sm:$0xf0]  ;;  %v1278_v54 = vld [vmem:[%s1599_s28 + $0xb0] sm:$0xf] }
  0x1e   : > { %v1275_v51 = vor.u32 %v1403_v46, %v1272_v47  ;;  %v1406_v55 = vld [vmem:[%s1599_s28 + $0xb4] sm:$0xf0]  ;;  %v1389_v56 = vld [vmem:[%s1599_s28 + $0x34] sm:$0xf]  ;;  %v1216_v57 = vld [vmem:[%s1599_s28 + $0x38] sm:$0xf0]  ;;  %v1215_v60 = vor.u32 %v1390_v53, %v1214_v52 }
  0x1f   : > { %v1405_v58 = vld [vmem:[%s1599_s28 + $0xb4] sm:$0xf]  ;;  %v1280_v59 = vld [vmem:[%s1599_s28 + $0xb8] sm:$0xf0]  ;;  %v1279_v61 = vor.u32 %v1406_v55, %v1278_v54  ;;  %v1219_v62 = vor.u32 %v1389_v56, %v1216_v57  ;;  %v1222_v0 = vld [vmem:[%s1599_s28 + $0x40] sm:$0xf] }
  0x20   : > { %653 = vmatpush.bf16.msra.mxu0 %v1418_v8  ;;  %1435 = vmatpush.bf16.msra.mxu2 %v1418_v8  ;;  %v1283_v63 = vor.u32 %v1405_v58, %v1280_v59  ;;  %v1392_v1 = vld [vmem:[%s1599_s28 + $0x44] sm:$0xf0]  ;;  %v1286_v2 = vld [vmem:[%s1599_s28 + $0xc0] sm:$0xf]  ;;  %v1391_v4 = vld [vmem:[%s1599_s28 + $0x44] sm:$0xf] }
  0x21   : > { %742 = vmatpush.bf16.msra.mxu1 %v1426_v9  ;;  %1443 = vmatpush.bf16.msra.mxu3 %v1426_v9  ;;  %v1408_v3 = vld [vmem:[%s1599_s28 + $0xc4] sm:$0xf0]  ;;  %v1224_v5 = vld [vmem:[%s1599_s28 + $0x48] sm:$0xf0]  ;;  %v1407_v6 = vld [vmem:[%s1599_s28 + $0xc4] sm:$0xf]  ;;  %v1223_v8 = vor.u32 %v1392_v1, %v1222_v0 }
  0x22   : > { %v1288_v7 = vld [vmem:[%s1599_s28 + $0xc8] sm:$0xf0]  ;;  %v1287_v9 = vor.u32 %v1408_v3, %v1286_v2  ;;  %v1393_v16 = vld [vmem:[%s1599_s28 + $0x54] sm:$0xf]  ;;  %v1232_v17 = vld [vmem:[%s1599_s28 + $0x58] sm:$0xf0] }
  0x23   : > { %v1409_v18 = vld [vmem:[%s1599_s28 + $0xd4] sm:$0xf]  ;;  %v1296_v19 = vld [vmem:[%s1599_s28 + $0xd8] sm:$0xf0]  ;;  %v1235_v22 = vor.u32 %v1393_v16, %v1232_v17  ;;  %v1395_v28 = vld [vmem:[%s1599_s28 + $0x64] sm:$0xf] }
  0x24   : > { %654 = vmatpush.bf16.msra.mxu0 %v1417_v10  ;;  %1436 = vmatpush.bf16.msra.mxu2 %v1417_v10  ;;  %v1227_v10 = vor.u32 %v1391_v4, %v1224_v5  ;;  %v1299_v23 = vor.u32 %v1409_v18, %v1296_v19  ;;  %v1240_v29 = vld [vmem:[%s1599_s28 + $0x68] sm:$0xf0]  ;;  %v1411_v30 = vld [vmem:[%s1599_s28 + $0xe4] sm:$0xf]  ;;  %v1414_v40 = vld [vmem:[%s1599_s28 + $0xf4] sm:$0xf0] }
  0x25   : > { %743 = vmatpush.bf16.msra.mxu1 %v1425_v11  ;;  %1444 = vmatpush.bf16.msra.mxu3 %v1425_v11  ;;  %v1291_v11 = vor.u32 %v1407_v6, %v1288_v7  ;;  %v1304_v31 = vld [vmem:[%s1599_s28 + $0xe8] sm:$0xf0]  ;;  %v1243_v34 = vor.u32 %v1395_v28, %v1240_v29  ;;  %v1397_v41 = vld [vmem:[%s1599_s28 + $0x74] sm:$0xf]  ;;  %v1248_v42 = vld [vmem:[%s1599_s28 + $0x78] sm:$0xf0] }
  0x26   : > { %v1307_v35 = vor.u32 %v1411_v30, %v1304_v31  ;;  %v1413_v43 = vld [vmem:[%s1599_s28 + $0xf4] sm:$0xf]  ;;  %v1312_v44 = vld [vmem:[%s1599_s28 + $0xf8] sm:$0xf0]  ;;  %v1251_v47 = vor.u32 %v1397_v41, %v1248_v42 }
  0x28   : > { %655 = vmatpush.bf16.msra.mxu0 %v1416_v12  ;;  %1437 = vmatpush.bf16.msra.mxu2 %v1416_v12  ;;  %v1230_v12 = vld [vmem:[%s1599_s28 + $0x50] sm:$0xf] }
  0x29   : > { %744 = vmatpush.bf16.msra.mxu1 %v1424_v13  ;;  %1445 = vmatpush.bf16.msra.mxu3 %v1424_v13  ;;  %v1394_v13 = vld [vmem:[%s1599_s28 + $0x54] sm:$0xf0] }
  0x2a   : > { %v1231_v20 = vor.u32 %v1394_v13, %v1230_v12 }
  0x2c   : > { %656 = vmatpush.bf16.msra.mxu0 %v1415_v14  ;;  %1438 = vmatpush.bf16.msra.mxu2 %v1415_v14  ;;  %v1294_v14 = vld [vmem:[%s1599_s28 + $0xd0] sm:$0xf] }
  0x2d   : > { %745 = vmatpush.bf16.msra.mxu1 %v1423_v15  ;;  %1446 = vmatpush.bf16.msra.mxu3 %v1423_v15  ;;  %v1410_v15 = vld [vmem:[%s1599_s28 + $0xd4] sm:$0xf0] }
  0x2e   : > { %v1295_v21 = vor.u32 %v1410_v15, %v1294_v14 }
  0x2f   : > { %657 = vmatmul.bf16.vlgmr.msra.gmra.mxu0 %v1191_v24  ;;  %697 = vmatmul.bf16.vlgmr.msra.gmra.mxu2 %v1255_v25  ;;  %v1238_v24 = vld [vmem:[%s1599_s28 + $0x60] sm:$0xf]  ;;  %v1396_v25 = vld [vmem:[%s1599_s28 + $0x64] sm:$0xf0] }
  0x30   : > { %746 = vmatmul.bf16.vlgmr.msra.gmra.mxu1 %v1195_v26  ;;  %786 = vmatmul.bf16.vlgmr.msra.gmra.mxu3 %v1259_v27  ;;  %v1302_v26 = vld [vmem:[%s1599_s28 + $0xe0] sm:$0xf]  ;;  %v1412_v27 = vld [vmem:[%s1599_s28 + $0xe4] sm:$0xf0]  ;;  %v1239_v32 = vor.u32 %v1396_v25, %v1238_v24 }
  0x31   : > { %v1303_v33 = vor.u32 %v1412_v27, %v1302_v26 }
  0x3f   : > { %662 = vmatmul.bf16.gmra.mxu0 %v1199_v36  ;;  %702 = vmatmul.bf16.gmra.mxu2 %v1263_v37  ;;  %v1547_v36 = vmov 0.0   ;;  %v1246_v37 = vld [vmem:[%s1599_s28 + $0x70] sm:$0xf] }
  0x40   : > { %751 = vmatmul.bf16.gmra.mxu1 %v1203_v38  ;;  %791 = vmatmul.bf16.gmra.mxu3 %v1267_v39  ;;  %265 = vst.msk [vmem:[#allocation2] sm:$0xff] %vm264_vm0, %v1547_v36  ;;  %v1398_v38 = vld [vmem:[%s1599_s28 + $0x74] sm:$0xf0]  ;;  %v1310_v39 = vld [vmem:[%s1599_s28 + $0xf0] sm:$0xf] }
  0x41   : > { %266 = vst.msk [vmem:[#allocation2 + $0x8] sm:$0xff] %vm264_vm0, %v1547_v36  ;;  %v1247_v45 = vor.u32 %v1398_v38, %v1246_v37  ;;  %v1311_v46 = vor.u32 %v1414_v40, %v1310_v39 }
  0x42   : > { %267 = vst.msk [vmem:[#allocation2 + $0x10] sm:$0xff] %vm264_vm0, %v1547_v36 }
  0x43   : > { %268 = vst.msk [vmem:[#allocation2 + $0x18] sm:$0xff] %vm264_vm0, %v1547_v36 }
  0x44   : > { %269 = vst.msk [vmem:[#allocation2 + $0x20] sm:$0xff] %vm264_vm0, %v1547_v36 }
  0x45   : > { %270 = vst.msk [vmem:[#allocation2 + $0x28] sm:$0xff] %vm264_vm0, %v1547_v36 }
  0x46   : > { %271 = vst.msk [vmem:[#allocation2 + $0x30] sm:$0xff] %vm264_vm0, %v1547_v36 }
  0x47   : > { %272 = vst.msk [vmem:[#allocation2 + $0x38] sm:$0xff] %vm264_vm0, %v1547_v36 }
  0x48   : > { %273 = vst.msk [vmem:[#allocation2 + $0x40] sm:$0xff] %vm264_vm0, %v1547_v36  ;;  %v298_v59 = vld [vmem:[#allocation2 + $0x8] sm:$0xff] }
  0x49   : > { %274 = vst.msk [vmem:[#allocation2 + $0x48] sm:$0xff] %vm264_vm0, %v1547_v36 }
  0x4a   : > { %275 = vst.msk [vmem:[#allocation2 + $0x50] sm:$0xff] %vm264_vm0, %v1547_v36  ;;  %v300_v27 = vld [vmem:[#allocation2 + $0x18] sm:$0xff] }
  0x4b   : > { %276 = vst.msk [vmem:[#allocation2 + $0x58] sm:$0xff] %vm264_vm0, %v1547_v36 }
  0x4c   : > { %277 = vst.msk [vmem:[#allocation2 + $0x60] sm:$0xff] %vm264_vm0, %v1547_v36 }
  0x4d   : > { %278 = vst.msk [vmem:[#allocation2 + $0x68] sm:$0xff] %vm264_vm0, %v1547_v36 }
  0x4e   : > { %279 = vst.msk [vmem:[#allocation2 + $0x70] sm:$0xff] %vm264_vm0, %v1547_v36 }
  0x4f   : > { %667 = vmatmul.bf16.gmra.mxu0 %v1207_v48  ;;  %707 = vmatmul.bf16.gmra.mxu2 %v1271_v49  ;;  %v1315_v48 = vor.u32 %v1413_v43, %v1312_v44  ;;  %280 = vst.msk [vmem:[#allocation2 + $0x78] sm:$0xff] %vm264_vm0, %v1547_v36 }
  0x50   : > { %756 = vmatmul.bf16.gmra.mxu1 %v1211_v50  ;;  %796 = vmatmul.bf16.gmra.mxu3 %v1275_v51  ;;  %281 = vst.msk [vmem:[#allocation2 + $0x80] sm:$0xff] %vm264_vm0, %v1547_v36  ;;  %v297_v50 = vld [vmem:[#allocation2] sm:$0xff] }
  0x51   : > { %282 = vst.msk [vmem:[#allocation2 + $0x88] sm:$0xff] %vm264_vm0, %v1547_v36 }
  0x52   : > { %283 = vst.msk [vmem:[#allocation2 + $0x90] sm:$0xff] %vm264_vm0, %v1547_v36 }
  0x53   : > { %284 = vst.msk [vmem:[#allocation2 + $0x98] sm:$0xff] %vm264_vm0, %v1547_v36 }
  0x54   : > { %285 = vst.msk [vmem:[#allocation2 + $0xa0] sm:$0xff] %vm264_vm0, %v1547_v36 }
  0x55   : > { %286 = vst.msk [vmem:[#allocation2 + $0xa8] sm:$0xff] %vm264_vm0, %v1547_v36 }
  0x56   : > { %287 = vst.msk [vmem:[#allocation2 + $0xb0] sm:$0xff] %vm264_vm0, %v1547_v36 }
  0x57   : > { %288 = vst.msk [vmem:[#allocation2 + $0xb8] sm:$0xff] %vm264_vm0, %v1547_v36  ;;  %v313_v55 = vld [vmem:[#allocation2 + $0x80] sm:$0xff] }
  0x58   : > { %289 = vst.msk [vmem:[#allocation2 + $0xc0] sm:$0xff] %vm264_vm0, %v1547_v36  ;;  %v314_v4 = vld [vmem:[#allocation2 + $0x88] sm:$0xff] }
  0x59   : > { %290 = vst.msk [vmem:[#allocation2 + $0xc8] sm:$0xff] %vm264_vm0, %v1547_v36 }
  0x5a   : > { %291 = vst.msk [vmem:[#allocation2 + $0xd0] sm:$0xff] %vm264_vm0, %v1547_v36  ;;  %v316_v39 = vld [vmem:[#allocation2 + $0x98] sm:$0xff] }
  0x5b   : > { %292 = vst.msk [vmem:[#allocation2 + $0xd8] sm:$0xff] %vm264_vm0, %v1547_v36 }
  0x5c   : > { %293 = vst.msk [vmem:[#allocation2 + $0xe0] sm:$0xff] %vm264_vm0, %v1547_v36 }
  0x5d   : > { %294 = vst.msk [vmem:[#allocation2 + $0xe8] sm:$0xff] %vm264_vm0, %v1547_v36 }
  0x5e   : > { %295 = vst.msk [vmem:[#allocation2 + $0xf0] sm:$0xff] %vm264_vm0, %v1547_v36 }
  0x5f   : > { %672 = vmatmul.bf16.gmra.mxu0 %v1215_v60  ;;  %712 = vmatmul.bf16.gmra.mxu2 %v1279_v61  ;;  %296 = vst.msk [vmem:[#allocation2 + $0xf8] sm:$0xff] %vm264_vm0, %v1547_v36  ;;  %v1701_v61 = vld [vmem:[%s1847_s2] ss:$0 sm:$0xff] }
  0x60   : > { %761 = vmatmul.bf16.gmra.mxu1 %v1219_v62  ;;  %801 = vmatmul.bf16.gmra.mxu3 %v1283_v63 }
  0x6f   : > { %677 = vmatmul.bf16.gmra.mxu0 %v1223_v8  ;;  %717 = vmatmul.bf16.gmra.mxu2 %v1287_v9  ;;  %v299_v9 = vld [vmem:[#allocation2 + $0x10] sm:$0xff] }
  0x70   : > { %766 = vmatmul.bf16.gmra.mxu1 %v1227_v10  ;;  %806 = vmatmul.bf16.gmra.mxu3 %v1291_v11 }
  0x7f   : > { %682 = vmatmul.bf16.gmra.mxu0 %v1231_v20  ;;  %722 = vmatmul.bf16.gmra.mxu2 %v1295_v21  ;;  %v315_v21 = vld [vmem:[#allocation2 + $0x90] sm:$0xff] }
  0x80   : > { %771 = vmatmul.bf16.gmra.mxu1 %v1235_v22  ;;  %811 = vmatmul.bf16.gmra.mxu3 %v1299_v23 }
  0x8f   : > { %687 = vmatmul.bf16.gmra.mxu0 %v1239_v32  ;;  %727 = vmatmul.bf16.gmra.mxu2 %v1303_v33 }
  0x90   : > { %776 = vmatmul.bf16.gmra.mxu1 %v1243_v34  ;;  %816 = vmatmul.bf16.gmra.mxu3 %v1307_v35 }
  0x9f   : > { %692 = vmatmul.bf16.gmra.mxu0 %v1247_v45  ;;  %732 = vmatmul.bf16.gmra.mxu2 %v1311_v46  ;;  %v301_v45 = vld [vmem:[#allocation2 + $0x20] sm:$0xff] }
  0xa0   : > { %781 = vmatmul.bf16.gmra.mxu1 %v1251_v47  ;;  %821 = vmatmul.bf16.gmra.mxu3 %v1315_v48 }
  0xac   : > { %v658_v49 = vpop.f32.mrf.mxu0 }
  0xad   : > { %v747_v51 = vpop.f32.mrf.mxu1 }
  0xae   : > { %v748_v52 = vadd.f32 %v747_v51, %v658_v49 }
  0xb0   : > { %v827_v53 = vadd.f32 %v748_v52, %v297_v50 }
  0xb2   : > { %860 = vst.msk [vmem:[#allocation2] sm:$0xff] %vm264_vm0, %v827_v53  ;;  %v698_v54 = vpop.f32.mrf.mxu2 }
  0xb3   : > { %v787_v56 = vpop.f32.mrf.mxu3 }
  0xb4   : > { %v788_v57 = vadd.f32 %v787_v56, %v698_v54  ;;  %v660_v58 = vpop.f32.mrf.mxu0 }
  0xb5   : > { %v749_v60 = vpop.f32.mrf.mxu1 }
  0xb6   : > { %v843_v62 = vadd.f32 %v788_v57, %v313_v55  ;;  %v750_v63 = vadd.f32 %v749_v60, %v660_v58  ;;  %v317_v57 = vld [vmem:[#allocation2 + $0xa0] sm:$0xff] }
  0xb8   : > { %876 = vst.msk [vmem:[#allocation2 + $0x80] sm:$0xff] %vm264_vm0, %v843_v62  ;;  %v828_v0 = vadd.f32 %v750_v63, %v298_v59 }
  0xb9   : > { %v895_v1 = vld [vmem:[#allocation2] sm:$0xff] }
  0xba   : > { %v931_v2 = vadd.f32 %v1701_v61, %v895_v1  ;;  %861 = vst.msk [vmem:[#allocation2 + $0x8] sm:$0xff] %vm264_vm0, %v828_v0  ;;  %v700_v3 = vpop.f32.mrf.mxu2  ;;  %v302_v0 = vld [vmem:[#allocation2 + $0x28] sm:$0xff] }
  0xbb   : > { %v789_v5 = vpop.f32.mrf.mxu3 }
  0xbc   : > { %v963_v6 = vmax.f32 %v931_v2, 0.0  ;;  %v790_v7 = vadd.f32 %v789_v5, %v700_v3  ;;  %v663_v8 = vpop.f32.mrf.mxu0 }
  0xbd   : > { %v752_v10 = vpop.f32.mrf.mxu1 }
  0xbe   : > { %v995_v11 = vpack.c.bf16 %v963_v6, %v963_v6  ;;  %v844_v12 = vadd.f32 %v790_v7, %v314_v4  ;;  %v753_v13 = vadd.f32 %v752_v10, %v663_v8 }
  0xbf   : > { %v911_v14 = vld [vmem:[#allocation2 + $0x80] sm:$0xff] }
  0xc0   : > { %1028 = vst.msk [vmem:[%s1710_s7] sm:$0xf] %vm1027_vm1, %v995_v11  ;;  %v947_v15 = vadd.f32 %v1701_v61, %v911_v14  ;;  %v829_v16 = vadd.f32 %v753_v13, %v299_v9 }
  0xc1   : > { %v896_v17 = vld [vmem:[#allocation2 + $0x8] sm:$0xff]  ;;  %877 = vst.msk [vmem:[#allocation2 + $0x88] sm:$0xff] %vm264_vm0, %v844_v12 }
  0xc2   : > { %v979_v18 = vmax.f32 %v947_v15, 0.0  ;;  %v932_v19 = vadd.f32 %v1701_v61, %v896_v17  ;;  %862 = vst.msk [vmem:[#allocation2 + $0x10] sm:$0xff] %vm264_vm0, %v829_v16  ;;  %v703_v20 = vpop.f32.mrf.mxu2  ;;  %v318_v12 = vld [vmem:[#allocation2 + $0xa8] sm:$0xff] }
  0xc3   : > { %v792_v22 = vpop.f32.mrf.mxu3 }
  0xc4   : > { %v1011_v23 = vpack.c.bf16 %v979_v18, %v979_v18  ;;  %v964_v24 = vmax.f32 %v932_v19, 0.0  ;;  %v793_v25 = vadd.f32 %v792_v22, %v703_v20  ;;  %v665_v26 = vpop.f32.mrf.mxu0  ;;  %v303_v18 = vld [vmem:[#allocation2 + $0x30] sm:$0xff] }
  0xc5   : > { %v754_v28 = vpop.f32.mrf.mxu1 }
  0xc6   : > { %1044 = vst.msk [vmem:[%s1710_s7 + $0x40] sm:$0xf] %vm1027_vm1, %v1011_v23  ;;  %v996_v29 = vpack.c.bf16 %v964_v24, %v964_v24  ;;  %v845_v30 = vadd.f32 %v793_v25, %v315_v21  ;;  %v755_v31 = vadd.f32 %v754_v28, %v665_v26 }
  0xc8   : > { %1029 = vst.msk [vmem:[%s1710_s7 + $0x4] sm:$0xf] %vm1027_vm1, %v996_v29  ;;  %v912_v32 = vld [vmem:[#allocation2 + $0x88] sm:$0xff]  ;;  %v830_v33 = vadd.f32 %v755_v31, %v300_v27 }
  0xc9   : > { %v948_v34 = vadd.f32 %v1701_v61, %v912_v32  ;;  %v897_v35 = vld [vmem:[#allocation2 + $0x10] sm:$0xff]  ;;  %878 = vst.msk [vmem:[#allocation2 + $0x90] sm:$0xff] %vm264_vm0, %v845_v30 }
  0xca   : > { %v933_v36 = vadd.f32 %v1701_v61, %v897_v35  ;;  %863 = vst.msk [vmem:[#allocation2 + $0x18] sm:$0xff] %vm264_vm0, %v830_v33  ;;  %v705_v37 = vpop.f32.mrf.mxu2  ;;  %v319_v30 = vld [vmem:[#allocation2 + $0xb0] sm:$0xff] }
  0xcb   : > { %v980_v38 = vmax.f32 %v948_v34, 0.0  ;;  %v794_v40 = vpop.f32.mrf.mxu3 }
  0xcc   : > { %v965_v41 = vmax.f32 %v933_v36, 0.0  ;;  %v795_v42 = vadd.f32 %v794_v40, %v705_v37  ;;  %v668_v43 = vpop.f32.mrf.mxu0  ;;  %v304_v36 = vld [vmem:[#allocation2 + $0x38] sm:$0xff] }
  0xcd   : > { %v1012_v44 = vpack.c.bf16 %v980_v38, %v980_v38  ;;  %v757_v46 = vpop.f32.mrf.mxu1 }
  0xce   : > { %v997_v47 = vpack.c.bf16 %v965_v41, %v965_v41  ;;  %v846_v48 = vadd.f32 %v795_v42, %v316_v39  ;;  %v758_v49 = vadd.f32 %v757_v46, %v668_v43 }
  0xcf   : > { %1045 = vst.msk [vmem:[%s1710_s7 + $0x44] sm:$0xf] %vm1027_vm1, %v1012_v44 }
  0xd0   : > { %1030 = vst.msk [vmem:[%s1710_s7 + $0x8] sm:$0xf] %vm1027_vm1, %v997_v47  ;;  %v913_v50 = vld [vmem:[#allocation2 + $0x90] sm:$0xff]  ;;  %v831_v51 = vadd.f32 %v758_v49, %v301_v45 }
  0xd1   : > { %v949_v52 = vadd.f32 %v1701_v61, %v913_v50  ;;  %v898_v53 = vld [vmem:[#allocation2 + $0x18] sm:$0xff]  ;;  %879 = vst.msk [vmem:[#allocation2 + $0x98] sm:$0xff] %vm264_vm0, %v846_v48 }
  0xd2   : > { %v934_v54 = vadd.f32 %v1701_v61, %v898_v53  ;;  %864 = vst.msk [vmem:[#allocation2 + $0x20] sm:$0xff] %vm264_vm0, %v831_v51  ;;  %v708_v55 = vpop.f32.mrf.mxu2  ;;  %v320_v48 = vld [vmem:[#allocation2 + $0xb8] sm:$0xff] }
  0xd3   : > { %v981_v56 = vmax.f32 %v949_v52, 0.0  ;;  %v797_v58 = vpop.f32.mrf.mxu3 }
  0xd4   : > { %v966_v59 = vmax.f32 %v934_v54, 0.0  ;;  %v798_v60 = vadd.f32 %v797_v58, %v708_v55  ;;  %v670_v62 = vpop.f32.mrf.mxu0  ;;  %v305_v54 = vld [vmem:[#allocation2 + $0x40] sm:$0xff] }
  0xd5   : > { %v1013_v63 = vpack.c.bf16 %v981_v56, %v981_v56  ;;  %v759_v1 = vpop.f32.mrf.mxu1 }
  0xd6   : > { %v998_v2 = vpack.c.bf16 %v966_v59, %v966_v59  ;;  %v847_v3 = vadd.f32 %v798_v60, %v317_v57  ;;  %v760_v4 = vadd.f32 %v759_v1, %v670_v62 }
  0xd7   : > { %1046 = vst.msk [vmem:[%s1710_s7 + $0x48] sm:$0xf] %vm1027_vm1, %v1013_v63 }
  0xd8   : > { %1031 = vst.msk [vmem:[%s1710_s7 + $0xc] sm:$0xf] %vm1027_vm1, %v998_v2  ;;  %v914_v5 = vld [vmem:[#allocation2 + $0x98] sm:$0xff]  ;;  %v832_v6 = vadd.f32 %v760_v4, %v302_v0 }
  0xd9   : > { %v950_v7 = vadd.f32 %v1701_v61, %v914_v5  ;;  %v899_v8 = vld [vmem:[#allocation2 + $0x20] sm:$0xff]  ;;  %880 = vst.msk [vmem:[#allocation2 + $0xa0] sm:$0xff] %vm264_vm0, %v847_v3 }
  0xda   : > { %v935_v9 = vadd.f32 %v1701_v61, %v899_v8  ;;  %865 = vst.msk [vmem:[#allocation2 + $0x28] sm:$0xff] %vm264_vm0, %v832_v6  ;;  %v710_v10 = vpop.f32.mrf.mxu2  ;;  %v321_v3 = vld [vmem:[#allocation2 + $0xc0] sm:$0xff] }
  0xdb   : > { %v982_v11 = vmax.f32 %v950_v7, 0.0  ;;  %v799_v13 = vpop.f32.mrf.mxu3 }
  0xdc   : > { %v967_v14 = vmax.f32 %v935_v9, 0.0  ;;  %v800_v15 = vadd.f32 %v799_v13, %v710_v10  ;;  %v673_v16 = vpop.f32.mrf.mxu0  ;;  %v306_v9 = vld [vmem:[#allocation2 + $0x48] sm:$0xff] }
  0xdd   : > { %v1014_v17 = vpack.c.bf16 %v982_v11, %v982_v11  ;;  %v762_v19 = vpop.f32.mrf.mxu1 }
  0xde   : > { %v999_v20 = vpack.c.bf16 %v967_v14, %v967_v14  ;;  %v848_v21 = vadd.f32 %v800_v15, %v318_v12  ;;  %v763_v22 = vadd.f32 %v762_v19, %v673_v16 }
  0xdf   : > { %1047 = vst.msk [vmem:[%s1710_s7 + $0x4c] sm:$0xf] %vm1027_vm1, %v1014_v17 }
  0xe0   : > { %1032 = vst.msk [vmem:[%s1710_s7 + $0x10] sm:$0xf] %vm1027_vm1, %v999_v20  ;;  %v915_v23 = vld [vmem:[#allocation2 + $0xa0] sm:$0xff]  ;;  %v833_v24 = vadd.f32 %v763_v22, %v303_v18 }
  0xe1   : > { %v951_v25 = vadd.f32 %v1701_v61, %v915_v23  ;;  %v900_v26 = vld [vmem:[#allocation2 + $0x28] sm:$0xff]  ;;  %881 = vst.msk [vmem:[#allocation2 + $0xa8] sm:$0xff] %vm264_vm0, %v848_v21 }
  0xe2   : > { %v936_v27 = vadd.f32 %v1701_v61, %v900_v26  ;;  %866 = vst.msk [vmem:[#allocation2 + $0x30] sm:$0xff] %vm264_vm0, %v833_v24  ;;  %v713_v28 = vpop.f32.mrf.mxu2  ;;  %v322_v21 = vld [vmem:[#allocation2 + $0xc8] sm:$0xff] }
  0xe3   : > { %v983_v29 = vmax.f32 %v951_v25, 0.0  ;;  %v802_v31 = vpop.f32.mrf.mxu3 }
  0xe4   : > { %v968_v32 = vmax.f32 %v936_v27, 0.0  ;;  %v803_v33 = vadd.f32 %v802_v31, %v713_v28  ;;  %v675_v34 = vpop.f32.mrf.mxu0  ;;  %v307_v27 = vld [vmem:[#allocation2 + $0x50] sm:$0xff] }
  0xe5   : > { %v1015_v35 = vpack.c.bf16 %v983_v29, %v983_v29  ;;  %v764_v37 = vpop.f32.mrf.mxu1 }
  0xe6   : > { %v1000_v38 = vpack.c.bf16 %v968_v32, %v968_v32  ;;  %v849_v39 = vadd.f32 %v803_v33, %v319_v30  ;;  %v765_v40 = vadd.f32 %v764_v37, %v675_v34 }
  0xe7   : > { %1048 = vst.msk [vmem:[%s1710_s7 + $0x50] sm:$0xf] %vm1027_vm1, %v1015_v35 }
  0xe8   : > { %1033 = vst.msk [vmem:[%s1710_s7 + $0x14] sm:$0xf] %vm1027_vm1, %v1000_v38  ;;  %v916_v41 = vld [vmem:[#allocation2 + $0xa8] sm:$0xff]  ;;  %v834_v42 = vadd.f32 %v765_v40, %v304_v36 }
  0xe9   : > { %v952_v43 = vadd.f32 %v1701_v61, %v916_v41  ;;  %v901_v44 = vld [vmem:[#allocation2 + $0x30] sm:$0xff]  ;;  %882 = vst.msk [vmem:[#allocation2 + $0xb0] sm:$0xff] %vm264_vm0, %v849_v39 }
  0xea   : > { %v937_v45 = vadd.f32 %v1701_v61, %v901_v44  ;;  %867 = vst.msk [vmem:[#allocation2 + $0x38] sm:$0xff] %vm264_vm0, %v834_v42  ;;  %v715_v46 = vpop.f32.mrf.mxu2  ;;  %v323_v39 = vld [vmem:[#allocation2 + $0xd0] sm:$0xff] }
  0xeb   : > { %v984_v47 = vmax.f32 %v952_v43, 0.0  ;;  %v804_v49 = vpop.f32.mrf.mxu3 }
  0xec   : > { %v969_v50 = vmax.f32 %v937_v45, 0.0  ;;  %v805_v51 = vadd.f32 %v804_v49, %v715_v46  ;;  %v678_v52 = vpop.f32.mrf.mxu0  ;;  %v308_v45 = vld [vmem:[#allocation2 + $0x58] sm:$0xff] }
  0xed   : > { %v1016_v53 = vpack.c.bf16 %v984_v47, %v984_v47  ;;  %v767_v55 = vpop.f32.mrf.mxu1 }
  0xee   : > { %v1001_v56 = vpack.c.bf16 %v969_v50, %v969_v50  ;;  %v850_v57 = vadd.f32 %v805_v51, %v320_v48  ;;  %v768_v58 = vadd.f32 %v767_v55, %v678_v52 }
  0xef   : > { %1049 = vst.msk [vmem:[%s1710_s7 + $0x54] sm:$0xf] %vm1027_vm1, %v1016_v53 }
  0xf0   : > { %1034 = vst.msk [vmem:[%s1710_s7 + $0x18] sm:$0xf] %vm1027_vm1, %v1001_v56  ;;  %v917_v59 = vld [vmem:[#allocation2 + $0xb0] sm:$0xff]  ;;  %v835_v60 = vadd.f32 %v768_v58, %v305_v54 }
  0xf1   : > { %v953_v62 = vadd.f32 %v1701_v61, %v917_v59  ;;  %v902_v63 = vld [vmem:[#allocation2 + $0x38] sm:$0xff]  ;;  %883 = vst.msk [vmem:[#allocation2 + $0xb8] sm:$0xff] %vm264_vm0, %v850_v57 }
  0xf2   : > { %v938_v0 = vadd.f32 %v1701_v61, %v902_v63  ;;  %868 = vst.msk [vmem:[#allocation2 + $0x40] sm:$0xff] %vm264_vm0, %v835_v60  ;;  %v718_v1 = vpop.f32.mrf.mxu2  ;;  %v324_v57 = vld [vmem:[#allocation2 + $0xd8] sm:$0xff] }
  0xf3   : > { %v985_v2 = vmax.f32 %v953_v62, 0.0  ;;  %v807_v4 = vpop.f32.mrf.mxu3 }
  0xf4   : > { %v970_v5 = vmax.f32 %v938_v0, 0.0  ;;  %v808_v6 = vadd.f32 %v807_v4, %v718_v1  ;;  %v680_v7 = vpop.f32.mrf.mxu0  ;;  %v309_v0 = vld [vmem:[#allocation2 + $0x60] sm:$0xff] }
  0xf5   : > { %v1017_v8 = vpack.c.bf16 %v985_v2, %v985_v2  ;;  %v769_v10 = vpop.f32.mrf.mxu1 }
  0xf6   : > { %v1002_v11 = vpack.c.bf16 %v970_v5, %v970_v5  ;;  %v851_v12 = vadd.f32 %v808_v6, %v321_v3  ;;  %v770_v13 = vadd.f32 %v769_v10, %v680_v7 }
  0xf7   : > { %1050 = vst.msk [vmem:[%s1710_s7 + $0x58] sm:$0xf] %vm1027_vm1, %v1017_v8 }
  0xf8   : > { %1035 = vst.msk [vmem:[%s1710_s7 + $0x1c] sm:$0xf] %vm1027_vm1, %v1002_v11  ;;  %v918_v14 = vld [vmem:[#allocation2 + $0xb8] sm:$0xff]  ;;  %v836_v15 = vadd.f32 %v770_v13, %v306_v9 }
  0xf9   : > { %v954_v16 = vadd.f32 %v1701_v61, %v918_v14  ;;  %v903_v17 = vld [vmem:[#allocation2 + $0x40] sm:$0xff]  ;;  %884 = vst.msk [vmem:[#allocation2 + $0xc0] sm:$0xff] %vm264_vm0, %v851_v12 }
  0xfa   : > { %v939_v18 = vadd.f32 %v1701_v61, %v903_v17  ;;  %869 = vst.msk [vmem:[#allocation2 + $0x48] sm:$0xff] %vm264_vm0, %v836_v15  ;;  %v720_v19 = vpop.f32.mrf.mxu2  ;;  %v325_v12 = vld [vmem:[#allocation2 + $0xe0] sm:$0xff] }
  0xfb   : > { %v986_v20 = vmax.f32 %v954_v16, 0.0  ;;  %v809_v22 = vpop.f32.mrf.mxu3 }
  0xfc   : > { %v971_v23 = vmax.f32 %v939_v18, 0.0  ;;  %v810_v24 = vadd.f32 %v809_v22, %v720_v19  ;;  %v683_v25 = vpop.f32.mrf.mxu0  ;;  %v310_v18 = vld [vmem:[#allocation2 + $0x68] sm:$0xff] }
  0xfd   : > { %v1018_v26 = vpack.c.bf16 %v986_v20, %v986_v20  ;;  %v772_v28 = vpop.f32.mrf.mxu1 }
  0xfe   : > { %v1003_v29 = vpack.c.bf16 %v971_v23, %v971_v23  ;;  %v852_v30 = vadd.f32 %v810_v24, %v322_v21  ;;  %v773_v31 = vadd.f32 %v772_v28, %v683_v25 }
  0xff   : > { %1051 = vst.msk [vmem:[%s1710_s7 + $0x5c] sm:$0xf] %vm1027_vm1, %v1018_v26 }
 0x100   : > { %1036 = vst.msk [vmem:[%s1710_s7 + $0x20] sm:$0xf] %vm1027_vm1, %v1003_v29  ;;  %v919_v32 = vld [vmem:[#allocation2 + $0xc0] sm:$0xff]  ;;  %v837_v33 = vadd.f32 %v773_v31, %v307_v27 }
 0x101   : > { %v955_v34 = vadd.f32 %v1701_v61, %v919_v32  ;;  %v904_v35 = vld [vmem:[#allocation2 + $0x48] sm:$0xff]  ;;  %885 = vst.msk [vmem:[#allocation2 + $0xc8] sm:$0xff] %vm264_vm0, %v852_v30 }
 0x102   : > { %v940_v36 = vadd.f32 %v1701_v61, %v904_v35  ;;  %870 = vst.msk [vmem:[#allocation2 + $0x50] sm:$0xff] %vm264_vm0, %v837_v33  ;;  %v723_v37 = vpop.f32.mrf.mxu2  ;;  %v326_v30 = vld [vmem:[#allocation2 + $0xe8] sm:$0xff] }
 0x103   : > { %v987_v38 = vmax.f32 %v955_v34, 0.0  ;;  %v812_v40 = vpop.f32.mrf.mxu3 }
 0x104   : > { %v972_v41 = vmax.f32 %v940_v36, 0.0  ;;  %v813_v42 = vadd.f32 %v812_v40, %v723_v37  ;;  %v685_v43 = vpop.f32.mrf.mxu0  ;;  %v311_v36 = vld [vmem:[#allocation2 + $0x70] sm:$0xff] }
 0x105   : > { %v1019_v44 = vpack.c.bf16 %v987_v38, %v987_v38  ;;  %v774_v46 = vpop.f32.mrf.mxu1 }
 0x106   : > { %v1004_v47 = vpack.c.bf16 %v972_v41, %v972_v41  ;;  %v853_v48 = vadd.f32 %v813_v42, %v323_v39  ;;  %v775_v49 = vadd.f32 %v774_v46, %v685_v43 }
 0x107   : > { %1052 = vst.msk [vmem:[%s1710_s7 + $0x60] sm:$0xf] %vm1027_vm1, %v1019_v44 }
 0x108   : > { %1037 = vst.msk [vmem:[%s1710_s7 + $0x24] sm:$0xf] %vm1027_vm1, %v1004_v47  ;;  %v920_v50 = vld [vmem:[#allocation2 + $0xc8] sm:$0xff]  ;;  %v838_v51 = vadd.f32 %v775_v49, %v308_v45 }
 0x109   : > { %v956_v52 = vadd.f32 %v1701_v61, %v920_v50  ;;  %v905_v53 = vld [vmem:[#allocation2 + $0x50] sm:$0xff]  ;;  %886 = vst.msk [vmem:[#allocation2 + $0xd0] sm:$0xff] %vm264_vm0, %v853_v48 }
 0x10a   : > { %v941_v54 = vadd.f32 %v1701_v61, %v905_v53  ;;  %871 = vst.msk [vmem:[#allocation2 + $0x58] sm:$0xff] %vm264_vm0, %v838_v51  ;;  %v725_v55 = vpop.f32.mrf.mxu2  ;;  %v327_v48 = vld [vmem:[#allocation2 + $0xf0] sm:$0xff] }
 0x10b   : > { %v988_v56 = vmax.f32 %v956_v52, 0.0  ;;  %v814_v58 = vpop.f32.mrf.mxu3 }
 0x10c   : > { %v973_v59 = vmax.f32 %v941_v54, 0.0  ;;  %v815_v60 = vadd.f32 %v814_v58, %v725_v55  ;;  %v688_v62 = vpop.f32.mrf.mxu0  ;;  %v312_v54 = vld [vmem:[#allocation2 + $0x78] sm:$0xff] }
 0x10d   : > { %v1020_v63 = vpack.c.bf16 %v988_v56, %v988_v56  ;;  %v777_v1 = vpop.f32.mrf.mxu1 }
 0x10e   : > { %v1005_v2 = vpack.c.bf16 %v973_v59, %v973_v59  ;;  %v854_v3 = vadd.f32 %v815_v60, %v324_v57  ;;  %v778_v4 = vadd.f32 %v777_v1, %v688_v62 }
 0x10f   : > { %1053 = vst.msk [vmem:[%s1710_s7 + $0x64] sm:$0xf] %vm1027_vm1, %v1020_v63 }
 0x110   : > { %1038 = vst.msk [vmem:[%s1710_s7 + $0x28] sm:$0xf] %vm1027_vm1, %v1005_v2  ;;  %v921_v5 = vld [vmem:[#allocation2 + $0xd0] sm:$0xff]  ;;  %v839_v6 = vadd.f32 %v778_v4, %v309_v0 }
 0x111   : > { %v957_v7 = vadd.f32 %v1701_v61, %v921_v5  ;;  %v906_v8 = vld [vmem:[#allocation2 + $0x58] sm:$0xff]  ;;  %887 = vst.msk [vmem:[#allocation2 + $0xd8] sm:$0xff] %vm264_vm0, %v854_v3 }
 0x112   : > { %v942_v9 = vadd.f32 %v1701_v61, %v906_v8  ;;  %872 = vst.msk [vmem:[#allocation2 + $0x60] sm:$0xff] %vm264_vm0, %v839_v6  ;;  %v728_v10 = vpop.f32.mrf.mxu2  ;;  %v328_v3 = vld [vmem:[#allocation2 + $0xf8] sm:$0xff] }
 0x113   : > { %v989_v11 = vmax.f32 %v957_v7, 0.0  ;;  %v817_v13 = vpop.f32.mrf.mxu3 }
 0x114   : > { %v974_v14 = vmax.f32 %v942_v9, 0.0  ;;  %v818_v15 = vadd.f32 %v817_v13, %v728_v10  ;;  %v690_v16 = vpop.f32.mrf.mxu0 }
 0x115   : > { %v1021_v17 = vpack.c.bf16 %v989_v11, %v989_v11  ;;  %v779_v19 = vpop.f32.mrf.mxu1 }
 0x116   : > { %v1006_v20 = vpack.c.bf16 %v974_v14, %v974_v14  ;;  %v855_v21 = vadd.f32 %v818_v15, %v325_v12  ;;  %v780_v22 = vadd.f32 %v779_v19, %v690_v16 }
 0x117   : > { %1054 = vst.msk [vmem:[%s1710_s7 + $0x68] sm:$0xf] %vm1027_vm1, %v1021_v17 }
 0x118   : > { %1039 = vst.msk [vmem:[%s1710_s7 + $0x2c] sm:$0xf] %vm1027_vm1, %v1006_v20  ;;  %v922_v23 = vld [vmem:[#allocation2 + $0xd8] sm:$0xff]  ;;  %v840_v24 = vadd.f32 %v780_v22, %v310_v18 }
 0x119   : > { %v958_v25 = vadd.f32 %v1701_v61, %v922_v23  ;;  %v907_v26 = vld [vmem:[#allocation2 + $0x60] sm:$0xff]  ;;  %888 = vst.msk [vmem:[#allocation2 + $0xe0] sm:$0xff] %vm264_vm0, %v855_v21 }
 0x11a   : > { %v943_v27 = vadd.f32 %v1701_v61, %v907_v26  ;;  %873 = vst.msk [vmem:[#allocation2 + $0x68] sm:$0xff] %vm264_vm0, %v840_v24  ;;  %v730_v28 = vpop.f32.mrf.mxu2 }
 0x11b   : > { %v990_v29 = vmax.f32 %v958_v25, 0.0  ;;  %v819_v31 = vpop.f32.mrf.mxu3 }
 0x11c   : > { %v975_v32 = vmax.f32 %v943_v27, 0.0  ;;  %v820_v33 = vadd.f32 %v819_v31, %v730_v28  ;;  %v693_v34 = vpop.f32.mrf.mxu0 }
 0x11d   : > { %v1022_v35 = vpack.c.bf16 %v990_v29, %v990_v29  ;;  %v782_v37 = vpop.f32.mrf.mxu1 }
 0x11e   : > { %v1007_v38 = vpack.c.bf16 %v975_v32, %v975_v32  ;;  %v856_v39 = vadd.f32 %v820_v33, %v326_v30  ;;  %v783_v40 = vadd.f32 %v782_v37, %v693_v34 }
 0x11f   : > { %1055 = vst.msk [vmem:[%s1710_s7 + $0x6c] sm:$0xf] %vm1027_vm1, %v1022_v35 }
 0x120   : > { %1040 = vst.msk [vmem:[%s1710_s7 + $0x30] sm:$0xf] %vm1027_vm1, %v1007_v38  ;;  %v923_v41 = vld [vmem:[#allocation2 + $0xe0] sm:$0xff]  ;;  %v841_v42 = vadd.f32 %v783_v40, %v311_v36 }
 0x121   : > { %v959_v43 = vadd.f32 %v1701_v61, %v923_v41  ;;  %v908_v44 = vld [vmem:[#allocation2 + $0x68] sm:$0xff]  ;;  %889 = vst.msk [vmem:[#allocation2 + $0xe8] sm:$0xff] %vm264_vm0, %v856_v39 }
 0x122   : > { %v944_v45 = vadd.f32 %v1701_v61, %v908_v44  ;;  %874 = vst.msk [vmem:[#allocation2 + $0x70] sm:$0xff] %vm264_vm0, %v841_v42  ;;  %v733_v46 = vpop.f32.mrf.mxu2 }
 0x123   : > { %v991_v47 = vmax.f32 %v959_v43, 0.0  ;;  %v822_v49 = vpop.f32.mrf.mxu3 }
 0x124   : > { %v976_v50 = vmax.f32 %v944_v45, 0.0  ;;  %v823_v51 = vadd.f32 %v822_v49, %v733_v46  ;;  %v695_v52 = vpop.f32.mrf.mxu0 }
 0x125   : > { %v1023_v53 = vpack.c.bf16 %v991_v47, %v991_v47  ;;  %v784_v55 = vpop.f32.mrf.mxu1 }
 0x126   : > { %v1008_v56 = vpack.c.bf16 %v976_v50, %v976_v50  ;;  %v857_v57 = vadd.f32 %v823_v51, %v327_v48  ;;  %v785_v58 = vadd.f32 %v784_v55, %v695_v52 }
 0x127   : > { %1056 = vst.msk [vmem:[%s1710_s7 + $0x70] sm:$0xf] %vm1027_vm1, %v1023_v53 }
 0x128   : > { %1041 = vst.msk [vmem:[%s1710_s7 + $0x34] sm:$0xf] %vm1027_vm1, %v1008_v56  ;;  %v924_v59 = vld [vmem:[#allocation2 + $0xe8] sm:$0xff]  ;;  %v842_v60 = vadd.f32 %v785_v58, %v312_v54 }
 0x129   : > { %v960_v62 = vadd.f32 %v1701_v61, %v924_v59  ;;  %v909_v63 = vld [vmem:[#allocation2 + $0x70] sm:$0xff]  ;;  %890 = vst.msk [vmem:[#allocation2 + $0xf0] sm:$0xff] %vm264_vm0, %v857_v57 }
 0x12a   : > { %v945_v0 = vadd.f32 %v1701_v61, %v909_v63  ;;  %875 = vst.msk [vmem:[#allocation2 + $0x78] sm:$0xff] %vm264_vm0, %v842_v60  ;;  %v735_v1 = vpop.f32.mrf.mxu2 }
 0x12b   : > { %v992_v2 = vmax.f32 %v960_v62, 0.0  ;;  %v824_v4 = vpop.f32.mrf.mxu3 }
 0x12c   : > { %v977_v5 = vmax.f32 %v945_v0, 0.0  ;;  %v825_v6 = vadd.f32 %v824_v4, %v735_v1 }
 0x12d   : > { %v1024_v7 = vpack.c.bf16 %v992_v2, %v992_v2 }
 0x12e   : > { %v1009_v8 = vpack.c.bf16 %v977_v5, %v977_v5  ;;  %v858_v9 = vadd.f32 %v825_v6, %v328_v3 }
 0x12f   : > { %1057 = vst.msk [vmem:[%s1710_s7 + $0x74] sm:$0xf] %vm1027_vm1, %v1024_v7 }
 0x130   : > { %1042 = vst.msk [vmem:[%s1710_s7 + $0x38] sm:$0xf] %vm1027_vm1, %v1009_v8  ;;  %v925_v10 = vld [vmem:[#allocation2 + $0xf0] sm:$0xff] }
 0x131   : > { %v961_v11 = vadd.f32 %v1701_v61, %v925_v10  ;;  %v910_v12 = vld [vmem:[#allocation2 + $0x78] sm:$0xff]  ;;  %891 = vst.msk [vmem:[#allocation2 + $0xf8] sm:$0xff] %vm264_vm0, %v858_v9 }
 0x132   : > { %v946_v13 = vadd.f32 %v1701_v61, %v910_v12 }
 0x133   : > { %v993_v14 = vmax.f32 %v961_v11, 0.0 }
 0x134   : > { %v978_v15 = vmax.f32 %v946_v13, 0.0 }
 0x135   : > { %v1025_v16 = vpack.c.bf16 %v993_v14, %v993_v14 }
 0x136   : > { %v1010_v17 = vpack.c.bf16 %v978_v15, %v978_v15 }
 0x137   : > { %1058 = vst.msk [vmem:[%s1710_s7 + $0x78] sm:$0xf] %vm1027_vm1, %v1025_v16 }
 0x138   : > { %1043 = vst.msk [vmem:[%s1710_s7 + $0x3c] sm:$0xf] %vm1027_vm1, %v1010_v17  ;;  %v926_v18 = vld [vmem:[#allocation2 + $0xf8] sm:$0xff] }
 0x139   : > { %v962_v19 = vadd.f32 %v1701_v61, %v926_v18 }
 0x13b   : > { %v994_v20 = vmax.f32 %v962_v19, 0.0 }
 0x13d   : > { %v1026_v21 = vpack.c.bf16 %v994_v20, %v994_v20 }
 0x13f   : > { %1059 = vst.msk [vmem:[%s1710_s7 + $0x7c] sm:$0xf] %vm1027_vm1, %v1026_v21 }
 0x140 PF: > { %s14_s14 = sadd.s32 1, %s1542_s14   ;;  %s1849_s12 = smov %s1538_s13 }
 0x141   : > { %p11_p8 = scmp.ge.s32.totalorder %s14_s14, 4   ;;  %s1850_s13 = smov %s1852_s16 }
 0x143   :  { %13 = sbr.rel (!%p11_p8) target bundleno = 2 (0x2), region = 79 }
 0x148   :  { %1088 = vsyncpa [#allocation4], 1 }
 0x149   :  { %1090 = vsyncpa [#allocation4 + $0x1], 1 }

// kernel: _lambda_.21
= control target key start
LH: loop header
LB: loop body
LE: loop exit
PB: predicated region body
PF: predicated region fallthrough
CT: control target
= control target key end

     0   :  { %8 = vsyncpa [#allocation4], 0  ;;  %s1189_s0 = inlined_call_operand.vmem [shape: bf16[9,128,64], index: 0, kind: input, shape index: {}]   ;;  %s1190_s1 = inlined_call_operand.hbm [shape: bf16[9,64,64], index: 1, kind: input, shape index: {}]   ;;  %s1191_s2 = inlined_call_operand.vmem [shape: f32[1,64], index: 2, kind: input, shape index: {}]   ;;  %s1192_s3 = inlined_call_operand.vmem [shape: bf16[128,64], index: 3, kind: output, shape index: {}]  }
   0x1   :  { %10 = vsyncpa [#allocation4 + $0x1], 0  ;;  %s976_s12 = smov 0   ;;  %s978_s13 = smov 0  }
   0x2   :  { %s980_s14 = smov 0   ;;  %s982_s15 = smov 0  }
   0x3   :  { %s984_s16 = smov 0   ;;  %s986_s17 = smov 0  }
   0x4 LB: > { %s713_s18 = sadd.s32 4294967295, %s951_s17   ;;  %s28_s19 = sadd.s32 1, %s947_s16  ;;  %s951_s17 = sphi %s986_s17, %s16_s17   ;;  %s947_s16 = sphi %s984_s16, %s1199_s16   ;;  %s943_s15 = sphi %s982_s15, %s1198_s15   ;;  %s939_s14 = sphi %s980_s14, %s1197_s14   ;;  %s935_s13 = sphi %s978_s13, %s1196_s13   ;;  %s931_s12 = sphi %s976_s12, %s1195_s12  }
   0x5   : > { %p29_p0 = scmp.ge.s32.totalorder %s28_s19, 9  ;;  %s72_s20 = sadd.s32 1, %s939_s14 }
   0x6   : > { %p79_p1 = scmp.ne.s32.totalorder %s939_s14, %s935_s13  ;;  %p80_p2 = scmp.eq.s32.totalorder %s951_s17, 0 }
   0x7   : > { %s1201_s19 = smov (%p29_p0, %s28_s19), 0  ;;  %p85_p4 = scmp.ne.s32.totalorder %s935_s13, %s931_s12 }
   0x8   : > { %p1012_p3 = por %p80_p2, %p79_p1  ;;  %s67_s22 = ssub.s32 %s947_s16, %s1201_s19 }
   0x9   : > { %p86_p5 = scmp.eq.s32.totalorder %s713_s18, 0  ;;  %p70_p6 = scmp.eq.s32.totalorder %s67_s22, 0 }
   0xa   : > { %p818_p8 = scmp.lt.s32.totalorder %s951_s17, 9  ;;  %s182_s25 = sand.u32 1, %s939_s14  }
   0xb   : > { %p1019_p7 = por %p86_p5, %p85_p4  ;;  %s786_s26 = sshll.u32 %s947_s16, 5 }
   0xc   : > { %s1025_s24 = scalar_select %p70_p6, %s939_s14, %s72_s20  }
   0xd   : > { %s717_s27 = sshll.u32 %s182_s25, 5  ;;  %s192_s30 = scalar_lea.hbm %s1190_s1, %s786_s26 }
   0xe   : > { %s193_s4 = sshll.u32 %s192_s30, 4  ;;  %s186_s5 = scalar_lea.vmem [#allocation3], %s717_s27  ;;  %s194_s4 = int_to_ptr.hbm [resolvable:$true] %s193_s4 }
   0xf   : > { %s195_s6 = sshll.u32 %s186_s5, 4  ;;  %p815_p9 = pnand %p818_p8, %p1012_p3  ;;  %s196_s6 = int_to_ptr.vmem [resolvable:$true] %s195_s6 }
  0x10   : > { %p720_p10 = scmp.ge.s32.totalorder %s951_s17, 1  ;;  %p203_p11 = scmp.lt.s32.totalorder %s951_s17, 10 }
  0x11   : > { %s183_s7 = scalar_lea.sflag [#allocation4], %s182_s25  ;;  %s953_s8 = smov 64  }
  0x12   : > { %s954_s9 = smov 4   ;;  %p204_p12 = pnand %p720_p10, %p203_p11 }
  0x13   : > { %817 = dma.hbm_to_vmem [thread:$0]  (!%p815_p9), %s194_s4, 512, %s196_s6, %s183_s7, %s953_s8, %s953_s8, %s954_s9  }
  0x14   : > { %207 = sbr.rel (%p204_p12) target bundleno = 252 (0xfc), region = 32  ;;  %s209_s10 = sand.u32 (!%p204_p12), 1, %s935_s13  }
  0x15   : > { %s721_s11 = sshll.u32 (!%p204_p12), %s209_s10, 5  ;;  %s210_s12 = scalar_lea.sflag (!%p204_p12), [#allocation4], %s209_s10 }
  0x16   : > { %s1037_s18 = scalar_lea.vmem (!%p204_p12), [#allocation3], %s721_s11 }
  0x19   : > { %926 = dma.done.wait (%p1019_p7), %s210_s12, 512  }
  0x1a   : > { %928 = vsyncadd (%p1019_p7), %s210_s12, 4294966784  ;;  %p253_p13 = scmp.lt.s32.totalorder %s943_s15, 8  ;;  %p724_p0 = scmp.ne.s32.totalorder %s943_s15, 0 }
  0x1c   : > { %s254_s20 = scalar_select %p253_p13, %s943_s15, 8 }
  0x1d   : > { %278 = sbr.rel (%p724_p0) target bundleno = 51 (0x33), region = 40 }
  0x1e   : > { %s787_s21 = sshll.u32 %s254_s20, 6 }
  0x1f   : > { %s1048_s26 = scalar_lea.vmem %s1189_s0, %s787_s21 }
  0x22   : > { %vm279_vm0 = vcmask 523264   ;;  %v955_v0 = vmov 0.0  }
  0x23   : > { %280 = vst.msk [vmem:[#allocation2] sm:$0xff] %vm279_vm0, %v955_v0 }
  0x24   : > { %281 = vst.msk [vmem:[#allocation2 + $0x8] sm:$0xff] %vm279_vm0, %v955_v0 }
  0x25   : > { %282 = vst.msk [vmem:[#allocation2 + $0x10] sm:$0xff] %vm279_vm0, %v955_v0 }
  0x26   : > { %283 = vst.msk [vmem:[#allocation2 + $0x18] sm:$0xff] %vm279_vm0, %v955_v0 }
  0x27   : > { %284 = vst.msk [vmem:[#allocation2 + $0x20] sm:$0xff] %vm279_vm0, %v955_v0 }
  0x28   : > { %285 = vst.msk [vmem:[#allocation2 + $0x28] sm:$0xff] %vm279_vm0, %v955_v0 }
  0x29   : > { %286 = vst.msk [vmem:[#allocation2 + $0x30] sm:$0xff] %vm279_vm0, %v955_v0 }
  0x2a   : > { %287 = vst.msk [vmem:[#allocation2 + $0x38] sm:$0xff] %vm279_vm0, %v955_v0 }
  0x2b   : > { %288 = vst.msk [vmem:[#allocation2 + $0x40] sm:$0xff] %vm279_vm0, %v955_v0 }
  0x2c   : > { %289 = vst.msk [vmem:[#allocation2 + $0x48] sm:$0xff] %vm279_vm0, %v955_v0 }
  0x2d   : > { %290 = vst.msk [vmem:[#allocation2 + $0x50] sm:$0xff] %vm279_vm0, %v955_v0 }
  0x2e   : > { %291 = vst.msk [vmem:[#allocation2 + $0x58] sm:$0xff] %vm279_vm0, %v955_v0 }
  0x2f   : > { %292 = vst.msk [vmem:[#allocation2 + $0x60] sm:$0xff] %vm279_vm0, %v955_v0 }
  0x30   : > { %293 = vst.msk [vmem:[#allocation2 + $0x68] sm:$0xff] %vm279_vm0, %v955_v0 }
  0x31   : > { %294 = vst.msk [vmem:[#allocation2 + $0x70] sm:$0xff] %vm279_vm0, %v955_v0 }
  0x32   : > { %295 = vst.msk [vmem:[#allocation2 + $0x78] sm:$0xff] %vm279_vm0, %v955_v0 }
  0x33 PF: > { %v799_v1 = vld [vmem:[%s1037_s18 + $0x18] sm:$0xff]  ;;  %v798_v2 = vld [vmem:[%s1037_s18 + $0x10] sm:$0xff]  ;;  %v797_v3 = vld [vmem:[%s1037_s18 + $0x8] sm:$0xff]  ;;  %vm400_vm1 = vcmask 523264   ;;  %p781_p1 = scmp.ne.s32.totalorder %s943_s15, 8 }
  0x34   : > { %429 = vmatpush.bf16.msra.mxu0 %v799_v1  ;;  %800 = vmatpush.bf16.msra.mxu1 %v799_v1  ;;  %v796_v4 = vld [vmem:[%s1037_s18] sm:$0xff]  ;;  %v790_v6 = vld [vmem:[%s1048_s26 + $0x10] sm:$0xff]  ;;  %v789_v9 = vld [vmem:[%s1048_s26 + $0x8] sm:$0xff] }
  0x35   : > { %801 = vmatpush.bf16.msra.mxu2 %v799_v1  ;;  %802 = vmatpush.bf16.msra.mxu3 %v799_v1  ;;  %v788_v5 = vld [vmem:[%s1048_s26] sm:$0xff]  ;;  %v794_v8 = vld [vmem:[%s1048_s26 + $0x30] sm:$0xff]  ;;  %v791_v10 = vld [vmem:[%s1048_s26 + $0x18] sm:$0xff] }
  0x36   : > { %v792_v7 = vld [vmem:[%s1048_s26 + $0x20] sm:$0xff]  ;;  %v793_v11 = vld [vmem:[%s1048_s26 + $0x28] sm:$0xff]  ;;  %v795_v12 = vld [vmem:[%s1048_s26 + $0x38] sm:$0xff] }
  0x37   : > { %v296_v13 = vld [vmem:[#allocation2] sm:$0xff]  ;;  %v297_v21 = vld [vmem:[#allocation2 + $0x8] sm:$0xff]  ;;  %v298_v33 = vld [vmem:[#allocation2 + $0x10] sm:$0xff] }
  0x38   : > { %430 = vmatpush.bf16.msra.mxu0 %v798_v2  ;;  %803 = vmatpush.bf16.msra.mxu1 %v798_v2  ;;  %v300_v14 = vld [vmem:[#allocation2 + $0x20] sm:$0xff]  ;;  %v301_v22 = vld [vmem:[#allocation2 + $0x28] sm:$0xff]  ;;  %v302_v34 = vld [vmem:[#allocation2 + $0x30] sm:$0xff] }
  0x39   : > { %804 = vmatpush.bf16.msra.mxu2 %v798_v2  ;;  %805 = vmatpush.bf16.msra.mxu3 %v798_v2  ;;  %v304_v19 = vld [vmem:[#allocation2 + $0x40] sm:$0xff]  ;;  %v305_v31 = vld [vmem:[#allocation2 + $0x48] sm:$0xff]  ;;  %v306_v43 = vld [vmem:[#allocation2 + $0x50] sm:$0xff] }
  0x3a   : > { %v308_v20 = vld [vmem:[#allocation2 + $0x60] sm:$0xff]  ;;  %v309_v32 = vld [vmem:[#allocation2 + $0x68] sm:$0xff]  ;;  %v310_v44 = vld [vmem:[#allocation2 + $0x70] sm:$0xff] }
  0x3b   : > { %v299_v45 = vld [vmem:[#allocation2 + $0x18] sm:$0xff] }
  0x3c   : > { %431 = vmatpush.bf16.msra.mxu0 %v797_v3  ;;  %806 = vmatpush.bf16.msra.mxu1 %v797_v3  ;;  %v303_v46 = vld [vmem:[#allocation2 + $0x38] sm:$0xff] }
  0x3d   : > { %807 = vmatpush.bf16.msra.mxu2 %v797_v3  ;;  %808 = vmatpush.bf16.msra.mxu3 %v797_v3  ;;  %v307_v55 = vld [vmem:[#allocation2 + $0x58] sm:$0xff] }
  0x3e   : > { %v311_v56 = vld [vmem:[#allocation2 + $0x78] sm:$0xff] }
  0x40   : > { %432 = vmatpush.bf16.msra.mxu0 %v796_v4  ;;  %809 = vmatpush.bf16.msra.mxu1 %v796_v4 }
  0x41   : > { %810 = vmatpush.bf16.msra.mxu2 %v796_v4  ;;  %811 = vmatpush.bf16.msra.mxu3 %v796_v4 }
  0x43   : > { %773 = vmatmul.msk.bf16.vlgmr.msra.gmra.mxu0 %vm400_vm1, %v788_v5  ;;  %775 = vmatmul.msk.bf16.vlgmr.msra.gmra.mxu1 %vm400_vm1, %v790_v6 }
  0x44   : > { %777 = vmatmul.msk.bf16.vlgmr.msra.gmra.mxu2 %vm400_vm1, %v792_v7  ;;  %779 = vmatmul.msk.bf16.vlgmr.msra.gmra.mxu3 %vm400_vm1, %v794_v8 }
  0x53   : > { %774 = vmatmul.msk.bf16.gmra.mxu0 %vm400_vm1, %v789_v9  ;;  %776 = vmatmul.msk.bf16.gmra.mxu1 %vm400_vm1, %v791_v10 }
  0x54   : > { %778 = vmatmul.msk.bf16.gmra.mxu2 %vm400_vm1, %v793_v11  ;;  %780 = vmatmul.msk.bf16.gmra.mxu3 %vm400_vm1, %v795_v12 }
  0xc0   : > { %v434_v15 = vpop.f32.mrf.mxu0  ;;  %v444_v16 = vpop.f32.mrf.mxu1 }
  0xc1   : > { %v474_v17 = vadd.f32 %v434_v15, %v296_v13  ;;  %v478_v18 = vadd.f32 %v444_v16, %v300_v14 }
  0xc3   : > { %490 = vst.msk [vmem:[#allocation2] sm:$0xff] %vm400_vm1, %v474_v17 }
  0xc4   : > { %494 = vst.msk [vmem:[#allocation2 + $0x20] sm:$0xff] %vm400_vm1, %v478_v18 }
  0xc7   : > { %v454_v23 = vpop.f32.mrf.mxu2  ;;  %v464_v24 = vpop.f32.mrf.mxu3 }
  0xc8   : > { %v482_v25 = vadd.f32 %v454_v23, %v304_v19  ;;  %v486_v26 = vadd.f32 %v464_v24, %v308_v20  ;;  %v436_v27 = vpop.f32.mrf.mxu0  ;;  %v446_v28 = vpop.f32.mrf.mxu1 }
  0xc9   : > { %v475_v29 = vadd.f32 %v436_v27, %v297_v21  ;;  %v479_v30 = vadd.f32 %v446_v28, %v301_v22 }
  0xca   : > { %498 = vst.msk [vmem:[#allocation2 + $0x40] sm:$0xff] %vm400_vm1, %v482_v25 }
  0xcb   : > { %502 = vst.msk [vmem:[#allocation2 + $0x60] sm:$0xff] %vm400_vm1, %v486_v26 }
  0xcc   : > { %491 = vst.msk [vmem:[#allocation2 + $0x8] sm:$0xff] %vm400_vm1, %v475_v29 }
  0xcd   : > { %495 = vst.msk [vmem:[#allocation2 + $0x28] sm:$0xff] %vm400_vm1, %v479_v30 }
  0xcf   : > { %v456_v35 = vpop.f32.mrf.mxu2  ;;  %v466_v36 = vpop.f32.mrf.mxu3 }
  0xd0   : > { %v483_v37 = vadd.f32 %v456_v35, %v305_v31  ;;  %v487_v38 = vadd.f32 %v466_v36, %v309_v32  ;;  %v439_v39 = vpop.f32.mrf.mxu0  ;;  %v449_v40 = vpop.f32.mrf.mxu1 }
  0xd1   : > { %v476_v41 = vadd.f32 %v439_v39, %v298_v33  ;;  %v480_v42 = vadd.f32 %v449_v40, %v302_v34 }
  0xd2   : > { %499 = vst.msk [vmem:[#allocation2 + $0x48] sm:$0xff] %vm400_vm1, %v483_v37 }
  0xd3   : > { %503 = vst.msk [vmem:[#allocation2 + $0x68] sm:$0xff] %vm400_vm1, %v487_v38 }
  0xd4   : > { %492 = vst.msk [vmem:[#allocation2 + $0x10] sm:$0xff] %vm400_vm1, %v476_v41 }
  0xd5   : > { %496 = vst.msk [vmem:[#allocation2 + $0x30] sm:$0xff] %vm400_vm1, %v480_v42 }
  0xd7   : > { %v459_v47 = vpop.f32.mrf.mxu2  ;;  %v469_v48 = vpop.f32.mrf.mxu3 }
  0xd8   : > { %v484_v49 = vadd.f32 %v459_v47, %v306_v43  ;;  %v488_v50 = vadd.f32 %v469_v48, %v310_v44  ;;  %v441_v51 = vpop.f32.mrf.mxu0  ;;  %v451_v52 = vpop.f32.mrf.mxu1 }
  0xd9   : > { %v477_v53 = vadd.f32 %v441_v51, %v299_v45  ;;  %v481_v54 = vadd.f32 %v451_v52, %v303_v46 }
  0xda   : > { %500 = vst.msk [vmem:[#allocation2 + $0x50] sm:$0xff] %vm400_vm1, %v484_v49 }
  0xdb   : > { %504 = vst.msk [vmem:[#allocation2 + $0x70] sm:$0xff] %vm400_vm1, %v488_v50 }
  0xdc   : > { %493 = vst.msk [vmem:[#allocation2 + $0x18] sm:$0xff] %vm400_vm1, %v477_v53 }
  0xdd   : > { %497 = vst.msk [vmem:[#allocation2 + $0x38] sm:$0xff] %vm400_vm1, %v481_v54 }
  0xdf   : > { %v461_v57 = vpop.f32.mrf.mxu2  ;;  %v471_v58 = vpop.f32.mrf.mxu3  ;;  %509 = sbr.rel (%p781_p1) target bundleno = 252 (0xfc), region = 44 }
  0xe0   : > { %v485_v59 = vadd.f32 %v461_v57, %v307_v55  ;;  %v489_v60 = vadd.f32 %v471_v58, %v311_v56 }
  0xe2   : > { %501 = vst.msk [vmem:[#allocation2 + $0x58] sm:$0xff] %vm400_vm1, %v485_v59 }
  0xe3   : > { %505 = vst.msk [vmem:[#allocation2 + $0x78] sm:$0xff] %vm400_vm1, %v489_v60 }
  0xe4   : > { %v510_v61 = vld [vmem:[#allocation2] sm:$0xff]  ;;  %v511_v63 = vld [vmem:[#allocation2 + $0x8] sm:$0xff]  ;;  %v512_v0 = vld [vmem:[#allocation2 + $0x10] sm:$0xff]  ;;  %vm578_vm2 = vcmask 519168  }
  0xe5   : > { %v870_v62 = vld [vmem:[%s1191_s2] ss:$0 sm:$0xff]  ;;  %v513_v1 = vld [vmem:[#allocation2 + $0x18] sm:$0xff]  ;;  %v515_v7 = vld [vmem:[#allocation2 + $0x28] sm:$0xff] }
  0xe6   : > { %v530_v2 = vadd.f32 %v870_v62, %v510_v61  ;;  %v531_v3 = vadd.f32 %v870_v62, %v511_v63  ;;  %v532_v4 = vadd.f32 %v870_v62, %v512_v0  ;;  %v533_v5 = vadd.f32 %v870_v62, %v513_v1  ;;  %v514_v6 = vld [vmem:[#allocation2 + $0x20] sm:$0xff]  ;;  %v516_v8 = vld [vmem:[#allocation2 + $0x30] sm:$0xff]  ;;  %v517_v12 = vld [vmem:[#allocation2 + $0x38] sm:$0xff] }
  0xe7   : > { %v534_v9 = vadd.f32 %v870_v62, %v514_v6  ;;  %v535_v10 = vadd.f32 %v870_v62, %v515_v7  ;;  %v536_v11 = vadd.f32 %v870_v62, %v516_v8  ;;  %v518_v17 = vld [vmem:[#allocation2 + $0x40] sm:$0xff]  ;;  %v537_v21 = vadd.f32 %v870_v62, %v517_v12  ;;  %v519_v22 = vld [vmem:[#allocation2 + $0x48] sm:$0xff]  ;;  %v520_v23 = vld [vmem:[#allocation2 + $0x50] sm:$0xff] }
  0xe8   : > { %v546_v13 = vmax.f32 %v530_v2, 0.0  ;;  %v547_v14 = vmax.f32 %v531_v3, 0.0  ;;  %v548_v15 = vmax.f32 %v532_v4, 0.0  ;;  %v549_v16 = vmax.f32 %v533_v5, 0.0  ;;  %v522_v28 = vld [vmem:[#allocation2 + $0x60] sm:$0xff]  ;;  %v523_v29 = vld [vmem:[#allocation2 + $0x68] sm:$0xff] }
  0xe9   : > { %v550_v18 = vmax.f32 %v534_v9, 0.0  ;;  %v551_v19 = vmax.f32 %v535_v10, 0.0  ;;  %v552_v20 = vmax.f32 %v536_v11, 0.0  ;;  %v521_v24 = vld [vmem:[#allocation2 + $0x58] sm:$0xff]  ;;  %v553_v32 = vmax.f32 %v537_v21, 0.0  ;;  %v524_v33 = vld [vmem:[#allocation2 + $0x70] sm:$0xff] }
  0xea   : > { %v562_v25 = vpack.c.bf16 %v546_v13, %v546_v13  ;;  %v563_v26 = vpack.c.bf16 %v547_v14, %v547_v14  ;;  %v564_v27 = vpack.c.bf16 %v548_v15, %v548_v15  ;;  %v565_v30 = vpack.c.bf16 %v549_v16, %v549_v16  ;;  %v525_v38 = vld [vmem:[#allocation2 + $0x78] sm:$0xff] }
  0xeb   : > { %v566_v31 = vpack.c.bf16 %v550_v18, %v550_v18  ;;  %v538_v34 = vadd.f32 %v870_v62, %v518_v17  ;;  %v539_v35 = vadd.f32 %v870_v62, %v519_v22  ;;  %v540_v36 = vadd.f32 %v870_v62, %v520_v23 }
  0xec   : > { %579 = vst.msk [vmem:[%s1192_s3] sm:$0xf] %vm578_vm2, %v562_v25  ;;  %v541_v37 = vadd.f32 %v870_v62, %v521_v24  ;;  %v567_v39 = vpack.c.bf16 %v551_v19, %v551_v19  ;;  %v568_v40 = vpack.c.bf16 %v552_v20, %v552_v20  ;;  %v542_v41 = vadd.f32 %v870_v62, %v522_v28 }
  0xed   : > { %580 = vst.msk [vmem:[%s1192_s3 + $0x4] sm:$0xf] %vm578_vm2, %v563_v26  ;;  %v543_v42 = vadd.f32 %v870_v62, %v523_v29  ;;  %v554_v43 = vmax.f32 %v538_v34, 0.0  ;;  %v555_v44 = vmax.f32 %v539_v35, 0.0  ;;  %v556_v45 = vmax.f32 %v540_v36, 0.0 }
  0xee   : > { %581 = vst.msk [vmem:[%s1192_s3 + $0x8] sm:$0xf] %vm578_vm2, %v564_v27  ;;  %v544_v46 = vadd.f32 %v870_v62, %v524_v33  ;;  %v569_v47 = vpack.c.bf16 %v553_v32, %v553_v32  ;;  %v557_v48 = vmax.f32 %v541_v37, 0.0  ;;  %v545_v49 = vadd.f32 %v870_v62, %v525_v38 }
  0xef   : > { %582 = vst.msk [vmem:[%s1192_s3 + $0xc] sm:$0xf] %vm578_vm2, %v565_v30  ;;  %v570_v50 = vpack.c.bf16 %v554_v43, %v554_v43  ;;  %v558_v51 = vmax.f32 %v542_v41, 0.0  ;;  %v571_v52 = vpack.c.bf16 %v555_v44, %v555_v44  ;;  %v559_v53 = vmax.f32 %v543_v42, 0.0 }
  0xf0   : > { %583 = vst.msk [vmem:[%s1192_s3 + $0x10] sm:$0xf] %vm578_vm2, %v566_v31  ;;  %v572_v54 = vpack.c.bf16 %v556_v45, %v556_v45  ;;  %v560_v55 = vmax.f32 %v544_v46, 0.0  ;;  %v573_v56 = vpack.c.bf16 %v557_v48, %v557_v48  ;;  %v561_v57 = vmax.f32 %v545_v49, 0.0 }
  0xf1   : > { %584 = vst.msk [vmem:[%s1192_s3 + $0x14] sm:$0xf] %vm578_vm2, %v567_v39  ;;  %v574_v58 = vpack.c.bf16 %v558_v51, %v558_v51  ;;  %v575_v59 = vpack.c.bf16 %v559_v53, %v559_v53 }
  0xf2   : > { %585 = vst.msk [vmem:[%s1192_s3 + $0x18] sm:$0xf] %vm578_vm2, %v568_v40  ;;  %v576_v60 = vpack.c.bf16 %v560_v55, %v560_v55  ;;  %v577_v61 = vpack.c.bf16 %v561_v57, %v561_v57 }
  0xf3   : > { %586 = vst.msk [vmem:[%s1192_s3 + $0x1c] sm:$0xf] %vm578_vm2, %v569_v47 }
  0xf4   : > { %587 = vst.msk [vmem:[%s1192_s3 + $0x20] sm:$0xf] %vm578_vm2, %v570_v50 }
  0xf5   : > { %588 = vst.msk [vmem:[%s1192_s3 + $0x24] sm:$0xf] %vm578_vm2, %v571_v52 }
  0xf6   : > { %589 = vst.msk [vmem:[%s1192_s3 + $0x28] sm:$0xf] %vm578_vm2, %v572_v54 }
  0xf7   : > { %590 = vst.msk [vmem:[%s1192_s3 + $0x2c] sm:$0xf] %vm578_vm2, %v573_v56 }
  0xf8   : > { %591 = vst.msk [vmem:[%s1192_s3 + $0x30] sm:$0xf] %vm578_vm2, %v574_v58 }
  0xf9   : > { %592 = vst.msk [vmem:[%s1192_s3 + $0x34] sm:$0xf] %vm578_vm2, %v575_v59 }
  0xfa   : > { %593 = vst.msk [vmem:[%s1192_s3 + $0x38] sm:$0xf] %vm578_vm2, %v576_v60 }
  0xfb   : > { %594 = vst.msk [vmem:[%s1192_s3 + $0x3c] sm:$0xf] %vm578_vm2, %v577_v61 }
  0xfc PF: > { %s16_s17 = sadd.s32 1, %s951_s17   ;;  %s1195_s12 = smov %s935_s13 }
  0xfd   : > { %p13_p2 = scmp.ge.s32.totalorder %s16_s17, 11   ;;  %s1196_s13 = smov %s939_s14 }
  0xfe   : > { %s1197_s14 = smov %s1025_s24  ;;  %s1198_s15 = smov %s947_s16 }
  0xff   : > { %s1199_s16 = smov %s1201_s19  ;;  %15 = sbr.rel (!%p13_p2) target bundleno = 4 (0x4), region = 86 }
 0x104   :  { %623 = vsyncpa [#allocation4], 1 }
 0x105   :  { %625 = vsyncpa [#allocation4 + $0x1], 1 }

// kernel: _lambda_.22
= control target key start
LH: loop header
LB: loop body
LE: loop exit
PB: predicated region body
PF: predicated region fallthrough
CT: control target
= control target key end

     0   :  { %9 = vsyncpa [#allocation4], 0  ;;  %s1402_s0 = inlined_call_operand.vmem [shape: bf16[9,128,64], index: 0, kind: input, shape index: {}]   ;;  %s1403_s1 = inlined_call_operand.hbm [shape: bf16[9,64,64], index: 1, kind: input, shape index: {}]   ;;  %s1404_s2 = inlined_call_operand.vmem [shape: f32[1,64], index: 2, kind: input, shape index: {}]   ;;  %s1405_s3 = inlined_call_operand.vmem [shape: bf16[128,64], index: 3, kind: input, shape index: {}]   ;;  %s1406_s4 = inlined_call_operand.vmem [shape: bf16[128,64], index: 4, kind: output, shape index: {}]  }
   0x1   :  { %11 = vsyncpa [#allocation4 + $0x1], 0  ;;  %s1147_s15 = smov 0   ;;  %s1149_s16 = smov 0  }
   0x2   :  { %s1151_s17 = smov 0   ;;  %s1153_s18 = smov 0  }
   0x3   :  { %s1155_s19 = smov 0   ;;  %s1157_s20 = smov 0  }
   0x4 LB: > { %s839_s21 = sadd.s32 4294967295, %s1117_s20   ;;  %s29_s22 = sadd.s32 1, %s1113_s19  ;;  %s1117_s20 = sphi %s1157_s20, %s17_s20   ;;  %s1113_s19 = sphi %s1155_s19, %s1413_s19   ;;  %s1109_s18 = sphi %s1153_s18, %s1412_s18   ;;  %s1105_s17 = sphi %s1151_s17, %s1411_s17   ;;  %s1101_s16 = sphi %s1149_s16, %s1410_s16   ;;  %s1097_s15 = sphi %s1147_s15, %s1409_s15  }
   0x5   : > { %p30_p0 = scmp.ge.s32.totalorder %s29_s22, 9  ;;  %s73_s23 = sadd.s32 1, %s1105_s17 }
   0x6   : > { %p80_p1 = scmp.ne.s32.totalorder %s1105_s17, %s1101_s16  ;;  %p81_p2 = scmp.eq.s32.totalorder %s1117_s20, 0 }
   0x7   : > { %s1415_s22 = smov (%p30_p0, %s29_s22), 0  ;;  %p86_p4 = scmp.ne.s32.totalorder %s1101_s16, %s1097_s15 }
   0x8   : > { %p1183_p3 = por %p81_p2, %p80_p1  ;;  %s68_s25 = ssub.s32 %s1113_s19, %s1415_s22 }
   0x9   : > { %p87_p5 = scmp.eq.s32.totalorder %s839_s21, 0  ;;  %p71_p6 = scmp.eq.s32.totalorder %s68_s25, 0 }
   0xa   : > { %p984_p8 = scmp.lt.s32.totalorder %s1117_s20, 9  ;;  %s223_s28 = sand.u32 1, %s1105_s17  }
   0xb   : > { %p1190_p7 = por %p87_p5, %p86_p4  ;;  %s913_s29 = sshll.u32 %s1113_s19, 5 }
   0xc   : > { %s1196_s27 = scalar_select %p71_p6, %s1105_s17, %s73_s23  }
   0xd   : > { %s844_s30 = sshll.u32 %s223_s28, 5  ;;  %s233_s7 = scalar_lea.hbm %s1403_s1, %s913_s29 }
   0xe   : > { %s234_s8 = sshll.u32 %s233_s7, 4  ;;  %s227_s9 = scalar_lea.vmem [#allocation3], %s844_s30  ;;  %s235_s8 = int_to_ptr.hbm [resolvable:$true] %s234_s8 }
   0xf   : > { %s236_s10 = sshll.u32 %s227_s9, 4  ;;  %p981_p9 = pnand %p984_p8, %p1183_p3  ;;  %s237_s10 = int_to_ptr.vmem [resolvable:$true] %s236_s10 }
  0x10   : > { %p847_p10 = scmp.ge.s32.totalorder %s1117_s20, 1  ;;  %p244_p11 = scmp.lt.s32.totalorder %s1117_s20, 10 }
  0x11   : > { %s224_s11 = scalar_lea.sflag [#allocation4], %s223_s28  ;;  %s1119_s12 = smov 64  }
  0x12   : > { %s1120_s13 = smov 4   ;;  %p245_p12 = pnand %p847_p10, %p244_p11 }
  0x13   : > { %983 = dma.hbm_to_vmem [thread:$0]  (!%p981_p9), %s235_s8, 512, %s237_s10, %s224_s11, %s1119_s12, %s1119_s12, %s1120_s13  }
  0x14   : > { %248 = sbr.rel (%p245_p12) target bundleno = 256 (0x100), region = 36  ;;  %s250_s14 = sand.u32 (!%p245_p12), 1, %s1101_s16  }
  0x15   : > { %s848_s15 = sshll.u32 (!%p245_p12), %s250_s14, 5  ;;  %s251_s21 = scalar_lea.sflag (!%p245_p12), [#allocation4], %s250_s14 }
  0x16   : > { %s1208_s23 = scalar_lea.vmem (!%p245_p12), [#allocation3], %s848_s15 }
  0x19   : > { %1092 = dma.done.wait (%p1190_p7), %s251_s21, 512  }
  0x1a   : > { %1094 = vsyncadd (%p1190_p7), %s251_s21, 4294966784  ;;  %p304_p13 = scmp.lt.s32.totalorder %s1109_s18, 8  ;;  %p851_p0 = scmp.ne.s32.totalorder %s1109_s18, 0 }
  0x1c   : > { %s305_s24 = scalar_select %p304_p13, %s1109_s18, 8 }
  0x1d   : > { %338 = sbr.rel (%p851_p0) target bundleno = 51 (0x33), region = 44 }
  0x1e   : > { %s914_s25 = sshll.u32 %s305_s24, 6 }
  0x1f   : > { %s1219_s30 = scalar_lea.vmem %s1402_s0, %s914_s25 }
  0x22   : > { %vm339_vm0 = vcmask 523264   ;;  %v1121_v0 = vmov 0.0  }
  0x23   : > { %340 = vst.msk [vmem:[#allocation2] sm:$0xff] %vm339_vm0, %v1121_v0 }
  0x24   : > { %341 = vst.msk [vmem:[#allocation2 + $0x8] sm:$0xff] %vm339_vm0, %v1121_v0 }
  0x25   : > { %342 = vst.msk [vmem:[#allocation2 + $0x10] sm:$0xff] %vm339_vm0, %v1121_v0 }
  0x26   : > { %343 = vst.msk [vmem:[#allocation2 + $0x18] sm:$0xff] %vm339_vm0, %v1121_v0 }
  0x27   : > { %344 = vst.msk [vmem:[#allocation2 + $0x20] sm:$0xff] %vm339_vm0, %v1121_v0 }
  0x28   : > { %345 = vst.msk [vmem:[#allocation2 + $0x28] sm:$0xff] %vm339_vm0, %v1121_v0 }
  0x29   : > { %346 = vst.msk [vmem:[#allocation2 + $0x30] sm:$0xff] %vm339_vm0, %v1121_v0 }
  0x2a   : > { %347 = vst.msk [vmem:[#allocation2 + $0x38] sm:$0xff] %vm339_vm0, %v1121_v0 }
  0x2b   : > { %348 = vst.msk [vmem:[#allocation2 + $0x40] sm:$0xff] %vm339_vm0, %v1121_v0 }
  0x2c   : > { %349 = vst.msk [vmem:[#allocation2 + $0x48] sm:$0xff] %vm339_vm0, %v1121_v0 }
  0x2d   : > { %350 = vst.msk [vmem:[#allocation2 + $0x50] sm:$0xff] %vm339_vm0, %v1121_v0 }
  0x2e   : > { %351 = vst.msk [vmem:[#allocation2 + $0x58] sm:$0xff] %vm339_vm0, %v1121_v0 }
  0x2f   : > { %352 = vst.msk [vmem:[#allocation2 + $0x60] sm:$0xff] %vm339_vm0, %v1121_v0 }
  0x30   : > { %353 = vst.msk [vmem:[#allocation2 + $0x68] sm:$0xff] %vm339_vm0, %v1121_v0 }
  0x31   : > { %354 = vst.msk [vmem:[#allocation2 + $0x70] sm:$0xff] %vm339_vm0, %v1121_v0 }
  0x32   : > { %355 = vst.msk [vmem:[#allocation2 + $0x78] sm:$0xff] %vm339_vm0, %v1121_v0 }
  0x33 PF: > { %v926_v1 = vld [vmem:[%s1208_s23 + $0x18] sm:$0xff]  ;;  %v925_v2 = vld [vmem:[%s1208_s23 + $0x10] sm:$0xff]  ;;  %v924_v3 = vld [vmem:[%s1208_s23 + $0x8] sm:$0xff]  ;;  %vm460_vm1 = vcmask 523264   ;;  %p908_p1 = scmp.ne.s32.totalorder %s1109_s18, 8 }
  0x34   : > { %489 = vmatpush.bf16.msra.mxu0 %v926_v1  ;;  %966 = vmatpush.bf16.msra.mxu1 %v926_v1  ;;  %v923_v4 = vld [vmem:[%s1208_s23] sm:$0xff]  ;;  %v917_v6 = vld [vmem:[%s1219_s30 + $0x10] sm:$0xff]  ;;  %v916_v9 = vld [vmem:[%s1219_s30 + $0x8] sm:$0xff] }
  0x35   : > { %967 = vmatpush.bf16.msra.mxu2 %v926_v1  ;;  %968 = vmatpush.bf16.msra.mxu3 %v926_v1  ;;  %v915_v5 = vld [vmem:[%s1219_s30] sm:$0xff]  ;;  %v921_v8 = vld [vmem:[%s1219_s30 + $0x30] sm:$0xff]  ;;  %v918_v10 = vld [vmem:[%s1219_s30 + $0x18] sm:$0xff] }
  0x36   : > { %v919_v7 = vld [vmem:[%s1219_s30 + $0x20] sm:$0xff]  ;;  %v920_v11 = vld [vmem:[%s1219_s30 + $0x28] sm:$0xff]  ;;  %v922_v12 = vld [vmem:[%s1219_s30 + $0x38] sm:$0xff] }
  0x37   : > { %v356_v13 = vld [vmem:[#allocation2] sm:$0xff]  ;;  %v357_v21 = vld [vmem:[#allocation2 + $0x8] sm:$0xff]  ;;  %v358_v33 = vld [vmem:[#allocation2 + $0x10] sm:$0xff] }
  0x38   : > { %490 = vmatpush.bf16.msra.mxu0 %v925_v2  ;;  %969 = vmatpush.bf16.msra.mxu1 %v925_v2  ;;  %v360_v14 = vld [vmem:[#allocation2 + $0x20] sm:$0xff]  ;;  %v361_v22 = vld [vmem:[#allocation2 + $0x28] sm:$0xff]  ;;  %v362_v34 = vld [vmem:[#allocation2 + $0x30] sm:$0xff] }
  0x39   : > { %970 = vmatpush.bf16.msra.mxu2 %v925_v2  ;;  %971 = vmatpush.bf16.msra.mxu3 %v925_v2  ;;  %v364_v19 = vld [vmem:[#allocation2 + $0x40] sm:$0xff]  ;;  %v365_v31 = vld [vmem:[#allocation2 + $0x48] sm:$0xff]  ;;  %v366_v43 = vld [vmem:[#allocation2 + $0x50] sm:$0xff] }
  0x3a   : > { %v368_v20 = vld [vmem:[#allocation2 + $0x60] sm:$0xff]  ;;  %v369_v32 = vld [vmem:[#allocation2 + $0x68] sm:$0xff]  ;;  %v370_v44 = vld [vmem:[#allocation2 + $0x70] sm:$0xff] }
  0x3b   : > { %v359_v45 = vld [vmem:[#allocation2 + $0x18] sm:$0xff] }
  0x3c   : > { %491 = vmatpush.bf16.msra.mxu0 %v924_v3  ;;  %972 = vmatpush.bf16.msra.mxu1 %v924_v3  ;;  %v363_v46 = vld [vmem:[#allocation2 + $0x38] sm:$0xff] }
  0x3d   : > { %973 = vmatpush.bf16.msra.mxu2 %v924_v3  ;;  %974 = vmatpush.bf16.msra.mxu3 %v924_v3  ;;  %v367_v55 = vld [vmem:[#allocation2 + $0x58] sm:$0xff] }
  0x3e   : > { %v371_v56 = vld [vmem:[#allocation2 + $0x78] sm:$0xff] }
  0x40   : > { %492 = vmatpush.bf16.msra.mxu0 %v923_v4  ;;  %975 = vmatpush.bf16.msra.mxu1 %v923_v4 }
  0x41   : > { %976 = vmatpush.bf16.msra.mxu2 %v923_v4  ;;  %977 = vmatpush.bf16.msra.mxu3 %v923_v4 }
  0x43   : > { %900 = vmatmul.msk.bf16.vlgmr.msra.gmra.mxu0 %vm460_vm1, %v915_v5  ;;  %902 = vmatmul.msk.bf16.vlgmr.msra.gmra.mxu1 %vm460_vm1, %v917_v6 }
  0x44   : > { %904 = vmatmul.msk.bf16.vlgmr.msra.gmra.mxu2 %vm460_vm1, %v919_v7  ;;  %906 = vmatmul.msk.bf16.vlgmr.msra.gmra.mxu3 %vm460_vm1, %v921_v8 }
  0x53   : > { %901 = vmatmul.msk.bf16.gmra.mxu0 %vm460_vm1, %v916_v9  ;;  %903 = vmatmul.msk.bf16.gmra.mxu1 %vm460_vm1, %v918_v10 }
  0x54   : > { %905 = vmatmul.msk.bf16.gmra.mxu2 %vm460_vm1, %v920_v11  ;;  %907 = vmatmul.msk.bf16.gmra.mxu3 %vm460_vm1, %v922_v12 }
  0xc0   : > { %v494_v15 = vpop.f32.mrf.mxu0  ;;  %v504_v16 = vpop.f32.mrf.mxu1 }
  0xc1   : > { %v534_v17 = vadd.f32 %v494_v15, %v356_v13  ;;  %v538_v18 = vadd.f32 %v504_v16, %v360_v14 }
  0xc3   : > { %550 = vst.msk [vmem:[#allocation2] sm:$0xff] %vm460_vm1, %v534_v17 }
  0xc4   : > { %554 = vst.msk [vmem:[#allocation2 + $0x20] sm:$0xff] %vm460_vm1, %v538_v18 }
  0xc7   : > { %v514_v23 = vpop.f32.mrf.mxu2  ;;  %v524_v24 = vpop.f32.mrf.mxu3 }
  0xc8   : > { %v542_v25 = vadd.f32 %v514_v23, %v364_v19  ;;  %v546_v26 = vadd.f32 %v524_v24, %v368_v20  ;;  %v496_v27 = vpop.f32.mrf.mxu0  ;;  %v506_v28 = vpop.f32.mrf.mxu1 }
  0xc9   : > { %v535_v29 = vadd.f32 %v496_v27, %v357_v21  ;;  %v539_v30 = vadd.f32 %v506_v28, %v361_v22 }
  0xca   : > { %558 = vst.msk [vmem:[#allocation2 + $0x40] sm:$0xff] %vm460_vm1, %v542_v25 }
  0xcb   : > { %562 = vst.msk [vmem:[#allocation2 + $0x60] sm:$0xff] %vm460_vm1, %v546_v26 }
  0xcc   : > { %551 = vst.msk [vmem:[#allocation2 + $0x8] sm:$0xff] %vm460_vm1, %v535_v29 }
  0xcd   : > { %555 = vst.msk [vmem:[#allocation2 + $0x28] sm:$0xff] %vm460_vm1, %v539_v30 }
  0xcf   : > { %v516_v35 = vpop.f32.mrf.mxu2  ;;  %v526_v36 = vpop.f32.mrf.mxu3 }
  0xd0   : > { %v543_v37 = vadd.f32 %v516_v35, %v365_v31  ;;  %v547_v38 = vadd.f32 %v526_v36, %v369_v32  ;;  %v499_v39 = vpop.f32.mrf.mxu0  ;;  %v509_v40 = vpop.f32.mrf.mxu1 }
  0xd1   : > { %v536_v41 = vadd.f32 %v499_v39, %v358_v33  ;;  %v540_v42 = vadd.f32 %v509_v40, %v362_v34 }
  0xd2   : > { %559 = vst.msk [vmem:[#allocation2 + $0x48] sm:$0xff] %vm460_vm1, %v543_v37 }
  0xd3   : > { %563 = vst.msk [vmem:[#allocation2 + $0x68] sm:$0xff] %vm460_vm1, %v547_v38 }
  0xd4   : > { %552 = vst.msk [vmem:[#allocation2 + $0x10] sm:$0xff] %vm460_vm1, %v536_v41 }
  0xd5   : > { %556 = vst.msk [vmem:[#allocation2 + $0x30] sm:$0xff] %vm460_vm1, %v540_v42 }
  0xd7   : > { %v519_v47 = vpop.f32.mrf.mxu2  ;;  %v529_v48 = vpop.f32.mrf.mxu3 }
  0xd8   : > { %v544_v49 = vadd.f32 %v519_v47, %v366_v43  ;;  %v548_v50 = vadd.f32 %v529_v48, %v370_v44  ;;  %v501_v51 = vpop.f32.mrf.mxu0  ;;  %v511_v52 = vpop.f32.mrf.mxu1 }
  0xd9   : > { %v537_v53 = vadd.f32 %v501_v51, %v359_v45  ;;  %v541_v54 = vadd.f32 %v511_v52, %v363_v46 }
  0xda   : > { %560 = vst.msk [vmem:[#allocation2 + $0x50] sm:$0xff] %vm460_vm1, %v544_v49 }
  0xdb   : > { %564 = vst.msk [vmem:[#allocation2 + $0x70] sm:$0xff] %vm460_vm1, %v548_v50 }
  0xdc   : > { %553 = vst.msk [vmem:[#allocation2 + $0x18] sm:$0xff] %vm460_vm1, %v537_v53 }
  0xdd   : > { %557 = vst.msk [vmem:[#allocation2 + $0x38] sm:$0xff] %vm460_vm1, %v541_v54 }
  0xdf   : > { %v521_v57 = vpop.f32.mrf.mxu2  ;;  %v531_v58 = vpop.f32.mrf.mxu3  ;;  %569 = sbr.rel (%p908_p1) target bundleno = 256 (0x100), region = 48 }
  0xe0   : > { %v545_v59 = vadd.f32 %v521_v57, %v367_v55  ;;  %v549_v60 = vadd.f32 %v531_v58, %v371_v56 }
  0xe2   : > { %561 = vst.msk [vmem:[#allocation2 + $0x58] sm:$0xff] %vm460_vm1, %v545_v59 }
  0xe3   : > { %565 = vst.msk [vmem:[#allocation2 + $0x78] sm:$0xff] %vm460_vm1, %v549_v60 }
  0xe4   : > { %v570_v61 = vld [vmem:[#allocation2] sm:$0xff]  ;;  %vm686_vm2 = vcmask 519168   ;;  %v571_v0 = vld [vmem:[#allocation2 + $0x8] sm:$0xff]  ;;  %v572_v1 = vld [vmem:[#allocation2 + $0x10] sm:$0xff] }
  0xe5   : > { %v1278_v62 = vld [vmem:[%s1404_s2] ss:$0 sm:$0xff]  ;;  %v959_v6 = vld [vmem:[%s1405_s3 + $0x8] sm:$0xff]   ;;  %v573_v7 = vld [vmem:[#allocation2 + $0x18] sm:$0xff] }
  0xe6   : > { %v928_v63 = vld [vmem:[%s1405_s3] sm:$0xff]   ;;  %v590_v2 = vadd.f32 %v1278_v62, %v570_v61  ;;  %v591_v4 = vadd.f32 %v1278_v62, %v571_v0  ;;  %v592_v9 = vadd.f32 %v1278_v62, %v572_v1  ;;  %v933_v10 = vunpack.c.l.bf16 %v959_v6  ;;  %v960_v13 = vld [vmem:[%s1405_s3 + $0x10] sm:$0xff]   ;;  %v575_v14 = vld [vmem:[#allocation2 + $0x28] sm:$0xff] }
  0xe7   : > { %v929_v3 = vunpack.c.l.bf16 %v928_v63  ;;  %v930_v5 = vunpack.c.h.bf16 %v928_v63  ;;  %v574_v8 = vld [vmem:[#allocation2 + $0x20] sm:$0xff]  ;;  %v593_v11 = vadd.f32 %v1278_v62, %v573_v7  ;;  %v934_v12 = vunpack.c.h.bf16 %v959_v6  ;;  %v576_v15 = vld [vmem:[#allocation2 + $0x30] sm:$0xff]  ;;  %v961_v20 = vld [vmem:[%s1405_s3 + $0x18] sm:$0xff]  }
  0xe8   : > { %v594_v18 = vadd.f32 %v1278_v62, %v574_v8  ;;  %v937_v19 = vunpack.c.l.bf16 %v960_v13  ;;  %v640_v21 = vadd.f32 %v933_v10, %v592_v9  ;;  %v595_v23 = vadd.f32 %v1278_v62, %v575_v14  ;;  %v577_v25 = vld [vmem:[#allocation2 + $0x38] sm:$0xff]  ;;  %v578_v34 = vld [vmem:[#allocation2 + $0x40] sm:$0xff]  ;;  %v579_v40 = vld [vmem:[#allocation2 + $0x48] sm:$0xff] }
  0xe9   : > { %v638_v16 = vadd.f32 %v929_v3, %v590_v2  ;;  %v639_v17 = vadd.f32 %v930_v5, %v591_v4  ;;  %v641_v22 = vadd.f32 %v934_v12, %v593_v11  ;;  %v938_v24 = vunpack.c.h.bf16 %v960_v13  ;;  %v962_v35 = vld [vmem:[%s1405_s3 + $0x20] sm:$0xff]   ;;  %v580_v45 = vld [vmem:[#allocation2 + $0x50] sm:$0xff]  ;;  %v963_v46 = vld [vmem:[%s1405_s3 + $0x28] sm:$0xff]  }
  0xea   : > { %v642_v28 = vadd.f32 %v937_v19, %v594_v18  ;;  %v596_v29 = vadd.f32 %v1278_v62, %v576_v15  ;;  %v656_v30 = vmax.f32 %v640_v21, 0.0  ;;  %v941_v33 = vunpack.c.l.bf16 %v961_v20  ;;  %v581_v51 = vld [vmem:[#allocation2 + $0x58] sm:$0xff]  ;;  %v582_v56 = vld [vmem:[#allocation2 + $0x60] sm:$0xff]  ;;  %v964_v61 = vld [vmem:[%s1405_s3 + $0x30] sm:$0xff]  }
  0xeb   : > { %v654_v26 = vmax.f32 %v638_v16, 0.0  ;;  %v655_v27 = vmax.f32 %v639_v17, 0.0  ;;  %v657_v31 = vmax.f32 %v641_v22, 0.0  ;;  %v643_v32 = vadd.f32 %v938_v24, %v595_v23  ;;  %v583_v63 = vld [vmem:[#allocation2 + $0x68] sm:$0xff]  ;;  %v584_v8 = vld [vmem:[#allocation2 + $0x70] sm:$0xff]  ;;  %v965_v13 = vld [vmem:[%s1405_s3 + $0x38] sm:$0xff]  }
  0xec   : > { %v658_v38 = vmax.f32 %v642_v28, 0.0  ;;  %v597_v39 = vadd.f32 %v1278_v62, %v577_v25  ;;  %v672_v41 = vpack.c.bf16 %v656_v30, %v656_v30  ;;  %v644_v44 = vadd.f32 %v941_v33, %v596_v29  ;;  %v585_v14 = vld [vmem:[#allocation2 + $0x78] sm:$0xff] }
  0xed   : > { %v670_v36 = vpack.c.bf16 %v654_v26, %v654_v26  ;;  %v671_v37 = vpack.c.bf16 %v655_v27, %v655_v27  ;;  %v673_v42 = vpack.c.bf16 %v657_v31, %v657_v31  ;;  %v659_v43 = vmax.f32 %v643_v32, 0.0 }
  0xee   : > { %v674_v47 = vpack.c.bf16 %v658_v38, %v658_v38  ;;  %v942_v48 = vunpack.c.h.bf16 %v961_v20  ;;  %v598_v49 = vadd.f32 %v1278_v62, %v578_v34  ;;  %v945_v50 = vunpack.c.l.bf16 %v962_v35  ;;  %689 = vst.msk [vmem:[%s1406_s4 + $0x8] sm:$0xf] %vm686_vm2, %v672_v41 }
  0xef   : > { %687 = vst.msk [vmem:[%s1406_s4] sm:$0xf] %vm686_vm2, %v670_v36  ;;  %v675_v52 = vpack.c.bf16 %v659_v43, %v659_v43  ;;  %v660_v53 = vmax.f32 %v644_v44, 0.0  ;;  %v599_v54 = vadd.f32 %v1278_v62, %v579_v40  ;;  %v946_v55 = vunpack.c.h.bf16 %v962_v35 }
  0xf0   : > { %688 = vst.msk [vmem:[%s1406_s4 + $0x4] sm:$0xf] %vm686_vm2, %v671_v37  ;;  %v645_v57 = vadd.f32 %v942_v48, %v597_v39  ;;  %v646_v58 = vadd.f32 %v945_v50, %v598_v49  ;;  %v600_v59 = vadd.f32 %v1278_v62, %v580_v45  ;;  %v949_v60 = vunpack.c.l.bf16 %v963_v46 }
  0xf1   : > { %690 = vst.msk [vmem:[%s1406_s4 + $0xc] sm:$0xf] %vm686_vm2, %v673_v42  ;;  %v676_v0 = vpack.c.bf16 %v660_v53, %v660_v53  ;;  %v647_v1 = vadd.f32 %v946_v55, %v599_v54  ;;  %v601_v2 = vadd.f32 %v1278_v62, %v581_v51  ;;  %v950_v3 = vunpack.c.h.bf16 %v963_v46 }
  0xf2   : > { %691 = vst.msk [vmem:[%s1406_s4 + $0x10] sm:$0xf] %vm686_vm2, %v674_v47  ;;  %v661_v4 = vmax.f32 %v645_v57, 0.0  ;;  %v662_v5 = vmax.f32 %v646_v58, 0.0  ;;  %v648_v6 = vadd.f32 %v949_v60, %v600_v59  ;;  %v602_v7 = vadd.f32 %v1278_v62, %v582_v56 }
  0xf3   : > { %692 = vst.msk [vmem:[%s1406_s4 + $0x14] sm:$0xf] %vm686_vm2, %v675_v52  ;;  %v663_v9 = vmax.f32 %v647_v1, 0.0  ;;  %v649_v10 = vadd.f32 %v950_v3, %v601_v2  ;;  %v953_v11 = vunpack.c.l.bf16 %v964_v61  ;;  %v603_v12 = vadd.f32 %v1278_v62, %v583_v63 }
  0xf4   : > { %693 = vst.msk [vmem:[%s1406_s4 + $0x18] sm:$0xf] %vm686_vm2, %v676_v0  ;;  %v677_v15 = vpack.c.bf16 %v661_v4, %v661_v4  ;;  %v678_v16 = vpack.c.bf16 %v662_v5, %v662_v5  ;;  %v664_v17 = vmax.f32 %v648_v6, 0.0  ;;  %v954_v18 = vunpack.c.h.bf16 %v964_v61 }
  0xf5   : > { %v679_v19 = vpack.c.bf16 %v663_v9, %v663_v9  ;;  %v665_v20 = vmax.f32 %v649_v10, 0.0  ;;  %v650_v21 = vadd.f32 %v953_v11, %v602_v7  ;;  %v604_v22 = vadd.f32 %v1278_v62, %v584_v8 }
  0xf6   : > { %694 = vst.msk [vmem:[%s1406_s4 + $0x1c] sm:$0xf] %vm686_vm2, %v677_v15  ;;  %v680_v23 = vpack.c.bf16 %v664_v17, %v664_v17  ;;  %v651_v24 = vadd.f32 %v954_v18, %v603_v12  ;;  %v957_v25 = vunpack.c.l.bf16 %v965_v13  ;;  %v605_v26 = vadd.f32 %v1278_v62, %v585_v14 }
  0xf7   : > { %695 = vst.msk [vmem:[%s1406_s4 + $0x20] sm:$0xf] %vm686_vm2, %v678_v16  ;;  %v681_v27 = vpack.c.bf16 %v665_v20, %v665_v20  ;;  %v666_v28 = vmax.f32 %v650_v21, 0.0  ;;  %v958_v29 = vunpack.c.h.bf16 %v965_v13 }
  0xf8   : > { %696 = vst.msk [vmem:[%s1406_s4 + $0x24] sm:$0xf] %vm686_vm2, %v679_v19  ;;  %v667_v30 = vmax.f32 %v651_v24, 0.0  ;;  %v652_v31 = vadd.f32 %v957_v25, %v604_v22 }
  0xf9   : > { %697 = vst.msk [vmem:[%s1406_s4 + $0x28] sm:$0xf] %vm686_vm2, %v680_v23  ;;  %v682_v62 = vpack.c.bf16 %v666_v28, %v666_v28  ;;  %v653_v32 = vadd.f32 %v958_v29, %v605_v26 }
  0xfa   : > { %698 = vst.msk [vmem:[%s1406_s4 + $0x2c] sm:$0xf] %vm686_vm2, %v681_v27  ;;  %v683_v33 = vpack.c.bf16 %v667_v30, %v667_v30  ;;  %v668_v34 = vmax.f32 %v652_v31, 0.0 }
  0xfb   : > { %699 = vst.msk [vmem:[%s1406_s4 + $0x30] sm:$0xf] %vm686_vm2, %v682_v62  ;;  %v669_v35 = vmax.f32 %v653_v32, 0.0 }
  0xfc   : > { %700 = vst.msk [vmem:[%s1406_s4 + $0x34] sm:$0xf] %vm686_vm2, %v683_v33  ;;  %v684_v36 = vpack.c.bf16 %v668_v34, %v668_v34 }
  0xfd   : > { %v685_v37 = vpack.c.bf16 %v669_v35, %v669_v35 }
  0xfe   : > { %701 = vst.msk [vmem:[%s1406_s4 + $0x38] sm:$0xf] %vm686_vm2, %v684_v36 }
  0xff   : > { %702 = vst.msk [vmem:[%s1406_s4 + $0x3c] sm:$0xf] %vm686_vm2, %v685_v37 }
 0x100 PF: > { %s17_s20 = sadd.s32 1, %s1117_s20   ;;  %s1409_s15 = smov %s1101_s16 }
 0x101   : > { %p14_p2 = scmp.ge.s32.totalorder %s17_s20, 11   ;;  %s1410_s16 = smov %s1105_s17 }
 0x102   : > { %s1411_s17 = smov %s1196_s27  ;;  %s1412_s18 = smov %s1113_s19 }
 0x103   : > { %s1413_s19 = smov %s1415_s22  ;;  %16 = sbr.rel (!%p14_p2) target bundleno = 4 (0x4), region = 93 }
 0x108   :  { %731 = vsyncpa [#allocation4], 1 }
 0x109   :  { %733 = vsyncpa [#allocation4 + $0x1], 1 }

// kernel: _lambda_.27
= control target key start
LH: loop header
LB: loop body
LE: loop exit
PB: predicated region body
PF: predicated region fallthrough
CT: control target
= control target key end

     0   :  { %8 = vsyncpa [#allocation4], 0  ;;  %s904_s0 = inlined_call_operand.vmem [shape: bf16[9,32,128], index: 0, kind: input, shape index: {}]   ;;  %s905_s1 = inlined_call_operand.hbm [shape: bf16[9,128,128], index: 1, kind: input, shape index: {}]   ;;  %s906_s2 = inlined_call_operand.vmem [shape: f32[1,128], index: 2, kind: input, shape index: {}]   ;;  %s907_s3 = inlined_call_operand.vmem [shape: bf16[32,128], index: 3, kind: output, shape index: {}]  }
   0x1   :  { %10 = vsyncpa [#allocation4 + $0x1], 0  ;;  %s791_s12 = smov 0   ;;  %s793_s13 = smov 0  }
   0x2   :  { %s795_s14 = smov 0   ;;  %s797_s15 = smov 0  }
   0x3   :  { %s799_s16 = smov 0   ;;  %s801_s17 = smov 0  }
   0x4 LB: > { %s539_s18 = sadd.s32 4294967295, %s766_s17   ;;  %s28_s19 = sadd.s32 1, %s762_s16  ;;  %s766_s17 = sphi %s801_s17, %s16_s17   ;;  %s762_s16 = sphi %s799_s16, %s914_s16   ;;  %s758_s15 = sphi %s797_s15, %s913_s15   ;;  %s754_s14 = sphi %s795_s14, %s912_s14   ;;  %s750_s13 = sphi %s793_s13, %s911_s13   ;;  %s746_s12 = sphi %s791_s12, %s910_s12  }
   0x5   : > { %p29_p0 = scmp.ge.s32.totalorder %s28_s19, 9  ;;  %s72_s20 = sadd.s32 1, %s754_s14 }
   0x6   : > { %p79_p1 = scmp.ne.s32.totalorder %s754_s14, %s750_s13  ;;  %p80_p2 = scmp.eq.s32.totalorder %s766_s17, 0 }
   0x7   : > { %s916_s19 = smov (%p29_p0, %s28_s19), 0  ;;  %p85_p4 = scmp.ne.s32.totalorder %s750_s13, %s746_s12 }
   0x8   : > { %p827_p3 = por %p80_p2, %p79_p1  ;;  %s67_s22 = ssub.s32 %s762_s16, %s916_s19 }
   0x9   : > { %p86_p5 = scmp.eq.s32.totalorder %s539_s18, 0  ;;  %p70_p6 = scmp.eq.s32.totalorder %s67_s22, 0 }
   0xa   : > { %p633_p8 = scmp.lt.s32.totalorder %s766_s17, 9  ;;  %s182_s25 = sand.u32 1, %s754_s14  }
   0xb   : > { %p834_p7 = por %p86_p5, %p85_p4  ;;  %s596_s26 = sshll.u32 %s762_s16, 6 }
   0xc   : > { %s840_s24 = scalar_select %p70_p6, %s754_s14, %s72_s20  }
   0xd   : > { %s543_s27 = sshll.u32 %s182_s25, 6  ;;  %s192_s30 = scalar_lea.hbm %s905_s1, %s596_s26 }
   0xe   : > { %s193_s4 = sshll.u32 %s192_s30, 4  ;;  %s186_s5 = scalar_lea.vmem [#allocation3], %s543_s27  ;;  %s194_s4 = int_to_ptr.hbm [resolvable:$true] %s193_s4 }
   0xf   : > { %s195_s6 = sshll.u32 %s186_s5, 4  ;;  %p630_p9 = pnand %p633_p8, %p827_p3  ;;  %s196_s6 = int_to_ptr.vmem [resolvable:$true] %s195_s6 }
  0x10   : > { %p546_p10 = scmp.ge.s32.totalorder %s766_s17, 1  ;;  %p203_p11 = scmp.lt.s32.totalorder %s766_s17, 10 }
  0x11   : > { %s183_s7 = scalar_lea.sflag [#allocation4], %s182_s25  ;;  %s768_s8 = smov 64  }
  0x12   : > { %s769_s9 = smov 4   ;;  %p204_p12 = pnand %p546_p10, %p203_p11 }
  0x13   : > { %632 = dma.hbm_to_vmem [thread:$0]  (!%p630_p9), %s194_s4, 1024, %s196_s6, %s183_s7, %s768_s8, %s768_s8, %s769_s9  }
  0x14   : > { %207 = sbr.rel (%p204_p12) target bundleno = 223 (0xdf), region = 32  ;;  %s209_s10 = sand.u32 (!%p204_p12), 1, %s750_s13  }
  0x15   : > { %s547_s11 = sshll.u32 (!%p204_p12), %s209_s10, 6  ;;  %s210_s12 = scalar_lea.sflag (!%p204_p12), [#allocation4], %s209_s10 }
  0x16   : > { %s852_s18 = scalar_lea.vmem (!%p204_p12), [#allocation3], %s547_s11 }
  0x19   : > { %741 = dma.done.wait (%p834_p7), %s210_s12, 1024  }
  0x1a   : > { %743 = vsyncadd (%p834_p7), %s210_s12, 4294966272  ;;  %p253_p13 = scmp.lt.s32.totalorder %s758_s15, 8  ;;  %p550_p0 = scmp.ne.s32.totalorder %s758_s15, 0 }
  0x1c   : > { %s254_s20 = scalar_select %p253_p13, %s758_s15, 8 }
  0x1d   : > { %277 = sbr.rel (%p550_p0) target bundleno = 39 (0x27), region = 40 }
  0x1e   : > { %s597_s21 = sshll.u32 %s254_s20, 4 }
  0x1f   : > { %s863_s26 = scalar_lea.vmem %s904_s0, %s597_s21 }
  0x22   : > { %v770_v0 = vmov 0.0  }
  0x23   : > { %278 = vst [vmem:[#allocation2 + $0x10] sm:$0xff] %v770_v0 }
  0x24   : > { %279 = vst [vmem:[#allocation2] sm:$0xff] %v770_v0 }
  0x25   : > { %280 = vst [vmem:[#allocation2 + $0x18] sm:$0xff] %v770_v0 }
  0x26   : > { %281 = vst [vmem:[#allocation2 + $0x8] sm:$0xff] %v770_v0 }
  0x27 PF: > { %v607_v1 = vld [vmem:[%s852_s18 + $0x38] sm:$0xff]  ;;  %v606_v2 = vld [vmem:[%s852_s18 + $0x30] sm:$0xff]  ;;  %v605_v3 = vld [vmem:[%s852_s18 + $0x28] sm:$0xff]  ;;  %p591_p1 = scmp.ne.s32.totalorder %s758_s15, 8 }
  0x28   : > { %366 = vmatpush.bf16.msra.mxu0 %v607_v1  ;;  %619 = vmatpush.bf16.msra.mxu1 %v607_v1  ;;  %v604_v4 = vld [vmem:[%s852_s18 + $0x20] sm:$0xff]  ;;  %v603_v5 = vld [vmem:[%s852_s18 + $0x18] sm:$0xff]  ;;  %v602_v6 = vld [vmem:[%s852_s18 + $0x10] sm:$0xff] }
  0x29   : > { %v601_v7 = vld [vmem:[%s852_s18 + $0x8] sm:$0xff]  ;;  %v600_v8 = vld [vmem:[%s852_s18] sm:$0xff] }
  0x2a   : > { %v598_v9 = vld [vmem:[%s863_s26] sm:$0xff]  ;;  %v599_v10 = vld [vmem:[%s863_s26 + $0x8] sm:$0xff]  ;;  %v282_v11 = vld [vmem:[#allocation2 + $0x10] sm:$0xff] }
  0x2b   : > { %v283_v17 = vld [vmem:[#allocation2] sm:$0xff] }
  0x2c   : > { %367 = vmatpush.bf16.msra.mxu0 %v606_v2  ;;  %620 = vmatpush.bf16.msra.mxu1 %v606_v2  ;;  %v284_v12 = vld [vmem:[#allocation2 + $0x18] sm:$0xff] }
  0x2d   : > { %v285_v18 = vld [vmem:[#allocation2 + $0x8] sm:$0xff] }
  0x30   : > { %368 = vmatpush.bf16.msra.mxu0 %v605_v3  ;;  %621 = vmatpush.bf16.msra.mxu1 %v605_v3 }
  0x34   : > { %369 = vmatpush.bf16.msra.mxu0 %v604_v4  ;;  %622 = vmatpush.bf16.msra.mxu1 %v604_v4 }
  0x38   : > { %370 = vmatpush.bf16.msra.mxu0 %v603_v5  ;;  %623 = vmatpush.bf16.msra.mxu1 %v603_v5 }
  0x3c   : > { %371 = vmatpush.bf16.msra.mxu0 %v602_v6  ;;  %624 = vmatpush.bf16.msra.mxu1 %v602_v6 }
  0x40   : > { %372 = vmatpush.bf16.msra.mxu0 %v601_v7  ;;  %625 = vmatpush.bf16.msra.mxu1 %v601_v7 }
  0x44   : > { %373 = vmatpush.bf16.msra.mxu0 %v600_v8  ;;  %626 = vmatpush.bf16.msra.mxu1 %v600_v8 }
  0x47   : > { %374 = vmatmul.bf16.vlgmr.msra.gmra.mxu0 %v598_v9  ;;  %379 = vmatmul.bf16.vlgmr.msra.gmra.mxu1 %v599_v10 }
  0xc4   : > { %v375_v13 = vpop.f32.mrf.mxu0  ;;  %v380_v14 = vpop.f32.mrf.mxu1 }
  0xc5   : > { %v385_v15 = vadd.f32 %v375_v13, %v282_v11  ;;  %v387_v16 = vadd.f32 %v380_v14, %v284_v12 }
  0xc7   : > { %389 = vst [vmem:[#allocation2 + $0x10] sm:$0xff] %v385_v15 }
  0xc8   : > { %391 = vst [vmem:[#allocation2 + $0x18] sm:$0xff] %v387_v16 }
  0xcc   : > { %v377_v19 = vpop.f32.mrf.mxu0  ;;  %v382_v20 = vpop.f32.mrf.mxu1  ;;  %396 = sbr.rel (%p591_p1) target bundleno = 223 (0xdf), region = 44 }
  0xcd   : > { %v386_v21 = vadd.f32 %v377_v19, %v283_v17  ;;  %v388_v22 = vadd.f32 %v382_v20, %v285_v18 }
  0xcf   : > { %390 = vst [vmem:[#allocation2] sm:$0xff] %v386_v21 }
  0xd0   : > { %392 = vst [vmem:[#allocation2 + $0x8] sm:$0xff] %v388_v22 }
  0xd1   : > { %v397_v23 = vld [vmem:[#allocation2 + $0x10] sm:$0xff]  ;;  %v685_v25 = vld [vmem:[%s906_s2] ss:$0 sm:$0xff]  ;;  %v399_v26 = vld [vmem:[#allocation2 + $0x18] sm:$0xff] }
  0xd2   : > { %v405_v28 = vadd.f32 %v685_v25, %v397_v23  ;;  %v407_v30 = vadd.f32 %v685_v25, %v399_v26 }
  0xd4   : > { %v409_v32 = vmax.f32 %v405_v28, 0.0  ;;  %v411_v34 = vmax.f32 %v407_v30, 0.0 }
  0xd6   : > { %v398_v24 = vld [vmem:[#allocation2] sm:$0xff] }
  0xd7   : > { %v400_v27 = vld [vmem:[#allocation2 + $0x8] sm:$0xff]  ;;  %v406_v29 = vadd.f32 %v685_v25, %v398_v24 }
  0xd8   : > { %v408_v31 = vadd.f32 %v685_v25, %v400_v27 }
  0xd9   : > { %v410_v33 = vmax.f32 %v406_v29, 0.0 }
  0xda   : > { %v412_v35 = vmax.f32 %v408_v31, 0.0 }
  0xdb   : > { %v611_v36 = vpack.c.bf16 %v410_v33, %v409_v32 }
  0xdc   : > { %v616_v37 = vpack.c.bf16 %v412_v35, %v411_v34 }
  0xdd   : > { %612 = vst [vmem:[%s907_s3] sm:$0xff] %v611_v36  }
  0xde   : > { %618 = vst [vmem:[%s907_s3 + $0x8] sm:$0xff] %v616_v37  }
  0xdf PF: > { %s16_s17 = sadd.s32 1, %s766_s17   ;;  %s910_s12 = smov %s750_s13 }
  0xe0   : > { %p13_p2 = scmp.ge.s32.totalorder %s16_s17, 11   ;;  %s911_s13 = smov %s754_s14 }
  0xe1   : > { %s912_s14 = smov %s840_s24  ;;  %s913_s15 = smov %s762_s16 }
  0xe2   : > { %s914_s16 = smov %s916_s19  ;;  %15 = sbr.rel (!%p13_p2) target bundleno = 4 (0x4), region = 86 }
  0xe7   :  { %449 = vsyncpa [#allocation4], 1 }
  0xe8   :  { %451 = vsyncpa [#allocation4 + $0x1], 1 }

// kernel: _lambda_.25
= control target key start
LH: loop header
LB: loop body
LE: loop exit
PB: predicated region body
PF: predicated region fallthrough
CT: control target
= control target key end

     0   :  { %s984_s21 = smov 0   ;;  %s986_s22 = smov 0   ;;  %s1064_s0 = inlined_call_operand.vmem [shape: bf16[9,32,64], index: 0, kind: input, shape index: {}]   ;;  %s1065_s1 = inlined_call_operand.vmem [shape: bf16[9,64,128], index: 1, kind: input, shape index: {}]   ;;  %s1066_s2 = inlined_call_operand.vmem [shape: bf16[64,128], index: 2, kind: input, shape index: {}]   ;;  %s1067_s3 = inlined_call_operand.vmem [shape: f32[1,128], index: 3, kind: input, shape index: {}, may-alias: {3,4}]   ;;  %s1068_s4 = inlined_call_operand.vmem [shape: f32[1,128], index: 4, kind: input, shape index: {}, may-alias: {3,4}]   ;;  %s1069_s5 = inlined_call_operand.vmem [shape: bf16[32,128], index: 5, kind: output, shape index: {0}]   ;;  %s1070_s6 = inlined_call_operand.vmem [shape: bf16[32,128], index: 6, kind: output, shape index: {1}]  }
   0x1   :  { %s988_s23 = smov 0  }
   0x2 LB: > { %s29_s24 = sadd.s32 1, %s942_s22  ;;  %p787_p0 = scmp.ge.s32.totalorder %s946_s23, 1  ;;  %s946_s23 = sphi %s988_s23, %s17_s23   ;;  %s942_s22 = sphi %s986_s22, %s1072_s22   ;;  %s938_s21 = sphi %s984_s21, %s1071_s21  }
   0x3   : > { %p30_p1 = scmp.ge.s32.totalorder %s29_s24, 9  ;;  %p285_p2 = scmp.lt.s32.totalorder %s946_s23, 10 }
   0x5   : > { %s1074_s24 = smov (%p30_p1, %s29_s24), 0  ;;  %p286_p3 = pnand %p787_p0, %p285_p2 }
   0x6   : > { %p349_p4 = scmp.lt.s32.totalorder (!%p286_p3), %s938_s21, 8  ;;  %p792_p5 = scmp.ne.s32.totalorder (!%p286_p3), %s938_s21, 0 }
   0x7   : > { %289 = sbr.rel (%p286_p3) target bundleno = 350 (0x15e), region = 40 }
   0xc   : > { %s350_s25 = scalar_select %p349_p4, %s938_s21, 8 }
   0xd   : > { %398 = sbr.rel (%p792_p5) target bundleno = 23 (0x17), region = 44 }
   0xe   : > { %s853_s26 = sshll.u32 %s350_s25, 4  ;;  %s854_s27 = sshll.u32 %s350_s25, 5 }
   0xf   : > { %s1009_s30 = scalar_lea.vmem %s1064_s0, %s853_s26  ;;  %s365_s9 = scalar_lea.vmem %s1065_s1, %s854_s27 }
  0x12   : > { %v948_v0 = vmov 0.0  }
  0x13   : > { %399 = vst [vmem:[#allocation2 + $0x10] sm:$0xff] %v948_v0 }
  0x14   : > { %400 = vst [vmem:[#allocation2] sm:$0xff] %v948_v0 }
  0x15   : > { %401 = vst [vmem:[#allocation2 + $0x18] sm:$0xff] %v948_v0 }
  0x16   : > { %402 = vst [vmem:[#allocation2 + $0x8] sm:$0xff] %v948_v0 }
  0x17 PF: > { %v860_v1 = vld [vmem:[%s365_s9 + $0x18] sm:$0xff]  ;;  %v859_v2 = vld [vmem:[%s365_s9 + $0x10] sm:$0xff]  ;;  %v858_v3 = vld [vmem:[%s365_s9 + $0x8] sm:$0xff]  ;;  %vm453_vm0 = vcmask 523264   ;;  %p819_p6 = scmp.ne.s32.totalorder %s938_s21, 4 }
  0x18   : > { %464 = vmatpush.bf16.msra.mxu0 %v860_v1  ;;  %889 = vmatpush.bf16.msra.mxu1 %v860_v1  ;;  %v857_v4 = vld [vmem:[%s365_s9] sm:$0xff]  ;;  %v856_v6 = vld [vmem:[%s1009_s30 + $0x8] sm:$0xff] }
  0x19   : > { %v855_v5 = vld [vmem:[%s1009_s30] sm:$0xff] }
  0x1a   : > { %v403_v7 = vld [vmem:[#allocation2 + $0x10] sm:$0xff] }
  0x1b   : > { %v404_v13 = vld [vmem:[#allocation2] sm:$0xff] }
  0x1c   : > { %465 = vmatpush.bf16.msra.mxu0 %v859_v2  ;;  %890 = vmatpush.bf16.msra.mxu1 %v859_v2  ;;  %v405_v8 = vld [vmem:[#allocation2 + $0x18] sm:$0xff] }
  0x1d   : > { %v406_v14 = vld [vmem:[#allocation2 + $0x8] sm:$0xff] }
  0x20   : > { %466 = vmatpush.bf16.msra.mxu0 %v858_v3  ;;  %891 = vmatpush.bf16.msra.mxu1 %v858_v3 }
  0x24   : > { %467 = vmatpush.bf16.msra.mxu0 %v857_v4  ;;  %892 = vmatpush.bf16.msra.mxu1 %v857_v4 }
  0x27   : > { %817 = vmatmul.msk.bf16.vlgmr.msra.gmra.mxu0 %vm453_vm0, %v855_v5  ;;  %818 = vmatmul.msk.bf16.vlgmr.msra.gmra.mxu1 %vm453_vm0, %v856_v6 }
  0xa4   : > { %v469_v9 = vpop.f32.mrf.mxu0  ;;  %v474_v10 = vpop.f32.mrf.mxu1 }
  0xa5   : > { %v479_v11 = vadd.f32 %v469_v9, %v403_v7  ;;  %v481_v12 = vadd.f32 %v474_v10, %v405_v8 }
  0xa7   : > { %483 = vst [vmem:[#allocation2 + $0x10] sm:$0xff] %v479_v11 }
  0xa8   : > { %485 = vst [vmem:[#allocation2 + $0x18] sm:$0xff] %v481_v12 }
  0xac   : > { %v471_v15 = vpop.f32.mrf.mxu0  ;;  %v476_v16 = vpop.f32.mrf.mxu1  ;;  %490 = sbr.rel (%p819_p6) target bundleno = 333 (0x14d), region = 48 }
  0xad   : > { %v480_v17 = vadd.f32 %v471_v15, %v404_v13  ;;  %v482_v18 = vadd.f32 %v476_v16, %v406_v14 }
  0xaf   : > { %484 = vst [vmem:[#allocation2] sm:$0xff] %v480_v17 }
  0xb0   : > { %486 = vst [vmem:[#allocation2 + $0x8] sm:$0xff] %v482_v18 }
  0xb1   : > { %v866_v19 = vld [vmem:[%s1066_s2 + $0x18] sm:$0xff]  ;;  %v865_v20 = vld [vmem:[%s1066_s2 + $0x10] sm:$0xff]  ;;  %v864_v21 = vld [vmem:[%s1066_s2 + $0x8] sm:$0xff] }
  0xb2   : > { %551 = vmatpush.bf16.msra.mxu0 %v866_v19  ;;  %893 = vmatpush.bf16.msra.mxu1 %v866_v19  ;;  %v863_v22 = vld [vmem:[%s1066_s2] sm:$0xff]  ;;  %v862_v24 = vld [vmem:[%s1009_s30 + $0x8] sm:$0xff] }
  0xb3   : > { %v861_v23 = vld [vmem:[%s1009_s30] sm:$0xff] }
  0xb4   : > { %v922_v27 = vld [vmem:[%s1068_s4] ss:$0 sm:$0xff] }
  0xb6   : > { %552 = vmatpush.bf16.msra.mxu0 %v865_v20  ;;  %894 = vmatpush.bf16.msra.mxu1 %v865_v20 }
  0xba   : > { %553 = vmatpush.bf16.msra.mxu0 %v864_v21  ;;  %895 = vmatpush.bf16.msra.mxu1 %v864_v21 }
  0xbe   : > { %554 = vmatpush.bf16.msra.mxu0 %v863_v22  ;;  %896 = vmatpush.bf16.msra.mxu1 %v863_v22 }
  0xc1   : > { %844 = vmatmul.msk.bf16.vlgmr.msra.gmra.mxu0 %vm453_vm0, %v861_v23  ;;  %845 = vmatmul.msk.bf16.vlgmr.msra.gmra.mxu1 %vm453_vm0, %v862_v24 }
 0x13e   : > { %v556_v25 = vpop.f32.mrf.mxu0  ;;  %v561_v26 = vpop.f32.mrf.mxu1 }
 0x13f   : > { %v557_v30 = vadd.f32 %v922_v27, %v556_v25  ;;  %v562_v31 = vadd.f32 %v922_v27, %v561_v26 }
 0x146   : > { %v558_v28 = vpop.f32.mrf.mxu0  ;;  %v563_v29 = vpop.f32.mrf.mxu1 }
 0x147   : > { %v559_v32 = vadd.f32 %v922_v27, %v558_v28  ;;  %v564_v33 = vadd.f32 %v922_v27, %v563_v29 }
 0x149   : > { %v870_v34 = vpack.c.bf16 %v559_v32, %v557_v30  ;;  %v875_v35 = vpack.c.bf16 %v564_v33, %v562_v31 }
 0x14b   : > { %871 = vst [vmem:[%s1070_s6] sm:$0xff] %v870_v34  }
 0x14c   : > { %887 = vst [vmem:[%s1070_s6 + $0x8] sm:$0xff] %v875_v35  }
 0x14d PF: > { %p846_p7 = scmp.ne.s32.totalorder %s938_s21, 8 }
 0x14f   : > { %577 = sbr.rel (%p846_p7) target bundleno = 350 (0x15e), region = 52 }
 0x154   : > { %v578_v36 = vld [vmem:[#allocation2 + $0x10] sm:$0xff]  ;;  %v579_v37 = vld [vmem:[#allocation2] sm:$0xff]  ;;  %v580_v39 = vld [vmem:[#allocation2 + $0x18] sm:$0xff] }
 0x155   : > { %v923_v38 = vld [vmem:[%s1067_s3] ss:$0 sm:$0xff]  ;;  %v581_v40 = vld [vmem:[#allocation2 + $0x8] sm:$0xff] }
 0x156   : > { %v586_v41 = vadd.f32 %v923_v38, %v578_v36  ;;  %v587_v42 = vadd.f32 %v923_v38, %v579_v37  ;;  %v588_v43 = vadd.f32 %v923_v38, %v580_v39  ;;  %v589_v44 = vadd.f32 %v923_v38, %v581_v40 }
 0x158   : > { %v590_v45 = vmax.f32 %v586_v41, 0.0  ;;  %v591_v46 = vmax.f32 %v587_v42, 0.0  ;;  %v592_v47 = vmax.f32 %v588_v43, 0.0  ;;  %v593_v48 = vmax.f32 %v589_v44, 0.0 }
 0x15a   : > { %v880_v49 = vpack.c.bf16 %v591_v46, %v590_v45  ;;  %v885_v50 = vpack.c.bf16 %v593_v48, %v592_v47 }
 0x15c   : > { %881 = vst [vmem:[%s1069_s5] sm:$0xff] %v880_v49  }
 0x15d   : > { %888 = vst [vmem:[%s1069_s5 + $0x8] sm:$0xff] %v885_v50  }
 0x15e PF: > { %s17_s23 = sadd.s32 1, %s946_s23   ;;  %s1071_s21 = smov %s942_s22 }
 0x15f   : > { %p14_p8 = scmp.ge.s32.totalorder %s17_s23, 11   ;;  %s1072_s22 = smov %s1074_s24 }
 0x161   :  { %16 = sbr.rel (!%p14_p8) target bundleno = 2 (0x2), region = 106 }

// kernel: _lambda_.26
= control target key start
LH: loop header
LB: loop body
LE: loop exit
PB: predicated region body
PF: predicated region fallthrough
CT: control target
= control target key end

     0   :  { %9 = vsyncpa [#allocation4], 0  ;;  %s1015_s0 = inlined_call_operand.vmem [shape: bf16[9,32,128], index: 0, kind: input, shape index: {}]   ;;  %s1016_s1 = inlined_call_operand.hbm [shape: bf16[9,128,128], index: 1, kind: input, shape index: {}]   ;;  %s1017_s2 = inlined_call_operand.vmem [shape: f32[1,128], index: 2, kind: input, shape index: {}]   ;;  %s1018_s3 = inlined_call_operand.vmem [shape: bf16[32,128], index: 3, kind: input, shape index: {}]   ;;  %s1019_s4 = inlined_call_operand.vmem [shape: bf16[32,128], index: 4, kind: output, shape index: {}]  }
   0x1   :  { %11 = vsyncpa [#allocation4 + $0x1], 0  ;;  %s896_s15 = smov 0   ;;  %s898_s16 = smov 0  }
   0x2   :  { %s900_s17 = smov 0   ;;  %s902_s18 = smov 0  }
   0x3   :  { %s904_s19 = smov 0   ;;  %s906_s20 = smov 0  }
   0x4 LB: > { %s629_s21 = sadd.s32 4294967295, %s866_s20   ;;  %s29_s22 = sadd.s32 1, %s862_s19  ;;  %s866_s20 = sphi %s906_s20, %s17_s20   ;;  %s862_s19 = sphi %s904_s19, %s1026_s19   ;;  %s858_s18 = sphi %s902_s18, %s1025_s18   ;;  %s854_s17 = sphi %s900_s17, %s1024_s17   ;;  %s850_s16 = sphi %s898_s16, %s1023_s16   ;;  %s846_s15 = sphi %s896_s15, %s1022_s15  }
   0x5   : > { %p30_p0 = scmp.ge.s32.totalorder %s29_s22, 9  ;;  %s73_s23 = sadd.s32 1, %s854_s17 }
   0x6   : > { %p80_p1 = scmp.ne.s32.totalorder %s854_s17, %s850_s16  ;;  %p81_p2 = scmp.eq.s32.totalorder %s866_s20, 0 }
   0x7   : > { %s1028_s22 = smov (%p30_p0, %s29_s22), 0  ;;  %p86_p4 = scmp.ne.s32.totalorder %s850_s16, %s846_s15 }
   0x8   : > { %p932_p3 = por %p81_p2, %p80_p1  ;;  %s68_s25 = ssub.s32 %s862_s19, %s1028_s22 }
   0x9   : > { %p87_p5 = scmp.eq.s32.totalorder %s629_s21, 0  ;;  %p71_p6 = scmp.eq.s32.totalorder %s68_s25, 0 }
   0xa   : > { %p733_p8 = scmp.lt.s32.totalorder %s866_s20, 9  ;;  %s223_s28 = sand.u32 1, %s854_s17  }
   0xb   : > { %p939_p7 = por %p87_p5, %p86_p4  ;;  %s687_s29 = sshll.u32 %s862_s19, 6 }
   0xc   : > { %s945_s27 = scalar_select %p71_p6, %s854_s17, %s73_s23  }
   0xd   : > { %s634_s30 = sshll.u32 %s223_s28, 6  ;;  %s233_s7 = scalar_lea.hbm %s1016_s1, %s687_s29 }
   0xe   : > { %s234_s8 = sshll.u32 %s233_s7, 4  ;;  %s227_s9 = scalar_lea.vmem [#allocation3], %s634_s30  ;;  %s235_s8 = int_to_ptr.hbm [resolvable:$true] %s234_s8 }
   0xf   : > { %s236_s10 = sshll.u32 %s227_s9, 4  ;;  %p730_p9 = pnand %p733_p8, %p932_p3  ;;  %s237_s10 = int_to_ptr.vmem [resolvable:$true] %s236_s10 }
  0x10   : > { %p637_p10 = scmp.ge.s32.totalorder %s866_s20, 1  ;;  %p244_p11 = scmp.lt.s32.totalorder %s866_s20, 10 }
  0x11   : > { %s224_s11 = scalar_lea.sflag [#allocation4], %s223_s28  ;;  %s868_s12 = smov 64  }
  0x12   : > { %s869_s13 = smov 4   ;;  %p245_p12 = pnand %p637_p10, %p244_p11 }
  0x13   : > { %732 = dma.hbm_to_vmem [thread:$0]  (!%p730_p9), %s235_s8, 1024, %s237_s10, %s224_s11, %s868_s12, %s868_s12, %s869_s13  }
  0x14   : > { %248 = sbr.rel (%p245_p12) target bundleno = 225 (0xe1), region = 36  ;;  %s250_s14 = sand.u32 (!%p245_p12), 1, %s850_s16  }
  0x15   : > { %s638_s15 = sshll.u32 (!%p245_p12), %s250_s14, 6  ;;  %s251_s21 = scalar_lea.sflag (!%p245_p12), [#allocation4], %s250_s14 }
  0x16   : > { %s957_s23 = scalar_lea.vmem (!%p245_p12), [#allocation3], %s638_s15 }
  0x19   : > { %841 = dma.done.wait (%p939_p7), %s251_s21, 1024  }
  0x1a   : > { %843 = vsyncadd (%p939_p7), %s251_s21, 4294966272  ;;  %p304_p13 = scmp.lt.s32.totalorder %s858_s18, 8  ;;  %p641_p0 = scmp.ne.s32.totalorder %s858_s18, 0 }
  0x1c   : > { %s305_s24 = scalar_select %p304_p13, %s858_s18, 8 }
  0x1d   : > { %337 = sbr.rel (%p641_p0) target bundleno = 39 (0x27), region = 44 }
  0x1e   : > { %s688_s25 = sshll.u32 %s305_s24, 4 }
  0x1f   : > { %s968_s30 = scalar_lea.vmem %s1015_s0, %s688_s25 }
  0x22   : > { %v870_v0 = vmov 0.0  }
  0x23   : > { %338 = vst [vmem:[#allocation2 + $0x10] sm:$0xff] %v870_v0 }
  0x24   : > { %339 = vst [vmem:[#allocation2] sm:$0xff] %v870_v0 }
  0x25   : > { %340 = vst [vmem:[#allocation2 + $0x18] sm:$0xff] %v870_v0 }
  0x26   : > { %341 = vst [vmem:[#allocation2 + $0x8] sm:$0xff] %v870_v0 }
  0x27 PF: > { %v698_v1 = vld [vmem:[%s957_s23 + $0x38] sm:$0xff]  ;;  %v697_v2 = vld [vmem:[%s957_s23 + $0x30] sm:$0xff]  ;;  %v696_v3 = vld [vmem:[%s957_s23 + $0x28] sm:$0xff]  ;;  %p682_p1 = scmp.ne.s32.totalorder %s858_s18, 8 }
  0x28   : > { %426 = vmatpush.bf16.msra.mxu0 %v698_v1  ;;  %719 = vmatpush.bf16.msra.mxu1 %v698_v1  ;;  %v695_v4 = vld [vmem:[%s957_s23 + $0x20] sm:$0xff]  ;;  %v694_v5 = vld [vmem:[%s957_s23 + $0x18] sm:$0xff]  ;;  %v693_v6 = vld [vmem:[%s957_s23 + $0x10] sm:$0xff] }
  0x29   : > { %v692_v7 = vld [vmem:[%s957_s23 + $0x8] sm:$0xff]  ;;  %v691_v8 = vld [vmem:[%s957_s23] sm:$0xff] }
  0x2a   : > { %v689_v9 = vld [vmem:[%s968_s30] sm:$0xff]  ;;  %v690_v10 = vld [vmem:[%s968_s30 + $0x8] sm:$0xff]  ;;  %v342_v11 = vld [vmem:[#allocation2 + $0x10] sm:$0xff] }
  0x2b   : > { %v343_v17 = vld [vmem:[#allocation2] sm:$0xff] }
  0x2c   : > { %427 = vmatpush.bf16.msra.mxu0 %v697_v2  ;;  %720 = vmatpush.bf16.msra.mxu1 %v697_v2  ;;  %v344_v12 = vld [vmem:[#allocation2 + $0x18] sm:$0xff] }
  0x2d   : > { %v345_v18 = vld [vmem:[#allocation2 + $0x8] sm:$0xff] }
  0x30   : > { %428 = vmatpush.bf16.msra.mxu0 %v696_v3  ;;  %721 = vmatpush.bf16.msra.mxu1 %v696_v3 }
  0x34   : > { %429 = vmatpush.bf16.msra.mxu0 %v695_v4  ;;  %722 = vmatpush.bf16.msra.mxu1 %v695_v4 }
  0x38   : > { %430 = vmatpush.bf16.msra.mxu0 %v694_v5  ;;  %723 = vmatpush.bf16.msra.mxu1 %v694_v5 }
  0x3c   : > { %431 = vmatpush.bf16.msra.mxu0 %v693_v6  ;;  %724 = vmatpush.bf16.msra.mxu1 %v693_v6 }
  0x40   : > { %432 = vmatpush.bf16.msra.mxu0 %v692_v7  ;;  %725 = vmatpush.bf16.msra.mxu1 %v692_v7 }
  0x44   : > { %433 = vmatpush.bf16.msra.mxu0 %v691_v8  ;;  %726 = vmatpush.bf16.msra.mxu1 %v691_v8 }
  0x47   : > { %434 = vmatmul.bf16.vlgmr.msra.gmra.mxu0 %v689_v9  ;;  %439 = vmatmul.bf16.vlgmr.msra.gmra.mxu1 %v690_v10 }
  0xc4   : > { %v435_v13 = vpop.f32.mrf.mxu0  ;;  %v440_v14 = vpop.f32.mrf.mxu1 }
  0xc5   : > { %v445_v15 = vadd.f32 %v435_v13, %v342_v11  ;;  %v447_v16 = vadd.f32 %v440_v14, %v344_v12 }
  0xc7   : > { %449 = vst [vmem:[#allocation2 + $0x10] sm:$0xff] %v445_v15 }
  0xc8   : > { %451 = vst [vmem:[#allocation2 + $0x18] sm:$0xff] %v447_v16 }
  0xcc   : > { %v437_v19 = vpop.f32.mrf.mxu0  ;;  %v442_v20 = vpop.f32.mrf.mxu1  ;;  %456 = sbr.rel (%p682_p1) target bundleno = 225 (0xe1), region = 48 }
  0xcd   : > { %v446_v21 = vadd.f32 %v437_v19, %v343_v17  ;;  %v448_v22 = vadd.f32 %v442_v20, %v345_v18 }
  0xcf   : > { %450 = vst [vmem:[#allocation2] sm:$0xff] %v446_v21 }
  0xd0   : > { %452 = vst [vmem:[#allocation2 + $0x8] sm:$0xff] %v448_v22 }
  0xd1   : > { %v457_v23 = vld [vmem:[#allocation2 + $0x10] sm:$0xff]  ;;  %v785_v25 = vld [vmem:[%s1017_s2] ss:$0 sm:$0xff]  ;;  %v459_v27 = vld [vmem:[#allocation2 + $0x18] sm:$0xff] }
  0xd2   : > { %v700_v26 = vld [vmem:[%s1018_s3] sm:$0xff]   ;;  %v717_v31 = vld [vmem:[%s1018_s3 + $0x8] sm:$0xff]   ;;  %v465_v32 = vadd.f32 %v785_v25, %v457_v23  ;;  %v467_v34 = vadd.f32 %v785_v25, %v459_v27 }
  0xd3   : > { %v701_v28 = vunpack.c.l.bf16 %v700_v26  ;;  %v702_v29 = vunpack.c.h.bf16 %v700_v26  ;;  %v705_v36 = vunpack.c.l.bf16 %v717_v31  ;;  %v706_v37 = vunpack.c.h.bf16 %v717_v31 }
  0xd5   : > { %v477_v38 = vadd.f32 %v701_v28, %v465_v32  ;;  %v479_v40 = vadd.f32 %v705_v36, %v467_v34 }
  0xd6   : > { %v458_v24 = vld [vmem:[#allocation2] sm:$0xff] }
  0xd7   : > { %v460_v30 = vld [vmem:[#allocation2 + $0x8] sm:$0xff]  ;;  %v466_v33 = vadd.f32 %v785_v25, %v458_v24  ;;  %v481_v42 = vmax.f32 %v477_v38, 0.0  ;;  %v483_v44 = vmax.f32 %v479_v40, 0.0 }
  0xd8   : > { %v468_v35 = vadd.f32 %v785_v25, %v460_v30 }
  0xd9   : > { %v478_v39 = vadd.f32 %v702_v29, %v466_v33 }
  0xda   : > { %v480_v41 = vadd.f32 %v706_v37, %v468_v35 }
  0xdb   : > { %v482_v43 = vmax.f32 %v478_v39, 0.0 }
  0xdc   : > { %v484_v45 = vmax.f32 %v480_v41, 0.0 }
  0xdd   : > { %v710_v46 = vpack.c.bf16 %v482_v43, %v481_v42 }
  0xde   : > { %v715_v47 = vpack.c.bf16 %v484_v45, %v483_v44 }
  0xdf   : > { %711 = vst [vmem:[%s1019_s4] sm:$0xff] %v710_v46  }
  0xe0   : > { %718 = vst [vmem:[%s1019_s4 + $0x8] sm:$0xff] %v715_v47  }
  0xe1 PF: > { %s17_s20 = sadd.s32 1, %s866_s20   ;;  %s1022_s15 = smov %s850_s16 }
  0xe2   : > { %p14_p2 = scmp.ge.s32.totalorder %s17_s20, 11   ;;  %s1023_s16 = smov %s854_s17 }
  0xe3   : > { %s1024_s17 = smov %s945_s27  ;;  %s1025_s18 = smov %s862_s19 }
  0xe4   : > { %s1026_s19 = smov %s1028_s22  ;;  %16 = sbr.rel (!%p14_p2) target bundleno = 4 (0x4), region = 93 }
  0xe9   :  { %521 = vsyncpa [#allocation4], 1 }
  0xea   :  { %523 = vsyncpa [#allocation4 + $0x1], 1 }

// kernel: _lambda_.28
= control target key start
LH: loop header
LB: loop body
LE: loop exit
PB: predicated region body
PF: predicated region fallthrough
CT: control target
= control target key end

     0   :  { %s780_s15 = smov 0   ;;  %s782_s16 = smov 0   ;;  %s838_s0 = inlined_call_operand.vmem [shape: bf16[9,32,128], index: 0, kind: input, shape index: {}]   ;;  %s839_s1 = inlined_call_operand.vmem [shape: bf16[9,128,128], index: 1, kind: input, shape index: {}]   ;;  %s840_s2 = inlined_call_operand.vmem [shape: f32[1,128], index: 2, kind: input, shape index: {}]   ;;  %s841_s3 = inlined_call_operand.vmem [shape: bf16[32,128], index: 3, kind: input, shape index: {}]   ;;  %s842_s4 = inlined_call_operand.vmem [shape: bf16[32,128], index: 4, kind: output, shape index: {}]  }
   0x1   :  { %s784_s17 = smov 0  }
   0x2 LB: > { %s26_s18 = sadd.s32 1, %s748_s16  ;;  %p613_p0 = scmp.ge.s32.totalorder %s752_s17, 1  ;;  %s752_s17 = sphi %s784_s17, %s14_s17   ;;  %s748_s16 = sphi %s782_s16, %s844_s16   ;;  %s744_s15 = sphi %s780_s15, %s843_s15  }
   0x3   : > { %p27_p1 = scmp.ge.s32.totalorder %s26_s18, 9  ;;  %p229_p2 = scmp.lt.s32.totalorder %s752_s17, 10 }
   0x5   : > { %s846_s18 = smov (%p27_p1, %s26_s18), 0  ;;  %p230_p3 = pnand %p613_p0, %p229_p2 }
   0x6   : > { %p282_p4 = scmp.lt.s32.totalorder (!%p230_p3), %s744_s15, 8  ;;  %p618_p5 = scmp.ne.s32.totalorder (!%p230_p3), %s744_s15, 0 }
   0x7   : > { %233 = sbr.rel (%p230_p3) target bundleno = 209 (0xd1), region = 36 }
   0xc   : > { %s283_s19 = scalar_select %p282_p4, %s744_s15, 8 }
   0xd   : > { %323 = sbr.rel (%p618_p5) target bundleno = 23 (0x17), region = 40 }
   0xe   : > { %s664_s20 = sshll.u32 %s283_s19, 4  ;;  %s665_s21 = sshll.u32 %s283_s19, 6 }
   0xf   : > { %s805_s24 = scalar_lea.vmem %s838_s0, %s664_s20  ;;  %s298_s27 = scalar_lea.vmem %s839_s1, %s665_s21 }
  0x12   : > { %v754_v0 = vmov 0.0  }
  0x13   : > { %324 = vst [vmem:[#allocation2 + $0x10] sm:$0xff] %v754_v0 }
  0x14   : > { %325 = vst [vmem:[#allocation2] sm:$0xff] %v754_v0 }
  0x15   : > { %326 = vst [vmem:[#allocation2 + $0x18] sm:$0xff] %v754_v0 }
  0x16   : > { %327 = vst [vmem:[#allocation2 + $0x8] sm:$0xff] %v754_v0 }
  0x17 PF: > { %v675_v1 = vld [vmem:[%s298_s27 + $0x38] sm:$0xff]  ;;  %v674_v2 = vld [vmem:[%s298_s27 + $0x30] sm:$0xff]  ;;  %v673_v3 = vld [vmem:[%s298_s27 + $0x28] sm:$0xff]  ;;  %p659_p6 = scmp.ne.s32.totalorder %s744_s15, 8 }
  0x18   : > { %412 = vmatpush.bf16.msra.mxu0 %v675_v1  ;;  %696 = vmatpush.bf16.msra.mxu1 %v675_v1  ;;  %v672_v4 = vld [vmem:[%s298_s27 + $0x20] sm:$0xff]  ;;  %v671_v5 = vld [vmem:[%s298_s27 + $0x18] sm:$0xff]  ;;  %v670_v6 = vld [vmem:[%s298_s27 + $0x10] sm:$0xff] }
  0x19   : > { %v669_v7 = vld [vmem:[%s298_s27 + $0x8] sm:$0xff]  ;;  %v668_v8 = vld [vmem:[%s298_s27] sm:$0xff] }
  0x1a   : > { %v666_v9 = vld [vmem:[%s805_s24] sm:$0xff]  ;;  %v667_v10 = vld [vmem:[%s805_s24 + $0x8] sm:$0xff]  ;;  %v328_v11 = vld [vmem:[#allocation2 + $0x10] sm:$0xff] }
  0x1b   : > { %v329_v17 = vld [vmem:[#allocation2] sm:$0xff] }
  0x1c   : > { %413 = vmatpush.bf16.msra.mxu0 %v674_v2  ;;  %697 = vmatpush.bf16.msra.mxu1 %v674_v2  ;;  %v330_v12 = vld [vmem:[#allocation2 + $0x18] sm:$0xff] }
  0x1d   : > { %v331_v18 = vld [vmem:[#allocation2 + $0x8] sm:$0xff] }
  0x20   : > { %414 = vmatpush.bf16.msra.mxu0 %v673_v3  ;;  %698 = vmatpush.bf16.msra.mxu1 %v673_v3 }
  0x24   : > { %415 = vmatpush.bf16.msra.mxu0 %v672_v4  ;;  %699 = vmatpush.bf16.msra.mxu1 %v672_v4 }
  0x28   : > { %416 = vmatpush.bf16.msra.mxu0 %v671_v5  ;;  %700 = vmatpush.bf16.msra.mxu1 %v671_v5 }
  0x2c   : > { %417 = vmatpush.bf16.msra.mxu0 %v670_v6  ;;  %701 = vmatpush.bf16.msra.mxu1 %v670_v6 }
  0x30   : > { %418 = vmatpush.bf16.msra.mxu0 %v669_v7  ;;  %702 = vmatpush.bf16.msra.mxu1 %v669_v7 }
  0x34   : > { %419 = vmatpush.bf16.msra.mxu0 %v668_v8  ;;  %703 = vmatpush.bf16.msra.mxu1 %v668_v8 }
  0x37   : > { %420 = vmatmul.bf16.vlgmr.msra.gmra.mxu0 %v666_v9  ;;  %425 = vmatmul.bf16.vlgmr.msra.gmra.mxu1 %v667_v10 }
  0xb4   : > { %v421_v13 = vpop.f32.mrf.mxu0  ;;  %v426_v14 = vpop.f32.mrf.mxu1 }
  0xb5   : > { %v431_v15 = vadd.f32 %v421_v13, %v328_v11  ;;  %v433_v16 = vadd.f32 %v426_v14, %v330_v12 }
  0xb7   : > { %435 = vst [vmem:[#allocation2 + $0x10] sm:$0xff] %v431_v15 }
  0xb8   : > { %437 = vst [vmem:[#allocation2 + $0x18] sm:$0xff] %v433_v16 }
  0xbc   : > { %v423_v19 = vpop.f32.mrf.mxu0  ;;  %v428_v20 = vpop.f32.mrf.mxu1  ;;  %442 = sbr.rel (%p659_p6) target bundleno = 209 (0xd1), region = 44 }
  0xbd   : > { %v432_v21 = vadd.f32 %v423_v19, %v329_v17  ;;  %v434_v22 = vadd.f32 %v428_v20, %v331_v18 }
  0xbf   : > { %436 = vst [vmem:[#allocation2] sm:$0xff] %v432_v21 }
  0xc0   : > { %438 = vst [vmem:[#allocation2 + $0x8] sm:$0xff] %v434_v22 }
  0xc1   : > { %v443_v23 = vld [vmem:[#allocation2 + $0x10] sm:$0xff]  ;;  %v729_v25 = vld [vmem:[%s840_s2] ss:$0 sm:$0xff]  ;;  %v445_v27 = vld [vmem:[#allocation2 + $0x18] sm:$0xff] }
  0xc2   : > { %v677_v26 = vld [vmem:[%s841_s3] sm:$0xff]   ;;  %v694_v31 = vld [vmem:[%s841_s3 + $0x8] sm:$0xff]   ;;  %v451_v32 = vadd.f32 %v729_v25, %v443_v23  ;;  %v453_v34 = vadd.f32 %v729_v25, %v445_v27 }
  0xc3   : > { %v678_v28 = vunpack.c.l.bf16 %v677_v26  ;;  %v679_v29 = vunpack.c.h.bf16 %v677_v26  ;;  %v682_v36 = vunpack.c.l.bf16 %v694_v31  ;;  %v683_v37 = vunpack.c.h.bf16 %v694_v31 }
  0xc5   : > { %v463_v38 = vadd.f32 %v678_v28, %v451_v32  ;;  %v465_v40 = vadd.f32 %v682_v36, %v453_v34 }
  0xc6   : > { %v444_v24 = vld [vmem:[#allocation2] sm:$0xff] }
  0xc7   : > { %v446_v30 = vld [vmem:[#allocation2 + $0x8] sm:$0xff]  ;;  %v452_v33 = vadd.f32 %v729_v25, %v444_v24  ;;  %v467_v42 = vmax.f32 %v463_v38, 0.0  ;;  %v469_v44 = vmax.f32 %v465_v40, 0.0 }
  0xc8   : > { %v454_v35 = vadd.f32 %v729_v25, %v446_v30 }
  0xc9   : > { %v464_v39 = vadd.f32 %v679_v29, %v452_v33 }
  0xca   : > { %v466_v41 = vadd.f32 %v683_v37, %v454_v35 }
  0xcb   : > { %v468_v43 = vmax.f32 %v464_v39, 0.0 }
  0xcc   : > { %v470_v45 = vmax.f32 %v466_v41, 0.0 }
  0xcd   : > { %v687_v46 = vpack.c.bf16 %v468_v43, %v467_v42 }
  0xce   : > { %v692_v47 = vpack.c.bf16 %v470_v45, %v469_v44 }
  0xcf   : > { %688 = vst [vmem:[%s842_s4] sm:$0xff] %v687_v46  }
  0xd0   : > { %695 = vst [vmem:[%s842_s4 + $0x8] sm:$0xff] %v692_v47  }
  0xd1 PF: > { %s14_s17 = sadd.s32 1, %s752_s17   ;;  %s843_s15 = smov %s748_s16 }
  0xd2   : > { %p11_p7 = scmp.ge.s32.totalorder %s14_s17, 11   ;;  %s844_s16 = smov %s846_s18 }
  0xd4   :  { %13 = sbr.rel (!%p11_p7) target bundleno = 2 (0x2), region = 83 }

// kernel: _lambda_.29
= control target key start
LH: loop header
LB: loop body
LE: loop exit
PB: predicated region body
PF: predicated region fallthrough
CT: control target
= control target key end

     0   :  { %s1452_s0 = inlined_call_operand.vmem [shape: bf16[9,8,128], index: 0, kind: input, shape index: {}]   ;;  %s1453_s1 = inlined_call_operand.hbm [shape: bf16[9,128,256], index: 1, kind: input, shape index: {}]   ;;  %s1454_s2 = inlined_call_operand.hbm [shape: bf16[128,256], index: 2, kind: input, shape index: {}]   ;;  %s1455_s3 = inlined_call_operand.vmem [shape: f32[1,256], index: 3, kind: input, shape index: {}, may-alias: {3,4}]   ;;  %s1456_s4 = inlined_call_operand.vmem [shape: f32[1,256], index: 4, kind: input, shape index: {}, may-alias: {3,4}]   ;;  %s1457_s5 = inlined_call_operand.vmem [shape: bf16[8,256], index: 5, kind: output, shape index: {0}]   ;;  %s1458_s6 = inlined_call_operand.vmem [shape: bf16[8,256], index: 6, kind: output, shape index: {1}]  }
   0x1   :  { %1464 = sst [smem:[#allocation15_spill]] %s1453_s1 }
   0x2   :  { %1465 = sst [smem:[#allocation16_spill]] %s1457_s5 }
   0x3   :  { %1466 = sst [smem:[#allocation17_spill]] %s1458_s6 }
   0x4   :  { %12 = vsyncpa [#allocation4], 0 }
   0x5   :  { %14 = vsyncpa [#allocation4 + $0x1], 0 }
   0x6   :  { %15 = vsyncpa [#allocation6], 0 }
   0x7   :  { %17 = vsyncpa [#allocation6 + $0x1], 0  ;;  %s1210_s21 = smov 0   ;;  %s1212_s22 = smov 0  }
   0x8   :  { %s1214_s23 = smov 0   ;;  %s1216_s24 = smov 0  }
   0x9   :  { %s1218_s25 = smov 0   ;;  %s1220_s26 = smov 0  }
   0xa   :  { %s1222_s27 = smov 0   ;;  %s1224_s28 = smov 0  }
   0xb   :  { %s1226_s29 = smov 0   ;;  %s1228_s30 = smov 0  }
   0xc   :  { %s1230_s7 = smov 0  }
   0xd LB: > { %1467 = sst [smem:[#allocation9_spill]] %s1149_s26  ;;  %s809_s8 = sadd.s32 4294967295, %s1169_s7   ;;  %s1169_s7 = sphi %s1230_s7, %s23_s7   ;;  %s1165_s30 = sphi %s1228_s30, %s1486_s30   ;;  %s1161_s29 = sphi %s1226_s29, %s1485_s29   ;;  %s1157_s28 = sphi %s1224_s28, %s1484_s28   ;;  %s1153_s27 = sphi %s1222_s27, %s1492_s27   ;;  %s1149_s26 = sphi %s1220_s26, %s1482_s26   ;;  %s1145_s25 = sphi %s1218_s25, %s1491_s25   ;;  %s1141_s24 = sphi %s1216_s24, %s1490_s24   ;;  %s1137_s23 = sphi %s1214_s23, %s1489_s23   ;;  %s1133_s22 = sphi %s1212_s22, %s1488_s22   ;;  %s1129_s21 = sphi %s1210_s21, %s1487_s21  }
   0xe   : > { %1468 = sst [smem:[#allocation10_spill]] %s1161_s29  ;;  %s35_s9 = sadd.s32 1, %s1161_s29 }
   0xf   : > { %1469 = sst [smem:[#allocation11_spill]] %s1165_s30  ;;  %p36_p0 = scmp.ge.s32.totalorder %s35_s9, 9 }
  0x10   : > { %s38_s10 = sadd.s32 1, %s1165_s30  ;;  %s79_s11 = sadd.s32 1, %s1149_s26 }
  0x11   : > { %p86_p1 = scmp.ne.s32.totalorder %s1149_s26, %s1145_s25  ;;  %s1494_s9 = smov (%p36_p0, %s35_s9), 0 }
  0x12   : > { %1470 = sst [smem:[#allocation12_spill]] %s1494_s9  ;;  %s1496_s10 = smov (!%p36_p0, %s38_s10), %s1165_s30 }
  0x13   : > { %s74_s12 = ssub.s32 %s1161_s29, %s1494_s9  ;;  %p87_p2 = scmp.eq.s32.totalorder %s1169_s7, 0 }
  0x14   : > { %p40_p3 = scmp.ge.s32.totalorder %s1496_s10, 2  ;;  %p92_p4 = scmp.ne.s32.totalorder %s1145_s25, %s1141_s24 }
  0x15   : > { %p1278_p5 = por %p87_p2, %p86_p1  ;;  %p1282_p6 = scmp.eq.s32.totalorder %s809_s8, 0 }
  0x16   : > { %s1498_s10 = smov (%p40_p3, %s1496_s10), 0  ;;  %p920_p8 = scmp.lt.s32.totalorder %s1169_s7, 18 }
  0x17   : > { %1473 = sst [smem:[#allocation13_spill]] %s1498_s10  ;;  %p1290_p7 = por %p1282_p6, %p92_p4 }
  0x18   : > { %s75_s16 = ssub.s32 %s1165_s30, %s1498_s10  ;;  %s260_s18 = sand.u32 1, %s1149_s26  }
  0x19   : > { %s76_s17 = sor.u32 %s75_s16, %s74_s12  ;;  %p103_p9 = scmp.eq.s32.totalorder %s75_s16, 0 }
  0x1a   : > { %p77_p10 = scmp.eq.s32.totalorder %s76_s17, 0  ;;  %s813_s19 = sshll.u32 %s260_s18, 6 }
  0x1b   : > { %s814_s24 = sshll.u32 %s1161_s29, 5  ;;  %s264_s9 = scalar_lea.vmem [#allocation3], %s813_s19 }
  0x1c   : > { %s1299_s20 = scalar_select %p77_p10, %s1149_s26, %s79_s11  }
  0x1d   : > { %s268_s8 = sadd.s32 %s1165_s30, %s814_s24  ;;  %s273_s6 = sshll.u32 %s264_s9, 4  ;;  %s274_s6 = int_to_ptr.vmem [resolvable:$true] %s273_s6 }
  0x1e   : > { %1475 = sst [smem:[#allocation14_spill]] %s1299_s20  ;;  %s815_s5 = sshll.u32 %s268_s8, 2 }
  0x1f   : > { %s1476_s1 = sld [smem:[#allocation15_spill]]  ;;  %p914_p11 = pnand %p920_p8, %p1278_p5 }
  0x20   : > { %s261_s9 = scalar_lea.sflag [#allocation4], %s260_s18  ;;  %s1171_s19 = smov 128  }
  0x21   : > { %s1172_s24 = smov 64   ;;  %s1173_s8 = smov 4  }
  0x22   : > { %p818_p12 = scmp.ge.s32.totalorder %s1169_s7, 1  ;;  %p314_p13 = scmp.lt.s32.totalorder %s1169_s7, 19 }
  0x23   : > { %p112_p1 = scmp.ne.s32.totalorder %s1137_s23, %s1133_s22  ;;  %p118_p3 = scmp.ne.s32.totalorder %s1133_s22, %s1129_s21 }
  0x24   : > { %p1312_p0 = pnand %p818_p12, %p314_p13  ;;  %s283_s12 = sand.u32 1, %s1137_s23  }
  0x25   : > { %s270_s17 = scalar_lea.hbm %s1476_s1, %s815_s5  ;;  %s105_s5 = sadd.s32 1, %s1137_s23 }
  0x26   : > { %s271_s11 = sshll.u32 %s270_s17, 4  ;;  %s817_s17 = sshll.u32 %s1165_s30, 2  ;;  %s272_s11 = int_to_ptr.hbm [resolvable:$true] %s271_s11 }
  0x27   : > { %916 = dma.hbm_to_vmem [thread:$0]  (!%p914_p11), %s272_s11, 1024, %s274_s6, %s261_s9, %s1171_s19, %s1172_s24, %s1173_s8  }
  0x28   : > { %s1319_s13 = scalar_select %p103_p9, %s1137_s23, %s105_s5  }
  0x29   : > { %p1329_p4 = por %p118_p3, %p1282_p6  ;;  %p114_p5 = por %p112_p1, %p87_p2 }
  0x2a   : > { %s816_s6 = sshll.u32 %s283_s12, 6  ;;  %s291_s1 = scalar_lea.hbm %s1454_s2, %s817_s17 }
  0x2b   : > { %s292_s29 = sshll.u32 %s291_s1, 4  ;;  %s287_s16 = scalar_lea.vmem [#allocation5], %s816_s6  ;;  %s293_s29 = int_to_ptr.hbm [resolvable:$true] %s292_s29 }
  0x2c   : > { %s294_s5 = sshll.u32 %s287_s16, 4  ;;  %p917_p9 = pnand %p920_p8, %p114_p5  ;;  %s295_s5 = int_to_ptr.vmem [resolvable:$true] %s294_s5 }
  0x2d   : > { %s284_s21 = scalar_lea.sflag [#allocation6], %s283_s12  ;;  %318 = sbr.rel (%p1312_p0) target bundleno = 418 (0x1a2), region = 40 }
  0x2e   : > { %919 = dma.hbm_to_vmem [thread:$0]  (!%p917_p9), %s293_s29, 1024, %s295_s5, %s284_s21, %s1171_s19, %s1172_s24, %s1173_s8  }
  0x2f   : > { %s320_s14 = sand.u32 (!%p1312_p0), 1, %s1145_s25  }
  0x30   : > { %s819_s30 = sshll.u32 (!%p1312_p0), %s320_s14, 6  ;;  %s321_s20 = scalar_lea.sflag (!%p1312_p0), [#allocation4], %s320_s14 }
  0x31   : > { %s1343_s26 = scalar_lea.vmem (!%p1312_p0), [#allocation3], %s819_s30 }
  0x32   : > { %1120 = dma.done.wait (%p1290_p7), %s321_s20, 1024  }
  0x33   : > { %1122 = vsyncadd (%p1290_p7), %s321_s20, 4294966272  ;;  %s330_s1 = sand.u32 1, %s1133_s22  }
  0x34   : > { %s820_s12 = sshll.u32 %s330_s1, 6  ;;  %s331_s29 = scalar_lea.sflag [#allocation6], %s330_s1 }
  0x35   : > { %s1350_s19 = scalar_lea.vmem [#allocation5], %s820_s12 }
  0x36   : > { %1124 = dma.done.wait (%p1329_p4), %s331_s29, 1024  }
  0x37   : > { %1126 = vsyncadd (%p1329_p4), %s331_s29, 4294966272  ;;  %p393_p2 = scmp.lt.s32.totalorder %s1153_s27, 8  ;;  %p400_p6 = scmp.lt.s32.totalorder %s1157_s28, 1 }
  0x38   : > { %s1479_s14 = sld [smem:[#allocation16_spill]]  ;;  %p824_p7 = scmp.ne.s32.totalorder %s1153_s27, 0 }
  0x39   : > { %s394_s30 = scalar_select %p393_p2, %s1153_s27, 8 }
  0x3a   : > { %s1500_s28 = smov (!%p400_p6, %s1157_s28), 1 }
  0x3b   : > { %s821_s15 = sshll.u32 %s394_s30, 2  ;;  %s402_s18 = scalar_lea.vmem %s1455_s3, %s1500_s28 }
  0x3c   : > { %s1365_s8 = scalar_lea.vmem %s1452_s0, %s821_s15  ;;  %s405_s9 = scalar_lea.vmem %s1456_s4, %s1500_s28 }
  0x3d   : > { %s822_s16 = sshll.u32 %s1500_s28, 2  ;;  %s1480_s30 = sld [smem:[#allocation17_spill]] }
  0x3e   : > { %s1379_s1 = scalar_lea.vmem %s1479_s14, %s822_s16 }
  0x3f   : > { %425 = sbr.rel (%p824_p7) target bundleno = 70 (0x46), region = 52 }
  0x43   : > { %s1384_s20 = scalar_lea.vmem %s1480_s30, %s822_s16 }
  0x44   : > { %v1174_v0 = vmov 0.0  }
  0x45   : > { %426 = vst [vmem:[#allocation2] sm:$0xff] %v1174_v0 }
  0x46 PF: > { %v900_v1 = vld [vmem:[%s1343_s26 + $0x38] sm:$0xff]  ;;  %v899_v2 = vld [vmem:[%s1343_s26 + $0x30] sm:$0xff]  ;;  %v898_v3 = vld [vmem:[%s1343_s26 + $0x28] sm:$0xff]  ;;  %p857_p8 = scmp.ne.s32.totalorder %s1153_s27, 4 }
  0x47   : > { %493 = vmatpush.bf16.msra.mxu0 %v900_v1  ;;  %v897_v4 = vld [vmem:[%s1343_s26 + $0x20] sm:$0xff]  ;;  %v896_v5 = vld [vmem:[%s1343_s26 + $0x18] sm:$0xff]  ;;  %v895_v6 = vld [vmem:[%s1343_s26 + $0x10] sm:$0xff] }
  0x48   : > { %v894_v7 = vld [vmem:[%s1343_s26 + $0x8] sm:$0xff]  ;;  %v893_v8 = vld [vmem:[%s1343_s26] sm:$0xff]  ;;  %v428_v9 = vld [vmem:[%s1365_s8] sm:$0xf] }
  0x4b   : > { %494 = vmatpush.bf16.msra.mxu0 %v899_v2 }
  0x4c   : > { %v427_v10 = vld [vmem:[#allocation2] sm:$0xff] }
  0x4f   : > { %495 = vmatpush.bf16.msra.mxu0 %v898_v3 }
  0x53   : > { %496 = vmatpush.bf16.msra.mxu0 %v897_v4 }
  0x57   : > { %497 = vmatpush.bf16.msra.mxu0 %v896_v5 }
  0x5b   : > { %498 = vmatpush.bf16.msra.mxu0 %v895_v6 }
  0x5f   : > { %499 = vmatpush.bf16.msra.mxu0 %v894_v7 }
  0x63   : > { %500 = vmatpush.bf16.msra.mxu0 %v893_v8 }
  0x66   : > { %501 = vmatmul.bf16.vlgmr.msra.gmra.mxu0 %v428_v9 }
  0xe3   : > { %v502_v11 = vpop.f32.mrf.mxu0 }
  0xe4   : > { %v506_v12 = vadd.f32 %v502_v11, %v427_v10 }
  0xe6   : > { %507 = vst [vmem:[#allocation2] sm:$0xff] %v506_v12 }
  0xe7   : > { %511 = sbr.rel (%p857_p8) target bundleno = 402 (0x192), region = 56 }
  0xeb   : > { %v504_v13 = vpop.f32.mrf.mxu0 }
  0xec   : > { %v908_v14 = vld [vmem:[%s1350_s19 + $0x38] sm:$0xff]  ;;  %v907_v15 = vld [vmem:[%s1350_s19 + $0x30] sm:$0xff]  ;;  %v906_v16 = vld [vmem:[%s1350_s19 + $0x28] sm:$0xff] }
  0xed   : > { %581 = vmatpush.bf16.msra.mxu0 %v908_v14  ;;  %v905_v17 = vld [vmem:[%s1350_s19 + $0x20] sm:$0xff]  ;;  %v904_v18 = vld [vmem:[%s1350_s19 + $0x18] sm:$0xff]  ;;  %v903_v19 = vld [vmem:[%s1350_s19 + $0x10] sm:$0xff] }
  0xee   : > { %v902_v20 = vld [vmem:[%s1350_s19 + $0x8] sm:$0xff]  ;;  %v901_v21 = vld [vmem:[%s1350_s19] sm:$0xff]  ;;  %v512_v22 = vld [vmem:[%s1365_s8] sm:$0xf] }
  0xef   : > { %v1013_v23 = vld [vmem:[%s405_s9] ss:$0 sm:$0xff] }
  0xf1   : > { %582 = vmatpush.bf16.msra.mxu0 %v907_v15 }
  0xf5   : > { %583 = vmatpush.bf16.msra.mxu0 %v906_v16 }
  0xf9   : > { %584 = vmatpush.bf16.msra.mxu0 %v905_v17 }
  0xfd   : > { %585 = vmatpush.bf16.msra.mxu0 %v904_v18 }
 0x101   : > { %586 = vmatpush.bf16.msra.mxu0 %v903_v19 }
 0x105   : > { %587 = vmatpush.bf16.msra.mxu0 %v902_v20 }
 0x109   : > { %588 = vmatpush.bf16.msra.mxu0 %v901_v21 }
 0x10c   : > { %589 = vmatmul.bf16.vlgmr.msra.gmra.mxu0 %v512_v22 }
 0x189   : > { %v590_v24 = vpop.f32.mrf.mxu0 }
 0x18a   : > { %v591_v25 = vadd.f32 %v1013_v23, %v590_v24 }
 0x18c   : > { %v594_v26 = vpack.c.bf16 %v591_v25, %v591_v25 }
 0x18e   : > { %595 = vst [vmem:[%s1384_s20] sm:$0xf] %v594_v26 }
 0x191   : > { %v592_v27 = vpop.f32.mrf.mxu0 }
 0x192 PF: > { %p890_p10 = scmp.ne.s32.totalorder %s1153_s27, 8 }
 0x194   : > { %599 = sbr.rel (%p890_p10) target bundleno = 418 (0x1a2), region = 60 }
 0x199   : > { %v600_v28 = vld [vmem:[#allocation2] sm:$0xff] }
 0x19a   : > { %v1014_v29 = vld [vmem:[%s402_s18] ss:$0 sm:$0xff] }
 0x19b   : > { %v605_v30 = vadd.f32 %v1014_v29, %v600_v28 }
 0x19d   : > { %v606_v31 = vmax.f32 %v605_v30, 0.0 }
 0x19f   : > { %v607_v32 = vpack.c.bf16 %v606_v31, %v606_v31 }
 0x1a1   : > { %608 = vst [vmem:[%s1379_s1] sm:$0xf] %v607_v32 }
 0x1a2 PF: > { %s23_s7 = sadd.s32 1, %s1169_s7   ;;  %s1481_s27 = sld [smem:[#allocation9_spill]] }
 0x1a3   : > { %p20_p11 = scmp.ge.s32.totalorder %s23_s7, 20   ;;  %s1482_s26 = sld [smem:[#allocation14_spill]] }
 0x1a4   : > { %s1483_s8 = sld [smem:[#allocation10_spill]]  ;;  %s1487_s21 = smov %s1133_s22 }
 0x1a5   : > { %s1484_s28 = sld [smem:[#allocation11_spill]]  ;;  %s1488_s22 = smov %s1137_s23 }
 0x1a6   : > { %s1485_s29 = sld [smem:[#allocation12_spill]]  ;;  %s1489_s23 = smov %s1319_s13 }
 0x1a7   : > { %s1486_s30 = sld [smem:[#allocation13_spill]]  ;;  %s1490_s24 = smov %s1145_s25 }
 0x1a8   : > { %s1491_s25 = smov %s1481_s27  ;;  %22 = sbr.rel (!%p20_p11) target bundleno = 13 (0xd), region = 126 }
 0x1aa   : > { %s1492_s27 = smov %s1483_s8 }
 0x1ad   :  { %658 = vsyncpa [#allocation4], 1 }
 0x1ae   :  { %660 = vsyncpa [#allocation4 + $0x1], 1 }
 0x1af   :  { %661 = vsyncpa [#allocation6], 1 }
 0x1b0   :  { %663 = vsyncpa [#allocation6 + $0x1], 1 }

// kernel: _lambda_.31
= control target key start
LH: loop header
LB: loop body
LE: loop exit
PB: predicated region body
PF: predicated region fallthrough
CT: control target
= control target key end

     0   :  { %s953_s12 = smov 0   ;;  %s955_s13 = smov 0   ;;  %s1153_s0 = inlined_call_operand.vmem [shape: bf16[9,8,256], index: 0, kind: input, shape index: {}]   ;;  %s1154_s1 = inlined_call_operand.vmem [shape: bf16[9,256,256], index: 1, kind: input, shape index: {}]   ;;  %s1155_s2 = inlined_call_operand.vmem [shape: f32[1,256], index: 2, kind: input, shape index: {}]   ;;  %s1156_s3 = inlined_call_operand.vmem [shape: bf16[8,256], index: 3, kind: output, shape index: {}]  }
   0x1   :  { %s957_s14 = smov 0   ;;  %s959_s15 = smov 0  }
   0x2   :  { %s961_s16 = smov 0   ;;  %s963_s17 = smov 0  }
   0x3   :  { %s965_s18 = smov 0  }
   0x4 LB: > { %s25_s19 = sadd.s32 1, %s922_s16  ;;  %s28_s20 = sadd.s32 1, %s926_s17  ;;  %s930_s18 = sphi %s965_s18, %s13_s18   ;;  %s926_s17 = sphi %s963_s17, %s1162_s17   ;;  %s922_s16 = sphi %s961_s16, %s1161_s16   ;;  %s918_s15 = sphi %s959_s15, %s1160_s15   ;;  %s914_s14 = sphi %s957_s14, %s1159_s14   ;;  %s910_s13 = sphi %s955_s13, %s1158_s13   ;;  %s906_s12 = sphi %s953_s12, %s1157_s12  }
   0x5   : > { %p26_p0 = scmp.ge.s32.totalorder %s25_s19, 9  ;;  %p76_p1 = scmp.ne.s32.totalorder %s910_s13, %s906_s12 }
   0x6   : > { %p77_p2 = scmp.eq.s32.totalorder %s930_s18, 0  ;;  %s69_s24 = sadd.s32 1, %s910_s13 }
   0x7   : > { %s1164_s19 = smov (%p26_p0, %s25_s19), 0  ;;  %s1166_s20 = smov (!%p26_p0, %s28_s20), %s926_s17 }
   0x8   : > { %p78_p3 = por %p77_p2, %p76_p1  ;;  %p30_p4 = scmp.ge.s32.totalorder %s1166_s20, 2 }
   0x9   : > { %s64_s21 = ssub.s32 %s922_s16, %s1164_s19  ;;  %p724_p6 = scmp.ge.s32.totalorder %s930_s18, 18 }
   0xa   : > { %s1168_s20 = smov (%p30_p4, %s1166_s20), 0 }
   0xb   : > { %s65_s22 = ssub.s32 %s926_s17, %s1168_s20  ;;  %156 = sbr.rel (%p724_p6) target bundleno = 54 (0x36), region = 16 }
   0xc   : > { %s66_s23 = sor.u32 %s65_s22, %s64_s21 }
   0xd   : > { %p67_p5 = scmp.eq.s32.totalorder %s66_s23, 0 }
   0xf   : > { %s1004_s25 = scalar_select %p67_p5, %s910_s13, %s69_s24  }
  0x10   : > { %171 = sbr.rel (!%p78_p3) target bundleno = 54 (0x36), region = 24  ;;  %s173_s26 = sand.u32 (%p78_p3), 1, %s910_s13  }
  0x11   : > { %s726_s27 = sshll.u32 (%p78_p3), %s922_s16, 6  ;;  %s725_s28 = sshll.u32 (%p78_p3), %s173_s26, 7 }
  0x12   : > { %s177_s29 = sadd.s32 (%p78_p3), %s926_s17, %s726_s27  ;;  %s1018_s7 = scalar_lea.vmem (%p78_p3), [#allocation3], %s725_s28 }
  0x13   : > { %s727_s30 = sshll.u32 (%p78_p3), %s177_s29, 2 }
  0x14   : > { %s1013_s6 = scalar_lea.vmem (%p78_p3), %s1154_s1, %s727_s30 }
  0x15   : > { %v196_v0 = vld [vmem:[%s1013_s6] sm:$0xf]  ;;  %v198_v1 = vld [vmem:[%s1013_s6 + $0x8] sm:$0xf]  ;;  %v200_v2 = vld [vmem:[%s1013_s6 + $0x10] sm:$0xf] }
  0x16   : > { %197 = vst [vmem:[%s1018_s7] sm:$0xf] %v196_v0  ;;  %v202_v3 = vld [vmem:[%s1013_s6 + $0x18] sm:$0xf]  ;;  %v204_v4 = vld [vmem:[%s1013_s6 + $0x20] sm:$0xf] }
  0x17   : > { %199 = vst [vmem:[%s1018_s7 + $0x4] sm:$0xf] %v198_v1  ;;  %v206_v5 = vld [vmem:[%s1013_s6 + $0x28] sm:$0xf]  ;;  %v208_v6 = vld [vmem:[%s1013_s6 + $0x30] sm:$0xf] }
  0x18   : > { %201 = vst [vmem:[%s1018_s7 + $0x8] sm:$0xf] %v200_v2  ;;  %v210_v7 = vld [vmem:[%s1013_s6 + $0x38] sm:$0xf]  ;;  %v212_v8 = vld [vmem:[%s1013_s6 + $0x40] sm:$0xf] }
  0x19   : > { %203 = vst [vmem:[%s1018_s7 + $0xc] sm:$0xf] %v202_v3  ;;  %v214_v9 = vld [vmem:[%s1013_s6 + $0x48] sm:$0xf]  ;;  %v216_v10 = vld [vmem:[%s1013_s6 + $0x50] sm:$0xf] }
  0x1a   : > { %205 = vst [vmem:[%s1018_s7 + $0x10] sm:$0xf] %v204_v4  ;;  %v218_v11 = vld [vmem:[%s1013_s6 + $0x58] sm:$0xf]  ;;  %v220_v12 = vld [vmem:[%s1013_s6 + $0x60] sm:$0xf] }
  0x1b   : > { %207 = vst [vmem:[%s1018_s7 + $0x14] sm:$0xf] %v206_v5  ;;  %v222_v13 = vld [vmem:[%s1013_s6 + $0x68] sm:$0xf]  ;;  %v224_v14 = vld [vmem:[%s1013_s6 + $0x70] sm:$0xf] }
  0x1c   : > { %209 = vst [vmem:[%s1018_s7 + $0x18] sm:$0xf] %v208_v6  ;;  %v226_v15 = vld [vmem:[%s1013_s6 + $0x78] sm:$0xf]  ;;  %v228_v16 = vld [vmem:[%s1013_s6 + $0x80] sm:$0xf] }
  0x1d   : > { %211 = vst [vmem:[%s1018_s7 + $0x1c] sm:$0xf] %v210_v7  ;;  %v230_v17 = vld [vmem:[%s1013_s6 + $0x88] sm:$0xf]  ;;  %v232_v18 = vld [vmem:[%s1013_s6 + $0x90] sm:$0xf] }
  0x1e   : > { %213 = vst [vmem:[%s1018_s7 + $0x20] sm:$0xf] %v212_v8  ;;  %v234_v19 = vld [vmem:[%s1013_s6 + $0x98] sm:$0xf]  ;;  %v236_v20 = vld [vmem:[%s1013_s6 + $0xa0] sm:$0xf] }
  0x1f   : > { %215 = vst [vmem:[%s1018_s7 + $0x24] sm:$0xf] %v214_v9  ;;  %v238_v21 = vld [vmem:[%s1013_s6 + $0xa8] sm:$0xf]  ;;  %v240_v22 = vld [vmem:[%s1013_s6 + $0xb0] sm:$0xf] }
  0x20   : > { %217 = vst [vmem:[%s1018_s7 + $0x28] sm:$0xf] %v216_v10  ;;  %v242_v23 = vld [vmem:[%s1013_s6 + $0xb8] sm:$0xf]  ;;  %v244_v24 = vld [vmem:[%s1013_s6 + $0xc0] sm:$0xf] }
  0x21   : > { %219 = vst [vmem:[%s1018_s7 + $0x2c] sm:$0xf] %v218_v11  ;;  %v246_v25 = vld [vmem:[%s1013_s6 + $0xc8] sm:$0xf]  ;;  %v248_v26 = vld [vmem:[%s1013_s6 + $0xd0] sm:$0xf] }
  0x22   : > { %221 = vst [vmem:[%s1018_s7 + $0x30] sm:$0xf] %v220_v12  ;;  %v250_v27 = vld [vmem:[%s1013_s6 + $0xd8] sm:$0xf]  ;;  %v252_v28 = vld [vmem:[%s1013_s6 + $0xe0] sm:$0xf] }
  0x23   : > { %223 = vst [vmem:[%s1018_s7 + $0x34] sm:$0xf] %v222_v13  ;;  %v254_v29 = vld [vmem:[%s1013_s6 + $0xe8] sm:$0xf]  ;;  %v256_v30 = vld [vmem:[%s1013_s6 + $0xf0] sm:$0xf] }
  0x24   : > { %225 = vst [vmem:[%s1018_s7 + $0x38] sm:$0xf] %v224_v14  ;;  %v258_v31 = vld [vmem:[%s1013_s6 + $0xf8] sm:$0xf] }
  0x25   : > { %227 = vst [vmem:[%s1018_s7 + $0x3c] sm:$0xf] %v226_v15 }
  0x26   : > { %229 = vst [vmem:[%s1018_s7 + $0x40] sm:$0xf] %v228_v16 }
  0x27   : > { %231 = vst [vmem:[%s1018_s7 + $0x44] sm:$0xf] %v230_v17 }
  0x28   : > { %233 = vst [vmem:[%s1018_s7 + $0x48] sm:$0xf] %v232_v18 }
  0x29   : > { %235 = vst [vmem:[%s1018_s7 + $0x4c] sm:$0xf] %v234_v19 }
  0x2a   : > { %237 = vst [vmem:[%s1018_s7 + $0x50] sm:$0xf] %v236_v20 }
  0x2b   : > { %239 = vst [vmem:[%s1018_s7 + $0x54] sm:$0xf] %v238_v21 }
  0x2c   : > { %241 = vst [vmem:[%s1018_s7 + $0x58] sm:$0xf] %v240_v22 }
  0x2d   : > { %243 = vst [vmem:[%s1018_s7 + $0x5c] sm:$0xf] %v242_v23 }
  0x2e   : > { %245 = vst [vmem:[%s1018_s7 + $0x60] sm:$0xf] %v244_v24 }
  0x2f   : > { %247 = vst [vmem:[%s1018_s7 + $0x64] sm:$0xf] %v246_v25 }
  0x30   : > { %249 = vst [vmem:[%s1018_s7 + $0x68] sm:$0xf] %v248_v26 }
  0x31   : > { %251 = vst [vmem:[%s1018_s7 + $0x6c] sm:$0xf] %v250_v27 }
  0x32   : > { %253 = vst [vmem:[%s1018_s7 + $0x70] sm:$0xf] %v252_v28 }
  0x33   : > { %255 = vst [vmem:[%s1018_s7 + $0x74] sm:$0xf] %v254_v29 }
  0x34   : > { %257 = vst [vmem:[%s1018_s7 + $0x78] sm:$0xf] %v256_v30 }
  0x35   : > { %259 = vst [vmem:[%s1018_s7 + $0x7c] sm:$0xf] %v258_v31 }
  0x36 PF: > { %p728_p7 = scmp.ge.s32.totalorder %s930_s18, 1  ;;  %p352_p8 = scmp.lt.s32.totalorder %s930_s18, 19 }
  0x38   : > { %p353_p9 = pnand %p728_p7, %p352_p8 }
  0x39   : > { %s359_s8 = sand.u32 (!%p353_p9), 1, %s906_s12   ;;  %p397_p10 = scmp.lt.s32.totalorder (!%p353_p9), %s914_s14, 8 }
  0x3a   : > { %356 = sbr.rel (%p353_p9) target bundleno = 249 (0xf9), region = 69  ;;  %s729_s9 = sshll.u32 (!%p353_p9), %s359_s8, 7 }
  0x3b   : > { %p406_p11 = scmp.lt.s32.totalorder (!%p353_p9), %s918_s15, 1  ;;  %s1105_s4 = scalar_lea.vmem (!%p353_p9), [#allocation3], %s729_s9 }
  0x3c   : > { %p733_p12 = scmp.ne.s32.totalorder (!%p353_p9), %s914_s14, 0 }
  0x3f   : > { %s398_s10 = scalar_select %p397_p10, %s914_s14, 8 }
  0x40   : > { %s1170_s15 = smov (!%p406_p11, %s918_s15), 1  ;;  %420 = sbr.rel (%p733_p12) target bundleno = 71 (0x47), region = 77 }
  0x41   : > { %s801_s11 = sshll.u32 %s398_s10, 3  ;;  %s408_s27 = scalar_lea.vmem %s1155_s2, %s1170_s15 }
  0x42   : > { %s1093_s23 = scalar_lea.vmem %s1153_s0, %s801_s11  ;;  %s732_s28 = sshll.u32 %s1170_s15, 2 }
  0x43   : > { %s1103_s30 = scalar_lea.vmem %s1156_s3, %s732_s28 }
  0x45   : > { %v932_v32 = vmov 0.0  }
  0x46   : > { %421 = vst [vmem:[#allocation2] sm:$0xff] %v932_v32 }
  0x47 PF: > { %v809_v33 = vld [vmem:[%s1105_s4 + $0x38] sm:$0xff]  ;;  %v808_v35 = vld [vmem:[%s1105_s4 + $0x30] sm:$0xff]  ;;  %v807_v37 = vld [vmem:[%s1105_s4 + $0x28] sm:$0xff]  ;;  %p798_p13 = scmp.ne.s32.totalorder %s914_s14, 8 }
  0x48   : > { %v817_v34 = vld [vmem:[%s1105_s4 + $0x78] sm:$0xff]  ;;  %559 = vmatpush.bf16.msra.mxu0 %v809_v33  ;;  %v816_v36 = vld [vmem:[%s1105_s4 + $0x70] sm:$0xff]  ;;  %v815_v38 = vld [vmem:[%s1105_s4 + $0x68] sm:$0xff] }
  0x49   : > { %572 = vmatpush.bf16.msra.mxu1 %v817_v34  ;;  %v806_v39 = vld [vmem:[%s1105_s4 + $0x20] sm:$0xff]  ;;  %v805_v41 = vld [vmem:[%s1105_s4 + $0x18] sm:$0xff]  ;;  %v804_v43 = vld [vmem:[%s1105_s4 + $0x10] sm:$0xff] }
  0x4a   : > { %v814_v40 = vld [vmem:[%s1105_s4 + $0x60] sm:$0xff]  ;;  %v813_v42 = vld [vmem:[%s1105_s4 + $0x58] sm:$0xff]  ;;  %v812_v44 = vld [vmem:[%s1105_s4 + $0x50] sm:$0xff] }
  0x4b   : > { %v803_v45 = vld [vmem:[%s1105_s4 + $0x8] sm:$0xff]  ;;  %v423_v47 = vld [vmem:[%s1093_s23] sm:$0xff]  ;;  %v802_v50 = vld [vmem:[%s1105_s4] sm:$0xff] }
  0x4c   : > { %560 = vmatpush.bf16.msra.mxu0 %v808_v35  ;;  %v811_v46 = vld [vmem:[%s1105_s4 + $0x48] sm:$0xff]  ;;  %v457_v48 = vunpack.c.l.b16 %v423_v47  ;;  %v458_v49 = vunpack.c.h.b16 %v423_v47  ;;  %v810_v51 = vld [vmem:[%s1105_s4 + $0x40] sm:$0xff] }
  0x4d   : > { %573 = vmatpush.bf16.msra.mxu1 %v816_v36  ;;  %v422_v55 = vld [vmem:[#allocation2] sm:$0xff] }
  0x4e   : > { %v459_v52 = vpack.c.b16 %v457_v48, %v457_v48  ;;  %v460_v53 = vpack.c.b16 %v458_v49, %v458_v49 }
  0x50   : > { %561 = vmatpush.bf16.msra.mxu0 %v807_v37 }
  0x51   : > { %574 = vmatpush.bf16.msra.mxu1 %v815_v38 }
  0x54   : > { %562 = vmatpush.bf16.msra.mxu0 %v806_v39 }
  0x55   : > { %575 = vmatpush.bf16.msra.mxu1 %v814_v40 }
  0x58   : > { %563 = vmatpush.bf16.msra.mxu0 %v805_v41 }
  0x59   : > { %576 = vmatpush.bf16.msra.mxu1 %v813_v42 }
  0x5c   : > { %564 = vmatpush.bf16.msra.mxu0 %v804_v43 }
  0x5d   : > { %577 = vmatpush.bf16.msra.mxu1 %v812_v44 }
  0x60   : > { %565 = vmatpush.bf16.msra.mxu0 %v803_v45 }
  0x61   : > { %578 = vmatpush.bf16.msra.mxu1 %v811_v46 }
  0x64   : > { %566 = vmatpush.bf16.msra.mxu0 %v802_v50 }
  0x65   : > { %579 = vmatpush.bf16.msra.mxu1 %v810_v51 }
  0x67   : > { %567 = vmatmul.bf16.vlgmr.msra.gmra.mxu0 %v459_v52 }
  0x68   : > { %580 = vmatmul.bf16.vlgmr.msra.gmra.mxu1 %v460_v53 }
  0xe4   : > { %v568_v54 = vpop.f32.mrf.mxu0 }
  0xe5   : > { %v581_v56 = vpop.f32.mrf.mxu1 }
  0xe6   : > { %v582_v57 = vadd.f32 %v581_v56, %v568_v54 }
  0xe8   : > { %v585_v58 = vadd.f32 %v582_v57, %v422_v55 }
  0xe9   : > { %590 = sbr.rel (%p798_p13) target bundleno = 249 (0xf9), region = 81 }
  0xea   : > { %586 = vst [vmem:[#allocation2] sm:$0xff] %v585_v58 }
  0xec   : > { %v570_v59 = vpop.f32.mrf.mxu0 }
  0xed   : > { %v583_v60 = vpop.f32.mrf.mxu1 }
  0xee   : > { %v875_v62 = vld [vmem:[%s408_s27] ss:$0 sm:$0xff] }
  0xf1   : > { %v591_v61 = vld [vmem:[#allocation2] sm:$0xff] }
  0xf2   : > { %v596_v63 = vadd.f32 %v875_v62, %v591_v61 }
  0xf4   : > { %v597_v0 = vmax.f32 %v596_v63, 0.0 }
  0xf6   : > { %v598_v1 = vpack.c.bf16 %v597_v0, %v597_v0 }
  0xf8   : > { %599 = vst [vmem:[%s1103_s30] sm:$0xf] %v598_v1 }
  0xf9 PF: > { %s13_s18 = sadd.s32 1, %s930_s18   ;;  %s1157_s12 = smov %s910_s13 }
  0xfa   : > { %p10_p0 = scmp.ge.s32.totalorder %s13_s18, 20   ;;  %s1158_s13 = smov %s1004_s25 }
  0xfb   : > { %s1159_s14 = smov %s922_s16  ;;  %s1160_s15 = smov %s926_s17 }
  0xfc   : > { %s1161_s16 = smov %s1164_s19  ;;  %s1162_s17 = smov %s1168_s20 }
  0xfd   :  { %12 = sbr.rel (!%p10_p0) target bundleno = 4 (0x4), region = 122 }

// kernel: _lambda_.30
= control target key start
LH: loop header
LB: loop body
LE: loop exit
PB: predicated region body
PF: predicated region fallthrough
CT: control target
= control target key end

     0   :  { %9 = vsyncpa [#allocation4], 0  ;;  %s1123_s0 = inlined_call_operand.vmem [shape: bf16[9,8,256], index: 0, kind: input, shape index: {}]   ;;  %s1124_s1 = inlined_call_operand.hbm [shape: bf16[9,256,256], index: 1, kind: input, shape index: {}]   ;;  %s1125_s2 = inlined_call_operand.vmem [shape: f32[1,256], index: 2, kind: input, shape index: {}]   ;;  %s1126_s3 = inlined_call_operand.vmem [shape: bf16[8,256], index: 3, kind: input, shape index: {}]   ;;  %s1127_s4 = inlined_call_operand.vmem [shape: bf16[8,256], index: 4, kind: output, shape index: {}]  }
   0x1   :  { %11 = vsyncpa [#allocation4 + $0x1], 0  ;;  %s961_s15 = smov 0   ;;  %s963_s16 = smov 0  }
   0x2   :  { %s965_s17 = smov 0   ;;  %s967_s18 = smov 0  }
   0x3   :  { %s969_s19 = smov 0   ;;  %s971_s20 = smov 0  }
   0x4   :  { %s973_s21 = smov 0   ;;  %s975_s22 = smov 0  }
   0x5 LB: > { %s660_s23 = sadd.s32 4294967295, %s930_s22   ;;  %s29_s24 = sadd.s32 1, %s922_s20  ;;  %s930_s22 = sphi %s975_s22, %s17_s22   ;;  %s926_s21 = sphi %s973_s21, %s1139_s21   ;;  %s922_s20 = sphi %s971_s20, %s1138_s20   ;;  %s918_s19 = sphi %s969_s19, %s1137_s19   ;;  %s914_s18 = sphi %s967_s18, %s1136_s18   ;;  %s910_s17 = sphi %s965_s17, %s1135_s17   ;;  %s906_s16 = sphi %s963_s16, %s1134_s16   ;;  %s902_s15 = sphi %s961_s15, %s1133_s15  }
   0x6   : > { %p30_p0 = scmp.ge.s32.totalorder %s29_s24, 9  ;;  %s32_s25 = sadd.s32 1, %s926_s21 }
   0x7   : > { %s73_s26 = sadd.s32 1, %s910_s17  ;;  %p80_p1 = scmp.ne.s32.totalorder %s910_s17, %s906_s16 }
   0x8   : > { %s1141_s24 = smov (%p30_p0, %s29_s24), 0  ;;  %s1143_s25 = smov (!%p30_p0, %s32_s25), %s926_s21 }
   0x9   : > { %s68_s27 = ssub.s32 %s922_s20, %s1141_s24  ;;  %p81_p2 = scmp.eq.s32.totalorder %s930_s22, 0 }
   0xa   : > { %p34_p3 = scmp.ge.s32.totalorder %s1143_s25, 2  ;;  %p86_p4 = scmp.ne.s32.totalorder %s906_s16, %s902_s15 }
   0xb   : > { %p1012_p5 = por %p81_p2, %p80_p1  ;;  %p87_p6 = scmp.eq.s32.totalorder %s660_s23, 0 }
   0xc   : > { %s1145_s25 = smov (%p34_p3, %s1143_s25), 0  ;;  %p764_p8 = scmp.lt.s32.totalorder %s930_s22, 18 }
   0xd   : > { %1130 = sst [smem:[#allocation6_spill]] %s1145_s25  ;;  %p1018_p7 = por %p87_p6, %p86_p4 }
   0xe   : > { %s69_s30 = ssub.s32 %s926_s21, %s1145_s25  ;;  %s204_s6 = sand.u32 1, %s910_s17  }
   0xf   : > { %s70_s5 = sor.u32 %s69_s30, %s68_s27  ;;  %s664_s7 = sshll.u32 %s204_s6, 7 }
  0x10   : > { %p71_p9 = scmp.eq.s32.totalorder %s70_s5, 0  ;;  %s665_s8 = sshll.u32 %s922_s20, 6 }
  0x11   : > { %s212_s10 = sadd.s32 %s926_s21, %s665_s8  ;;  %s208_s12 = scalar_lea.vmem [#allocation3], %s664_s7 }
  0x12   : > { %s1028_s9 = scalar_select %p71_p9, %s910_s17, %s73_s26  }
  0x13   : > { %s666_s11 = sshll.u32 %s212_s10, 2  ;;  %s217_s13 = sshll.u32 %s208_s12, 4  ;;  %s218_s13 = int_to_ptr.vmem [resolvable:$true] %s217_s13 }
  0x14   : > { %s214_s23 = scalar_lea.hbm %s1124_s1, %s666_s11  ;;  %p761_p10 = pnand %p764_p8, %p1012_p5 }
  0x15   : > { %s215_s25 = sshll.u32 %s214_s23, 4  ;;  %p667_p11 = scmp.ge.s32.totalorder %s930_s22, 1  ;;  %s216_s25 = int_to_ptr.hbm [resolvable:$true] %s215_s25 }
  0x16   : > { %s205_s27 = scalar_lea.sflag [#allocation4], %s204_s6  ;;  %s932_s30 = smov 128  }
  0x17   : > { %s933_s26 = smov 64   ;;  %s934_s5 = smov 4  }
  0x18   : > { %763 = dma.hbm_to_vmem [thread:$0]  (!%p761_p10), %s216_s25, 2048, %s218_s13, %s205_s27, %s932_s30, %s933_s26, %s934_s5  }
  0x19   : > { %p242_p12 = scmp.lt.s32.totalorder %s930_s22, 19 }
  0x1b   : > { %p243_p13 = pnand %p667_p11, %p242_p12 }
  0x1c   : > { %s248_s7 = sand.u32 (!%p243_p13), 1, %s906_s16  }
  0x1d   : > { %246 = sbr.rel (%p243_p13) target bundleno = 225 (0xe1), region = 36  ;;  %s668_s8 = sshll.u32 (!%p243_p13), %s248_s7, 7 }
  0x1e   : > { %s249_s10 = scalar_lea.sflag (!%p243_p13), [#allocation4], %s248_s7  ;;  %s1041_s11 = scalar_lea.vmem (!%p243_p13), [#allocation3], %s668_s8 }
  0x22   : > { %897 = dma.done.wait (%p1018_p7), %s249_s10, 2048  }
  0x23   : > { %899 = vsyncadd (%p1018_p7), %s249_s10, 4294965248  ;;  %p301_p0 = scmp.lt.s32.totalorder %s914_s18, 8  ;;  %p310_p1 = scmp.lt.s32.totalorder %s918_s19, 1 }
  0x24   : > { %p673_p2 = scmp.ne.s32.totalorder %s914_s18, 0 }
  0x25   : > { %s302_s25 = scalar_select %p301_p0, %s914_s18, 8 }
  0x26   : > { %s1147_s19 = smov (!%p310_p1, %s918_s19), 1  ;;  %332 = sbr.rel (%p673_p2) target bundleno = 45 (0x2d), region = 44 }
  0x27   : > { %s741_s28 = sshll.u32 %s302_s25, 3  ;;  %s312_s15 = scalar_lea.vmem %s1125_s2, %s1147_s19 }
  0x28   : > { %s1056_s13 = scalar_lea.vmem %s1123_s0, %s741_s28  ;;  %s671_s23 = sshll.u32 %s1147_s19, 2 }
  0x29   : > { %s1066_s26 = scalar_lea.vmem %s1126_s3, %s671_s23  ;;  %s1071_s8 = scalar_lea.vmem %s1127_s4, %s671_s23 }
  0x2b   : > { %v935_v0 = vmov 0.0  }
  0x2c   : > { %333 = vst [vmem:[#allocation2] sm:$0xff] %v935_v0 }
  0x2d PF: > { %v749_v1 = vld [vmem:[%s1041_s11 + $0x38] sm:$0xff]  ;;  %v748_v3 = vld [vmem:[%s1041_s11 + $0x30] sm:$0xff]  ;;  %v747_v5 = vld [vmem:[%s1041_s11 + $0x28] sm:$0xff]  ;;  %p738_p3 = scmp.ne.s32.totalorder %s914_s18, 8 }
  0x2e   : > { %v757_v2 = vld [vmem:[%s1041_s11 + $0x78] sm:$0xff]  ;;  %471 = vmatpush.bf16.msra.mxu0 %v749_v1  ;;  %v756_v4 = vld [vmem:[%s1041_s11 + $0x70] sm:$0xff]  ;;  %v755_v6 = vld [vmem:[%s1041_s11 + $0x68] sm:$0xff] }
  0x2f   : > { %484 = vmatpush.bf16.msra.mxu1 %v757_v2  ;;  %v746_v7 = vld [vmem:[%s1041_s11 + $0x20] sm:$0xff]  ;;  %v745_v9 = vld [vmem:[%s1041_s11 + $0x18] sm:$0xff]  ;;  %v744_v11 = vld [vmem:[%s1041_s11 + $0x10] sm:$0xff] }
  0x30   : > { %v754_v8 = vld [vmem:[%s1041_s11 + $0x60] sm:$0xff]  ;;  %v753_v10 = vld [vmem:[%s1041_s11 + $0x58] sm:$0xff]  ;;  %v752_v12 = vld [vmem:[%s1041_s11 + $0x50] sm:$0xff] }
  0x31   : > { %v743_v13 = vld [vmem:[%s1041_s11 + $0x8] sm:$0xff]  ;;  %v335_v15 = vld [vmem:[%s1056_s13] sm:$0xff]  ;;  %v742_v18 = vld [vmem:[%s1041_s11] sm:$0xff] }
  0x32   : > { %472 = vmatpush.bf16.msra.mxu0 %v748_v3  ;;  %v751_v14 = vld [vmem:[%s1041_s11 + $0x48] sm:$0xff]  ;;  %v369_v16 = vunpack.c.l.b16 %v335_v15  ;;  %v370_v17 = vunpack.c.h.b16 %v335_v15  ;;  %v750_v19 = vld [vmem:[%s1041_s11 + $0x40] sm:$0xff] }
  0x33   : > { %485 = vmatpush.bf16.msra.mxu1 %v756_v4  ;;  %v334_v23 = vld [vmem:[#allocation2] sm:$0xff] }
  0x34   : > { %v371_v20 = vpack.c.b16 %v369_v16, %v369_v16  ;;  %v372_v21 = vpack.c.b16 %v370_v17, %v370_v17 }
  0x36   : > { %473 = vmatpush.bf16.msra.mxu0 %v747_v5 }
  0x37   : > { %486 = vmatpush.bf16.msra.mxu1 %v755_v6 }
  0x3a   : > { %474 = vmatpush.bf16.msra.mxu0 %v746_v7 }
  0x3b   : > { %487 = vmatpush.bf16.msra.mxu1 %v754_v8 }
  0x3e   : > { %475 = vmatpush.bf16.msra.mxu0 %v745_v9 }
  0x3f   : > { %488 = vmatpush.bf16.msra.mxu1 %v753_v10 }
  0x42   : > { %476 = vmatpush.bf16.msra.mxu0 %v744_v11 }
  0x43   : > { %489 = vmatpush.bf16.msra.mxu1 %v752_v12 }
  0x46   : > { %477 = vmatpush.bf16.msra.mxu0 %v743_v13 }
  0x47   : > { %490 = vmatpush.bf16.msra.mxu1 %v751_v14 }
  0x4a   : > { %478 = vmatpush.bf16.msra.mxu0 %v742_v18 }
  0x4b   : > { %491 = vmatpush.bf16.msra.mxu1 %v750_v19 }
  0x4d   : > { %479 = vmatmul.bf16.vlgmr.msra.gmra.mxu0 %v371_v20 }
  0x4e   : > { %492 = vmatmul.bf16.vlgmr.msra.gmra.mxu1 %v372_v21 }
  0xca   : > { %v480_v22 = vpop.f32.mrf.mxu0 }
  0xcb   : > { %v493_v24 = vpop.f32.mrf.mxu1 }
  0xcc   : > { %v494_v25 = vadd.f32 %v493_v24, %v480_v22 }
  0xce   : > { %v497_v26 = vadd.f32 %v494_v25, %v334_v23 }
  0xcf   : > { %502 = sbr.rel (%p738_p3) target bundleno = 225 (0xe1), region = 48 }
  0xd0   : > { %498 = vst [vmem:[#allocation2] sm:$0xff] %v497_v26 }
  0xd2   : > { %v482_v27 = vpop.f32.mrf.mxu0 }
  0xd3   : > { %v495_v28 = vpop.f32.mrf.mxu1 }
  0xd4   : > { %v833_v30 = vld [vmem:[%s312_s15] ss:$0 sm:$0xff] }
  0xd5   : > { %v509_v31 = vld [vmem:[%s1066_s26] sm:$0xf] }
  0xd6   : > { %v510_v33 = vunpack.c.l.bf16 %v509_v31 }
  0xd7   : > { %v503_v29 = vld [vmem:[#allocation2] sm:$0xff] }
  0xd8   : > { %v508_v32 = vadd.f32 %v833_v30, %v503_v29 }
  0xda   : > { %v511_v34 = vadd.f32 %v510_v33, %v508_v32 }
  0xdc   : > { %v512_v35 = vmax.f32 %v511_v34, 0.0 }
  0xde   : > { %v513_v36 = vpack.c.bf16 %v512_v35, %v512_v35 }
  0xe0   : > { %514 = vst [vmem:[%s1071_s8] sm:$0xf] %v513_v36 }
  0xe1 PF: > { %s17_s22 = sadd.s32 1, %s930_s22   ;;  %s1132_s25 = sld [smem:[#allocation6_spill]] }
  0xe2   : > { %p14_p4 = scmp.ge.s32.totalorder %s17_s22, 20   ;;  %s1133_s15 = smov %s906_s16 }
  0xe3   : > { %s1134_s16 = smov %s910_s17  ;;  %s1135_s17 = smov %s1028_s9 }
  0xe4   : > { %s1136_s18 = smov %s922_s20  ;;  %s1137_s19 = smov %s926_s21 }
  0xe5   : > { %s1138_s20 = smov %s1141_s24  ;;  %16 = sbr.rel (!%p14_p4) target bundleno = 5 (0x5), region = 93 }
  0xe7   : > { %s1139_s21 = smov %s1132_s25 }
  0xea   :  { %542 = vsyncpa [#allocation4], 1 }
  0xeb   :  { %544 = vsyncpa [#allocation4 + $0x1], 1 }

// kernel: _lambda_.32
= control target key start
LH: loop header
LB: loop body
LE: loop exit
PB: predicated region body
PF: predicated region fallthrough
CT: control target
= control target key end

     0   :  { %s1038_s15 = smov 0   ;;  %s1040_s16 = smov 0   ;;  %s1244_s0 = inlined_call_operand.vmem [shape: bf16[9,8,256], index: 0, kind: input, shape index: {}]   ;;  %s1245_s1 = inlined_call_operand.vmem [shape: bf16[9,256,256], index: 1, kind: input, shape index: {}]   ;;  %s1246_s2 = inlined_call_operand.vmem [shape: f32[1,256], index: 2, kind: input, shape index: {}]   ;;  %s1247_s3 = inlined_call_operand.vmem [shape: bf16[8,256], index: 3, kind: input, shape index: {}]   ;;  %s1248_s4 = inlined_call_operand.vmem [shape: bf16[8,256], index: 4, kind: output, shape index: {}]  }
   0x1   :  { %s1042_s17 = smov 0   ;;  %s1044_s18 = smov 0  }
   0x2   :  { %s1046_s19 = smov 0   ;;  %s1048_s20 = smov 0  }
   0x3   :  { %s1050_s21 = smov 0  }
   0x4 LB: > { %s26_s22 = sadd.s32 1, %s1002_s19  ;;  %s29_s23 = sadd.s32 1, %s1006_s20  ;;  %s1010_s21 = sphi %s1050_s21, %s14_s21   ;;  %s1006_s20 = sphi %s1048_s20, %s1254_s20   ;;  %s1002_s19 = sphi %s1046_s19, %s1253_s19   ;;  %s998_s18 = sphi %s1044_s18, %s1252_s18   ;;  %s994_s17 = sphi %s1042_s17, %s1251_s17   ;;  %s990_s16 = sphi %s1040_s16, %s1250_s16   ;;  %s986_s15 = sphi %s1038_s15, %s1249_s15  }
   0x5   : > { %p27_p0 = scmp.ge.s32.totalorder %s26_s22, 9  ;;  %p77_p1 = scmp.ne.s32.totalorder %s990_s16, %s986_s15 }
   0x6   : > { %p78_p2 = scmp.eq.s32.totalorder %s1010_s21, 0  ;;  %s70_s27 = sadd.s32 1, %s990_s16 }
   0x7   : > { %s1256_s22 = smov (%p27_p0, %s26_s22), 0  ;;  %s1258_s23 = smov (!%p27_p0, %s29_s23), %s1006_s20 }
   0x8   : > { %p79_p3 = por %p78_p2, %p77_p1  ;;  %p31_p4 = scmp.ge.s32.totalorder %s1258_s23, 2 }
   0x9   : > { %s65_s24 = ssub.s32 %s1002_s19, %s1256_s22  ;;  %p803_p6 = scmp.ge.s32.totalorder %s1010_s21, 18 }
   0xa   : > { %s1260_s23 = smov (%p31_p4, %s1258_s23), 0 }
   0xb   : > { %s66_s25 = ssub.s32 %s1006_s20, %s1260_s23  ;;  %185 = sbr.rel (%p803_p6) target bundleno = 54 (0x36), region = 16 }
   0xc   : > { %s67_s26 = sor.u32 %s66_s25, %s65_s24 }
   0xd   : > { %p68_p5 = scmp.eq.s32.totalorder %s67_s26, 0 }
   0xf   : > { %s1089_s28 = scalar_select %p68_p5, %s990_s16, %s70_s27  }
  0x10   : > { %200 = sbr.rel (!%p79_p3) target bundleno = 54 (0x36), region = 24  ;;  %s202_s29 = sand.u32 (%p79_p3), 1, %s990_s16  }
  0x11   : > { %s805_s30 = sshll.u32 (%p79_p3), %s1002_s19, 6  ;;  %s804_s5 = sshll.u32 (%p79_p3), %s202_s29, 7 }
  0x12   : > { %s206_s6 = sadd.s32 (%p79_p3), %s1006_s20, %s805_s30  ;;  %s1103_s11 = scalar_lea.vmem (%p79_p3), [#allocation3], %s804_s5 }
  0x13   : > { %s806_s7 = sshll.u32 (%p79_p3), %s206_s6, 2 }
  0x14   : > { %s1098_s10 = scalar_lea.vmem (%p79_p3), %s1245_s1, %s806_s7 }
  0x15   : > { %v225_v0 = vld [vmem:[%s1098_s10] sm:$0xf]  ;;  %v227_v1 = vld [vmem:[%s1098_s10 + $0x8] sm:$0xf]  ;;  %v229_v2 = vld [vmem:[%s1098_s10 + $0x10] sm:$0xf] }
  0x16   : > { %226 = vst [vmem:[%s1103_s11] sm:$0xf] %v225_v0  ;;  %v231_v3 = vld [vmem:[%s1098_s10 + $0x18] sm:$0xf]  ;;  %v233_v4 = vld [vmem:[%s1098_s10 + $0x20] sm:$0xf] }
  0x17   : > { %228 = vst [vmem:[%s1103_s11 + $0x4] sm:$0xf] %v227_v1  ;;  %v235_v5 = vld [vmem:[%s1098_s10 + $0x28] sm:$0xf]  ;;  %v237_v6 = vld [vmem:[%s1098_s10 + $0x30] sm:$0xf] }
  0x18   : > { %230 = vst [vmem:[%s1103_s11 + $0x8] sm:$0xf] %v229_v2  ;;  %v239_v7 = vld [vmem:[%s1098_s10 + $0x38] sm:$0xf]  ;;  %v241_v8 = vld [vmem:[%s1098_s10 + $0x40] sm:$0xf] }
  0x19   : > { %232 = vst [vmem:[%s1103_s11 + $0xc] sm:$0xf] %v231_v3  ;;  %v243_v9 = vld [vmem:[%s1098_s10 + $0x48] sm:$0xf]  ;;  %v245_v10 = vld [vmem:[%s1098_s10 + $0x50] sm:$0xf] }
  0x1a   : > { %234 = vst [vmem:[%s1103_s11 + $0x10] sm:$0xf] %v233_v4  ;;  %v247_v11 = vld [vmem:[%s1098_s10 + $0x58] sm:$0xf]  ;;  %v249_v12 = vld [vmem:[%s1098_s10 + $0x60] sm:$0xf] }
  0x1b   : > { %236 = vst [vmem:[%s1103_s11 + $0x14] sm:$0xf] %v235_v5  ;;  %v251_v13 = vld [vmem:[%s1098_s10 + $0x68] sm:$0xf]  ;;  %v253_v14 = vld [vmem:[%s1098_s10 + $0x70] sm:$0xf] }
  0x1c   : > { %238 = vst [vmem:[%s1103_s11 + $0x18] sm:$0xf] %v237_v6  ;;  %v255_v15 = vld [vmem:[%s1098_s10 + $0x78] sm:$0xf]  ;;  %v257_v16 = vld [vmem:[%s1098_s10 + $0x80] sm:$0xf] }
  0x1d   : > { %240 = vst [vmem:[%s1103_s11 + $0x1c] sm:$0xf] %v239_v7  ;;  %v259_v17 = vld [vmem:[%s1098_s10 + $0x88] sm:$0xf]  ;;  %v261_v18 = vld [vmem:[%s1098_s10 + $0x90] sm:$0xf] }
  0x1e   : > { %242 = vst [vmem:[%s1103_s11 + $0x20] sm:$0xf] %v241_v8  ;;  %v263_v19 = vld [vmem:[%s1098_s10 + $0x98] sm:$0xf]  ;;  %v265_v20 = vld [vmem:[%s1098_s10 + $0xa0] sm:$0xf] }
  0x1f   : > { %244 = vst [vmem:[%s1103_s11 + $0x24] sm:$0xf] %v243_v9  ;;  %v267_v21 = vld [vmem:[%s1098_s10 + $0xa8] sm:$0xf]  ;;  %v269_v22 = vld [vmem:[%s1098_s10 + $0xb0] sm:$0xf] }
  0x20   : > { %246 = vst [vmem:[%s1103_s11 + $0x28] sm:$0xf] %v245_v10  ;;  %v271_v23 = vld [vmem:[%s1098_s10 + $0xb8] sm:$0xf]  ;;  %v273_v24 = vld [vmem:[%s1098_s10 + $0xc0] sm:$0xf] }
  0x21   : > { %248 = vst [vmem:[%s1103_s11 + $0x2c] sm:$0xf] %v247_v11  ;;  %v275_v25 = vld [vmem:[%s1098_s10 + $0xc8] sm:$0xf]  ;;  %v277_v26 = vld [vmem:[%s1098_s10 + $0xd0] sm:$0xf] }
  0x22   : > { %250 = vst [vmem:[%s1103_s11 + $0x30] sm:$0xf] %v249_v12  ;;  %v279_v27 = vld [vmem:[%s1098_s10 + $0xd8] sm:$0xf]  ;;  %v281_v28 = vld [vmem:[%s1098_s10 + $0xe0] sm:$0xf] }
  0x23   : > { %252 = vst [vmem:[%s1103_s11 + $0x34] sm:$0xf] %v251_v13  ;;  %v283_v29 = vld [vmem:[%s1098_s10 + $0xe8] sm:$0xf]  ;;  %v285_v30 = vld [vmem:[%s1098_s10 + $0xf0] sm:$0xf] }
  0x24   : > { %254 = vst [vmem:[%s1103_s11 + $0x38] sm:$0xf] %v253_v14  ;;  %v287_v31 = vld [vmem:[%s1098_s10 + $0xf8] sm:$0xf] }
  0x25   : > { %256 = vst [vmem:[%s1103_s11 + $0x3c] sm:$0xf] %v255_v15 }
  0x26   : > { %258 = vst [vmem:[%s1103_s11 + $0x40] sm:$0xf] %v257_v16 }
  0x27   : > { %260 = vst [vmem:[%s1103_s11 + $0x44] sm:$0xf] %v259_v17 }
  0x28   : > { %262 = vst [vmem:[%s1103_s11 + $0x48] sm:$0xf] %v261_v18 }
  0x29   : > { %264 = vst [vmem:[%s1103_s11 + $0x4c] sm:$0xf] %v263_v19 }
  0x2a   : > { %266 = vst [vmem:[%s1103_s11 + $0x50] sm:$0xf] %v265_v20 }
  0x2b   : > { %268 = vst [vmem:[%s1103_s11 + $0x54] sm:$0xf] %v267_v21 }
  0x2c   : > { %270 = vst [vmem:[%s1103_s11 + $0x58] sm:$0xf] %v269_v22 }
  0x2d   : > { %272 = vst [vmem:[%s1103_s11 + $0x5c] sm:$0xf] %v271_v23 }
  0x2e   : > { %274 = vst [vmem:[%s1103_s11 + $0x60] sm:$0xf] %v273_v24 }
  0x2f   : > { %276 = vst [vmem:[%s1103_s11 + $0x64] sm:$0xf] %v275_v25 }
  0x30   : > { %278 = vst [vmem:[%s1103_s11 + $0x68] sm:$0xf] %v277_v26 }
  0x31   : > { %280 = vst [vmem:[%s1103_s11 + $0x6c] sm:$0xf] %v279_v27 }
  0x32   : > { %282 = vst [vmem:[%s1103_s11 + $0x70] sm:$0xf] %v281_v28 }
  0x33   : > { %284 = vst [vmem:[%s1103_s11 + $0x74] sm:$0xf] %v283_v29 }
  0x34   : > { %286 = vst [vmem:[%s1103_s11 + $0x78] sm:$0xf] %v285_v30 }
  0x35   : > { %288 = vst [vmem:[%s1103_s11 + $0x7c] sm:$0xf] %v287_v31 }
  0x36 PF: > { %p807_p7 = scmp.ge.s32.totalorder %s1010_s21, 1  ;;  %p392_p8 = scmp.lt.s32.totalorder %s1010_s21, 19 }
  0x38   : > { %p393_p9 = pnand %p807_p7, %p392_p8 }
  0x39   : > { %s399_s12 = sand.u32 (!%p393_p9), 1, %s986_s15   ;;  %p447_p10 = scmp.lt.s32.totalorder (!%p393_p9), %s994_s17, 8 }
  0x3a   : > { %396 = sbr.rel (%p393_p9) target bundleno = 251 (0xfb), region = 73  ;;  %s808_s13 = sshll.u32 (!%p393_p9), %s399_s12, 7 }
  0x3b   : > { %p456_p11 = scmp.lt.s32.totalorder (!%p393_p9), %s998_s18, 1  ;;  %s1195_s12 = scalar_lea.vmem (!%p393_p9), [#allocation3], %s808_s13 }
  0x3c   : > { %p813_p12 = scmp.ne.s32.totalorder (!%p393_p9), %s994_s17, 0 }
  0x3f   : > { %s448_s14 = scalar_select %p447_p10, %s994_s17, 8 }
  0x40   : > { %s1262_s18 = smov (!%p456_p11, %s998_s18), 1  ;;  %478 = sbr.rel (%p813_p12) target bundleno = 71 (0x47), region = 81 }
  0x41   : > { %s881_s24 = sshll.u32 %s448_s14, 3  ;;  %s458_s5 = scalar_lea.vmem %s1246_s2, %s1262_s18 }
  0x42   : > { %s1178_s27 = scalar_lea.vmem %s1244_s0, %s881_s24  ;;  %s811_s6 = sshll.u32 %s1262_s18, 2 }
  0x43   : > { %s1188_s8 = scalar_lea.vmem %s1247_s3, %s811_s6  ;;  %s1193_s11 = scalar_lea.vmem %s1248_s4, %s811_s6 }
  0x45   : > { %v1012_v32 = vmov 0.0  }
  0x46   : > { %479 = vst [vmem:[#allocation2] sm:$0xff] %v1012_v32 }
  0x47 PF: > { %v889_v33 = vld [vmem:[%s1195_s12 + $0x38] sm:$0xff]  ;;  %v888_v35 = vld [vmem:[%s1195_s12 + $0x30] sm:$0xff]  ;;  %v887_v37 = vld [vmem:[%s1195_s12 + $0x28] sm:$0xff]  ;;  %p878_p13 = scmp.ne.s32.totalorder %s994_s17, 8 }
  0x48   : > { %v897_v34 = vld [vmem:[%s1195_s12 + $0x78] sm:$0xff]  ;;  %617 = vmatpush.bf16.msra.mxu0 %v889_v33  ;;  %v896_v36 = vld [vmem:[%s1195_s12 + $0x70] sm:$0xff]  ;;  %v895_v38 = vld [vmem:[%s1195_s12 + $0x68] sm:$0xff] }
  0x49   : > { %630 = vmatpush.bf16.msra.mxu1 %v897_v34  ;;  %v886_v39 = vld [vmem:[%s1195_s12 + $0x20] sm:$0xff]  ;;  %v885_v41 = vld [vmem:[%s1195_s12 + $0x18] sm:$0xff]  ;;  %v884_v43 = vld [vmem:[%s1195_s12 + $0x10] sm:$0xff] }
  0x4a   : > { %v894_v40 = vld [vmem:[%s1195_s12 + $0x60] sm:$0xff]  ;;  %v893_v42 = vld [vmem:[%s1195_s12 + $0x58] sm:$0xff]  ;;  %v892_v44 = vld [vmem:[%s1195_s12 + $0x50] sm:$0xff] }
  0x4b   : > { %v883_v45 = vld [vmem:[%s1195_s12 + $0x8] sm:$0xff]  ;;  %v481_v47 = vld [vmem:[%s1178_s27] sm:$0xff]  ;;  %v882_v50 = vld [vmem:[%s1195_s12] sm:$0xff] }
  0x4c   : > { %618 = vmatpush.bf16.msra.mxu0 %v888_v35  ;;  %v891_v46 = vld [vmem:[%s1195_s12 + $0x48] sm:$0xff]  ;;  %v515_v48 = vunpack.c.l.b16 %v481_v47  ;;  %v516_v49 = vunpack.c.h.b16 %v481_v47  ;;  %v890_v51 = vld [vmem:[%s1195_s12 + $0x40] sm:$0xff] }
  0x4d   : > { %631 = vmatpush.bf16.msra.mxu1 %v896_v36  ;;  %v480_v55 = vld [vmem:[#allocation2] sm:$0xff] }
  0x4e   : > { %v517_v52 = vpack.c.b16 %v515_v48, %v515_v48  ;;  %v518_v53 = vpack.c.b16 %v516_v49, %v516_v49 }
  0x50   : > { %619 = vmatpush.bf16.msra.mxu0 %v887_v37 }
  0x51   : > { %632 = vmatpush.bf16.msra.mxu1 %v895_v38 }
  0x54   : > { %620 = vmatpush.bf16.msra.mxu0 %v886_v39 }
  0x55   : > { %633 = vmatpush.bf16.msra.mxu1 %v894_v40 }
  0x58   : > { %621 = vmatpush.bf16.msra.mxu0 %v885_v41 }
  0x59   : > { %634 = vmatpush.bf16.msra.mxu1 %v893_v42 }
  0x5c   : > { %622 = vmatpush.bf16.msra.mxu0 %v884_v43 }
  0x5d   : > { %635 = vmatpush.bf16.msra.mxu1 %v892_v44 }
  0x60   : > { %623 = vmatpush.bf16.msra.mxu0 %v883_v45 }
  0x61   : > { %636 = vmatpush.bf16.msra.mxu1 %v891_v46 }
  0x64   : > { %624 = vmatpush.bf16.msra.mxu0 %v882_v50 }
  0x65   : > { %637 = vmatpush.bf16.msra.mxu1 %v890_v51 }
  0x67   : > { %625 = vmatmul.bf16.vlgmr.msra.gmra.mxu0 %v517_v52 }
  0x68   : > { %638 = vmatmul.bf16.vlgmr.msra.gmra.mxu1 %v518_v53 }
  0xe4   : > { %v626_v54 = vpop.f32.mrf.mxu0 }
  0xe5   : > { %v639_v56 = vpop.f32.mrf.mxu1 }
  0xe6   : > { %v640_v57 = vadd.f32 %v639_v56, %v626_v54 }
  0xe8   : > { %v643_v58 = vadd.f32 %v640_v57, %v480_v55 }
  0xe9   : > { %648 = sbr.rel (%p878_p13) target bundleno = 251 (0xfb), region = 85 }
  0xea   : > { %644 = vst [vmem:[#allocation2] sm:$0xff] %v643_v58 }
  0xec   : > { %v628_v59 = vpop.f32.mrf.mxu0 }
  0xed   : > { %v641_v60 = vpop.f32.mrf.mxu1 }
  0xee   : > { %v955_v62 = vld [vmem:[%s458_s5] ss:$0 sm:$0xff] }
  0xef   : > { %v655_v63 = vld [vmem:[%s1188_s8] sm:$0xf] }
  0xf0   : > { %v656_v1 = vunpack.c.l.bf16 %v655_v63 }
  0xf1   : > { %v649_v61 = vld [vmem:[#allocation2] sm:$0xff] }
  0xf2   : > { %v654_v0 = vadd.f32 %v955_v62, %v649_v61 }
  0xf4   : > { %v657_v2 = vadd.f32 %v656_v1, %v654_v0 }
  0xf6   : > { %v658_v3 = vmax.f32 %v657_v2, 0.0 }
  0xf8   : > { %v659_v4 = vpack.c.bf16 %v658_v3, %v658_v3 }
  0xfa   : > { %660 = vst [vmem:[%s1193_s11] sm:$0xf] %v659_v4 }
  0xfb PF: > { %s14_s21 = sadd.s32 1, %s1010_s21   ;;  %s1249_s15 = smov %s990_s16 }
  0xfc   : > { %p11_p0 = scmp.ge.s32.totalorder %s14_s21, 20   ;;  %s1250_s16 = smov %s1089_s28 }
  0xfd   : > { %s1251_s17 = smov %s1002_s19  ;;  %s1252_s18 = smov %s1006_s20 }
  0xfe   : > { %s1253_s19 = smov %s1256_s22  ;;  %s1254_s20 = smov %s1260_s23 }
  0xff   :  { %13 = sbr.rel (!%p11_p0) target bundleno = 4 (0x4), region = 129 }

// kernel: _lambda_.36
= control target key start
LH: loop header
LB: loop body
LE: loop exit
PB: predicated region body
PF: predicated region fallthrough
CT: control target
= control target key end

     0   :  { %s2466_s0 = inlined_call_operand.vmem [shape: bf16[9,2,1,1,512], index: 0, kind: input, shape index: {}, may-alias: {0,5}]   ;;  %s2467_s1 = inlined_call_operand.vmem [shape: bf16[9,2,256], index: 1, kind: input, shape index: {}]   ;;  %s2468_s2 = inlined_call_operand.vmem [shape: bf16[9,256,512], index: 2, kind: input, shape index: {}]   ;;  %s2469_s3 = inlined_call_operand.vmem [shape: bf16[256,512], index: 3, kind: input, shape index: {}]   ;;  %s2470_s4 = inlined_call_operand.vmem [shape: f32[1,512], index: 4, kind: input, shape index: {}]   ;;  %s2471_s5 = inlined_call_operand.vmem [shape: bf16[9,2,1,1,512], index: 5, kind: output, shape index: {0}, may-alias: {0,5}]   ;;  %s2472_s6 = inlined_call_operand.vmem [shape: bf16[2,512], index: 6, kind: output, shape index: {1}]  }
   0x1   :  { %2474 = sst [smem:[#allocation7_spill]] %s2468_s2 }
   0x2   :  { %2475 = sst [smem:[#allocation8_spill]] %s2469_s3 }
   0x3   :  { %s2018_s21 = smov 0   ;;  %s2020_s0 = smov 0  }
   0x4   :  { %s2022_s22 = smov 0   ;;  %s2024_s23 = smov 0  }
   0x5   :  { %s2026_s24 = smov 0   ;;  %s2028_s25 = smov 0  }
   0x6   :  { %s2030_s26 = smov 0   ;;  %s2032_s27 = smov 0  }
   0x7   :  { %s2034_s28 = smov 0  }
   0x8 LB: > { %s30_s29 = sadd.s32 1, %s1972_s26  ;;  %s33_s30 = sadd.s32 1, %s1976_s27  ;;  %s1980_s28 = sphi %s2034_s28, %s18_s28   ;;  %s1976_s27 = sphi %s2032_s27, %s2490_s27   ;;  %s1972_s26 = sphi %s2030_s26, %s2489_s26   ;;  %s1968_s25 = sphi %s2028_s25, %s2488_s25   ;;  %s1964_s24 = sphi %s2026_s24, %s2487_s24   ;;  %s1960_s23 = sphi %s2024_s23, %s2486_s23   ;;  %s1956_s22 = sphi %s2022_s22, %s2485_s22   ;;  %s1952_s0 = sphi %s2020_s0, %s2484_s0   ;;  %s1948_s21 = sphi %s2018_s21, %s2483_s21  }
   0x9   : > { %p31_p0 = scmp.ge.s32.totalorder %s30_s29, 9  ;;  %s1489_s7 = sadd.s32 4294967295, %s1980_s28  }
   0xa   : > { %p81_p1 = scmp.ne.s32.totalorder %s1960_s23, %s1956_s22  ;;  %s74_s8 = sadd.s32 1, %s1960_s23 }
   0xb   : > { %s2492_s29 = smov (%p31_p0, %s30_s29), 0  ;;  %s2494_s30 = smov (!%p31_p0, %s33_s30), %s1976_s27 }
   0xc   : > { %p82_p2 = scmp.eq.s32.totalorder %s1980_s28, 0  ;;  %p35_p3 = scmp.ge.s32.totalorder %s2494_s30, 2 }
   0xd   : > { %s69_s9 = ssub.s32 %s1972_s26, %s2492_s29  ;;  %p107_p5 = scmp.ne.s32.totalorder %s1952_s0, %s1948_s21 }
   0xe   : > { %p2075_p4 = por %p82_p2, %p81_p1  ;;  %s2496_s30 = smov (%p35_p3, %s2494_s30), 0 }
   0xf   : > { %2477 = sst [smem:[#allocation6_spill]] %s2496_s30  ;;  %p2083_p6 = por %p107_p5, %p82_p2 }
  0x10   : > { %p191_p7 = scmp.eq.s32.totalorder %s1489_s7, 17  ;;  %s70_s12 = ssub.s32 %s1976_s27, %s2496_s30 }
  0x11   : > { %s100_s13 = sadd.s32 1, %s1952_s0  ;;  %s71_s14 = sor.u32 %s70_s12, %s69_s9 }
  0x12   : > { %p98_p8 = scmp.eq.s32.totalorder %s70_s12, 0  ;;  %p72_p9 = scmp.eq.s32.totalorder %s71_s14, 0 }
  0x13   : > { %p2090_p10 = por %p191_p7, %p107_p5  ;;  %p1492_p11 = scmp.ge.s32.totalorder %s1980_s28, 18 }
  0x14   : > { %s2095_s16 = scalar_select %p98_p8, %s1952_s0, %s100_s13  }
  0x15   : > { %s2098_s17 = scalar_select %p72_p9, %s1960_s23, %s74_s8  }
  0x16   : > { %241 = sbr.rel (%p1492_p11) target bundleno = 111 (0x6f), region = 16 }
  0x1b   : > { %255 = sbr.rel (!%p2075_p4) target bundleno = 69 (0x45), region = 24  ;;  %s257_s18 = sand.u32 (%p2075_p4), 1, %s1960_s23  }
  0x1c   : > { %s1494_s19 = sshll.u32 (%p2075_p4), %s1976_s27, 1  ;;  %s1493_s20 = sshll.u32 (%p2075_p4), %s257_s18, 8 }
  0x1d   : > { %s1495_s7 = sshll.u32 (%p2075_p4), %s1972_s26, 7  ;;  %s2480_s2 = sld [smem:[#allocation7_spill]] (%p2075_p4) }
  0x1e   : > { %s262_s9 = sadd.s32 (%p2075_p4), %s1495_s7, %s1494_s19  ;;  %s2114_s10 = scalar_lea.vmem (%p2075_p4), [#allocation3], %s1493_s20 }
  0x1f   : > { %s1496_s12 = sshll.u32 (%p2075_p4), %s262_s9, 2 }
  0x23   : > { %s2109_s8 = scalar_lea.vmem %s2480_s2, %s1496_s12 }
  0x24   : > { %v355_v0 = vld [vmem:[%s2109_s8] sm:$0xff]  ;;  %v357_v1 = vld [vmem:[%s2109_s8 + $0x10] sm:$0xff] }
  0x25   : > { %v359_v2 = vld [vmem:[%s2109_s8 + $0x20] sm:$0xff]  ;;  %356 = vst [vmem:[%s2114_s10] sm:$0xff] %v355_v0  ;;  %v361_v3 = vld [vmem:[%s2109_s8 + $0x30] sm:$0xff] }
  0x26   : > { %358 = vst [vmem:[%s2114_s10 + $0x8] sm:$0xff] %v357_v1  ;;  %v363_v4 = vld [vmem:[%s2109_s8 + $0x40] sm:$0xff]  ;;  %v365_v5 = vld [vmem:[%s2109_s8 + $0x50] sm:$0xff] }
  0x27   : > { %360 = vst [vmem:[%s2114_s10 + $0x10] sm:$0xff] %v359_v2  ;;  %v367_v6 = vld [vmem:[%s2109_s8 + $0x60] sm:$0xff]  ;;  %v369_v7 = vld [vmem:[%s2109_s8 + $0x70] sm:$0xff] }
  0x28   : > { %362 = vst [vmem:[%s2114_s10 + $0x18] sm:$0xff] %v361_v3  ;;  %v371_v8 = vld [vmem:[%s2109_s8 + $0x80] sm:$0xff]  ;;  %v373_v9 = vld [vmem:[%s2109_s8 + $0x90] sm:$0xff] }
  0x29   : > { %364 = vst [vmem:[%s2114_s10 + $0x20] sm:$0xff] %v363_v4  ;;  %v375_v10 = vld [vmem:[%s2109_s8 + $0xa0] sm:$0xff]  ;;  %v377_v11 = vld [vmem:[%s2109_s8 + $0xb0] sm:$0xff] }
  0x2a   : > { %366 = vst [vmem:[%s2114_s10 + $0x28] sm:$0xff] %v365_v5  ;;  %v379_v12 = vld [vmem:[%s2109_s8 + $0xc0] sm:$0xff]  ;;  %v381_v13 = vld [vmem:[%s2109_s8 + $0xd0] sm:$0xff] }
  0x2b   : > { %368 = vst [vmem:[%s2114_s10 + $0x30] sm:$0xff] %v367_v6  ;;  %v383_v14 = vld [vmem:[%s2109_s8 + $0xe0] sm:$0xff]  ;;  %v385_v15 = vld [vmem:[%s2109_s8 + $0xf0] sm:$0xff] }
  0x2c   : > { %370 = vst [vmem:[%s2114_s10 + $0x38] sm:$0xff] %v369_v7  ;;  %v387_v16 = vld [vmem:[%s2109_s8 + $0x100] sm:$0xff]  ;;  %v389_v17 = vld [vmem:[%s2109_s8 + $0x110] sm:$0xff] }
  0x2d   : > { %372 = vst [vmem:[%s2114_s10 + $0x40] sm:$0xff] %v371_v8  ;;  %v391_v18 = vld [vmem:[%s2109_s8 + $0x120] sm:$0xff]  ;;  %v393_v19 = vld [vmem:[%s2109_s8 + $0x130] sm:$0xff] }
  0x2e   : > { %374 = vst [vmem:[%s2114_s10 + $0x48] sm:$0xff] %v373_v9  ;;  %v395_v20 = vld [vmem:[%s2109_s8 + $0x140] sm:$0xff]  ;;  %v397_v21 = vld [vmem:[%s2109_s8 + $0x150] sm:$0xff] }
  0x2f   : > { %376 = vst [vmem:[%s2114_s10 + $0x50] sm:$0xff] %v375_v10  ;;  %v399_v22 = vld [vmem:[%s2109_s8 + $0x160] sm:$0xff]  ;;  %v401_v23 = vld [vmem:[%s2109_s8 + $0x170] sm:$0xff] }
  0x30   : > { %378 = vst [vmem:[%s2114_s10 + $0x58] sm:$0xff] %v377_v11  ;;  %v403_v24 = vld [vmem:[%s2109_s8 + $0x180] sm:$0xff]  ;;  %v405_v25 = vld [vmem:[%s2109_s8 + $0x190] sm:$0xff] }
  0x31   : > { %380 = vst [vmem:[%s2114_s10 + $0x60] sm:$0xff] %v379_v12  ;;  %v407_v26 = vld [vmem:[%s2109_s8 + $0x1a0] sm:$0xff]  ;;  %v409_v27 = vld [vmem:[%s2109_s8 + $0x1b0] sm:$0xff] }
  0x32   : > { %382 = vst [vmem:[%s2114_s10 + $0x68] sm:$0xff] %v381_v13  ;;  %v411_v28 = vld [vmem:[%s2109_s8 + $0x1c0] sm:$0xff]  ;;  %v413_v29 = vld [vmem:[%s2109_s8 + $0x1d0] sm:$0xff] }
  0x33   : > { %384 = vst [vmem:[%s2114_s10 + $0x70] sm:$0xff] %v383_v14  ;;  %v415_v30 = vld [vmem:[%s2109_s8 + $0x1e0] sm:$0xff]  ;;  %v417_v31 = vld [vmem:[%s2109_s8 + $0x1f0] sm:$0xff] }
  0x34   : > { %386 = vst [vmem:[%s2114_s10 + $0x78] sm:$0xff] %v385_v15 }
  0x35   : > { %388 = vst [vmem:[%s2114_s10 + $0x80] sm:$0xff] %v387_v16 }
  0x36   : > { %390 = vst [vmem:[%s2114_s10 + $0x88] sm:$0xff] %v389_v17 }
  0x37   : > { %392 = vst [vmem:[%s2114_s10 + $0x90] sm:$0xff] %v391_v18 }
  0x38   : > { %394 = vst [vmem:[%s2114_s10 + $0x98] sm:$0xff] %v393_v19 }
  0x39   : > { %396 = vst [vmem:[%s2114_s10 + $0xa0] sm:$0xff] %v395_v20 }
  0x3a   : > { %398 = vst [vmem:[%s2114_s10 + $0xa8] sm:$0xff] %v397_v21 }
  0x3b   : > { %400 = vst [vmem:[%s2114_s10 + $0xb0] sm:$0xff] %v399_v22 }
  0x3c   : > { %402 = vst [vmem:[%s2114_s10 + $0xb8] sm:$0xff] %v401_v23 }
  0x3d   : > { %404 = vst [vmem:[%s2114_s10 + $0xc0] sm:$0xff] %v403_v24 }
  0x3e   : > { %406 = vst [vmem:[%s2114_s10 + $0xc8] sm:$0xff] %v405_v25 }
  0x3f   : > { %408 = vst [vmem:[%s2114_s10 + $0xd0] sm:$0xff] %v407_v26 }
  0x40   : > { %410 = vst [vmem:[%s2114_s10 + $0xd8] sm:$0xff] %v409_v27 }
  0x41   : > { %412 = vst [vmem:[%s2114_s10 + $0xe0] sm:$0xff] %v411_v28 }
  0x42   : > { %414 = vst [vmem:[%s2114_s10 + $0xe8] sm:$0xff] %v413_v29 }
  0x43   : > { %416 = vst [vmem:[%s2114_s10 + $0xf0] sm:$0xff] %v415_v30 }
  0x44   : > { %418 = vst [vmem:[%s2114_s10 + $0xf8] sm:$0xff] %v417_v31 }
  0x45 PF: > { %424 = sbr.rel (!%p2083_p6) target bundleno = 111 (0x6f), region = 62  ;;  %s426_s18 = sand.u32 (%p2083_p6), 1, %s1952_s0  }
  0x46   : > { %s1772_s19 = sshll.u32 (%p2083_p6), %s1976_s27, 3  ;;  %s1497_s20 = sshll.u32 (%p2083_p6), %s426_s18, 8 }
  0x47   : > { %s2481_s3 = sld [smem:[#allocation8_spill]] (%p2083_p6)  ;;  %s2189_s11 = scalar_lea.vmem (%p2083_p6), [#allocation4], %s1497_s20 }
  0x4d   : > { %s2184_s12 = scalar_lea.vmem %s2481_s3, %s1772_s19 }
  0x4e   : > { %v522_v32 = vld [vmem:[%s2184_s12] sm:$0xff]  ;;  %v524_v33 = vld [vmem:[%s2184_s12 + $0x10] sm:$0xff] }
  0x4f   : > { %v526_v34 = vld [vmem:[%s2184_s12 + $0x20] sm:$0xff]  ;;  %523 = vst [vmem:[%s2189_s11] sm:$0xff] %v522_v32  ;;  %v528_v35 = vld [vmem:[%s2184_s12 + $0x30] sm:$0xff] }
  0x50   : > { %525 = vst [vmem:[%s2189_s11 + $0x8] sm:$0xff] %v524_v33  ;;  %v530_v36 = vld [vmem:[%s2184_s12 + $0x40] sm:$0xff]  ;;  %v532_v37 = vld [vmem:[%s2184_s12 + $0x50] sm:$0xff] }
  0x51   : > { %527 = vst [vmem:[%s2189_s11 + $0x10] sm:$0xff] %v526_v34  ;;  %v534_v38 = vld [vmem:[%s2184_s12 + $0x60] sm:$0xff]  ;;  %v536_v39 = vld [vmem:[%s2184_s12 + $0x70] sm:$0xff] }
  0x52   : > { %529 = vst [vmem:[%s2189_s11 + $0x18] sm:$0xff] %v528_v35  ;;  %v538_v40 = vld [vmem:[%s2184_s12 + $0x80] sm:$0xff]  ;;  %v540_v41 = vld [vmem:[%s2184_s12 + $0x90] sm:$0xff] }
  0x53   : > { %531 = vst [vmem:[%s2189_s11 + $0x20] sm:$0xff] %v530_v36  ;;  %v542_v42 = vld [vmem:[%s2184_s12 + $0xa0] sm:$0xff]  ;;  %v544_v43 = vld [vmem:[%s2184_s12 + $0xb0] sm:$0xff] }
  0x54   : > { %533 = vst [vmem:[%s2189_s11 + $0x28] sm:$0xff] %v532_v37  ;;  %v546_v44 = vld [vmem:[%s2184_s12 + $0xc0] sm:$0xff]  ;;  %v548_v45 = vld [vmem:[%s2184_s12 + $0xd0] sm:$0xff] }
  0x55   : > { %535 = vst [vmem:[%s2189_s11 + $0x30] sm:$0xff] %v534_v38  ;;  %v550_v46 = vld [vmem:[%s2184_s12 + $0xe0] sm:$0xff]  ;;  %v552_v47 = vld [vmem:[%s2184_s12 + $0xf0] sm:$0xff] }
  0x56   : > { %537 = vst [vmem:[%s2189_s11 + $0x38] sm:$0xff] %v536_v39  ;;  %v554_v48 = vld [vmem:[%s2184_s12 + $0x100] sm:$0xff]  ;;  %v556_v49 = vld [vmem:[%s2184_s12 + $0x110] sm:$0xff] }
  0x57   : > { %539 = vst [vmem:[%s2189_s11 + $0x40] sm:$0xff] %v538_v40  ;;  %v558_v50 = vld [vmem:[%s2184_s12 + $0x120] sm:$0xff]  ;;  %v560_v51 = vld [vmem:[%s2184_s12 + $0x130] sm:$0xff] }
  0x58   : > { %541 = vst [vmem:[%s2189_s11 + $0x48] sm:$0xff] %v540_v41  ;;  %v562_v52 = vld [vmem:[%s2184_s12 + $0x140] sm:$0xff]  ;;  %v564_v53 = vld [vmem:[%s2184_s12 + $0x150] sm:$0xff] }
  0x59   : > { %543 = vst [vmem:[%s2189_s11 + $0x50] sm:$0xff] %v542_v42  ;;  %v566_v54 = vld [vmem:[%s2184_s12 + $0x160] sm:$0xff]  ;;  %v568_v55 = vld [vmem:[%s2184_s12 + $0x170] sm:$0xff] }
  0x5a   : > { %545 = vst [vmem:[%s2189_s11 + $0x58] sm:$0xff] %v544_v43  ;;  %v570_v56 = vld [vmem:[%s2184_s12 + $0x180] sm:$0xff]  ;;  %v572_v57 = vld [vmem:[%s2184_s12 + $0x190] sm:$0xff] }
  0x5b   : > { %547 = vst [vmem:[%s2189_s11 + $0x60] sm:$0xff] %v546_v44  ;;  %v574_v58 = vld [vmem:[%s2184_s12 + $0x1a0] sm:$0xff]  ;;  %v576_v59 = vld [vmem:[%s2184_s12 + $0x1b0] sm:$0xff] }
  0x5c   : > { %549 = vst [vmem:[%s2189_s11 + $0x68] sm:$0xff] %v548_v45  ;;  %v578_v60 = vld [vmem:[%s2184_s12 + $0x1c0] sm:$0xff]  ;;  %v580_v61 = vld [vmem:[%s2184_s12 + $0x1d0] sm:$0xff] }
  0x5d   : > { %551 = vst [vmem:[%s2189_s11 + $0x70] sm:$0xff] %v550_v46  ;;  %v582_v62 = vld [vmem:[%s2184_s12 + $0x1e0] sm:$0xff]  ;;  %v584_v63 = vld [vmem:[%s2184_s12 + $0x1f0] sm:$0xff] }
  0x5e   : > { %553 = vst [vmem:[%s2189_s11 + $0x78] sm:$0xff] %v552_v47 }
  0x5f   : > { %555 = vst [vmem:[%s2189_s11 + $0x80] sm:$0xff] %v554_v48 }
  0x60   : > { %557 = vst [vmem:[%s2189_s11 + $0x88] sm:$0xff] %v556_v49 }
  0x61   : > { %559 = vst [vmem:[%s2189_s11 + $0x90] sm:$0xff] %v558_v50 }
  0x62   : > { %561 = vst [vmem:[%s2189_s11 + $0x98] sm:$0xff] %v560_v51 }
  0x63   : > { %563 = vst [vmem:[%s2189_s11 + $0xa0] sm:$0xff] %v562_v52 }
  0x64   : > { %565 = vst [vmem:[%s2189_s11 + $0xa8] sm:$0xff] %v564_v53 }
  0x65   : > { %567 = vst [vmem:[%s2189_s11 + $0xb0] sm:$0xff] %v566_v54 }
  0x66   : > { %569 = vst [vmem:[%s2189_s11 + $0xb8] sm:$0xff] %v568_v55 }
  0x67   : > { %571 = vst [vmem:[%s2189_s11 + $0xc0] sm:$0xff] %v570_v56 }
  0x68   : > { %573 = vst [vmem:[%s2189_s11 + $0xc8] sm:$0xff] %v572_v57 }
  0x69   : > { %575 = vst [vmem:[%s2189_s11 + $0xd0] sm:$0xff] %v574_v58 }
  0x6a   : > { %577 = vst [vmem:[%s2189_s11 + $0xd8] sm:$0xff] %v576_v59 }
  0x6b   : > { %579 = vst [vmem:[%s2189_s11 + $0xe0] sm:$0xff] %v578_v60 }
  0x6c   : > { %581 = vst [vmem:[%s2189_s11 + $0xe8] sm:$0xff] %v580_v61 }
  0x6d   : > { %583 = vst [vmem:[%s2189_s11 + $0xf0] sm:$0xff] %v582_v62 }
  0x6e   : > { %585 = vst [vmem:[%s2189_s11 + $0xf8] sm:$0xff] %v584_v63 }
  0x6f PF: > { %p1500_p12 = scmp.ge.s32.totalorder %s1980_s28, 1  ;;  %p606_p13 = scmp.lt.s32.totalorder %s1980_s28, 19 }
  0x71   : > { %p607_p0 = pnand %p1500_p12, %p606_p13 }
  0x72   : > { %s613_s14 = sand.u32 (!%p607_p0), 1, %s1956_s22   ;;  %s620_s13 = sand.u32 (!%p607_p0), 1, %s1948_s21  }
  0x73   : > { %610 = sbr.rel (%p607_p0) target bundleno = 523 (0x20b), region = 108  ;;  %s1501_s8 = sshll.u32 (!%p607_p0), %s613_s14, 8 }
  0x74   : > { %s1502_s10 = sshll.u32 (!%p607_p0), %s620_s13, 8  ;;  %s2256_s18 = sshll.u32 (!%p607_p0), %s620_s13, 1 }
  0x75   : > { %p676_p1 = scmp.lt.s32.totalorder (!%p607_p0), %s1964_s24, 8  ;;  %s2260_s19 = sshll.u32 (!%p607_p0), %s1968_s25, 1 }
  0x76   : > { %p687_p2 = scmp.lt.s32.totalorder (!%p607_p0), %s2260_s19, 3  ;;  %s2282_s30 = scalar_lea.vmem (!%p607_p0), [#allocation3], %s1501_s8 }
  0x77   : > { %s665_s9 = scalar_lea.vmem (!%p607_p0), [#allocation5], %s2256_s18  ;;  %p1508_p3 = scmp.ne.s32.totalorder (!%p607_p0), %s1964_s24, 0 }
  0x78   : > { %s677_s20 = scalar_select %p676_p1, %s1964_s24, 8 }
  0x79   : > { %s2270_s22 = scalar_select %p687_p2, %s2260_s19, 3 }
  0x7a   : > { %s1504_s7 = sshll.u32 %s677_s20, 1  ;;  %s2284_s20 = scalar_lea.vmem [#allocation4], %s1502_s10 }
  0x7b   : > { %s2267_s11 = scalar_lea.vmem %s2467_s1, %s1504_s7  ;;  %s2276_s13 = scalar_lea.vmem %s2470_s4, %s2270_s22 }
  0x7c   : > { %s704_s3 = scalar_lea.vmem %s2472_s6, %s2270_s22  ;;  %709 = sbr.rel (%p1508_p3) target bundleno = 131 (0x83), region = 120 }
  0x81   : > { %v1982_v0 = vmov 0.0  }
  0x82   : > { %710 = vst [vmem:[#allocation2] sm:$0xf] %v1982_v0 }
  0x83 PF: > { %v1567_v1 = vld [vmem:[%s2282_s30 + $0x70] sm:$0xf]  ;;  %v1788_v2 = vld [vmem:[%s2282_s30 + $0x74] sm:$0xf0]  ;;  %v1787_v6 = vld [vmem:[%s2282_s30 + $0x74] sm:$0xf] }
  0x84   : > { %v1631_v3 = vld [vmem:[%s2282_s30 + $0xf0] sm:$0xf]  ;;  %v1568_v4 = vor.u32 %v1788_v2, %v1567_v1  ;;  %v1804_v5 = vld [vmem:[%s2282_s30 + $0xf4] sm:$0xf0]  ;;  %v1569_v7 = vld [vmem:[%s2282_s30 + $0x78] sm:$0xf0] }
  0x85   : > { %v1632_v8 = vor.u32 %v1804_v5, %v1631_v3  ;;  %v1572_v9 = vor.u32 %v1787_v6, %v1569_v7  ;;  %v1803_v10 = vld [vmem:[%s2282_s30 + $0xf4] sm:$0xf]  ;;  %v1633_v11 = vld [vmem:[%s2282_s30 + $0xf8] sm:$0xf0]  ;;  %v1559_v12 = vld [vmem:[%s2282_s30 + $0x60] sm:$0xf] }
  0x86   : > { %911 = vmatpush.bf16.msra.mxu0 %v1568_v4  ;;  %v1636_v13 = vor.u32 %v1803_v10, %v1633_v11  ;;  %v1786_v14 = vld [vmem:[%s2282_s30 + $0x64] sm:$0xf0]  ;;  %v1623_v15 = vld [vmem:[%s2282_s30 + $0xe0] sm:$0xf]  ;;  %v1785_v19 = vld [vmem:[%s2282_s30 + $0x64] sm:$0xf] }
  0x87   : > { %v1802_v16 = vld [vmem:[%s2282_s30 + $0xe4] sm:$0xf0]  ;;  %924 = vmatpush.bf16.msra.mxu1 %v1632_v8  ;;  %937 = vmatpush.bf16.msra.mxu2 %v1572_v9  ;;  %v1560_v17 = vor.u32 %v1786_v14, %v1559_v12  ;;  %v1561_v20 = vld [vmem:[%s2282_s30 + $0x68] sm:$0xf0]  ;;  %v1801_v21 = vld [vmem:[%s2282_s30 + $0xe4] sm:$0xf] }
  0x88   : > { %v1624_v18 = vor.u32 %v1802_v16, %v1623_v15  ;;  %950 = vmatpush.bf16.msra.mxu3 %v1636_v13  ;;  %v1564_v22 = vor.u32 %v1785_v19, %v1561_v20  ;;  %v1625_v23 = vld [vmem:[%s2282_s30 + $0xe8] sm:$0xf0]  ;;  %v1551_v24 = vld [vmem:[%s2282_s30 + $0x50] sm:$0xf]  ;;  %v1784_v25 = vld [vmem:[%s2282_s30 + $0x54] sm:$0xf0] }
  0x89   : > { %v1628_v26 = vor.u32 %v1801_v21, %v1625_v23  ;;  %v1615_v27 = vld [vmem:[%s2282_s30 + $0xd0] sm:$0xf]  ;;  %v1800_v28 = vld [vmem:[%s2282_s30 + $0xd4] sm:$0xf0]  ;;  %v1783_v29 = vld [vmem:[%s2282_s30 + $0x54] sm:$0xf]  ;;  %v1552_v30 = vor.u32 %v1784_v25, %v1551_v24 }
  0x8a   : > { %912 = vmatpush.bf16.msra.mxu0 %v1560_v17  ;;  %v1553_v31 = vld [vmem:[%s2282_s30 + $0x58] sm:$0xf0]  ;;  %v1799_v32 = vld [vmem:[%s2282_s30 + $0xd4] sm:$0xf]  ;;  %v1616_v34 = vor.u32 %v1800_v28, %v1615_v27  ;;  %v1543_v36 = vld [vmem:[%s2282_s30 + $0x40] sm:$0xf] }
  0x8b   : > { %v1617_v33 = vld [vmem:[%s2282_s30 + $0xd8] sm:$0xf0]  ;;  %925 = vmatpush.bf16.msra.mxu1 %v1624_v18  ;;  %938 = vmatpush.bf16.msra.mxu2 %v1564_v22  ;;  %v1556_v35 = vor.u32 %v1783_v29, %v1553_v31  ;;  %v1782_v37 = vld [vmem:[%s2282_s30 + $0x44] sm:$0xf0]  ;;  %v1607_v38 = vld [vmem:[%s2282_s30 + $0xc0] sm:$0xf] }
  0x8c   : > { %951 = vmatpush.bf16.msra.mxu3 %v1628_v26  ;;  %v1620_v39 = vor.u32 %v1799_v32, %v1617_v33  ;;  %v1798_v40 = vld [vmem:[%s2282_s30 + $0xc4] sm:$0xf0]  ;;  %v1781_v41 = vld [vmem:[%s2282_s30 + $0x44] sm:$0xf]  ;;  %v1545_v42 = vld [vmem:[%s2282_s30 + $0x48] sm:$0xf0]  ;;  %v1544_v45 = vor.u32 %v1782_v37, %v1543_v36 }
  0x8d   : > { %v1797_v43 = vld [vmem:[%s2282_s30 + $0xc4] sm:$0xf]  ;;  %v1609_v44 = vld [vmem:[%s2282_s30 + $0xc8] sm:$0xf0]  ;;  %v1608_v46 = vor.u32 %v1798_v40, %v1607_v38  ;;  %v1548_v47 = vor.u32 %v1781_v41, %v1545_v42  ;;  %v1535_v48 = vld [vmem:[%s2282_s30 + $0x30] sm:$0xf] }
  0x8e   : > { %913 = vmatpush.bf16.msra.mxu0 %v1552_v30  ;;  %v1780_v49 = vld [vmem:[%s2282_s30 + $0x34] sm:$0xf0]  ;;  %v1599_v50 = vld [vmem:[%s2282_s30 + $0xb0] sm:$0xf]  ;;  %v1612_v51 = vor.u32 %v1797_v43, %v1609_v44  ;;  %v1779_v53 = vld [vmem:[%s2282_s30 + $0x34] sm:$0xf] }
  0x8f   : > { %926 = vmatpush.bf16.msra.mxu1 %v1616_v34  ;;  %939 = vmatpush.bf16.msra.mxu2 %v1556_v35  ;;  %v1796_v52 = vld [vmem:[%s2282_s30 + $0xb4] sm:$0xf0]  ;;  %v1537_v54 = vld [vmem:[%s2282_s30 + $0x38] sm:$0xf0]  ;;  %v1795_v55 = vld [vmem:[%s2282_s30 + $0xb4] sm:$0xf]  ;;  %v1536_v57 = vor.u32 %v1780_v49, %v1535_v48 }
  0x90   : > { %952 = vmatpush.bf16.msra.mxu3 %v1620_v39  ;;  %v1601_v56 = vld [vmem:[%s2282_s30 + $0xb8] sm:$0xf0]  ;;  %v1600_v58 = vor.u32 %v1796_v52, %v1599_v50  ;;  %v1540_v59 = vor.u32 %v1779_v53, %v1537_v54  ;;  %v1527_v60 = vld [vmem:[%s2282_s30 + $0x20] sm:$0xf]  ;;  %v1778_v61 = vld [vmem:[%s2282_s30 + $0x24] sm:$0xf0] }
  0x91   : > { %v1591_v62 = vld [vmem:[%s2282_s30 + $0xa0] sm:$0xf]  ;;  %v1604_v63 = vor.u32 %v1795_v55, %v1601_v56  ;;  %v1794_v0 = vld [vmem:[%s2282_s30 + $0xa4] sm:$0xf0]  ;;  %v1777_v1 = vld [vmem:[%s2282_s30 + $0x24] sm:$0xf]  ;;  %v1528_v5 = vor.u32 %v1778_v61, %v1527_v60 }
  0x92   : > { %914 = vmatpush.bf16.msra.mxu0 %v1544_v45  ;;  %v1529_v2 = vld [vmem:[%s2282_s30 + $0x28] sm:$0xf0]  ;;  %v1793_v3 = vld [vmem:[%s2282_s30 + $0xa4] sm:$0xf]  ;;  %v1519_v6 = vld [vmem:[%s2282_s30 + $0x10] sm:$0xf]  ;;  %v1592_v7 = vor.u32 %v1794_v0, %v1591_v62 }
  0x93   : > { %927 = vmatpush.bf16.msra.mxu1 %v1608_v46  ;;  %940 = vmatpush.bf16.msra.mxu2 %v1548_v47  ;;  %v1593_v4 = vld [vmem:[%s2282_s30 + $0xa8] sm:$0xf0]  ;;  %v1532_v8 = vor.u32 %v1777_v1, %v1529_v2  ;;  %v1776_v9 = vld [vmem:[%s2282_s30 + $0x14] sm:$0xf0]  ;;  %v1583_v10 = vld [vmem:[%s2282_s30 + $0x90] sm:$0xf] }
  0x94   : > { %953 = vmatpush.bf16.msra.mxu3 %v1612_v51  ;;  %v1792_v11 = vld [vmem:[%s2282_s30 + $0x94] sm:$0xf0]  ;;  %v1596_v12 = vor.u32 %v1793_v3, %v1593_v4  ;;  %v1775_v13 = vld [vmem:[%s2282_s30 + $0x14] sm:$0xf]  ;;  %v1521_v14 = vld [vmem:[%s2282_s30 + $0x18] sm:$0xf0]  ;;  %v1520_v18 = vor.u32 %v1776_v9, %v1519_v6 }
  0x95   : > { %v712_v15 = vld [vmem:[%s2267_s11] sm:$0x3]  ;;  %v1585_v17 = vld [vmem:[%s2282_s30 + $0x98] sm:$0xf0]  ;;  %v1584_v19 = vor.u32 %v1792_v11, %v1583_v10  ;;  %v1524_v20 = vor.u32 %v1775_v13, %v1521_v14  ;;  %v1511_v21 = vld [vmem:[%s2282_s30] sm:$0xf] }
  0x96   : > { %915 = vmatpush.bf16.msra.mxu0 %v1536_v57  ;;  %v1791_v16 = vld [vmem:[%s2282_s30 + $0x94] sm:$0xf]  ;;  %746 = vst [vmem:[#allocation1] ss:$9 sm:$0xff] %v712_v15  ;;  %v1774_v22 = vld [vmem:[%s2282_s30 + $0x4] sm:$0xf0] }
  0x97   : > { %928 = vmatpush.bf16.msra.mxu1 %v1600_v58  ;;  %941 = vmatpush.bf16.msra.mxu2 %v1540_v59  ;;  %v1575_v23 = vld [vmem:[%s2282_s30 + $0x80] sm:$0xf]  ;;  %v1588_v24 = vor.u32 %v1791_v16, %v1585_v17  ;;  %v1790_v25 = vld [vmem:[%s2282_s30 + $0x84] sm:$0xf0]  ;;  %v1773_v26 = vld [vmem:[%s2282_s30 + $0x4] sm:$0xf]  ;;  %v1512_v30 = vor.u32 %v1774_v22, %v1511_v21 }
  0x98   : > { %954 = vmatpush.bf16.msra.mxu3 %v1604_v63  ;;  %v1513_v27 = vld [vmem:[%s2282_s30 + $0x8] sm:$0xf0]  ;;  %v1789_v28 = vld [vmem:[%s2282_s30 + $0x84] sm:$0xf]  ;;  %v1576_v31 = vor.u32 %v1790_v25, %v1575_v23  ;;  %vm966_vm0 = vcmask 1041408   ;;  %p1637_p4 = scmp.ne.s32.totalorder %s1964_s24, 4 }
  0x99   : > { %v1577_v29 = vld [vmem:[%s2282_s30 + $0x88] sm:$0xf0]  ;;  %v1516_v32 = vor.u32 %v1773_v26, %v1513_v27  ;;  %v711_v44 = vld [vmem:[#allocation2] sm:$0xf] }
  0x9a   : > { %916 = vmatpush.bf16.msra.mxu0 %v1528_v5  ;;  %v1580_v33 = vor.u32 %v1789_v28, %v1577_v29 }
  0x9b   : > { %929 = vmatpush.bf16.msra.mxu1 %v1592_v7  ;;  %942 = vmatpush.bf16.msra.mxu2 %v1532_v8 }
  0x9c   : > { %955 = vmatpush.bf16.msra.mxu3 %v1596_v12 }
  0x9d   : > { %v747_v34 = vld [vmem:[#allocation1] sm:$0xff]  ;;  %v748_v35 = vld [vmem:[#allocation1 + $0x9] sm:$0xff] }
  0x9e   : > { %917 = vmatpush.bf16.msra.mxu0 %v1520_v18 }
  0x9f   : > { %930 = vmatpush.bf16.msra.mxu1 %v1584_v19  ;;  %943 = vmatpush.bf16.msra.mxu2 %v1524_v20 }
  0xa0   : > { %956 = vmatpush.bf16.msra.mxu3 %v1588_v24 }
  0xa2   : > { %918 = vmatpush.bf16.msra.mxu0 %v1512_v30 }
  0xa3   : > { %931 = vmatpush.bf16.msra.mxu1 %v1576_v31  ;;  %944 = vmatpush.bf16.msra.mxu2 %v1516_v32 }
  0xa4   : > { %957 = vmatpush.bf16.msra.mxu3 %v1580_v33 }
  0xa5   : > { %919 = vmatmul.bf16.vlgmr.msra.gmra.mxu0 %v747_v34 }
  0xa6   : > { %932 = vmatmul.bf16.vlgmr.msra.gmra.mxu1 %v748_v35  ;;  %945 = vmatmul.bf16.vlgmr.msra.gmra.mxu2 %v747_v34 }
  0xa7   : > { %958 = vmatmul.bf16.vlgmr.msra.gmra.mxu3 %v748_v35 }
 0x122   : > { %v920_v36 = vpop.f32.mrf.mxu0 }
 0x123   : > { %v933_v37 = vpop.f32.mrf.mxu1 }
 0x124   : > { %v934_v43 = vadd.f32 %v933_v37, %v920_v36 }
 0x129   : > { %v946_v38 = vpop.f32.mrf.mxu2 }
 0x12a   : > { %v959_v39 = vpop.f32.mrf.mxu3  ;;  %v922_v40 = vpop.f32.mrf.mxu0 }
 0x12b   : > { %v960_v41 = vadd.f32 %v959_v39, %v946_v38  ;;  %v935_v42 = vpop.f32.mrf.mxu1 }
 0x12d   : > { %v965_v45 = vrot.slane %v960_v41, 6 }
 0x12e   : > { %974 = sbr.rel (%p1637_p4) target bundleno = 484 (0x1e4), region = 124 }
 0x12f   : > { %v967_v46 = vsel %vm966_vm0, %v934_v43, %v965_v45 }
 0x130   : > { %v969_v47 = vadd.f32 %v967_v46, %v711_v44 }
 0x131   : > { %v948_v48 = vpop.f32.mrf.mxu2 }
 0x132   : > { %970 = vst [vmem:[#allocation2] sm:$0xf] %v969_v47  ;;  %v961_v49 = vpop.f32.mrf.mxu3 }
 0x133   : > { %v1696_v50 = vld [vmem:[%s2284_s20 + $0x70] sm:$0xf]  ;;  %v1820_v51 = vld [vmem:[%s2284_s20 + $0x74] sm:$0xf0]  ;;  %v1819_v55 = vld [vmem:[%s2284_s20 + $0x74] sm:$0xf] }
 0x134   : > { %v1760_v52 = vld [vmem:[%s2284_s20 + $0xf0] sm:$0xf]  ;;  %v1697_v53 = vor.u32 %v1820_v51, %v1696_v50  ;;  %v1836_v54 = vld [vmem:[%s2284_s20 + $0xf4] sm:$0xf0]  ;;  %v1698_v56 = vld [vmem:[%s2284_s20 + $0x78] sm:$0xf0] }
 0x135   : > { %v1761_v57 = vor.u32 %v1836_v54, %v1760_v52  ;;  %v1701_v58 = vor.u32 %v1819_v55, %v1698_v56  ;;  %v1835_v59 = vld [vmem:[%s2284_s20 + $0xf4] sm:$0xf]  ;;  %v1762_v60 = vld [vmem:[%s2284_s20 + $0xf8] sm:$0xf0]  ;;  %v1688_v61 = vld [vmem:[%s2284_s20 + $0x60] sm:$0xf] }
 0x136   : > { %1180 = vmatpush.bf16.msra.mxu0 %v1697_v53  ;;  %v1765_v62 = vor.u32 %v1835_v59, %v1762_v60  ;;  %v1818_v63 = vld [vmem:[%s2284_s20 + $0x64] sm:$0xf0]  ;;  %v1752_v0 = vld [vmem:[%s2284_s20 + $0xe0] sm:$0xf]  ;;  %v1817_v4 = vld [vmem:[%s2284_s20 + $0x64] sm:$0xf] }
 0x137   : > { %v1834_v1 = vld [vmem:[%s2284_s20 + $0xe4] sm:$0xf0]  ;;  %1193 = vmatpush.bf16.msra.mxu1 %v1761_v57  ;;  %1206 = vmatpush.bf16.msra.mxu2 %v1701_v58  ;;  %v1689_v2 = vor.u32 %v1818_v63, %v1688_v61  ;;  %v1690_v5 = vld [vmem:[%s2284_s20 + $0x68] sm:$0xf0]  ;;  %v1833_v6 = vld [vmem:[%s2284_s20 + $0xe4] sm:$0xf] }
 0x138   : > { %v1753_v3 = vor.u32 %v1834_v1, %v1752_v0  ;;  %1219 = vmatpush.bf16.msra.mxu3 %v1765_v62  ;;  %v1693_v7 = vor.u32 %v1817_v4, %v1690_v5  ;;  %v1754_v8 = vld [vmem:[%s2284_s20 + $0xe8] sm:$0xf0]  ;;  %v1680_v9 = vld [vmem:[%s2284_s20 + $0x50] sm:$0xf]  ;;  %v1816_v10 = vld [vmem:[%s2284_s20 + $0x54] sm:$0xf0] }
 0x139   : > { %v1757_v11 = vor.u32 %v1833_v6, %v1754_v8  ;;  %v1744_v12 = vld [vmem:[%s2284_s20 + $0xd0] sm:$0xf]  ;;  %v1832_v13 = vld [vmem:[%s2284_s20 + $0xd4] sm:$0xf0]  ;;  %v1815_v14 = vld [vmem:[%s2284_s20 + $0x54] sm:$0xf]  ;;  %v1681_v15 = vor.u32 %v1816_v10, %v1680_v9 }
 0x13a   : > { %1181 = vmatpush.bf16.msra.mxu0 %v1689_v2  ;;  %v1682_v16 = vld [vmem:[%s2284_s20 + $0x58] sm:$0xf0]  ;;  %v1831_v17 = vld [vmem:[%s2284_s20 + $0xd4] sm:$0xf]  ;;  %v1745_v19 = vor.u32 %v1832_v13, %v1744_v12  ;;  %v1672_v21 = vld [vmem:[%s2284_s20 + $0x40] sm:$0xf] }
 0x13b   : > { %v1746_v18 = vld [vmem:[%s2284_s20 + $0xd8] sm:$0xf0]  ;;  %1194 = vmatpush.bf16.msra.mxu1 %v1753_v3  ;;  %1207 = vmatpush.bf16.msra.mxu2 %v1693_v7  ;;  %v1685_v20 = vor.u32 %v1815_v14, %v1682_v16  ;;  %v1814_v22 = vld [vmem:[%s2284_s20 + $0x44] sm:$0xf0]  ;;  %v1736_v23 = vld [vmem:[%s2284_s20 + $0xc0] sm:$0xf] }
 0x13c   : > { %1220 = vmatpush.bf16.msra.mxu3 %v1757_v11  ;;  %v1749_v24 = vor.u32 %v1831_v17, %v1746_v18  ;;  %v1830_v25 = vld [vmem:[%s2284_s20 + $0xc4] sm:$0xf0]  ;;  %v1813_v26 = vld [vmem:[%s2284_s20 + $0x44] sm:$0xf]  ;;  %v1674_v27 = vld [vmem:[%s2284_s20 + $0x48] sm:$0xf0]  ;;  %v1673_v30 = vor.u32 %v1814_v22, %v1672_v21 }
 0x13d   : > { %v1829_v28 = vld [vmem:[%s2284_s20 + $0xc4] sm:$0xf]  ;;  %v1738_v29 = vld [vmem:[%s2284_s20 + $0xc8] sm:$0xf0]  ;;  %v1737_v31 = vor.u32 %v1830_v25, %v1736_v23  ;;  %v1677_v32 = vor.u32 %v1813_v26, %v1674_v27  ;;  %v1664_v33 = vld [vmem:[%s2284_s20 + $0x30] sm:$0xf] }
 0x13e   : > { %1182 = vmatpush.bf16.msra.mxu0 %v1681_v15  ;;  %v1812_v34 = vld [vmem:[%s2284_s20 + $0x34] sm:$0xf0]  ;;  %v1728_v35 = vld [vmem:[%s2284_s20 + $0xb0] sm:$0xf]  ;;  %v1741_v36 = vor.u32 %v1829_v28, %v1738_v29  ;;  %v1811_v38 = vld [vmem:[%s2284_s20 + $0x34] sm:$0xf] }
 0x13f   : > { %1195 = vmatpush.bf16.msra.mxu1 %v1745_v19  ;;  %1208 = vmatpush.bf16.msra.mxu2 %v1685_v20  ;;  %v1828_v37 = vld [vmem:[%s2284_s20 + $0xb4] sm:$0xf0]  ;;  %v1666_v39 = vld [vmem:[%s2284_s20 + $0x38] sm:$0xf0]  ;;  %v1827_v40 = vld [vmem:[%s2284_s20 + $0xb4] sm:$0xf]  ;;  %v1665_v42 = vor.u32 %v1812_v34, %v1664_v33 }
 0x140   : > { %1221 = vmatpush.bf16.msra.mxu3 %v1749_v24  ;;  %v1730_v41 = vld [vmem:[%s2284_s20 + $0xb8] sm:$0xf0]  ;;  %v1729_v43 = vor.u32 %v1828_v37, %v1728_v35  ;;  %v1669_v44 = vor.u32 %v1811_v38, %v1666_v39  ;;  %v1656_v45 = vld [vmem:[%s2284_s20 + $0x20] sm:$0xf]  ;;  %v1810_v46 = vld [vmem:[%s2284_s20 + $0x24] sm:$0xf0] }
 0x141   : > { %v1720_v47 = vld [vmem:[%s2284_s20 + $0xa0] sm:$0xf]  ;;  %v1733_v48 = vor.u32 %v1827_v40, %v1730_v41  ;;  %v1826_v49 = vld [vmem:[%s2284_s20 + $0xa4] sm:$0xf0]  ;;  %v1809_v50 = vld [vmem:[%s2284_s20 + $0x24] sm:$0xf]  ;;  %v1657_v54 = vor.u32 %v1810_v46, %v1656_v45 }
 0x142   : > { %1183 = vmatpush.bf16.msra.mxu0 %v1673_v30  ;;  %v1658_v51 = vld [vmem:[%s2284_s20 + $0x28] sm:$0xf0]  ;;  %v1825_v52 = vld [vmem:[%s2284_s20 + $0xa4] sm:$0xf]  ;;  %v1648_v55 = vld [vmem:[%s2284_s20 + $0x10] sm:$0xf]  ;;  %v1721_v56 = vor.u32 %v1826_v49, %v1720_v47 }
 0x143   : > { %1196 = vmatpush.bf16.msra.mxu1 %v1737_v31  ;;  %1209 = vmatpush.bf16.msra.mxu2 %v1677_v32  ;;  %v1722_v53 = vld [vmem:[%s2284_s20 + $0xa8] sm:$0xf0]  ;;  %v1661_v57 = vor.u32 %v1809_v50, %v1658_v51  ;;  %v1808_v58 = vld [vmem:[%s2284_s20 + $0x14] sm:$0xf0]  ;;  %v1712_v59 = vld [vmem:[%s2284_s20 + $0x90] sm:$0xf] }
 0x144   : > { %1222 = vmatpush.bf16.msra.mxu3 %v1741_v36  ;;  %v1824_v60 = vld [vmem:[%s2284_s20 + $0x94] sm:$0xf0]  ;;  %v1725_v61 = vor.u32 %v1825_v52, %v1722_v53  ;;  %v1807_v62 = vld [vmem:[%s2284_s20 + $0x14] sm:$0xf]  ;;  %v1650_v63 = vld [vmem:[%s2284_s20 + $0x18] sm:$0xf0]  ;;  %v1649_v3 = vor.u32 %v1808_v58, %v1648_v55 }
 0x145   : > { %v975_v0 = vld [vmem:[%s2267_s11] sm:$0x3]  ;;  %v1714_v2 = vld [vmem:[%s2284_s20 + $0x98] sm:$0xf0]  ;;  %v1713_v4 = vor.u32 %v1824_v60, %v1712_v59  ;;  %v1653_v5 = vor.u32 %v1807_v62, %v1650_v63  ;;  %v1640_v6 = vld [vmem:[%s2284_s20] sm:$0xf] }
 0x146   : > { %1184 = vmatpush.bf16.msra.mxu0 %v1665_v42  ;;  %v1823_v1 = vld [vmem:[%s2284_s20 + $0x94] sm:$0xf]  ;;  %1015 = vst [vmem:[#allocation1] ss:$9 sm:$0xff] %v975_v0  ;;  %v1806_v7 = vld [vmem:[%s2284_s20 + $0x4] sm:$0xf0] }
 0x147   : > { %1197 = vmatpush.bf16.msra.mxu1 %v1729_v43  ;;  %1210 = vmatpush.bf16.msra.mxu2 %v1669_v44  ;;  %v1704_v8 = vld [vmem:[%s2284_s20 + $0x80] sm:$0xf]  ;;  %v1717_v9 = vor.u32 %v1823_v1, %v1714_v2  ;;  %v1822_v10 = vld [vmem:[%s2284_s20 + $0x84] sm:$0xf0]  ;;  %v1805_v11 = vld [vmem:[%s2284_s20 + $0x4] sm:$0xf]  ;;  %v1641_v15 = vor.u32 %v1806_v7, %v1640_v6 }
 0x148   : > { %1223 = vmatpush.bf16.msra.mxu3 %v1733_v48  ;;  %v1642_v12 = vld [vmem:[%s2284_s20 + $0x8] sm:$0xf0]  ;;  %v1821_v13 = vld [vmem:[%s2284_s20 + $0x84] sm:$0xf]  ;;  %v1705_v16 = vor.u32 %v1822_v10, %v1704_v8  ;;  %v1008_v21 = vld [vmem:[%s2276_s13] sm:$0x3] }
 0x149   : > { %v1706_v14 = vld [vmem:[%s2284_s20 + $0x88] sm:$0xf0]  ;;  %v1645_v17 = vor.u32 %v1805_v11, %v1642_v12  ;;  %v1010_v22 = vperm.slane %v1008_v21, 0  ;;  %v1011_v26 = vperm.slane %v1008_v21, 1  ;;  %vm1235_vm1 = vcmask 1040384  }
 0x14a   : > { %1185 = vmatpush.bf16.msra.mxu0 %v1657_v54  ;;  %v1709_v18 = vor.u32 %v1821_v13, %v1706_v14 }
 0x14b   : > { %1198 = vmatpush.bf16.msra.mxu1 %v1721_v56  ;;  %1211 = vmatpush.bf16.msra.mxu2 %v1661_v57 }
 0x14c   : > { %1224 = vmatpush.bf16.msra.mxu3 %v1725_v61 }
 0x14d   : > { %v1016_v19 = vld [vmem:[#allocation1] sm:$0xff]  ;;  %v1017_v20 = vld [vmem:[#allocation1 + $0x9] sm:$0xff] }
 0x14e   : > { %1186 = vmatpush.bf16.msra.mxu0 %v1649_v3 }
 0x14f   : > { %1199 = vmatpush.bf16.msra.mxu1 %v1713_v4  ;;  %1212 = vmatpush.bf16.msra.mxu2 %v1653_v5 }
 0x150   : > { %1225 = vmatpush.bf16.msra.mxu3 %v1717_v9 }
 0x152   : > { %1187 = vmatpush.bf16.msra.mxu0 %v1641_v15 }
 0x153   : > { %1200 = vmatpush.bf16.msra.mxu1 %v1705_v16  ;;  %1213 = vmatpush.bf16.msra.mxu2 %v1645_v17 }
 0x154   : > { %1226 = vmatpush.bf16.msra.mxu3 %v1709_v18 }
 0x155   : > { %1188 = vmatmul.bf16.vlgmr.msra.gmra.mxu0 %v1016_v19 }
 0x156   : > { %1201 = vmatmul.bf16.vlgmr.msra.gmra.mxu1 %v1017_v20  ;;  %1214 = vmatmul.bf16.vlgmr.msra.gmra.mxu2 %v1016_v19 }
 0x157   : > { %1227 = vmatmul.bf16.vlgmr.msra.gmra.mxu3 %v1017_v20 }
 0x1d2   : > { %v1189_v23 = vpop.f32.mrf.mxu0 }
 0x1d3   : > { %v1202_v24 = vpop.f32.mrf.mxu1  ;;  %v1190_v25 = vadd.f32 %v1189_v23, %v1010_v22 }
 0x1d5   : > { %v1203_v28 = vadd.f32 %v1202_v24, %v1190_v25 }
 0x1d9   : > { %v1215_v27 = vpop.f32.mrf.mxu2 }
 0x1da   : > { %v1216_v29 = vadd.f32 %v1215_v27, %v1011_v26  ;;  %v1228_v30 = vpop.f32.mrf.mxu3  ;;  %v1191_v31 = vpop.f32.mrf.mxu0 }
 0x1db   : > { %v1204_v32 = vpop.f32.mrf.mxu1 }
 0x1dc   : > { %v1229_v33 = vadd.f32 %v1228_v30, %v1216_v29 }
 0x1de   : > { %v1232_v34 = vpack.c.bf16 %v1229_v33, %v1203_v28 }
 0x1e0   : > { %v1234_v35 = vrot.slane %v1232_v34, 3 }
 0x1e1   : > { %v1217_v36 = vpop.f32.mrf.mxu2 }
 0x1e2   : > { %v1238_v37 = vsel %vm1235_vm1, %v1232_v34, %v1234_v35  ;;  %v1230_v38 = vpop.f32.mrf.mxu3 }
 0x1e3   : > { %1240 = vst [vmem:[%s704_s3] sm:$0x3] %v1238_v37 }
 0x1e4 PF: > { %p1766_p5 = scmp.ne.s32.totalorder %s1964_s24, 8 }
 0x1e6   : > { %1244 = sbr.rel (%p1766_p5) target bundleno = 515 (0x203), region = 128 }
 0x1eb   : > { %v1246_v39 = vld [vmem:[%s2276_s13] sm:$0x3]  ;;  %v1245_v42 = vld [vmem:[#allocation2] sm:$0xf]  ;;  %vm1264_vm2 = vcmask 1040384  }
 0x1ec   : > { %v1248_v40 = vperm.slane %v1246_v39, 0  ;;  %v1249_v41 = vperm.slane %v1246_v39, 1 }
 0x1ee   : > { %v1250_v43 = vrot.slane %v1249_v41, 6 }
 0x1f0   : > { %v1251_v44 = vsel %vm966_vm0, %v1248_v40, %v1250_v43 }
 0x1f1   : > { %v1253_v45 = vadd.f32 %v1251_v44, %v1245_v42 }
 0x1f3   : > { %v1254_v46 = vmax.f32 %v1253_v45, 0.0 }
 0x1f5   : > { %1256 = vst [vmem:[#allocation1] ss:$4 sm:$0xff] %v1254_v46 }
 0x1fc   : > { %v1257_v47 = vld.sshfl [vmem:[#allocation1] sm:$0xff pattern:$0x73625140]  ;;  %v1258_v48 = vld.sshfl [vmem:[#allocation1 + $0x8] sm:$0xff pattern:$0x73625140] }
 0x1fd   : > { %v1261_v49 = vpack.c.bf16 %v1258_v48, %v1257_v47 }
 0x1ff   : > { %v1263_v50 = vrot.slane %v1261_v49, 3 }
 0x201   : > { %v1267_v51 = vsel %vm1264_vm2, %v1261_v49, %v1263_v50 }
 0x202   : > { %1269 = vst [vmem:[%s665_s9] sm:$0x3] %v1267_v51 }
 0x203 PF: > { %1284 = sbr.rel (!%p2090_p10) target bundleno = 523 (0x20b), region = 132  ;;  %s1402_s8 = scalar_lea.vmem (%p2090_p10), %s2471_s5, %s2260_s19 }
 0x209   : > { %v1305_v52 = vld [vmem:[%s665_s9] sm:$0x3] }
 0x20a   : > { %1769 = vst [vmem:[%s1402_s8 + $0x10] sm:$0x3] %v1305_v52 }
 0x20b PF: > { %s18_s28 = sadd.s32 1, %s1980_s28   ;;  %s2482_s15 = sld [smem:[#allocation6_spill]] }
 0x20c   : > { %p15_p6 = scmp.ge.s32.totalorder %s18_s28, 20   ;;  %s2483_s21 = smov %s1952_s0 }
 0x20d   : > { %s2484_s0 = smov %s2095_s16  ;;  %s2485_s22 = smov %s1960_s23 }
 0x20e   : > { %s2486_s23 = smov %s2098_s17  ;;  %s2487_s24 = smov %s1972_s26 }
 0x20f   : > { %s2488_s25 = smov %s1976_s27  ;;  %s2489_s26 = smov %s2492_s29 }
 0x210   :  { %17 = sbr.rel (!%p15_p6) target bundleno = 8 (0x8), region = 227 }
 0x211   : > { %s2490_s27 = smov %s2482_s15 }

// kernel: _lambda_.33
= control target key start
LH: loop header
LB: loop body
LE: loop exit
PB: predicated region body
PF: predicated region fallthrough
CT: control target
= control target key end

     0   :  { %s1756_s15 = smov 0   ;;  %s1758_s16 = smov 0   ;;  %s2160_s0 = inlined_call_operand.vmem [shape: bf16[9,2,512], index: 0, kind: input, shape index: {}]   ;;  %s2161_s1 = inlined_call_operand.vmem [shape: bf16[9,512,512], index: 1, kind: input, shape index: {}]   ;;  %s2162_s2 = inlined_call_operand.vmem [shape: f32[1,512], index: 2, kind: input, shape index: {}]   ;;  %s2163_s3 = inlined_call_operand.vmem [shape: bf16[2,512], index: 3, kind: input, shape index: {}]   ;;  %s2164_s4 = inlined_call_operand.vmem [shape: bf16[2,512], index: 4, kind: output, shape index: {}]  }
   0x1   :  { %s1760_s17 = smov 0   ;;  %s1762_s18 = smov 0  }
   0x2   :  { %s1764_s19 = smov 0   ;;  %s1766_s20 = smov 0  }
   0x3   :  { %s1768_s21 = smov 0  }
   0x4 LB: > { %s26_s22 = sadd.s32 1, %s1720_s19  ;;  %s29_s23 = sadd.s32 1, %s1724_s20  ;;  %s1728_s21 = sphi %s1768_s21, %s14_s21   ;;  %s1724_s20 = sphi %s1766_s20, %s2170_s20   ;;  %s1720_s19 = sphi %s1764_s19, %s2169_s19   ;;  %s1716_s18 = sphi %s1762_s18, %s2168_s18   ;;  %s1712_s17 = sphi %s1760_s17, %s2167_s17   ;;  %s1708_s16 = sphi %s1758_s16, %s2166_s16   ;;  %s1704_s15 = sphi %s1756_s15, %s2165_s15  }
   0x5   : > { %p27_p0 = scmp.ge.s32.totalorder %s26_s22, 9  ;;  %p77_p1 = scmp.ne.s32.totalorder %s1708_s16, %s1704_s15 }
   0x6   : > { %p78_p2 = scmp.eq.s32.totalorder %s1728_s21, 0  ;;  %s70_s27 = sadd.s32 1, %s1708_s16 }
   0x7   : > { %s2172_s22 = smov (%p27_p0, %s26_s22), 0  ;;  %s2174_s23 = smov (!%p27_p0, %s29_s23), %s1724_s20 }
   0x8   : > { %p79_p3 = por %p78_p2, %p77_p1  ;;  %p31_p4 = scmp.ge.s32.totalorder %s2174_s23, 2 }
   0x9   : > { %s65_s24 = ssub.s32 %s1720_s19, %s2172_s22  ;;  %p1282_p6 = scmp.ge.s32.totalorder %s1728_s21, 18 }
   0xa   : > { %s2176_s23 = smov (%p31_p4, %s2174_s23), 0 }
   0xb   : > { %s66_s25 = ssub.s32 %s1724_s20, %s2176_s23  ;;  %185 = sbr.rel (%p1282_p6) target bundleno = 87 (0x57), region = 16 }
   0xc   : > { %s67_s26 = sor.u32 %s66_s25, %s65_s24 }
   0xd   : > { %p68_p5 = scmp.eq.s32.totalorder %s67_s26, 0 }
   0xf   : > { %s1807_s28 = scalar_select %p68_p5, %s1708_s16, %s70_s27  }
  0x10   : > { %199 = sbr.rel (!%p79_p3) target bundleno = 87 (0x57), region = 24  ;;  %s201_s29 = sand.u32 (%p79_p3), 1, %s1708_s16  }
  0x11   : > { %s1284_s30 = sshll.u32 (%p79_p3), %s1724_s20, 1  ;;  %s1283_s5 = sshll.u32 (%p79_p3), %s201_s29, 9 }
  0x12   : > { %s1285_s6 = sshll.u32 (%p79_p3), %s1720_s19, 8  ;;  %s1821_s12 = scalar_lea.vmem (%p79_p3), [#allocation3], %s1283_s5 }
  0x13   : > { %s206_s7 = sadd.s32 (%p79_p3), %s1285_s6, %s1284_s30 }
  0x14   : > { %s1286_s8 = sshll.u32 (%p79_p3), %s206_s7, 2 }
  0x15   : > { %s1816_s11 = scalar_lea.vmem %s2161_s1, %s1286_s8 }
  0x16   : > { %v363_v0 = vld [vmem:[%s1816_s11] sm:$0xff]  ;;  %v365_v1 = vld [vmem:[%s1816_s11 + $0x10] sm:$0xff] }
  0x17   : > { %v367_v2 = vld [vmem:[%s1816_s11 + $0x20] sm:$0xff]  ;;  %364 = vst [vmem:[%s1821_s12] sm:$0xff] %v363_v0  ;;  %v369_v3 = vld [vmem:[%s1816_s11 + $0x30] sm:$0xff] }
  0x18   : > { %366 = vst [vmem:[%s1821_s12 + $0x8] sm:$0xff] %v365_v1  ;;  %v371_v4 = vld [vmem:[%s1816_s11 + $0x40] sm:$0xff]  ;;  %v373_v5 = vld [vmem:[%s1816_s11 + $0x50] sm:$0xff] }
  0x19   : > { %368 = vst [vmem:[%s1821_s12 + $0x10] sm:$0xff] %v367_v2  ;;  %v375_v6 = vld [vmem:[%s1816_s11 + $0x60] sm:$0xff]  ;;  %v377_v7 = vld [vmem:[%s1816_s11 + $0x70] sm:$0xff] }
  0x1a   : > { %370 = vst [vmem:[%s1821_s12 + $0x18] sm:$0xff] %v369_v3  ;;  %v379_v8 = vld [vmem:[%s1816_s11 + $0x80] sm:$0xff]  ;;  %v381_v9 = vld [vmem:[%s1816_s11 + $0x90] sm:$0xff] }
  0x1b   : > { %372 = vst [vmem:[%s1821_s12 + $0x20] sm:$0xff] %v371_v4  ;;  %v383_v10 = vld [vmem:[%s1816_s11 + $0xa0] sm:$0xff]  ;;  %v385_v11 = vld [vmem:[%s1816_s11 + $0xb0] sm:$0xff] }
  0x1c   : > { %374 = vst [vmem:[%s1821_s12 + $0x28] sm:$0xff] %v373_v5  ;;  %v387_v12 = vld [vmem:[%s1816_s11 + $0xc0] sm:$0xff]  ;;  %v389_v13 = vld [vmem:[%s1816_s11 + $0xd0] sm:$0xff] }
  0x1d   : > { %376 = vst [vmem:[%s1821_s12 + $0x30] sm:$0xff] %v375_v6  ;;  %v391_v14 = vld [vmem:[%s1816_s11 + $0xe0] sm:$0xff]  ;;  %v393_v15 = vld [vmem:[%s1816_s11 + $0xf0] sm:$0xff] }
  0x1e   : > { %378 = vst [vmem:[%s1821_s12 + $0x38] sm:$0xff] %v377_v7  ;;  %v395_v16 = vld [vmem:[%s1816_s11 + $0x100] sm:$0xff]  ;;  %v397_v17 = vld [vmem:[%s1816_s11 + $0x110] sm:$0xff] }
  0x1f   : > { %380 = vst [vmem:[%s1821_s12 + $0x40] sm:$0xff] %v379_v8  ;;  %v399_v18 = vld [vmem:[%s1816_s11 + $0x120] sm:$0xff]  ;;  %v401_v19 = vld [vmem:[%s1816_s11 + $0x130] sm:$0xff] }
  0x20   : > { %382 = vst [vmem:[%s1821_s12 + $0x48] sm:$0xff] %v381_v9  ;;  %v403_v20 = vld [vmem:[%s1816_s11 + $0x140] sm:$0xff]  ;;  %v405_v21 = vld [vmem:[%s1816_s11 + $0x150] sm:$0xff] }
  0x21   : > { %384 = vst [vmem:[%s1821_s12 + $0x50] sm:$0xff] %v383_v10  ;;  %v407_v22 = vld [vmem:[%s1816_s11 + $0x160] sm:$0xff]  ;;  %v409_v23 = vld [vmem:[%s1816_s11 + $0x170] sm:$0xff] }
  0x22   : > { %386 = vst [vmem:[%s1821_s12 + $0x58] sm:$0xff] %v385_v11  ;;  %v411_v24 = vld [vmem:[%s1816_s11 + $0x180] sm:$0xff]  ;;  %v413_v25 = vld [vmem:[%s1816_s11 + $0x190] sm:$0xff] }
  0x23   : > { %388 = vst [vmem:[%s1821_s12 + $0x60] sm:$0xff] %v387_v12  ;;  %v415_v26 = vld [vmem:[%s1816_s11 + $0x1a0] sm:$0xff]  ;;  %v417_v27 = vld [vmem:[%s1816_s11 + $0x1b0] sm:$0xff] }
  0x24   : > { %390 = vst [vmem:[%s1821_s12 + $0x68] sm:$0xff] %v389_v13  ;;  %v419_v28 = vld [vmem:[%s1816_s11 + $0x1c0] sm:$0xff]  ;;  %v421_v29 = vld [vmem:[%s1816_s11 + $0x1d0] sm:$0xff] }
  0x25   : > { %392 = vst [vmem:[%s1821_s12 + $0x70] sm:$0xff] %v391_v14  ;;  %v423_v30 = vld [vmem:[%s1816_s11 + $0x1e0] sm:$0xff]  ;;  %v425_v31 = vld [vmem:[%s1816_s11 + $0x1f0] sm:$0xff] }
  0x26   : > { %394 = vst [vmem:[%s1821_s12 + $0x78] sm:$0xff] %v393_v15  ;;  %v427_v32 = vld [vmem:[%s1816_s11 + $0x200] sm:$0xff]  ;;  %v429_v33 = vld [vmem:[%s1816_s11 + $0x210] sm:$0xff] }
  0x27   : > { %396 = vst [vmem:[%s1821_s12 + $0x80] sm:$0xff] %v395_v16  ;;  %v431_v34 = vld [vmem:[%s1816_s11 + $0x220] sm:$0xff]  ;;  %v433_v35 = vld [vmem:[%s1816_s11 + $0x230] sm:$0xff] }
  0x28   : > { %398 = vst [vmem:[%s1821_s12 + $0x88] sm:$0xff] %v397_v17  ;;  %v435_v36 = vld [vmem:[%s1816_s11 + $0x240] sm:$0xff]  ;;  %v437_v37 = vld [vmem:[%s1816_s11 + $0x250] sm:$0xff] }
  0x29   : > { %400 = vst [vmem:[%s1821_s12 + $0x90] sm:$0xff] %v399_v18  ;;  %v439_v38 = vld [vmem:[%s1816_s11 + $0x260] sm:$0xff]  ;;  %v441_v39 = vld [vmem:[%s1816_s11 + $0x270] sm:$0xff] }
  0x2a   : > { %402 = vst [vmem:[%s1821_s12 + $0x98] sm:$0xff] %v401_v19  ;;  %v443_v40 = vld [vmem:[%s1816_s11 + $0x280] sm:$0xff]  ;;  %v445_v41 = vld [vmem:[%s1816_s11 + $0x290] sm:$0xff] }
  0x2b   : > { %404 = vst [vmem:[%s1821_s12 + $0xa0] sm:$0xff] %v403_v20  ;;  %v447_v42 = vld [vmem:[%s1816_s11 + $0x2a0] sm:$0xff]  ;;  %v449_v43 = vld [vmem:[%s1816_s11 + $0x2b0] sm:$0xff] }
  0x2c   : > { %406 = vst [vmem:[%s1821_s12 + $0xa8] sm:$0xff] %v405_v21  ;;  %v451_v44 = vld [vmem:[%s1816_s11 + $0x2c0] sm:$0xff]  ;;  %v453_v45 = vld [vmem:[%s1816_s11 + $0x2d0] sm:$0xff] }
  0x2d   : > { %408 = vst [vmem:[%s1821_s12 + $0xb0] sm:$0xff] %v407_v22  ;;  %v455_v46 = vld [vmem:[%s1816_s11 + $0x2e0] sm:$0xff]  ;;  %v457_v47 = vld [vmem:[%s1816_s11 + $0x2f0] sm:$0xff] }
  0x2e   : > { %410 = vst [vmem:[%s1821_s12 + $0xb8] sm:$0xff] %v409_v23  ;;  %v459_v48 = vld [vmem:[%s1816_s11 + $0x300] sm:$0xff]  ;;  %v461_v49 = vld [vmem:[%s1816_s11 + $0x310] sm:$0xff] }
  0x2f   : > { %412 = vst [vmem:[%s1821_s12 + $0xc0] sm:$0xff] %v411_v24  ;;  %v463_v50 = vld [vmem:[%s1816_s11 + $0x320] sm:$0xff]  ;;  %v465_v51 = vld [vmem:[%s1816_s11 + $0x330] sm:$0xff] }
  0x30   : > { %414 = vst [vmem:[%s1821_s12 + $0xc8] sm:$0xff] %v413_v25  ;;  %v467_v52 = vld [vmem:[%s1816_s11 + $0x340] sm:$0xff]  ;;  %v469_v53 = vld [vmem:[%s1816_s11 + $0x350] sm:$0xff] }
  0x31   : > { %416 = vst [vmem:[%s1821_s12 + $0xd0] sm:$0xff] %v415_v26  ;;  %v471_v54 = vld [vmem:[%s1816_s11 + $0x360] sm:$0xff]  ;;  %v473_v55 = vld [vmem:[%s1816_s11 + $0x370] sm:$0xff] }
  0x32   : > { %418 = vst [vmem:[%s1821_s12 + $0xd8] sm:$0xff] %v417_v27  ;;  %v475_v56 = vld [vmem:[%s1816_s11 + $0x380] sm:$0xff]  ;;  %v477_v57 = vld [vmem:[%s1816_s11 + $0x390] sm:$0xff] }
  0x33   : > { %420 = vst [vmem:[%s1821_s12 + $0xe0] sm:$0xff] %v419_v28  ;;  %v479_v58 = vld [vmem:[%s1816_s11 + $0x3a0] sm:$0xff]  ;;  %v481_v59 = vld [vmem:[%s1816_s11 + $0x3b0] sm:$0xff] }
  0x34   : > { %422 = vst [vmem:[%s1821_s12 + $0xe8] sm:$0xff] %v421_v29  ;;  %v483_v60 = vld [vmem:[%s1816_s11 + $0x3c0] sm:$0xff]  ;;  %v485_v61 = vld [vmem:[%s1816_s11 + $0x3d0] sm:$0xff] }
  0x35   : > { %424 = vst [vmem:[%s1821_s12 + $0xf0] sm:$0xff] %v423_v30  ;;  %v487_v62 = vld [vmem:[%s1816_s11 + $0x3e0] sm:$0xff]  ;;  %v489_v63 = vld [vmem:[%s1816_s11 + $0x3f0] sm:$0xff] }
  0x36   : > { %426 = vst [vmem:[%s1821_s12 + $0xf8] sm:$0xff] %v425_v31 }
  0x37   : > { %428 = vst [vmem:[%s1821_s12 + $0x100] sm:$0xff] %v427_v32 }
  0x38   : > { %430 = vst [vmem:[%s1821_s12 + $0x108] sm:$0xff] %v429_v33 }
  0x39   : > { %432 = vst [vmem:[%s1821_s12 + $0x110] sm:$0xff] %v431_v34 }
  0x3a   : > { %434 = vst [vmem:[%s1821_s12 + $0x118] sm:$0xff] %v433_v35 }
  0x3b   : > { %436 = vst [vmem:[%s1821_s12 + $0x120] sm:$0xff] %v435_v36 }
  0x3c   : > { %438 = vst [vmem:[%s1821_s12 + $0x128] sm:$0xff] %v437_v37 }
  0x3d   : > { %440 = vst [vmem:[%s1821_s12 + $0x130] sm:$0xff] %v439_v38 }
  0x3e   : > { %442 = vst [vmem:[%s1821_s12 + $0x138] sm:$0xff] %v441_v39 }
  0x3f   : > { %444 = vst [vmem:[%s1821_s12 + $0x140] sm:$0xff] %v443_v40 }
  0x40   : > { %446 = vst [vmem:[%s1821_s12 + $0x148] sm:$0xff] %v445_v41 }
  0x41   : > { %448 = vst [vmem:[%s1821_s12 + $0x150] sm:$0xff] %v447_v42 }
  0x42   : > { %450 = vst [vmem:[%s1821_s12 + $0x158] sm:$0xff] %v449_v43 }
  0x43   : > { %452 = vst [vmem:[%s1821_s12 + $0x160] sm:$0xff] %v451_v44 }
  0x44   : > { %454 = vst [vmem:[%s1821_s12 + $0x168] sm:$0xff] %v453_v45 }
  0x45   : > { %456 = vst [vmem:[%s1821_s12 + $0x170] sm:$0xff] %v455_v46 }
  0x46   : > { %458 = vst [vmem:[%s1821_s12 + $0x178] sm:$0xff] %v457_v47 }
  0x47   : > { %460 = vst [vmem:[%s1821_s12 + $0x180] sm:$0xff] %v459_v48 }
  0x48   : > { %462 = vst [vmem:[%s1821_s12 + $0x188] sm:$0xff] %v461_v49 }
  0x49   : > { %464 = vst [vmem:[%s1821_s12 + $0x190] sm:$0xff] %v463_v50 }
  0x4a   : > { %466 = vst [vmem:[%s1821_s12 + $0x198] sm:$0xff] %v465_v51 }
  0x4b   : > { %468 = vst [vmem:[%s1821_s12 + $0x1a0] sm:$0xff] %v467_v52 }
  0x4c   : > { %470 = vst [vmem:[%s1821_s12 + $0x1a8] sm:$0xff] %v469_v53 }
  0x4d   : > { %472 = vst [vmem:[%s1821_s12 + $0x1b0] sm:$0xff] %v471_v54 }
  0x4e   : > { %474 = vst [vmem:[%s1821_s12 + $0x1b8] sm:$0xff] %v473_v55 }
  0x4f   : > { %476 = vst [vmem:[%s1821_s12 + $0x1c0] sm:$0xff] %v475_v56 }
  0x50   : > { %478 = vst [vmem:[%s1821_s12 + $0x1c8] sm:$0xff] %v477_v57 }
  0x51   : > { %480 = vst [vmem:[%s1821_s12 + $0x1d0] sm:$0xff] %v479_v58 }
  0x52   : > { %482 = vst [vmem:[%s1821_s12 + $0x1d8] sm:$0xff] %v481_v59 }
  0x53   : > { %484 = vst [vmem:[%s1821_s12 + $0x1e0] sm:$0xff] %v483_v60 }
  0x54   : > { %486 = vst [vmem:[%s1821_s12 + $0x1e8] sm:$0xff] %v485_v61 }
  0x55   : > { %488 = vst [vmem:[%s1821_s12 + $0x1f0] sm:$0xff] %v487_v62 }
  0x56   : > { %490 = vst [vmem:[%s1821_s12 + $0x1f8] sm:$0xff] %v489_v63 }
  0x57 PF: > { %p1287_p7 = scmp.ge.s32.totalorder %s1728_s21, 1  ;;  %p515_p8 = scmp.lt.s32.totalorder %s1728_s21, 19 }
  0x59   : > { %p516_p9 = pnand %p1287_p7, %p515_p8 }
  0x5a   : > { %s522_s13 = sand.u32 (!%p516_p9), 1, %s1704_s15   ;;  %p570_p10 = scmp.lt.s32.totalorder (!%p516_p9), %s1712_s17, 8 }
  0x5b   : > { %519 = sbr.rel (%p516_p9) target bundleno = 341 (0x155), region = 70  ;;  %s1288_s14 = sshll.u32 (!%p516_p9), %s522_s13, 9 }
  0x5c   : > { %s1290_s24 = sshll.u32 (!%p516_p9), %s1716_s18, 1  ;;  %s1973_s12 = scalar_lea.vmem (!%p516_p9), [#allocation3], %s1288_s14 }
  0x5d   : > { %p580_p11 = scmp.lt.s32.totalorder (!%p516_p9), %s1290_s24, 3  ;;  %p1293_p12 = scmp.ne.s32.totalorder (!%p516_p9), %s1712_s17, 0 }
  0x60   : > { %s571_s25 = scalar_select %p570_p10, %s1712_s17, 8 }
  0x61   : > { %s2178_s24 = smov (!%p580_p11, %s1290_s24), 3  ;;  %605 = sbr.rel (%p1293_p12) target bundleno = 104 (0x68), region = 78 }
  0x62   : > { %s1289_s26 = sshll.u32 %s571_s25, 2  ;;  %s582_s15 = scalar_lea.vmem %s2162_s2, %s2178_s24 }
  0x63   : > { %s1959_s30 = scalar_lea.vmem %s2160_s0, %s1289_s26  ;;  %s591_s18 = scalar_lea.vmem %s2163_s3, %s2178_s24 }
  0x64   : > { %s600_s11 = scalar_lea.vmem %s2164_s4, %s2178_s24 }
  0x66   : > { %v1730_v0 = vmov 0.0  }
  0x67   : > { %606 = vst [vmem:[#allocation2] sm:$0xf] %v1730_v0 }
  0x68 PF: > { %v1352_v1 = vld [vmem:[%s1973_s12 + $0x70] sm:$0xf]  ;;  %v1568_v2 = vld [vmem:[%s1973_s12 + $0x74] sm:$0xf0]  ;;  %v1344_v12 = vld [vmem:[%s1973_s12 + $0x60] sm:$0xf] }
  0x69   : > { %v1416_v3 = vld [vmem:[%s1973_s12 + $0xf0] sm:$0xf]  ;;  %v1353_v4 = vor.u32 %v1568_v2, %v1352_v1  ;;  %v1584_v5 = vld [vmem:[%s1973_s12 + $0xf4] sm:$0xf0]  ;;  %v1566_v14 = vld [vmem:[%s1973_s12 + $0x64] sm:$0xf0] }
  0x6a   : > { %v1480_v6 = vld [vmem:[%s1973_s12 + $0x170] sm:$0xf]  ;;  %v1600_v7 = vld [vmem:[%s1973_s12 + $0x174] sm:$0xf0]  ;;  %v1417_v8 = vor.u32 %v1584_v5, %v1416_v3  ;;  %v1408_v15 = vld [vmem:[%s1973_s12 + $0xe0] sm:$0xf]  ;;  %v1345_v17 = vor.u32 %v1566_v14, %v1344_v12 }
  0x6b   : > { %v1481_v9 = vor.u32 %v1600_v7, %v1480_v6  ;;  %v1544_v10 = vld [vmem:[%s1973_s12 + $0x1f0] sm:$0xf]  ;;  %v1616_v11 = vld [vmem:[%s1973_s12 + $0x1f4] sm:$0xf0]  ;;  %1003 = vmatpush.bf16.msra.mxu0 %v1353_v4  ;;  %v1582_v16 = vld [vmem:[%s1973_s12 + $0xe4] sm:$0xf0] }
  0x6c   : > { %v1545_v13 = vor.u32 %v1616_v11, %v1544_v10  ;;  %1016 = vmatpush.bf16.msra.mxu1 %v1417_v8  ;;  %v1409_v18 = vor.u32 %v1582_v16, %v1408_v15  ;;  %v1472_v19 = vld [vmem:[%s1973_s12 + $0x160] sm:$0xf]  ;;  %v1598_v20 = vld [vmem:[%s1973_s12 + $0x164] sm:$0xf0]  ;;  %v1336_v24 = vld [vmem:[%s1973_s12 + $0x50] sm:$0xf] }
  0x6d   : > { %1029 = vmatpush.bf16.msra.mxu2 %v1481_v9  ;;  %v1536_v21 = vld [vmem:[%s1973_s12 + $0x1e0] sm:$0xf]  ;;  %v1473_v22 = vor.u32 %v1598_v20, %v1472_v19  ;;  %v1614_v23 = vld [vmem:[%s1973_s12 + $0x1e4] sm:$0xf0]  ;;  %v1564_v25 = vld [vmem:[%s1973_s12 + $0x54] sm:$0xf0] }
  0x6e   : > { %1042 = vmatpush.bf16.msra.mxu3 %v1545_v13  ;;  %v1537_v26 = vor.u32 %v1614_v23, %v1536_v21  ;;  %v1400_v27 = vld [vmem:[%s1973_s12 + $0xd0] sm:$0xf]  ;;  %v1580_v28 = vld [vmem:[%s1973_s12 + $0xd4] sm:$0xf0]  ;;  %v1337_v30 = vor.u32 %v1564_v25, %v1336_v24  ;;  %v1328_v36 = vld [vmem:[%s1973_s12 + $0x40] sm:$0xf] }
  0x6f   : > { %v1464_v29 = vld [vmem:[%s1973_s12 + $0x150] sm:$0xf]  ;;  %1004 = vmatpush.bf16.msra.mxu0 %v1345_v17  ;;  %v1596_v31 = vld [vmem:[%s1973_s12 + $0x154] sm:$0xf0]  ;;  %v1401_v34 = vor.u32 %v1580_v28, %v1400_v27  ;;  %v1562_v37 = vld [vmem:[%s1973_s12 + $0x44] sm:$0xf0] }
  0x70   : > { %v1528_v32 = vld [vmem:[%s1973_s12 + $0x1d0] sm:$0xf]  ;;  %v1612_v33 = vld [vmem:[%s1973_s12 + $0x1d4] sm:$0xf0]  ;;  %1017 = vmatpush.bf16.msra.mxu1 %v1409_v18  ;;  %v1465_v35 = vor.u32 %v1596_v31, %v1464_v29  ;;  %v1392_v38 = vld [vmem:[%s1973_s12 + $0xc0] sm:$0xf]  ;;  %v1329_v45 = vor.u32 %v1562_v37, %v1328_v36 }
  0x71   : > { %1030 = vmatpush.bf16.msra.mxu2 %v1473_v22  ;;  %v1529_v39 = vor.u32 %v1612_v33, %v1528_v32  ;;  %v1578_v40 = vld [vmem:[%s1973_s12 + $0xc4] sm:$0xf0]  ;;  %v1456_v41 = vld [vmem:[%s1973_s12 + $0x140] sm:$0xf]  ;;  %v1320_v48 = vld [vmem:[%s1973_s12 + $0x30] sm:$0xf] }
  0x72   : > { %1043 = vmatpush.bf16.msra.mxu3 %v1537_v26  ;;  %v1594_v42 = vld [vmem:[%s1973_s12 + $0x144] sm:$0xf0]  ;;  %v1520_v43 = vld [vmem:[%s1973_s12 + $0x1c0] sm:$0xf]  ;;  %v1393_v46 = vor.u32 %v1578_v40, %v1392_v38  ;;  %v1560_v49 = vld [vmem:[%s1973_s12 + $0x34] sm:$0xf0] }
  0x73   : > { %v1610_v44 = vld [vmem:[%s1973_s12 + $0x1c4] sm:$0xf0]  ;;  %1005 = vmatpush.bf16.msra.mxu0 %v1337_v30  ;;  %v1457_v47 = vor.u32 %v1594_v42, %v1456_v41  ;;  %v1384_v50 = vld [vmem:[%s1973_s12 + $0xb0] sm:$0xf]  ;;  %v1576_v52 = vld [vmem:[%s1973_s12 + $0xb4] sm:$0xf0]  ;;  %v1321_v57 = vor.u32 %v1560_v49, %v1320_v48 }
  0x74   : > { %1018 = vmatpush.bf16.msra.mxu1 %v1401_v34  ;;  %v1521_v51 = vor.u32 %v1610_v44, %v1520_v43  ;;  %v1448_v53 = vld [vmem:[%s1973_s12 + $0x130] sm:$0xf]  ;;  %v1592_v54 = vld [vmem:[%s1973_s12 + $0x134] sm:$0xf0]  ;;  %v1385_v58 = vor.u32 %v1576_v52, %v1384_v50  ;;  %v1312_v60 = vld [vmem:[%s1973_s12 + $0x20] sm:$0xf] }
  0x75   : > { %1031 = vmatpush.bf16.msra.mxu2 %v1465_v35  ;;  %v1512_v55 = vld [vmem:[%s1973_s12 + $0x1b0] sm:$0xf]  ;;  %v1608_v56 = vld [vmem:[%s1973_s12 + $0x1b4] sm:$0xf0]  ;;  %v1449_v59 = vor.u32 %v1592_v54, %v1448_v53  ;;  %v1558_v61 = vld [vmem:[%s1973_s12 + $0x24] sm:$0xf0] }
  0x76   : > { %1044 = vmatpush.bf16.msra.mxu3 %v1529_v39  ;;  %v1376_v62 = vld [vmem:[%s1973_s12 + $0xa0] sm:$0xf]  ;;  %v1513_v63 = vor.u32 %v1608_v56, %v1512_v55  ;;  %v1574_v0 = vld [vmem:[%s1973_s12 + $0xa4] sm:$0xf0]  ;;  %v1313_v5 = vor.u32 %v1558_v61, %v1312_v60  ;;  %v1304_v8 = vld [vmem:[%s1973_s12 + $0x10] sm:$0xf] }
  0x77   : > { %1006 = vmatpush.bf16.msra.mxu0 %v1329_v45  ;;  %v1440_v1 = vld [vmem:[%s1973_s12 + $0x120] sm:$0xf]  ;;  %v1590_v2 = vld [vmem:[%s1973_s12 + $0x124] sm:$0xf0]  ;;  %v1377_v6 = vor.u32 %v1574_v0, %v1376_v62  ;;  %v1556_v9 = vld [vmem:[%s1973_s12 + $0x14] sm:$0xf0] }
  0x78   : > { %1019 = vmatpush.bf16.msra.mxu1 %v1393_v46  ;;  %v1504_v3 = vld [vmem:[%s1973_s12 + $0x1a0] sm:$0xf]  ;;  %v1606_v4 = vld [vmem:[%s1973_s12 + $0x1a4] sm:$0xf0]  ;;  %v1441_v7 = vor.u32 %v1590_v2, %v1440_v1  ;;  %v1368_v10 = vld [vmem:[%s1973_s12 + $0x90] sm:$0xf]  ;;  %v1305_v18 = vor.u32 %v1556_v9, %v1304_v8 }
  0x79   : > { %1032 = vmatpush.bf16.msra.mxu2 %v1457_v47  ;;  %v1505_v11 = vor.u32 %v1606_v4, %v1504_v3  ;;  %v1572_v12 = vld [vmem:[%s1973_s12 + $0x94] sm:$0xf0]  ;;  %v1432_v13 = vld [vmem:[%s1973_s12 + $0x110] sm:$0xf]  ;;  %v1296_v17 = vld [vmem:[%s1973_s12] sm:$0xf] }
  0x7a   : > { %1045 = vmatpush.bf16.msra.mxu3 %v1521_v51  ;;  %v1588_v14 = vld [vmem:[%s1973_s12 + $0x114] sm:$0xf0]  ;;  %v1496_v15 = vld [vmem:[%s1973_s12 + $0x190] sm:$0xf]  ;;  %v1554_v19 = vld [vmem:[%s1973_s12 + $0x4] sm:$0xf0]  ;;  %v1369_v22 = vor.u32 %v1572_v12, %v1368_v10 }
  0x7b   : > { %1007 = vmatpush.bf16.msra.mxu0 %v1321_v57  ;;  %v1604_v16 = vld [vmem:[%s1973_s12 + $0x194] sm:$0xf0]  ;;  %v1360_v20 = vld [vmem:[%s1973_s12 + $0x80] sm:$0xf]  ;;  %v1570_v21 = vld [vmem:[%s1973_s12 + $0x84] sm:$0xf0]  ;;  %v1433_v23 = vor.u32 %v1588_v14, %v1432_v13  ;;  %v1297_v34 = vor.u32 %v1554_v19, %v1296_v17 }
  0x7c   : > { %1020 = vmatpush.bf16.msra.mxu1 %v1385_v58  ;;  %v1424_v24 = vld [vmem:[%s1973_s12 + $0x100] sm:$0xf]  ;;  %v1586_v25 = vld [vmem:[%s1973_s12 + $0x104] sm:$0xf0]  ;;  %v1497_v27 = vor.u32 %v1604_v16, %v1496_v15  ;;  %v1567_v29 = vld [vmem:[%s1973_s12 + $0x74] sm:$0xf]  ;;  %v1361_v37 = vor.u32 %v1570_v21, %v1360_v20 }
  0x7d   : > { %1033 = vmatpush.bf16.msra.mxu2 %v1449_v59  ;;  %v1488_v26 = vld [vmem:[%s1973_s12 + $0x180] sm:$0xf]  ;;  %v1602_v28 = vld [vmem:[%s1973_s12 + $0x184] sm:$0xf0]  ;;  %v1354_v30 = vld [vmem:[%s1973_s12 + $0x78] sm:$0xf0]  ;;  %v1425_v38 = vor.u32 %v1586_v25, %v1424_v24 }
  0x7e   : > { %1046 = vmatpush.bf16.msra.mxu3 %v1513_v63  ;;  %v1583_v31 = vld [vmem:[%s1973_s12 + $0xf4] sm:$0xf]  ;;  %v1418_v32 = vld [vmem:[%s1973_s12 + $0xf8] sm:$0xf0]  ;;  %v1489_v41 = vor.u32 %v1602_v28, %v1488_v26  ;;  %v1357_v42 = vor.u32 %v1567_v29, %v1354_v30  ;;  %v1565_v45 = vld [vmem:[%s1973_s12 + $0x64] sm:$0xf] }
  0x7f   : > { %1008 = vmatpush.bf16.msra.mxu0 %v1313_v5  ;;  %v608_v33 = vld [vmem:[%s1959_s30] sm:$0xf]  ;;  %v1482_v36 = vld [vmem:[%s1973_s12 + $0x178] sm:$0xf0]  ;;  %v1421_v43 = vor.u32 %v1583_v31, %v1418_v32  ;;  %v1346_v46 = vld [vmem:[%s1973_s12 + $0x68] sm:$0xf0] }
  0x80   : > { %1021 = vmatpush.bf16.msra.mxu1 %v1377_v6  ;;  %v1599_v35 = vld [vmem:[%s1973_s12 + $0x174] sm:$0xf]  ;;  %674 = vst [vmem:[#allocation1] ss:$9 sm:$0xff] %v608_v33  ;;  %v1546_v40 = vld [vmem:[%s1973_s12 + $0x1f8] sm:$0xf0]  ;;  %v1349_v55 = vor.u32 %v1565_v45, %v1346_v46 }
  0x81   : > { %1034 = vmatpush.bf16.msra.mxu2 %v1441_v7  ;;  %v1615_v39 = vld [vmem:[%s1973_s12 + $0x1f4] sm:$0xf]  ;;  %v1485_v44 = vor.u32 %v1599_v35, %v1482_v36  ;;  %v1581_v47 = vld [vmem:[%s1973_s12 + $0xe4] sm:$0xf]  ;;  %v1410_v49 = vld [vmem:[%s1973_s12 + $0xe8] sm:$0xf0] }
  0x82   : > { %1047 = vmatpush.bf16.msra.mxu3 %v1505_v11  ;;  %v1549_v48 = vor.u32 %v1615_v39, %v1546_v40  ;;  %v1597_v50 = vld [vmem:[%s1973_s12 + $0x164] sm:$0xf]  ;;  %v1474_v51 = vld [vmem:[%s1973_s12 + $0x168] sm:$0xf0]  ;;  %v1563_v54 = vld [vmem:[%s1973_s12 + $0x54] sm:$0xf]  ;;  %v1413_v59 = vor.u32 %v1581_v47, %v1410_v49 }
  0x83   : > { %1009 = vmatpush.bf16.msra.mxu0 %v1305_v18  ;;  %v1613_v52 = vld [vmem:[%s1973_s12 + $0x1e4] sm:$0xf]  ;;  %v1538_v53 = vld [vmem:[%s1973_s12 + $0x1e8] sm:$0xf0]  ;;  %v1338_v56 = vld [vmem:[%s1973_s12 + $0x58] sm:$0xf0]  ;;  %v1477_v60 = vor.u32 %v1597_v50, %v1474_v51 }
  0x84   : > { %1022 = vmatpush.bf16.msra.mxu1 %v1369_v22  ;;  %v1579_v57 = vld [vmem:[%s1973_s12 + $0xd4] sm:$0xf]  ;;  %v1402_v58 = vld [vmem:[%s1973_s12 + $0xd8] sm:$0xf0]  ;;  %v1541_v0 = vor.u32 %v1613_v52, %v1538_v53  ;;  %v1341_v6 = vor.u32 %v1563_v54, %v1338_v56  ;;  %v1561_v9 = vld [vmem:[%s1973_s12 + $0x44] sm:$0xf] }
  0x85   : > { %1035 = vmatpush.bf16.msra.mxu2 %v1433_v23  ;;  %v1595_v1 = vld [vmem:[%s1973_s12 + $0x154] sm:$0xf]  ;;  %v1466_v2 = vld [vmem:[%s1973_s12 + $0x158] sm:$0xf0]  ;;  %v1405_v7 = vor.u32 %v1579_v57, %v1402_v58  ;;  %v1330_v10 = vld [vmem:[%s1973_s12 + $0x48] sm:$0xf0] }
  0x86   : > { %1048 = vmatpush.bf16.msra.mxu3 %v1497_v27  ;;  %v1611_v4 = vld [vmem:[%s1973_s12 + $0x1d4] sm:$0xf]  ;;  %v1530_v5 = vld [vmem:[%s1973_s12 + $0x1d8] sm:$0xf0]  ;;  %v1469_v8 = vor.u32 %v1595_v1, %v1466_v2  ;;  %v1577_v11 = vld [vmem:[%s1973_s12 + $0xc4] sm:$0xf]  ;;  %v1333_v18 = vor.u32 %v1561_v9, %v1330_v10 }
  0x87   : > { %1010 = vmatpush.bf16.msra.mxu0 %v1297_v34  ;;  %v2061_v61 = vld [vmem:[#allocation1 + $0x12] sm:$0xff]  ;;  %v2063_v62 = vld [vmem:[#allocation1 + $0x1b] sm:$0xff]  ;;  %v2070_v3 = vld [vmem:[#allocation1 + $0x9] sm:$0xff]  ;;  %v1533_v12 = vor.u32 %v1611_v4, %v1530_v5  ;;  %vm1110_vm0 = vcmask 1041408   ;;  %p1550_p13 = scmp.ne.s32.totalorder %s1712_s17, 8 }
  0x88   : > { %1023 = vmatpush.bf16.msra.mxu1 %v1361_v37  ;;  %v2065_v63 = vld [vmem:[#allocation1] sm:$0xff]  ;;  %v1394_v13 = vld [vmem:[%s1973_s12 + $0xc8] sm:$0xf0]  ;;  %v1593_v14 = vld [vmem:[%s1973_s12 + $0x144] sm:$0xf] }
  0x89   : > { %1036 = vmatpush.bf16.msra.mxu2 %v1425_v38  ;;  %v1458_v15 = vld [vmem:[%s1973_s12 + $0x148] sm:$0xf0]  ;;  %v1609_v16 = vld [vmem:[%s1973_s12 + $0x1c4] sm:$0xf]  ;;  %v1397_v19 = vor.u32 %v1577_v11, %v1394_v13  ;;  %v1559_v21 = vld [vmem:[%s1973_s12 + $0x34] sm:$0xf] }
  0x8a   : > { %1049 = vmatpush.bf16.msra.mxu3 %v1489_v41  ;;  %1011 = vmatmul.bf16.vlgmr.msra.gmra.mxu0 %v2065_v63  ;;  %v1522_v17 = vld [vmem:[%s1973_s12 + $0x1c8] sm:$0xf0]  ;;  %v1461_v20 = vor.u32 %v1593_v14, %v1458_v15  ;;  %v1322_v22 = vld [vmem:[%s1973_s12 + $0x38] sm:$0xf0]  ;;  %v1575_v23 = vld [vmem:[%s1973_s12 + $0xb4] sm:$0xf] }
  0x8b   : > { %1055 = vmatpush.bf16.msrb.mxu0 %v1357_v42  ;;  %1024 = vmatmul.bf16.vlgmr.msra.gmra.mxu1 %v2070_v3  ;;  %v1525_v24 = vor.u32 %v1609_v16, %v1522_v17  ;;  %v1386_v25 = vld [vmem:[%s1973_s12 + $0xb8] sm:$0xf0]  ;;  %v1591_v26 = vld [vmem:[%s1973_s12 + $0x134] sm:$0xf]  ;;  %v1325_v30 = vor.u32 %v1559_v21, %v1322_v22  ;;  %v1557_v33 = vld [vmem:[%s1973_s12 + $0x24] sm:$0xf] }
  0x8c   : > { %1068 = vmatpush.bf16.msrb.mxu1 %v1421_v43  ;;  %1037 = vmatmul.bf16.vlgmr.msra.gmra.mxu2 %v2061_v61  ;;  %v1450_v27 = vld [vmem:[%s1973_s12 + $0x138] sm:$0xf0]  ;;  %v1607_v28 = vld [vmem:[%s1973_s12 + $0x1b4] sm:$0xf]  ;;  %v1389_v31 = vor.u32 %v1575_v23, %v1386_v25  ;;  %v1314_v34 = vld [vmem:[%s1973_s12 + $0x28] sm:$0xf0] }
  0x8d   : > { %1081 = vmatpush.bf16.msrb.mxu2 %v1485_v44  ;;  %1050 = vmatmul.bf16.vlgmr.msra.gmra.mxu3 %v2063_v62  ;;  %v1514_v29 = vld [vmem:[%s1973_s12 + $0x1b8] sm:$0xf0]  ;;  %v1453_v32 = vor.u32 %v1591_v26, %v1450_v27  ;;  %v1573_v35 = vld [vmem:[%s1973_s12 + $0xa4] sm:$0xf]  ;;  %v1378_v37 = vld [vmem:[%s1973_s12 + $0xa8] sm:$0xf0]  ;;  %v1317_v42 = vor.u32 %v1557_v33, %v1314_v34 }
  0x8e   : > { %1094 = vmatpush.bf16.msrb.mxu3 %v1549_v48  ;;  %v1517_v36 = vor.u32 %v1607_v28, %v1514_v29  ;;  %v1589_v38 = vld [vmem:[%s1973_s12 + $0x124] sm:$0xf]  ;;  %v1442_v39 = vld [vmem:[%s1973_s12 + $0x128] sm:$0xf0]  ;;  %v1381_v43 = vor.u32 %v1573_v35, %v1378_v37  ;;  %v1555_v45 = vld [vmem:[%s1973_s12 + $0x14] sm:$0xf] }
  0x8f   : > { %1056 = vmatpush.bf16.msrb.mxu0 %v1349_v55  ;;  %v1605_v40 = vld [vmem:[%s1973_s12 + $0x1a4] sm:$0xf]  ;;  %v1506_v41 = vld [vmem:[%s1973_s12 + $0x1a8] sm:$0xf0]  ;;  %v1445_v44 = vor.u32 %v1589_v38, %v1442_v39  ;;  %v1306_v46 = vld [vmem:[%s1973_s12 + $0x18] sm:$0xf0] }
  0x90   : > { %1069 = vmatpush.bf16.msrb.mxu1 %v1413_v59  ;;  %v1571_v47 = vld [vmem:[%s1973_s12 + $0x94] sm:$0xf]  ;;  %v1509_v48 = vor.u32 %v1605_v40, %v1506_v41  ;;  %v1370_v49 = vld [vmem:[%s1973_s12 + $0x98] sm:$0xf0]  ;;  %v1309_v54 = vor.u32 %v1555_v45, %v1306_v46  ;;  %v1553_v57 = vld [vmem:[%s1973_s12 + $0x4] sm:$0xf] }
  0x91   : > { %1082 = vmatpush.bf16.msrb.mxu2 %v1477_v60  ;;  %v1587_v50 = vld [vmem:[%s1973_s12 + $0x114] sm:$0xf]  ;;  %v1434_v51 = vld [vmem:[%s1973_s12 + $0x118] sm:$0xf0]  ;;  %v1373_v55 = vor.u32 %v1571_v47, %v1370_v49  ;;  %v1298_v58 = vld [vmem:[%s1973_s12 + $0x8] sm:$0xf0] }
  0x92   : > { %1095 = vmatpush.bf16.msrb.mxu3 %v1541_v0  ;;  %v1603_v52 = vld [vmem:[%s1973_s12 + $0x194] sm:$0xf]  ;;  %v1498_v53 = vld [vmem:[%s1973_s12 + $0x198] sm:$0xf0]  ;;  %v1437_v56 = vor.u32 %v1587_v50, %v1434_v51  ;;  %v1569_v59 = vld [vmem:[%s1973_s12 + $0x84] sm:$0xf] }
  0x93   : > { %1057 = vmatpush.bf16.msrb.mxu0 %v1341_v6  ;;  %v1501_v60 = vor.u32 %v1603_v52, %v1498_v53  ;;  %v1362_v0 = vld [vmem:[%s1973_s12 + $0x88] sm:$0xf0]  ;;  %v1585_v1 = vld [vmem:[%s1973_s12 + $0x104] sm:$0xf]  ;;  %v1301_v6 = vor.u32 %v1553_v57, %v1298_v58  ;;  %v607_v26 = vld [vmem:[#allocation2] sm:$0xf] }
  0x94   : > { %1070 = vmatpush.bf16.msrb.mxu1 %v1405_v7  ;;  %v1426_v2 = vld [vmem:[%s1973_s12 + $0x108] sm:$0xf0]  ;;  %v1601_v4 = vld [vmem:[%s1973_s12 + $0x184] sm:$0xf]  ;;  %v1365_v7 = vor.u32 %v1569_v59, %v1362_v0 }
  0x95   : > { %1083 = vmatpush.bf16.msrb.mxu2 %v1469_v8  ;;  %v1490_v5 = vld [vmem:[%s1973_s12 + $0x188] sm:$0xf0]  ;;  %v1429_v8 = vor.u32 %v1585_v1, %v1426_v2 }
  0x96   : > { %1096 = vmatpush.bf16.msrb.mxu3 %v1533_v12  ;;  %v1493_v9 = vor.u32 %v1601_v4, %v1490_v5 }
  0x97   : > { %1058 = vmatpush.bf16.msrb.mxu0 %v1333_v18 }
  0x98   : > { %1071 = vmatpush.bf16.msrb.mxu1 %v1397_v19 }
  0x99   : > { %1084 = vmatpush.bf16.msrb.mxu2 %v1461_v20 }
  0x9a   : > { %1097 = vmatpush.bf16.msrb.mxu3 %v1525_v24 }
  0x9b   : > { %1059 = vmatpush.bf16.msrb.mxu0 %v1325_v30 }
  0x9c   : > { %1072 = vmatpush.bf16.msrb.mxu1 %v1389_v31 }
  0x9d   : > { %1085 = vmatpush.bf16.msrb.mxu2 %v1453_v32 }
  0x9e   : > { %1098 = vmatpush.bf16.msrb.mxu3 %v1517_v36 }
  0x9f   : > { %1060 = vmatpush.bf16.msrb.mxu0 %v1317_v42 }
  0xa0   : > { %1073 = vmatpush.bf16.msrb.mxu1 %v1381_v43 }
  0xa1   : > { %1086 = vmatpush.bf16.msrb.mxu2 %v1445_v44 }
  0xa2   : > { %1099 = vmatpush.bf16.msrb.mxu3 %v1509_v48 }
  0xa3   : > { %1061 = vmatpush.bf16.msrb.mxu0 %v1309_v54 }
  0xa4   : > { %1074 = vmatpush.bf16.msrb.mxu1 %v1373_v55 }
  0xa5   : > { %1087 = vmatpush.bf16.msrb.mxu2 %v1437_v56 }
  0xa6   : > { %1100 = vmatpush.bf16.msrb.mxu3 %v1501_v60 }
  0xa7   : > { %1062 = vmatpush.bf16.msrb.mxu0 %v1301_v6 }
  0xa8   : > { %1075 = vmatpush.bf16.msrb.mxu1 %v1365_v7 }
  0xa9   : > { %1088 = vmatpush.bf16.msrb.mxu2 %v1429_v8 }
  0xaa   : > { %1101 = vmatpush.bf16.msrb.mxu3 %v1493_v9  ;;  %1063 = vmatmul.bf16.vlgmr.msrb.gmra.mxu0 %v2065_v63 }
  0xab   : > { %1076 = vmatmul.bf16.vlgmr.msrb.gmra.mxu1 %v2070_v3 }
  0xac   : > { %1089 = vmatmul.bf16.vlgmr.msrb.gmra.mxu2 %v2061_v61 }
  0xad   : > { %1102 = vmatmul.bf16.vlgmr.msrb.gmra.mxu3 %v2063_v62 }
 0x107   : > { %v1012_v10 = vpop.f32.mrf.mxu0 }
 0x108   : > { %v1025_v11 = vpop.f32.mrf.mxu1 }
 0x109   : > { %v1026_v20 = vadd.f32 %v1025_v11, %v1012_v10 }
 0x10f   : > { %v1038_v12 = vpop.f32.mrf.mxu2  ;;  %v1014_v14 = vpop.f32.mrf.mxu0 }
 0x110   : > { %v1051_v13 = vpop.f32.mrf.mxu3  ;;  %v1027_v15 = vpop.f32.mrf.mxu1  ;;  %v1039_v63 = vadd.f32 %v1038_v12, %v1026_v20 }
 0x112   : > { %v1052_v62 = vadd.f32 %v1051_v13, %v1039_v63 }
 0x117   : > { %v1040_v16 = vpop.f32.mrf.mxu2 }
 0x118   : > { %v1053_v17 = vpop.f32.mrf.mxu3 }
 0x127   : > { %v1064_v18 = vpop.f32.mrf.mxu0 }
 0x128   : > { %v1077_v19 = vpop.f32.mrf.mxu1 }
 0x129   : > { %v1078_v21 = vadd.f32 %v1077_v19, %v1064_v18 }
 0x12f   : > { %v1090_v22 = vpop.f32.mrf.mxu2  ;;  %v1066_v24 = vpop.f32.mrf.mxu0 }
 0x130   : > { %v1091_v23 = vadd.f32 %v1090_v22, %v1078_v21  ;;  %v1103_v3 = vpop.f32.mrf.mxu3  ;;  %v1079_v61 = vpop.f32.mrf.mxu1 }
 0x132   : > { %v1104_v25 = vadd.f32 %v1103_v3, %v1091_v23 }
 0x134   : > { %v1109_v27 = vrot.slane %v1104_v25, 6 }
 0x135   : > { %1118 = sbr.rel (%p1550_p13) target bundleno = 341 (0x155), region = 82 }
 0x136   : > { %v1111_v28 = vsel %vm1110_vm0, %v1052_v62, %v1109_v27 }
 0x137   : > { %v1113_v29 = vadd.f32 %v1111_v28, %v607_v26  ;;  %v1092_v30 = vpop.f32.mrf.mxu2 }
 0x138   : > { %v1105_v31 = vpop.f32.mrf.mxu3 }
 0x139   : > { %1114 = vst [vmem:[#allocation2] sm:$0xf] %v1113_v29 }
 0x13a   : > { %v1120_v32 = vld [vmem:[%s582_s15] sm:$0x3]  ;;  %vm1141_vm1 = vcmask 1040384  }
 0x13b   : > { %v1122_v33 = vperm.slane %v1120_v32, 0  ;;  %v1123_v34 = vperm.slane %v1120_v32, 1  ;;  %v1128_v35 = vld [vmem:[%s591_s18] sm:$0x3] }
 0x13c   : > { %v1129_v38 = vunpack.c.l.bf16 %v1128_v35 }
 0x13d   : > { %v1124_v37 = vrot.slane %v1123_v34, 6 }
 0x13f   : > { %v1125_v39 = vsel %vm1110_vm0, %v1122_v33, %v1124_v37 }
 0x140   : > { %v1119_v36 = vld [vmem:[#allocation2] sm:$0xf] }
 0x141   : > { %v1127_v40 = vadd.f32 %v1125_v39, %v1119_v36 }
 0x143   : > { %v1130_v41 = vadd.f32 %v1129_v38, %v1127_v40 }
 0x145   : > { %v1131_v42 = vmax.f32 %v1130_v41, 0.0 }
 0x147   : > { %1133 = vst [vmem:[#allocation1] ss:$4 sm:$0xff] %v1131_v42 }
 0x14e   : > { %v1134_v43 = vld.sshfl [vmem:[#allocation1] sm:$0xff pattern:$0x73625140]  ;;  %v1135_v44 = vld.sshfl [vmem:[#allocation1 + $0x8] sm:$0xff pattern:$0x73625140] }
 0x14f   : > { %v1138_v45 = vpack.c.bf16 %v1135_v44, %v1134_v43 }
 0x151   : > { %v1140_v46 = vrot.slane %v1138_v45, 3 }
 0x153   : > { %v1144_v47 = vsel %vm1141_vm1, %v1138_v45, %v1140_v46 }
 0x154   : > { %1146 = vst [vmem:[%s600_s11] sm:$0x3] %v1144_v47 }
 0x155 PF: > { %s14_s21 = sadd.s32 1, %s1728_s21   ;;  %s2165_s15 = smov %s1708_s16 }
 0x156   : > { %p11_p0 = scmp.ge.s32.totalorder %s14_s21, 20   ;;  %s2166_s16 = smov %s1807_s28 }
 0x157   : > { %s2167_s17 = smov %s1720_s19  ;;  %s2168_s18 = smov %s1724_s20 }
 0x158   : > { %s2169_s19 = smov %s2172_s22  ;;  %s2170_s20 = smov %s2176_s23 }
 0x159   :  { %13 = sbr.rel (!%p11_p0) target bundleno = 4 (0x4), region = 126 }

// kernel: _lambda_.37
= control target key start
LH: loop header
LB: loop body
LE: loop exit
PB: predicated region body
PF: predicated region fallthrough
CT: control target
= control target key end

     0   :  { %s1733_s15 = smov 0   ;;  %s1735_s16 = smov 0   ;;  %s2170_s0 = inlined_call_operand.vmem [shape: bf16[9,2,1,1,512], index: 0, kind: input, shape index: {}, may-alias: {0,4}]   ;;  %s2171_s1 = inlined_call_operand.vmem [shape: bf16[9,2,512], index: 1, kind: input, shape index: {}]   ;;  %s2172_s2 = inlined_call_operand.vmem [shape: bf16[9,512,512], index: 2, kind: input, shape index: {}]   ;;  %s2173_s3 = inlined_call_operand.vmem [shape: f32[1,512], index: 3, kind: input, shape index: {}]   ;;  %s2174_s4 = inlined_call_operand.vmem [shape: bf16[9,2,1,1,512], index: 4, kind: output, shape index: {}, may-alias: {0,4}]  }
   0x1   :  { %s1737_s17 = smov 0   ;;  %s1739_s18 = smov 0  }
   0x2   :  { %s1741_s0 = smov 0   ;;  %s1743_s19 = smov 0  }
   0x3   :  { %s1745_s20 = smov 0   ;;  %s1747_s21 = smov 0  }
   0x4   :  { %s1749_s22 = smov 0  }
   0x5 LB: > { %s27_s23 = sadd.s32 1, %s1697_s20  ;;  %s30_s24 = sadd.s32 1, %s1701_s21  ;;  %s1705_s22 = sphi %s1749_s22, %s15_s22   ;;  %s1701_s21 = sphi %s1747_s21, %s2184_s21   ;;  %s1697_s20 = sphi %s1745_s20, %s2183_s20   ;;  %s1693_s19 = sphi %s1743_s19, %s2182_s19   ;;  %s1689_s0 = sphi %s1741_s0, %s2181_s0   ;;  %s1685_s18 = sphi %s1739_s18, %s2180_s18   ;;  %s1681_s17 = sphi %s1737_s17, %s2179_s17   ;;  %s1677_s16 = sphi %s1735_s16, %s2178_s16   ;;  %s1673_s15 = sphi %s1733_s15, %s2177_s15  }
   0x6   : > { %p28_p0 = scmp.ge.s32.totalorder %s27_s23, 9  ;;  %p78_p1 = scmp.ne.s32.totalorder %s1685_s18, %s1681_s17 }
   0x7   : > { %s1222_s25 = sadd.s32 4294967295, %s1705_s22   ;;  %p79_p2 = scmp.eq.s32.totalorder %s1705_s22, 0 }
   0x8   : > { %s2186_s23 = smov (%p28_p0, %s27_s23), 0  ;;  %s2188_s24 = smov (!%p28_p0, %s30_s24), %s1701_s21 }
   0x9   : > { %p32_p3 = scmp.ge.s32.totalorder %s2188_s24, 2  ;;  %s66_s26 = ssub.s32 %s1697_s20, %s2186_s23 }
   0xa   : > { %p1789_p4 = por %p79_p2, %p78_p1  ;;  %p135_p5 = scmp.ne.s32.totalorder %s1677_s16, %s1673_s15 }
   0xb   : > { %s2190_s24 = smov (%p32_p3, %s2188_s24), 0  ;;  %s71_s28 = sadd.s32 1, %s1685_s18 }
   0xc   : > { %p136_p6 = scmp.eq.s32.totalorder %s1222_s25, 17  ;;  %s67_s29 = ssub.s32 %s1701_s21, %s2190_s24 }
   0xd   : > { %s125_s30 = sadd.s32 1, %s1677_s16  ;;  %s68_s5 = sor.u32 %s67_s29, %s66_s26 }
   0xe   : > { %p123_p7 = scmp.eq.s32.totalorder %s67_s29, 0  ;;  %p69_p8 = scmp.eq.s32.totalorder %s68_s5, 0 }
   0xf   : > { %p1801_p9 = por %p136_p6, %p135_p5  ;;  %p1225_p10 = scmp.ge.s32.totalorder %s1705_s22, 18 }
  0x10   : > { %s1806_s7 = scalar_select %p123_p7, %s1677_s16, %s125_s30  }
  0x11   : > { %s1809_s8 = scalar_select %p69_p8, %s1685_s18, %s71_s28  }
  0x12   : > { %158 = sbr.rel (%p1225_p10) target bundleno = 94 (0x5e), region = 16 }
  0x17   : > { %172 = sbr.rel (!%p1789_p4) target bundleno = 94 (0x5e), region = 24  ;;  %s174_s9 = sand.u32 (%p1789_p4), 1, %s1685_s18  }
  0x18   : > { %s1227_s10 = sshll.u32 (%p1789_p4), %s1701_s21, 1  ;;  %s1226_s11 = sshll.u32 (%p1789_p4), %s174_s9, 9 }
  0x19   : > { %s1228_s12 = sshll.u32 (%p1789_p4), %s1697_s20, 8  ;;  %s1825_s27 = scalar_lea.vmem (%p1789_p4), [#allocation3], %s1226_s11 }
  0x1a   : > { %s179_s13 = sadd.s32 (%p1789_p4), %s1228_s12, %s1227_s10 }
  0x1b   : > { %s1229_s14 = sshll.u32 (%p1789_p4), %s179_s13, 2 }
  0x1c   : > { %s1820_s28 = scalar_lea.vmem %s2172_s2, %s1229_s14 }
  0x1d   : > { %v336_v0 = vld [vmem:[%s1820_s28] sm:$0xff]  ;;  %v338_v1 = vld [vmem:[%s1820_s28 + $0x10] sm:$0xff] }
  0x1e   : > { %v340_v2 = vld [vmem:[%s1820_s28 + $0x20] sm:$0xff]  ;;  %337 = vst [vmem:[%s1825_s27] sm:$0xff] %v336_v0  ;;  %v342_v3 = vld [vmem:[%s1820_s28 + $0x30] sm:$0xff] }
  0x1f   : > { %339 = vst [vmem:[%s1825_s27 + $0x8] sm:$0xff] %v338_v1  ;;  %v344_v4 = vld [vmem:[%s1820_s28 + $0x40] sm:$0xff]  ;;  %v346_v5 = vld [vmem:[%s1820_s28 + $0x50] sm:$0xff] }
  0x20   : > { %341 = vst [vmem:[%s1825_s27 + $0x10] sm:$0xff] %v340_v2  ;;  %v348_v6 = vld [vmem:[%s1820_s28 + $0x60] sm:$0xff]  ;;  %v350_v7 = vld [vmem:[%s1820_s28 + $0x70] sm:$0xff] }
  0x21   : > { %343 = vst [vmem:[%s1825_s27 + $0x18] sm:$0xff] %v342_v3  ;;  %v352_v8 = vld [vmem:[%s1820_s28 + $0x80] sm:$0xff]  ;;  %v354_v9 = vld [vmem:[%s1820_s28 + $0x90] sm:$0xff] }
  0x22   : > { %345 = vst [vmem:[%s1825_s27 + $0x20] sm:$0xff] %v344_v4  ;;  %v356_v10 = vld [vmem:[%s1820_s28 + $0xa0] sm:$0xff]  ;;  %v358_v11 = vld [vmem:[%s1820_s28 + $0xb0] sm:$0xff] }
  0x23   : > { %347 = vst [vmem:[%s1825_s27 + $0x28] sm:$0xff] %v346_v5  ;;  %v360_v12 = vld [vmem:[%s1820_s28 + $0xc0] sm:$0xff]  ;;  %v362_v13 = vld [vmem:[%s1820_s28 + $0xd0] sm:$0xff] }
  0x24   : > { %349 = vst [vmem:[%s1825_s27 + $0x30] sm:$0xff] %v348_v6  ;;  %v364_v14 = vld [vmem:[%s1820_s28 + $0xe0] sm:$0xff]  ;;  %v366_v15 = vld [vmem:[%s1820_s28 + $0xf0] sm:$0xff] }
  0x25   : > { %351 = vst [vmem:[%s1825_s27 + $0x38] sm:$0xff] %v350_v7  ;;  %v368_v16 = vld [vmem:[%s1820_s28 + $0x100] sm:$0xff]  ;;  %v370_v17 = vld [vmem:[%s1820_s28 + $0x110] sm:$0xff] }
  0x26   : > { %353 = vst [vmem:[%s1825_s27 + $0x40] sm:$0xff] %v352_v8  ;;  %v372_v18 = vld [vmem:[%s1820_s28 + $0x120] sm:$0xff]  ;;  %v374_v19 = vld [vmem:[%s1820_s28 + $0x130] sm:$0xff] }
  0x27   : > { %355 = vst [vmem:[%s1825_s27 + $0x48] sm:$0xff] %v354_v9  ;;  %v376_v20 = vld [vmem:[%s1820_s28 + $0x140] sm:$0xff]  ;;  %v378_v21 = vld [vmem:[%s1820_s28 + $0x150] sm:$0xff] }
  0x28   : > { %357 = vst [vmem:[%s1825_s27 + $0x50] sm:$0xff] %v356_v10  ;;  %v380_v22 = vld [vmem:[%s1820_s28 + $0x160] sm:$0xff]  ;;  %v382_v23 = vld [vmem:[%s1820_s28 + $0x170] sm:$0xff] }
  0x29   : > { %359 = vst [vmem:[%s1825_s27 + $0x58] sm:$0xff] %v358_v11  ;;  %v384_v24 = vld [vmem:[%s1820_s28 + $0x180] sm:$0xff]  ;;  %v386_v25 = vld [vmem:[%s1820_s28 + $0x190] sm:$0xff] }
  0x2a   : > { %361 = vst [vmem:[%s1825_s27 + $0x60] sm:$0xff] %v360_v12  ;;  %v388_v26 = vld [vmem:[%s1820_s28 + $0x1a0] sm:$0xff]  ;;  %v390_v27 = vld [vmem:[%s1820_s28 + $0x1b0] sm:$0xff] }
  0x2b   : > { %363 = vst [vmem:[%s1825_s27 + $0x68] sm:$0xff] %v362_v13  ;;  %v392_v28 = vld [vmem:[%s1820_s28 + $0x1c0] sm:$0xff]  ;;  %v394_v29 = vld [vmem:[%s1820_s28 + $0x1d0] sm:$0xff] }
  0x2c   : > { %365 = vst [vmem:[%s1825_s27 + $0x70] sm:$0xff] %v364_v14  ;;  %v396_v30 = vld [vmem:[%s1820_s28 + $0x1e0] sm:$0xff]  ;;  %v398_v31 = vld [vmem:[%s1820_s28 + $0x1f0] sm:$0xff] }
  0x2d   : > { %367 = vst [vmem:[%s1825_s27 + $0x78] sm:$0xff] %v366_v15  ;;  %v400_v32 = vld [vmem:[%s1820_s28 + $0x200] sm:$0xff]  ;;  %v402_v33 = vld [vmem:[%s1820_s28 + $0x210] sm:$0xff] }
  0x2e   : > { %369 = vst [vmem:[%s1825_s27 + $0x80] sm:$0xff] %v368_v16  ;;  %v404_v34 = vld [vmem:[%s1820_s28 + $0x220] sm:$0xff]  ;;  %v406_v35 = vld [vmem:[%s1820_s28 + $0x230] sm:$0xff] }
  0x2f   : > { %371 = vst [vmem:[%s1825_s27 + $0x88] sm:$0xff] %v370_v17  ;;  %v408_v36 = vld [vmem:[%s1820_s28 + $0x240] sm:$0xff]  ;;  %v410_v37 = vld [vmem:[%s1820_s28 + $0x250] sm:$0xff] }
  0x30   : > { %373 = vst [vmem:[%s1825_s27 + $0x90] sm:$0xff] %v372_v18  ;;  %v412_v38 = vld [vmem:[%s1820_s28 + $0x260] sm:$0xff]  ;;  %v414_v39 = vld [vmem:[%s1820_s28 + $0x270] sm:$0xff] }
  0x31   : > { %375 = vst [vmem:[%s1825_s27 + $0x98] sm:$0xff] %v374_v19  ;;  %v416_v40 = vld [vmem:[%s1820_s28 + $0x280] sm:$0xff]  ;;  %v418_v41 = vld [vmem:[%s1820_s28 + $0x290] sm:$0xff] }
  0x32   : > { %377 = vst [vmem:[%s1825_s27 + $0xa0] sm:$0xff] %v376_v20  ;;  %v420_v42 = vld [vmem:[%s1820_s28 + $0x2a0] sm:$0xff]  ;;  %v422_v43 = vld [vmem:[%s1820_s28 + $0x2b0] sm:$0xff] }
  0x33   : > { %379 = vst [vmem:[%s1825_s27 + $0xa8] sm:$0xff] %v378_v21  ;;  %v424_v44 = vld [vmem:[%s1820_s28 + $0x2c0] sm:$0xff]  ;;  %v426_v45 = vld [vmem:[%s1820_s28 + $0x2d0] sm:$0xff] }
  0x34   : > { %381 = vst [vmem:[%s1825_s27 + $0xb0] sm:$0xff] %v380_v22  ;;  %v428_v46 = vld [vmem:[%s1820_s28 + $0x2e0] sm:$0xff]  ;;  %v430_v47 = vld [vmem:[%s1820_s28 + $0x2f0] sm:$0xff] }
  0x35   : > { %383 = vst [vmem:[%s1825_s27 + $0xb8] sm:$0xff] %v382_v23  ;;  %v432_v48 = vld [vmem:[%s1820_s28 + $0x300] sm:$0xff]  ;;  %v434_v49 = vld [vmem:[%s1820_s28 + $0x310] sm:$0xff] }
  0x36   : > { %385 = vst [vmem:[%s1825_s27 + $0xc0] sm:$0xff] %v384_v24  ;;  %v436_v50 = vld [vmem:[%s1820_s28 + $0x320] sm:$0xff]  ;;  %v438_v51 = vld [vmem:[%s1820_s28 + $0x330] sm:$0xff] }
  0x37   : > { %387 = vst [vmem:[%s1825_s27 + $0xc8] sm:$0xff] %v386_v25  ;;  %v440_v52 = vld [vmem:[%s1820_s28 + $0x340] sm:$0xff]  ;;  %v442_v53 = vld [vmem:[%s1820_s28 + $0x350] sm:$0xff] }
  0x38   : > { %389 = vst [vmem:[%s1825_s27 + $0xd0] sm:$0xff] %v388_v26  ;;  %v444_v54 = vld [vmem:[%s1820_s28 + $0x360] sm:$0xff]  ;;  %v446_v55 = vld [vmem:[%s1820_s28 + $0x370] sm:$0xff] }
  0x39   : > { %391 = vst [vmem:[%s1825_s27 + $0xd8] sm:$0xff] %v390_v27  ;;  %v448_v56 = vld [vmem:[%s1820_s28 + $0x380] sm:$0xff]  ;;  %v450_v57 = vld [vmem:[%s1820_s28 + $0x390] sm:$0xff] }
  0x3a   : > { %393 = vst [vmem:[%s1825_s27 + $0xe0] sm:$0xff] %v392_v28  ;;  %v452_v58 = vld [vmem:[%s1820_s28 + $0x3a0] sm:$0xff]  ;;  %v454_v59 = vld [vmem:[%s1820_s28 + $0x3b0] sm:$0xff] }
  0x3b   : > { %395 = vst [vmem:[%s1825_s27 + $0xe8] sm:$0xff] %v394_v29  ;;  %v456_v60 = vld [vmem:[%s1820_s28 + $0x3c0] sm:$0xff]  ;;  %v458_v61 = vld [vmem:[%s1820_s28 + $0x3d0] sm:$0xff] }
  0x3c   : > { %397 = vst [vmem:[%s1825_s27 + $0xf0] sm:$0xff] %v396_v30  ;;  %v460_v62 = vld [vmem:[%s1820_s28 + $0x3e0] sm:$0xff]  ;;  %v462_v63 = vld [vmem:[%s1820_s28 + $0x3f0] sm:$0xff] }
  0x3d   : > { %399 = vst [vmem:[%s1825_s27 + $0xf8] sm:$0xff] %v398_v31 }
  0x3e   : > { %401 = vst [vmem:[%s1825_s27 + $0x100] sm:$0xff] %v400_v32 }
  0x3f   : > { %403 = vst [vmem:[%s1825_s27 + $0x108] sm:$0xff] %v402_v33 }
  0x40   : > { %405 = vst [vmem:[%s1825_s27 + $0x110] sm:$0xff] %v404_v34 }
  0x41   : > { %407 = vst [vmem:[%s1825_s27 + $0x118] sm:$0xff] %v406_v35 }
  0x42   : > { %409 = vst [vmem:[%s1825_s27 + $0x120] sm:$0xff] %v408_v36 }
  0x43   : > { %411 = vst [vmem:[%s1825_s27 + $0x128] sm:$0xff] %v410_v37 }
  0x44   : > { %413 = vst [vmem:[%s1825_s27 + $0x130] sm:$0xff] %v412_v38 }
  0x45   : > { %415 = vst [vmem:[%s1825_s27 + $0x138] sm:$0xff] %v414_v39 }
  0x46   : > { %417 = vst [vmem:[%s1825_s27 + $0x140] sm:$0xff] %v416_v40 }
  0x47   : > { %419 = vst [vmem:[%s1825_s27 + $0x148] sm:$0xff] %v418_v41 }
  0x48   : > { %421 = vst [vmem:[%s1825_s27 + $0x150] sm:$0xff] %v420_v42 }
  0x49   : > { %423 = vst [vmem:[%s1825_s27 + $0x158] sm:$0xff] %v422_v43 }
  0x4a   : > { %425 = vst [vmem:[%s1825_s27 + $0x160] sm:$0xff] %v424_v44 }
  0x4b   : > { %427 = vst [vmem:[%s1825_s27 + $0x168] sm:$0xff] %v426_v45 }
  0x4c   : > { %429 = vst [vmem:[%s1825_s27 + $0x170] sm:$0xff] %v428_v46 }
  0x4d   : > { %431 = vst [vmem:[%s1825_s27 + $0x178] sm:$0xff] %v430_v47 }
  0x4e   : > { %433 = vst [vmem:[%s1825_s27 + $0x180] sm:$0xff] %v432_v48 }
  0x4f   : > { %435 = vst [vmem:[%s1825_s27 + $0x188] sm:$0xff] %v434_v49 }
  0x50   : > { %437 = vst [vmem:[%s1825_s27 + $0x190] sm:$0xff] %v436_v50 }
  0x51   : > { %439 = vst [vmem:[%s1825_s27 + $0x198] sm:$0xff] %v438_v51 }
  0x52   : > { %441 = vst [vmem:[%s1825_s27 + $0x1a0] sm:$0xff] %v440_v52 }
  0x53   : > { %443 = vst [vmem:[%s1825_s27 + $0x1a8] sm:$0xff] %v442_v53 }
  0x54   : > { %445 = vst [vmem:[%s1825_s27 + $0x1b0] sm:$0xff] %v444_v54 }
  0x55   : > { %447 = vst [vmem:[%s1825_s27 + $0x1b8] sm:$0xff] %v446_v55 }
  0x56   : > { %449 = vst [vmem:[%s1825_s27 + $0x1c0] sm:$0xff] %v448_v56 }
  0x57   : > { %451 = vst [vmem:[%s1825_s27 + $0x1c8] sm:$0xff] %v450_v57 }
  0x58   : > { %453 = vst [vmem:[%s1825_s27 + $0x1d0] sm:$0xff] %v452_v58 }
  0x59   : > { %455 = vst [vmem:[%s1825_s27 + $0x1d8] sm:$0xff] %v454_v59 }
  0x5a   : > { %457 = vst [vmem:[%s1825_s27 + $0x1e0] sm:$0xff] %v456_v60 }
  0x5b   : > { %459 = vst [vmem:[%s1825_s27 + $0x1e8] sm:$0xff] %v458_v61 }
  0x5c   : > { %461 = vst [vmem:[%s1825_s27 + $0x1f0] sm:$0xff] %v460_v62 }
  0x5d   : > { %463 = vst [vmem:[%s1825_s27 + $0x1f8] sm:$0xff] %v462_v63 }
  0x5e PF: > { %p1230_p11 = scmp.ge.s32.totalorder %s1705_s22, 1  ;;  %p476_p12 = scmp.lt.s32.totalorder %s1705_s22, 19 }
  0x60   : > { %p477_p13 = pnand %p1230_p11, %p476_p12 }
  0x61   : > { %s483_s29 = sand.u32 (!%p477_p13), 1, %s1681_s17   ;;  %s514_s30 = sand.u32 (!%p477_p13), 1, %s1673_s15  }
  0x62   : > { %480 = sbr.rel (%p477_p13) target bundleno = 355 (0x163), region = 66  ;;  %s1231_s5 = sshll.u32 (!%p477_p13), %s483_s29, 9 }
  0x63   : > { %s1956_s9 = sshll.u32 (!%p477_p13), %s514_s30, 1  ;;  %p517_p0 = scmp.lt.s32.totalorder (!%p477_p13), %s1689_s0, 8 }
  0x64   : > { %s1960_s10 = sshll.u32 (!%p477_p13), %s1693_s19, 1  ;;  %s1976_s27 = scalar_lea.vmem (!%p477_p13), [#allocation3], %s1231_s5 }
  0x65   : > { %p527_p1 = scmp.lt.s32.totalorder (!%p477_p13), %s1960_s10, 3  ;;  %s516_s19 = scalar_lea.vmem (!%p477_p13), [#allocation4], %s1956_s9 }
  0x66   : > { %p1235_p2 = scmp.ne.s32.totalorder (!%p477_p13), %s1689_s0, 0 }
  0x67   : > { %s518_s11 = scalar_select %p517_p0, %s1689_s0, 8 }
  0x68   : > { %s1965_s12 = scalar_select %p527_p1, %s1960_s10, 3 }
  0x69   : > { %s1233_s13 = sshll.u32 %s518_s11, 2  ;;  %535 = sbr.rel (%p1235_p2) target bundleno = 112 (0x70), region = 74 }
  0x6a   : > { %s1970_s17 = scalar_lea.vmem %s2171_s1, %s1233_s13  ;;  %s529_s28 = scalar_lea.vmem %s2173_s3, %s1965_s12 }
  0x6e   : > { %v1707_v0 = vmov 0.0  }
  0x6f   : > { %536 = vst [vmem:[#allocation2] sm:$0xf] %v1707_v0 }
  0x70 PF: > { %v1294_v1 = vld [vmem:[%s1976_s27 + $0x70] sm:$0xf]  ;;  %v1513_v2 = vld [vmem:[%s1976_s27 + $0x74] sm:$0xf0]  ;;  %v1286_v12 = vld [vmem:[%s1976_s27 + $0x60] sm:$0xf] }
  0x71   : > { %v1358_v3 = vld [vmem:[%s1976_s27 + $0xf0] sm:$0xf]  ;;  %v1295_v4 = vor.u32 %v1513_v2, %v1294_v1  ;;  %v1529_v5 = vld [vmem:[%s1976_s27 + $0xf4] sm:$0xf0]  ;;  %v1511_v14 = vld [vmem:[%s1976_s27 + $0x64] sm:$0xf0] }
  0x72   : > { %v1422_v6 = vld [vmem:[%s1976_s27 + $0x170] sm:$0xf]  ;;  %v1545_v7 = vld [vmem:[%s1976_s27 + $0x174] sm:$0xf0]  ;;  %v1359_v8 = vor.u32 %v1529_v5, %v1358_v3  ;;  %v1350_v15 = vld [vmem:[%s1976_s27 + $0xe0] sm:$0xf]  ;;  %v1287_v17 = vor.u32 %v1511_v14, %v1286_v12 }
  0x73   : > { %v1423_v9 = vor.u32 %v1545_v7, %v1422_v6  ;;  %v1486_v10 = vld [vmem:[%s1976_s27 + $0x1f0] sm:$0xf]  ;;  %v1561_v11 = vld [vmem:[%s1976_s27 + $0x1f4] sm:$0xf0]  ;;  %933 = vmatpush.bf16.msra.mxu0 %v1295_v4  ;;  %v1527_v16 = vld [vmem:[%s1976_s27 + $0xe4] sm:$0xf0] }
  0x74   : > { %v1487_v13 = vor.u32 %v1561_v11, %v1486_v10  ;;  %946 = vmatpush.bf16.msra.mxu1 %v1359_v8  ;;  %v1351_v18 = vor.u32 %v1527_v16, %v1350_v15  ;;  %v1414_v19 = vld [vmem:[%s1976_s27 + $0x160] sm:$0xf]  ;;  %v1543_v20 = vld [vmem:[%s1976_s27 + $0x164] sm:$0xf0]  ;;  %v1278_v24 = vld [vmem:[%s1976_s27 + $0x50] sm:$0xf] }
  0x75   : > { %959 = vmatpush.bf16.msra.mxu2 %v1423_v9  ;;  %v1478_v21 = vld [vmem:[%s1976_s27 + $0x1e0] sm:$0xf]  ;;  %v1415_v22 = vor.u32 %v1543_v20, %v1414_v19  ;;  %v1559_v23 = vld [vmem:[%s1976_s27 + $0x1e4] sm:$0xf0]  ;;  %v1509_v25 = vld [vmem:[%s1976_s27 + $0x54] sm:$0xf0] }
  0x76   : > { %972 = vmatpush.bf16.msra.mxu3 %v1487_v13  ;;  %v1479_v26 = vor.u32 %v1559_v23, %v1478_v21  ;;  %v1342_v27 = vld [vmem:[%s1976_s27 + $0xd0] sm:$0xf]  ;;  %v1525_v28 = vld [vmem:[%s1976_s27 + $0xd4] sm:$0xf0]  ;;  %v1279_v30 = vor.u32 %v1509_v25, %v1278_v24  ;;  %v1270_v36 = vld [vmem:[%s1976_s27 + $0x40] sm:$0xf] }
  0x77   : > { %v1406_v29 = vld [vmem:[%s1976_s27 + $0x150] sm:$0xf]  ;;  %934 = vmatpush.bf16.msra.mxu0 %v1287_v17  ;;  %v1541_v31 = vld [vmem:[%s1976_s27 + $0x154] sm:$0xf0]  ;;  %v1343_v34 = vor.u32 %v1525_v28, %v1342_v27  ;;  %v1507_v37 = vld [vmem:[%s1976_s27 + $0x44] sm:$0xf0] }
  0x78   : > { %v1470_v32 = vld [vmem:[%s1976_s27 + $0x1d0] sm:$0xf]  ;;  %v1557_v33 = vld [vmem:[%s1976_s27 + $0x1d4] sm:$0xf0]  ;;  %947 = vmatpush.bf16.msra.mxu1 %v1351_v18  ;;  %v1407_v35 = vor.u32 %v1541_v31, %v1406_v29  ;;  %v1334_v38 = vld [vmem:[%s1976_s27 + $0xc0] sm:$0xf]  ;;  %v1271_v45 = vor.u32 %v1507_v37, %v1270_v36 }
  0x79   : > { %960 = vmatpush.bf16.msra.mxu2 %v1415_v22  ;;  %v1471_v39 = vor.u32 %v1557_v33, %v1470_v32  ;;  %v1523_v40 = vld [vmem:[%s1976_s27 + $0xc4] sm:$0xf0]  ;;  %v1398_v41 = vld [vmem:[%s1976_s27 + $0x140] sm:$0xf]  ;;  %v1262_v48 = vld [vmem:[%s1976_s27 + $0x30] sm:$0xf] }
  0x7a   : > { %973 = vmatpush.bf16.msra.mxu3 %v1479_v26  ;;  %v1539_v42 = vld [vmem:[%s1976_s27 + $0x144] sm:$0xf0]  ;;  %v1462_v43 = vld [vmem:[%s1976_s27 + $0x1c0] sm:$0xf]  ;;  %v1335_v46 = vor.u32 %v1523_v40, %v1334_v38  ;;  %v1505_v49 = vld [vmem:[%s1976_s27 + $0x34] sm:$0xf0] }
  0x7b   : > { %v1555_v44 = vld [vmem:[%s1976_s27 + $0x1c4] sm:$0xf0]  ;;  %935 = vmatpush.bf16.msra.mxu0 %v1279_v30  ;;  %v1399_v47 = vor.u32 %v1539_v42, %v1398_v41  ;;  %v1326_v50 = vld [vmem:[%s1976_s27 + $0xb0] sm:$0xf]  ;;  %v1521_v52 = vld [vmem:[%s1976_s27 + $0xb4] sm:$0xf0]  ;;  %v1263_v57 = vor.u32 %v1505_v49, %v1262_v48 }
  0x7c   : > { %948 = vmatpush.bf16.msra.mxu1 %v1343_v34  ;;  %v1463_v51 = vor.u32 %v1555_v44, %v1462_v43  ;;  %v1390_v53 = vld [vmem:[%s1976_s27 + $0x130] sm:$0xf]  ;;  %v1537_v54 = vld [vmem:[%s1976_s27 + $0x134] sm:$0xf0]  ;;  %v1327_v58 = vor.u32 %v1521_v52, %v1326_v50  ;;  %v1254_v60 = vld [vmem:[%s1976_s27 + $0x20] sm:$0xf] }
  0x7d   : > { %961 = vmatpush.bf16.msra.mxu2 %v1407_v35  ;;  %v1454_v55 = vld [vmem:[%s1976_s27 + $0x1b0] sm:$0xf]  ;;  %v1553_v56 = vld [vmem:[%s1976_s27 + $0x1b4] sm:$0xf0]  ;;  %v1391_v59 = vor.u32 %v1537_v54, %v1390_v53  ;;  %v1503_v61 = vld [vmem:[%s1976_s27 + $0x24] sm:$0xf0] }
  0x7e   : > { %974 = vmatpush.bf16.msra.mxu3 %v1471_v39  ;;  %v1318_v62 = vld [vmem:[%s1976_s27 + $0xa0] sm:$0xf]  ;;  %v1455_v63 = vor.u32 %v1553_v56, %v1454_v55  ;;  %v1519_v0 = vld [vmem:[%s1976_s27 + $0xa4] sm:$0xf0]  ;;  %v1255_v5 = vor.u32 %v1503_v61, %v1254_v60  ;;  %v1246_v8 = vld [vmem:[%s1976_s27 + $0x10] sm:$0xf] }
  0x7f   : > { %936 = vmatpush.bf16.msra.mxu0 %v1271_v45  ;;  %v1382_v1 = vld [vmem:[%s1976_s27 + $0x120] sm:$0xf]  ;;  %v1535_v2 = vld [vmem:[%s1976_s27 + $0x124] sm:$0xf0]  ;;  %v1319_v6 = vor.u32 %v1519_v0, %v1318_v62  ;;  %v1501_v9 = vld [vmem:[%s1976_s27 + $0x14] sm:$0xf0] }
  0x80   : > { %949 = vmatpush.bf16.msra.mxu1 %v1335_v46  ;;  %v1446_v3 = vld [vmem:[%s1976_s27 + $0x1a0] sm:$0xf]  ;;  %v1551_v4 = vld [vmem:[%s1976_s27 + $0x1a4] sm:$0xf0]  ;;  %v1383_v7 = vor.u32 %v1535_v2, %v1382_v1  ;;  %v1310_v10 = vld [vmem:[%s1976_s27 + $0x90] sm:$0xf]  ;;  %v1247_v18 = vor.u32 %v1501_v9, %v1246_v8 }
  0x81   : > { %962 = vmatpush.bf16.msra.mxu2 %v1399_v47  ;;  %v1447_v11 = vor.u32 %v1551_v4, %v1446_v3  ;;  %v1517_v12 = vld [vmem:[%s1976_s27 + $0x94] sm:$0xf0]  ;;  %v1374_v13 = vld [vmem:[%s1976_s27 + $0x110] sm:$0xf]  ;;  %v1238_v17 = vld [vmem:[%s1976_s27] sm:$0xf] }
  0x82   : > { %975 = vmatpush.bf16.msra.mxu3 %v1463_v51  ;;  %v1533_v14 = vld [vmem:[%s1976_s27 + $0x114] sm:$0xf0]  ;;  %v1438_v15 = vld [vmem:[%s1976_s27 + $0x190] sm:$0xf]  ;;  %v1499_v19 = vld [vmem:[%s1976_s27 + $0x4] sm:$0xf0]  ;;  %v1311_v22 = vor.u32 %v1517_v12, %v1310_v10 }
  0x83   : > { %937 = vmatpush.bf16.msra.mxu0 %v1263_v57  ;;  %v1549_v16 = vld [vmem:[%s1976_s27 + $0x194] sm:$0xf0]  ;;  %v1302_v20 = vld [vmem:[%s1976_s27 + $0x80] sm:$0xf]  ;;  %v1515_v21 = vld [vmem:[%s1976_s27 + $0x84] sm:$0xf0]  ;;  %v1375_v23 = vor.u32 %v1533_v14, %v1374_v13  ;;  %v1239_v34 = vor.u32 %v1499_v19, %v1238_v17 }
  0x84   : > { %950 = vmatpush.bf16.msra.mxu1 %v1327_v58  ;;  %v1366_v24 = vld [vmem:[%s1976_s27 + $0x100] sm:$0xf]  ;;  %v1531_v25 = vld [vmem:[%s1976_s27 + $0x104] sm:$0xf0]  ;;  %v1439_v27 = vor.u32 %v1549_v16, %v1438_v15  ;;  %v1512_v29 = vld [vmem:[%s1976_s27 + $0x74] sm:$0xf]  ;;  %v1303_v37 = vor.u32 %v1515_v21, %v1302_v20 }
  0x85   : > { %963 = vmatpush.bf16.msra.mxu2 %v1391_v59  ;;  %v1430_v26 = vld [vmem:[%s1976_s27 + $0x180] sm:$0xf]  ;;  %v1547_v28 = vld [vmem:[%s1976_s27 + $0x184] sm:$0xf0]  ;;  %v1296_v30 = vld [vmem:[%s1976_s27 + $0x78] sm:$0xf0]  ;;  %v1367_v38 = vor.u32 %v1531_v25, %v1366_v24 }
  0x86   : > { %976 = vmatpush.bf16.msra.mxu3 %v1455_v63  ;;  %v1528_v31 = vld [vmem:[%s1976_s27 + $0xf4] sm:$0xf]  ;;  %v1360_v32 = vld [vmem:[%s1976_s27 + $0xf8] sm:$0xf0]  ;;  %v1431_v41 = vor.u32 %v1547_v28, %v1430_v26  ;;  %v1299_v42 = vor.u32 %v1512_v29, %v1296_v30  ;;  %v1510_v45 = vld [vmem:[%s1976_s27 + $0x64] sm:$0xf] }
  0x87   : > { %938 = vmatpush.bf16.msra.mxu0 %v1255_v5  ;;  %v538_v33 = vld [vmem:[%s1970_s17] sm:$0xf]  ;;  %v1424_v36 = vld [vmem:[%s1976_s27 + $0x178] sm:$0xf0]  ;;  %v1363_v43 = vor.u32 %v1528_v31, %v1360_v32  ;;  %v1288_v46 = vld [vmem:[%s1976_s27 + $0x68] sm:$0xf0] }
  0x88   : > { %951 = vmatpush.bf16.msra.mxu1 %v1319_v6  ;;  %v1544_v35 = vld [vmem:[%s1976_s27 + $0x174] sm:$0xf]  ;;  %604 = vst [vmem:[#allocation1] ss:$9 sm:$0xff] %v538_v33  ;;  %v1488_v40 = vld [vmem:[%s1976_s27 + $0x1f8] sm:$0xf0]  ;;  %v1291_v55 = vor.u32 %v1510_v45, %v1288_v46 }
  0x89   : > { %964 = vmatpush.bf16.msra.mxu2 %v1383_v7  ;;  %v1560_v39 = vld [vmem:[%s1976_s27 + $0x1f4] sm:$0xf]  ;;  %v1427_v44 = vor.u32 %v1544_v35, %v1424_v36  ;;  %v1526_v47 = vld [vmem:[%s1976_s27 + $0xe4] sm:$0xf]  ;;  %v1352_v49 = vld [vmem:[%s1976_s27 + $0xe8] sm:$0xf0] }
  0x8a   : > { %977 = vmatpush.bf16.msra.mxu3 %v1447_v11  ;;  %v1491_v48 = vor.u32 %v1560_v39, %v1488_v40  ;;  %v1542_v50 = vld [vmem:[%s1976_s27 + $0x164] sm:$0xf]  ;;  %v1416_v51 = vld [vmem:[%s1976_s27 + $0x168] sm:$0xf0]  ;;  %v1508_v54 = vld [vmem:[%s1976_s27 + $0x54] sm:$0xf]  ;;  %v1355_v59 = vor.u32 %v1526_v47, %v1352_v49 }
  0x8b   : > { %939 = vmatpush.bf16.msra.mxu0 %v1247_v18  ;;  %v1558_v52 = vld [vmem:[%s1976_s27 + $0x1e4] sm:$0xf]  ;;  %v1480_v53 = vld [vmem:[%s1976_s27 + $0x1e8] sm:$0xf0]  ;;  %v1280_v56 = vld [vmem:[%s1976_s27 + $0x58] sm:$0xf0]  ;;  %v1419_v60 = vor.u32 %v1542_v50, %v1416_v51 }
  0x8c   : > { %952 = vmatpush.bf16.msra.mxu1 %v1311_v22  ;;  %v1524_v57 = vld [vmem:[%s1976_s27 + $0xd4] sm:$0xf]  ;;  %v1344_v58 = vld [vmem:[%s1976_s27 + $0xd8] sm:$0xf0]  ;;  %v1483_v0 = vor.u32 %v1558_v52, %v1480_v53  ;;  %v1283_v6 = vor.u32 %v1508_v54, %v1280_v56  ;;  %v1506_v9 = vld [vmem:[%s1976_s27 + $0x44] sm:$0xf] }
  0x8d   : > { %965 = vmatpush.bf16.msra.mxu2 %v1375_v23  ;;  %v1540_v1 = vld [vmem:[%s1976_s27 + $0x154] sm:$0xf]  ;;  %v1408_v2 = vld [vmem:[%s1976_s27 + $0x158] sm:$0xf0]  ;;  %v1347_v7 = vor.u32 %v1524_v57, %v1344_v58  ;;  %v1272_v10 = vld [vmem:[%s1976_s27 + $0x48] sm:$0xf0] }
  0x8e   : > { %978 = vmatpush.bf16.msra.mxu3 %v1439_v27  ;;  %v1556_v4 = vld [vmem:[%s1976_s27 + $0x1d4] sm:$0xf]  ;;  %v1472_v5 = vld [vmem:[%s1976_s27 + $0x1d8] sm:$0xf0]  ;;  %v1411_v8 = vor.u32 %v1540_v1, %v1408_v2  ;;  %v1522_v11 = vld [vmem:[%s1976_s27 + $0xc4] sm:$0xf]  ;;  %v1275_v18 = vor.u32 %v1506_v9, %v1272_v10 }
  0x8f   : > { %940 = vmatpush.bf16.msra.mxu0 %v1239_v34  ;;  %v2065_v61 = vld [vmem:[#allocation1 + $0x12] sm:$0xff]  ;;  %v2067_v62 = vld [vmem:[#allocation1 + $0x1b] sm:$0xff]  ;;  %v2074_v3 = vld [vmem:[#allocation1 + $0x9] sm:$0xff]  ;;  %v1475_v12 = vor.u32 %v1556_v4, %v1472_v5  ;;  %vm1040_vm0 = vcmask 1041408   ;;  %p1492_p3 = scmp.ne.s32.totalorder %s1689_s0, 8 }
  0x90   : > { %953 = vmatpush.bf16.msra.mxu1 %v1303_v37  ;;  %v2069_v63 = vld [vmem:[#allocation1] sm:$0xff]  ;;  %v1336_v13 = vld [vmem:[%s1976_s27 + $0xc8] sm:$0xf0]  ;;  %v1538_v14 = vld [vmem:[%s1976_s27 + $0x144] sm:$0xf] }
  0x91   : > { %966 = vmatpush.bf16.msra.mxu2 %v1367_v38  ;;  %v1400_v15 = vld [vmem:[%s1976_s27 + $0x148] sm:$0xf0]  ;;  %v1554_v16 = vld [vmem:[%s1976_s27 + $0x1c4] sm:$0xf]  ;;  %v1339_v19 = vor.u32 %v1522_v11, %v1336_v13  ;;  %v1504_v21 = vld [vmem:[%s1976_s27 + $0x34] sm:$0xf] }
  0x92   : > { %979 = vmatpush.bf16.msra.mxu3 %v1431_v41  ;;  %941 = vmatmul.bf16.vlgmr.msra.gmra.mxu0 %v2069_v63  ;;  %v1464_v17 = vld [vmem:[%s1976_s27 + $0x1c8] sm:$0xf0]  ;;  %v1403_v20 = vor.u32 %v1538_v14, %v1400_v15  ;;  %v1264_v22 = vld [vmem:[%s1976_s27 + $0x38] sm:$0xf0]  ;;  %v1520_v23 = vld [vmem:[%s1976_s27 + $0xb4] sm:$0xf] }
  0x93   : > { %985 = vmatpush.bf16.msrb.mxu0 %v1299_v42  ;;  %954 = vmatmul.bf16.vlgmr.msra.gmra.mxu1 %v2074_v3  ;;  %v1467_v24 = vor.u32 %v1554_v16, %v1464_v17  ;;  %v1328_v25 = vld [vmem:[%s1976_s27 + $0xb8] sm:$0xf0]  ;;  %v1536_v26 = vld [vmem:[%s1976_s27 + $0x134] sm:$0xf]  ;;  %v1267_v30 = vor.u32 %v1504_v21, %v1264_v22  ;;  %v1502_v33 = vld [vmem:[%s1976_s27 + $0x24] sm:$0xf] }
  0x94   : > { %998 = vmatpush.bf16.msrb.mxu1 %v1363_v43  ;;  %967 = vmatmul.bf16.vlgmr.msra.gmra.mxu2 %v2065_v61  ;;  %v1392_v27 = vld [vmem:[%s1976_s27 + $0x138] sm:$0xf0]  ;;  %v1552_v28 = vld [vmem:[%s1976_s27 + $0x1b4] sm:$0xf]  ;;  %v1331_v31 = vor.u32 %v1520_v23, %v1328_v25  ;;  %v1256_v34 = vld [vmem:[%s1976_s27 + $0x28] sm:$0xf0] }
  0x95   : > { %1011 = vmatpush.bf16.msrb.mxu2 %v1427_v44  ;;  %980 = vmatmul.bf16.vlgmr.msra.gmra.mxu3 %v2067_v62  ;;  %v1456_v29 = vld [vmem:[%s1976_s27 + $0x1b8] sm:$0xf0]  ;;  %v1395_v32 = vor.u32 %v1536_v26, %v1392_v27  ;;  %v1518_v35 = vld [vmem:[%s1976_s27 + $0xa4] sm:$0xf]  ;;  %v1320_v37 = vld [vmem:[%s1976_s27 + $0xa8] sm:$0xf0]  ;;  %v1259_v42 = vor.u32 %v1502_v33, %v1256_v34 }
  0x96   : > { %1024 = vmatpush.bf16.msrb.mxu3 %v1491_v48  ;;  %v1459_v36 = vor.u32 %v1552_v28, %v1456_v29  ;;  %v1534_v38 = vld [vmem:[%s1976_s27 + $0x124] sm:$0xf]  ;;  %v1384_v39 = vld [vmem:[%s1976_s27 + $0x128] sm:$0xf0]  ;;  %v1323_v43 = vor.u32 %v1518_v35, %v1320_v37  ;;  %v1500_v45 = vld [vmem:[%s1976_s27 + $0x14] sm:$0xf] }
  0x97   : > { %986 = vmatpush.bf16.msrb.mxu0 %v1291_v55  ;;  %v1550_v40 = vld [vmem:[%s1976_s27 + $0x1a4] sm:$0xf]  ;;  %v1448_v41 = vld [vmem:[%s1976_s27 + $0x1a8] sm:$0xf0]  ;;  %v1387_v44 = vor.u32 %v1534_v38, %v1384_v39  ;;  %v1248_v46 = vld [vmem:[%s1976_s27 + $0x18] sm:$0xf0] }
  0x98   : > { %999 = vmatpush.bf16.msrb.mxu1 %v1355_v59  ;;  %v1516_v47 = vld [vmem:[%s1976_s27 + $0x94] sm:$0xf]  ;;  %v1451_v48 = vor.u32 %v1550_v40, %v1448_v41  ;;  %v1312_v49 = vld [vmem:[%s1976_s27 + $0x98] sm:$0xf0]  ;;  %v1251_v54 = vor.u32 %v1500_v45, %v1248_v46  ;;  %v1498_v57 = vld [vmem:[%s1976_s27 + $0x4] sm:$0xf] }
  0x99   : > { %1012 = vmatpush.bf16.msrb.mxu2 %v1419_v60  ;;  %v1532_v50 = vld [vmem:[%s1976_s27 + $0x114] sm:$0xf]  ;;  %v1376_v51 = vld [vmem:[%s1976_s27 + $0x118] sm:$0xf0]  ;;  %v1315_v55 = vor.u32 %v1516_v47, %v1312_v49  ;;  %v1240_v58 = vld [vmem:[%s1976_s27 + $0x8] sm:$0xf0] }
  0x9a   : > { %1025 = vmatpush.bf16.msrb.mxu3 %v1483_v0  ;;  %v1548_v52 = vld [vmem:[%s1976_s27 + $0x194] sm:$0xf]  ;;  %v1440_v53 = vld [vmem:[%s1976_s27 + $0x198] sm:$0xf0]  ;;  %v1379_v56 = vor.u32 %v1532_v50, %v1376_v51  ;;  %v1514_v59 = vld [vmem:[%s1976_s27 + $0x84] sm:$0xf] }
  0x9b   : > { %987 = vmatpush.bf16.msrb.mxu0 %v1283_v6  ;;  %v1443_v60 = vor.u32 %v1548_v52, %v1440_v53  ;;  %v1304_v0 = vld [vmem:[%s1976_s27 + $0x88] sm:$0xf0]  ;;  %v1530_v1 = vld [vmem:[%s1976_s27 + $0x104] sm:$0xf]  ;;  %v1243_v6 = vor.u32 %v1498_v57, %v1240_v58  ;;  %v537_v26 = vld [vmem:[#allocation2] sm:$0xf] }
  0x9c   : > { %1000 = vmatpush.bf16.msrb.mxu1 %v1347_v7  ;;  %v1368_v2 = vld [vmem:[%s1976_s27 + $0x108] sm:$0xf0]  ;;  %v1546_v4 = vld [vmem:[%s1976_s27 + $0x184] sm:$0xf]  ;;  %v1307_v7 = vor.u32 %v1514_v59, %v1304_v0 }
  0x9d   : > { %1013 = vmatpush.bf16.msrb.mxu2 %v1411_v8  ;;  %v1432_v5 = vld [vmem:[%s1976_s27 + $0x188] sm:$0xf0]  ;;  %v1371_v8 = vor.u32 %v1530_v1, %v1368_v2 }
  0x9e   : > { %1026 = vmatpush.bf16.msrb.mxu3 %v1475_v12  ;;  %v1435_v9 = vor.u32 %v1546_v4, %v1432_v5 }
  0x9f   : > { %988 = vmatpush.bf16.msrb.mxu0 %v1275_v18 }
  0xa0   : > { %1001 = vmatpush.bf16.msrb.mxu1 %v1339_v19 }
  0xa1   : > { %1014 = vmatpush.bf16.msrb.mxu2 %v1403_v20 }
  0xa2   : > { %1027 = vmatpush.bf16.msrb.mxu3 %v1467_v24 }
  0xa3   : > { %989 = vmatpush.bf16.msrb.mxu0 %v1267_v30 }
  0xa4   : > { %1002 = vmatpush.bf16.msrb.mxu1 %v1331_v31 }
  0xa5   : > { %1015 = vmatpush.bf16.msrb.mxu2 %v1395_v32 }
  0xa6   : > { %1028 = vmatpush.bf16.msrb.mxu3 %v1459_v36 }
  0xa7   : > { %990 = vmatpush.bf16.msrb.mxu0 %v1259_v42 }
  0xa8   : > { %1003 = vmatpush.bf16.msrb.mxu1 %v1323_v43 }
  0xa9   : > { %1016 = vmatpush.bf16.msrb.mxu2 %v1387_v44 }
  0xaa   : > { %1029 = vmatpush.bf16.msrb.mxu3 %v1451_v48 }
  0xab   : > { %991 = vmatpush.bf16.msrb.mxu0 %v1251_v54 }
  0xac   : > { %1004 = vmatpush.bf16.msrb.mxu1 %v1315_v55 }
  0xad   : > { %1017 = vmatpush.bf16.msrb.mxu2 %v1379_v56 }
  0xae   : > { %1030 = vmatpush.bf16.msrb.mxu3 %v1443_v60 }
  0xaf   : > { %992 = vmatpush.bf16.msrb.mxu0 %v1243_v6 }
  0xb0   : > { %1005 = vmatpush.bf16.msrb.mxu1 %v1307_v7 }
  0xb1   : > { %1018 = vmatpush.bf16.msrb.mxu2 %v1371_v8 }
  0xb2   : > { %1031 = vmatpush.bf16.msrb.mxu3 %v1435_v9  ;;  %993 = vmatmul.bf16.vlgmr.msrb.gmra.mxu0 %v2069_v63 }
  0xb3   : > { %1006 = vmatmul.bf16.vlgmr.msrb.gmra.mxu1 %v2074_v3 }
  0xb4   : > { %1019 = vmatmul.bf16.vlgmr.msrb.gmra.mxu2 %v2065_v61 }
  0xb5   : > { %1032 = vmatmul.bf16.vlgmr.msrb.gmra.mxu3 %v2067_v62 }
 0x10f   : > { %v942_v10 = vpop.f32.mrf.mxu0 }
 0x110   : > { %v955_v11 = vpop.f32.mrf.mxu1 }
 0x111   : > { %v956_v20 = vadd.f32 %v955_v11, %v942_v10 }
 0x117   : > { %v968_v12 = vpop.f32.mrf.mxu2  ;;  %v944_v14 = vpop.f32.mrf.mxu0 }
 0x118   : > { %v981_v13 = vpop.f32.mrf.mxu3  ;;  %v957_v15 = vpop.f32.mrf.mxu1  ;;  %v969_v63 = vadd.f32 %v968_v12, %v956_v20 }
 0x11a   : > { %v982_v62 = vadd.f32 %v981_v13, %v969_v63 }
 0x11f   : > { %v970_v16 = vpop.f32.mrf.mxu2 }
 0x120   : > { %v983_v17 = vpop.f32.mrf.mxu3 }
 0x12f   : > { %v994_v18 = vpop.f32.mrf.mxu0 }
 0x130   : > { %v1007_v19 = vpop.f32.mrf.mxu1 }
 0x131   : > { %v1008_v21 = vadd.f32 %v1007_v19, %v994_v18 }
 0x137   : > { %v1020_v22 = vpop.f32.mrf.mxu2  ;;  %v996_v24 = vpop.f32.mrf.mxu0 }
 0x138   : > { %v1021_v23 = vadd.f32 %v1020_v22, %v1008_v21  ;;  %v1033_v3 = vpop.f32.mrf.mxu3  ;;  %v1009_v61 = vpop.f32.mrf.mxu1 }
 0x13a   : > { %v1034_v25 = vadd.f32 %v1033_v3, %v1021_v23 }
 0x13c   : > { %v1039_v27 = vrot.slane %v1034_v25, 6 }
 0x13d   : > { %1048 = sbr.rel (%p1492_p3) target bundleno = 347 (0x15b), region = 78 }
 0x13e   : > { %v1041_v28 = vsel %vm1040_vm0, %v982_v62, %v1039_v27 }
 0x13f   : > { %v1043_v29 = vadd.f32 %v1041_v28, %v537_v26  ;;  %v1022_v30 = vpop.f32.mrf.mxu2 }
 0x140   : > { %v1035_v31 = vpop.f32.mrf.mxu3 }
 0x141   : > { %1044 = vst [vmem:[#allocation2] sm:$0xf] %v1043_v29 }
 0x142   : > { %v1050_v32 = vld [vmem:[%s529_s28] sm:$0x3]  ;;  %vm1068_vm1 = vcmask 1040384  }
 0x143   : > { %v1052_v33 = vperm.slane %v1050_v32, 0  ;;  %v1053_v34 = vperm.slane %v1050_v32, 1 }
 0x145   : > { %v1054_v36 = vrot.slane %v1053_v34, 6 }
 0x147   : > { %v1055_v37 = vsel %vm1040_vm0, %v1052_v33, %v1054_v36 }
 0x148   : > { %v1049_v35 = vld [vmem:[#allocation2] sm:$0xf] }
 0x149   : > { %v1057_v38 = vadd.f32 %v1055_v37, %v1049_v35 }
 0x14b   : > { %v1058_v39 = vmax.f32 %v1057_v38, 0.0 }
 0x14d   : > { %1060 = vst [vmem:[#allocation1] ss:$4 sm:$0xff] %v1058_v39 }
 0x154   : > { %v1061_v40 = vld.sshfl [vmem:[#allocation1] sm:$0xff pattern:$0x73625140]  ;;  %v1062_v41 = vld.sshfl [vmem:[#allocation1 + $0x8] sm:$0xff pattern:$0x73625140] }
 0x155   : > { %v1065_v42 = vpack.c.bf16 %v1062_v41, %v1061_v40 }
 0x157   : > { %v1067_v43 = vrot.slane %v1065_v42, 3 }
 0x159   : > { %v1071_v44 = vsel %vm1068_vm1, %v1065_v42, %v1067_v43 }
 0x15a   : > { %1073 = vst [vmem:[%s516_s19] sm:$0x3] %v1071_v44 }
 0x15b PF: > { %1080 = sbr.rel (!%p1801_p9) target bundleno = 355 (0x163), region = 82  ;;  %s1163_s11 = scalar_lea.vmem (%p1801_p9), %s2174_s4, %s1960_s10 }
 0x161   : > { %v1101_v45 = vld [vmem:[%s516_s19] sm:$0x3] }
 0x162   : > { %1495 = vst [vmem:[%s1163_s11 + $0x10] sm:$0x3] %v1101_v45 }
 0x163 PF: > { %s15_s22 = sadd.s32 1, %s1705_s22   ;;  %s2177_s15 = smov %s1677_s16 }
 0x164   : > { %p12_p4 = scmp.ge.s32.totalorder %s15_s22, 20   ;;  %s2178_s16 = smov %s1806_s7 }
 0x165   : > { %s2179_s17 = smov %s1685_s18  ;;  %s2180_s18 = smov %s1809_s8 }
 0x166   : > { %s2181_s0 = smov %s1697_s20  ;;  %s2182_s19 = smov %s1701_s21 }
 0x167   : > { %s2183_s20 = smov %s2186_s23  ;;  %s2184_s21 = smov %s2190_s24 }
 0x168   :  { %14 = sbr.rel (!%p12_p4) target bundleno = 5 (0x5), region = 154 }

// kernel: _lambda_.35
= control target key start
LH: loop header
LB: loop body
LE: loop exit
PB: predicated region body
PF: predicated region fallthrough
CT: control target
= control target key end

     0   :  { %vm131_vm0 = vcmask 1041409   ;;  %vm391_vm1 = vcmask 517120   ;;  %s691_s1 = inlined_call_operand.vmem [shape: bf16[512,64], index: 1, kind: input, shape index: {}]   ;;  %s692_s0 = inlined_call_operand.vmem [shape: bf16[2,1,512], index: 0, kind: input, shape index: {}]   ;;  %s693_s2 = inlined_call_operand.vmem [shape: f32[1,64], index: 2, kind: input, shape index: {}]   ;;  %s694_s3 = inlined_call_operand.vmem [shape: f32[2,64], index: 3, kind: output, shape index: {}]  }
   0x1   :  { %v532_v0 = vld [vmem:[%s691_s1 + $0x38] sm:$0xff]  ;;  %v531_v4 = vld [vmem:[%s691_s1 + $0x30] sm:$0xff]  ;;  %v530_v8 = vld [vmem:[%s691_s1 + $0x28] sm:$0xff] }
   0x2   :  { %v540_v1 = vld [vmem:[%s691_s1 + $0x78] sm:$0xff]  ;;  %339 = vmatpush.bf16.msra.mxu0 %v532_v0  ;;  %v539_v5 = vld [vmem:[%s691_s1 + $0x70] sm:$0xff]  ;;  %v538_v9 = vld [vmem:[%s691_s1 + $0x68] sm:$0xff] }
   0x3   :  { %v548_v2 = vld [vmem:[%s691_s1 + $0xb8] sm:$0xff]  ;;  %352 = vmatpush.bf16.msra.mxu1 %v540_v1  ;;  %v547_v6 = vld [vmem:[%s691_s1 + $0xb0] sm:$0xff]  ;;  %v546_v10 = vld [vmem:[%s691_s1 + $0xa8] sm:$0xff] }
   0x4   :  { %v556_v3 = vld [vmem:[%s691_s1 + $0xf8] sm:$0xff]  ;;  %365 = vmatpush.bf16.msra.mxu2 %v548_v2  ;;  %v555_v7 = vld [vmem:[%s691_s1 + $0xf0] sm:$0xff]  ;;  %v554_v11 = vld [vmem:[%s691_s1 + $0xe8] sm:$0xff] }
   0x5   :  { %378 = vmatpush.bf16.msra.mxu3 %v556_v3  ;;  %v529_v12 = vld [vmem:[%s691_s1 + $0x20] sm:$0xff]  ;;  %v528_v21 = vld [vmem:[%s691_s1 + $0x18] sm:$0xff]  ;;  %v527_v35 = vld [vmem:[%s691_s1 + $0x10] sm:$0xff] }
   0x6   :  { %340 = vmatpush.bf16.msra.mxu0 %v531_v4  ;;  %v537_v13 = vld [vmem:[%s691_s1 + $0x60] sm:$0xff]  ;;  %v536_v22 = vld [vmem:[%s691_s1 + $0x58] sm:$0xff]  ;;  %v535_v36 = vld [vmem:[%s691_s1 + $0x50] sm:$0xff] }
   0x7   :  { %353 = vmatpush.bf16.msra.mxu1 %v539_v5  ;;  %v558_v14 = vld [vmem:[%s692_s0] sm:$0xff]   ;;  %v544_v27 = vld [vmem:[%s691_s1 + $0x98] sm:$0xff]  ;;  %v543_v41 = vld [vmem:[%s691_s1 + $0x90] sm:$0xff] }
   0x8   :  { %366 = vmatpush.bf16.msra.mxu2 %v547_v6  ;;  %v545_v15 = vld [vmem:[%s691_s1 + $0xa0] sm:$0xff]  ;;  %v559_v17 = vunpack.c.l.bf16 %v558_v14  ;;  %v560_v18 = vunpack.c.h.bf16 %v558_v14  ;;  %v552_v28 = vld [vmem:[%s691_s1 + $0xd8] sm:$0xff]  ;;  %v551_v42 = vld [vmem:[%s691_s1 + $0xd0] sm:$0xff] }
   0x9   :  { %379 = vmatpush.bf16.msra.mxu3 %v555_v7  ;;  %v553_v16 = vld [vmem:[%s691_s1 + $0xe0] sm:$0xff]  ;;  %v526_v47 = vld [vmem:[%s691_s1 + $0x8] sm:$0xff] }
   0xa   :  { %341 = vmatpush.bf16.msra.mxu0 %v530_v8  ;;  %v26_v19 = vperm.slane %v560_v18, 0  ;;  %v27_v20 = vperm.slane %v560_v18, 2  ;;  %v22_v23 = vperm.slane %v559_v17, 0  ;;  %v23_v24 = vperm.slane %v559_v17, 2  ;;  %v534_v48 = vld [vmem:[%s691_s1 + $0x48] sm:$0xff]  ;;  %v525_v59 = vld [vmem:[%s691_s1] sm:$0xff] }
   0xb   :  { %354 = vmatpush.bf16.msra.mxu1 %v538_v9  ;;  %v28_v25 = vperm.slane %v560_v18, 4  ;;  %v29_v26 = vperm.slane %v560_v18, 6  ;;  %v24_v30 = vperm.slane %v559_v17, 4  ;;  %v25_v31 = vperm.slane %v559_v17, 6  ;;  %v542_v53 = vld [vmem:[%s691_s1 + $0x88] sm:$0xff]  ;;  %v533_v60 = vld [vmem:[%s691_s1 + $0x40] sm:$0xff] }
   0xc   :  { %367 = vmatpush.bf16.msra.mxu2 %v546_v10  ;;  %v42_v29 = vpack.c.bf16 %v26_v19, %v26_v19  ;;  %v43_v32 = vpack.c.bf16 %v27_v20, %v27_v20  ;;  %v38_v37 = vpack.c.bf16 %v22_v23, %v22_v23  ;;  %v39_v39 = vpack.c.bf16 %v23_v24, %v23_v24  ;;  %v550_v54 = vld [vmem:[%s691_s1 + $0xc8] sm:$0xff]  ;;  %v541_v63 = vld [vmem:[%s691_s1 + $0x80] sm:$0xff] }
   0xd   :  { %380 = vmatpush.bf16.msra.mxu3 %v554_v11  ;;  %v44_v33 = vpack.c.bf16 %v28_v25, %v28_v25  ;;  %v45_v34 = vpack.c.bf16 %v29_v26, %v29_v26  ;;  %v40_v43 = vpack.c.bf16 %v24_v30, %v24_v30  ;;  %v41_v45 = vpack.c.bf16 %v25_v31, %v25_v31  ;;  %v549_v0 = vld [vmem:[%s691_s1 + $0xc0] sm:$0xff] }
   0xe   :  { %342 = vmatpush.bf16.msra.mxu0 %v529_v12  ;;  %v126_v38 = vunpack.c.l.b16 %v42_v29  ;;  %v127_v40 = vunpack.c.l.b16 %v43_v32  ;;  %v122_v49 = vunpack.c.l.b16 %v38_v37  ;;  %v123_v51 = vunpack.c.l.b16 %v39_v39  ;;  %v561_v7 = vld [vmem:[%s693_s2] ss:$0 sm:$0xff] }
   0xf   :  { %355 = vmatpush.bf16.msra.mxu1 %v537_v13  ;;  %v128_v44 = vunpack.c.l.b16 %v44_v33  ;;  %v129_v46 = vunpack.c.l.b16 %v45_v34  ;;  %v124_v55 = vunpack.c.l.b16 %v40_v43  ;;  %v125_v57 = vunpack.c.l.b16 %v41_v45 }
  0x10   :  { %368 = vmatpush.bf16.msra.mxu2 %v545_v15  ;;  %v130_v50 = vrot.slane %v126_v38, 7  ;;  %v133_v52 = vrot.slane %v127_v40, 7 }
  0x11   :  { %381 = vmatpush.bf16.msra.mxu3 %v553_v16  ;;  %v135_v56 = vrot.slane %v128_v44, 7  ;;  %v137_v58 = vrot.slane %v129_v46, 7 }
  0x12   :  { %343 = vmatpush.bf16.msra.mxu0 %v528_v21  ;;  %v132_v61 = vsel %vm131_vm0, %v130_v50, %v122_v49  ;;  %v134_v62 = vsel %vm131_vm0, %v133_v52, %v123_v51 }
  0x13   :  { %356 = vmatpush.bf16.msra.mxu1 %v536_v22  ;;  %v136_v1 = vsel %vm131_vm0, %v135_v56, %v124_v55  ;;  %v138_v2 = vsel %vm131_vm0, %v137_v58, %v125_v57  ;;  %v139_v3 = vpack.c.b16 %v132_v61, %v132_v61  ;;  %v140_v4 = vpack.c.b16 %v134_v62, %v134_v62 }
  0x14   :  { %369 = vmatpush.bf16.msra.mxu2 %v544_v27  ;;  %v141_v5 = vpack.c.b16 %v136_v1, %v136_v1  ;;  %v142_v6 = vpack.c.b16 %v138_v2, %v138_v2 }
  0x15   :  { %382 = vmatpush.bf16.msra.mxu3 %v552_v28 }
  0x16   :  { %344 = vmatpush.bf16.msra.mxu0 %v527_v35 }
  0x17   :  { %357 = vmatpush.bf16.msra.mxu1 %v535_v36 }
  0x18   :  { %370 = vmatpush.bf16.msra.mxu2 %v543_v41 }
  0x19   :  { %383 = vmatpush.bf16.msra.mxu3 %v551_v42 }
  0x1a   :  { %345 = vmatpush.bf16.msra.mxu0 %v526_v47 }
  0x1b   :  { %358 = vmatpush.bf16.msra.mxu1 %v534_v48 }
  0x1c   :  { %371 = vmatpush.bf16.msra.mxu2 %v542_v53 }
  0x1d   :  { %384 = vmatpush.bf16.msra.mxu3 %v550_v54 }
  0x1e   :  { %346 = vmatpush.bf16.msra.mxu0 %v525_v59 }
  0x1f   :  { %359 = vmatpush.bf16.msra.mxu1 %v533_v60 }
  0x20   :  { %372 = vmatpush.bf16.msra.mxu2 %v541_v63 }
  0x21   :  { %385 = vmatpush.bf16.msra.mxu3 %v549_v0  ;;  %347 = vmatmul.bf16.vlgmr.msra.gmra.mxu0 %v139_v3 }
  0x22   :  { %360 = vmatmul.bf16.vlgmr.msra.gmra.mxu1 %v140_v4 }
  0x23   :  { %373 = vmatmul.bf16.vlgmr.msra.gmra.mxu2 %v141_v5 }
  0x24   :  { %386 = vmatmul.bf16.vlgmr.msra.gmra.mxu3 %v142_v6 }
  0x9e   :  { %v348_v8 = vpop.f32.mrf.mxu0 }
  0x9f   :  { %v361_v9 = vpop.f32.mrf.mxu1  ;;  %v349_v10 = vadd.f32 %v561_v7, %v348_v8 }
  0xa1   :  { %v362_v11 = vadd.f32 %v361_v9, %v349_v10 }
  0xa6   :  { %v374_v12 = vpop.f32.mrf.mxu2  ;;  %v350_v15 = vpop.f32.mrf.mxu0 }
  0xa7   :  { %v387_v13 = vpop.f32.mrf.mxu3  ;;  %v375_v14 = vadd.f32 %v374_v12, %v362_v11  ;;  %v363_v16 = vpop.f32.mrf.mxu1 }
  0xa9   :  { %v388_v17 = vadd.f32 %v387_v13, %v375_v14 }
  0xab   :  { %392 = vst.msk [vmem:[%s694_s3] sm:$0x3] %vm391_vm1, %v388_v17 }
  0xae   :  { %v376_v18 = vpop.f32.mrf.mxu2 }
  0xaf   :  { %v389_v19 = vpop.f32.mrf.mxu3 }

</bundles_post_ra>
